<compile_context>
chip_gen: v5e
topology: v5e:2x2
jax: 0.10.0
libtpu: 0.0.40
codegen_flags: <defaults>
</compile_context>

<pallas_src>
import functools
import math

import jax
import jax.numpy as jnp
from jax.experimental import pallas as pl
from jax.experimental.pallas import tpu as pltpu

_BF16 = jnp.bfloat16


# ---------------------------------------------------------------------------
# Bilinear-interp helpers (PyTorch F.interpolate, mode='bilinear',
# align_corners=False).  Taps/weights are trace-time Python constants.
# ---------------------------------------------------------------------------

def _interp_taps(out_size, in_size):
    scale = in_size / out_size
    taps = []
    for i in range(out_size):
        src = max((i + 0.5) * scale - 0.5, 0.0)
        i0 = min(int(math.floor(src)), in_size - 1)
        i1 = min(i0 + 1, in_size - 1)
        w1 = src - i0
        taps.append((i0, i1, 1.0 - w1, w1))
    return tuple(taps)


def _interp_matrix(out_size, in_size):
    rows = []
    for (i0, i1, w0, w1) in _interp_taps(out_size, in_size):
        row = [0.0] * in_size
        row[i0] += w0
        row[i1] += w1
        rows.append(row)
    return jnp.asarray(rows, dtype=jnp.float32)  # (out, in), exact f32


def _row_group(hout, wout, target=128):
    """Rows per in-kernel group so the W-interp matmul has M = g*wout ~ 128."""
    g = max(1, min(hout, target // max(wout, 1)))
    while hout % g:
        g -= 1
    return g


def _row_block(h, target=8):
    """Rows per conv grid step (must divide H)."""
    rb = max(1, min(h, target))
    while h % rb:
        rb -= 1
    return rb


# ---------------------------------------------------------------------------
# Kernels
# ---------------------------------------------------------------------------

def _head_up_add_kernel(x16_ref, x8_ref, w16_ref, s16_ref, b16_ref,
                        w8_ref, s8_ref, b8_ref, bd_ref, o_ref, *, g, h_taps):
    """head16 (1x1+BN+ReLU) -> bilinear up to x8 -> + head8 (1x1+BN+ReLU)."""
    H16, W16, C16 = x16_ref.shape[1], x16_ref.shape[2], x16_ref.shape[3]
    H8, W8, C = o_ref.shape[1], o_ref.shape[2], o_ref.shape[3]
    C8 = x8_ref.shape[3]

    # head16: one matmul over all pixels, bf16 operands, f32 accumulation.
    h16 = jnp.dot(x16_ref[0].reshape(H16 * W16, C16), w16_ref[...],
                  preferred_element_type=jnp.float32)
    h16 = jnp.maximum(h16 * s16_ref[...] + b16_ref[...], 0.0)
    h16 = h16.reshape(H16, W16, C)  # stays on-chip in f32, never hits HBM

    # TODO(synk): for very large images switch this trace-time loop to a
    # fori_loop / grid axis so code size and VMEM stay bounded.
    for blk in range(H8 // g):
        r0 = blk * g
        # H-direction bilinear: 2-tap VPU blend, taps are trace-time constants.
        rows = []
        for dr in range(g):
            i0, i1, w0, w1 = h_taps[r0 + dr]
            rows.append(w0 * h16[i0] + w1 * h16[i1])
        yh = jnp.stack(rows, axis=0)                               # (g, W16, C)
        # W-direction bilinear: one block-diagonal matmul for the row group.
        up = jnp.dot(bd_ref[...], yh.reshape(g * W16, C),
                     preferred_element_type=jnp.float32)           # (g*W8, C)
        # head8 on the matching x8 rows, fused (no HBM round trip of h8).
        h8 = jnp.dot(x8_ref[0, r0:r0 + g].reshape(g * W8, C8), w8_ref[...],
                     preferred_element_type=jnp.float32)
        h8 = jnp.maximum(h8 * s8_ref[...] + b8_ref[...], 0.0)
        o_ref[0, r0:r0 + g] = (up + h8).reshape(g, W8, C).astype(o_ref.dtype)


def _conv3x3_bn_relu_kernel(xlo_ref, xh1_ref, xh2_ref, w_ref, s_ref, b_ref,
                            o_ref):
    """3x3 conv + BN + ReLU over one (rb-row, whole-W) block with a 2-row halo.

    Taps are combined along dx into K = 3*Cin dots (deeper MXU contraction).
    """
    rb, Cin = xlo_ref.shape[1], xlo_ref.shape[3]
    W, Cout = o_ref.shape[2], o_ref.shape[3]
    # Assemble the (rb + 2)-row haloed slab from the three row windows.
    xfull = jnp.concatenate([xlo_ref[0], xh1_ref[0], xh2_ref[0]], axis=0)
    acc = jnp.zeros((rb * W, Cout), jnp.float32)
    for dy in range(3):
        rows = xfull[dy:dy + rb]                                   # (rb, W+2, Cin)
        patch = jnp.concatenate(
            [rows[:, 0:W], rows[:, 1:W + 1], rows[:, 2:W + 2]], axis=-1)
        acc = acc + jnp.dot(patch.reshape(rb * W, 3 * Cin), w_ref[dy],
                            preferred_element_type=jnp.float32)
    y = jnp.maximum(acc * s_ref[...] + b_ref[...], 0.0)
    # TODO(synk): emit a lane-dense (rb, W*Cout) layout here once the downstream
    # consumer is switched to it (avoids 64/128-lane masked stores).
    o_ref[0] = y.reshape(rb, W, Cout).astype(o_ref.dtype)


def _up_head4_cat_kernel(c8_ref, x4_ref, w4_ref, s4_ref, b4_ref, bd_ref, o_ref,
                         *, g, h_taps):
    """bilinear up(conv8) to x4 + head4 (1x1+BN+ReLU) + channel concat."""
    W8, Cm = c8_ref.shape[2], c8_ref.shape[3]
    H4, W4, Ccat = o_ref.shape[1], o_ref.shape[2], o_ref.shape[3]
    C4 = x4_ref.shape[3]
    c8 = c8_ref[0]                                                  # (H8, W8, Cm)

    for blk in range(H4 // g):
        r0 = blk * g
        rows = []
        for dr in range(g):
            i0, i1, w0, w1 = h_taps[r0 + dr]
            rows.append(w0 * c8[i0].astype(jnp.float32) +
                        w1 * c8[i1].astype(jnp.float32))
        yh = jnp.stack(rows, axis=0)                                # (g, W8, Cm)
        up = jnp.dot(bd_ref[...], yh.reshape(g * W8, Cm),
                     preferred_element_type=jnp.float32)            # (g*W4, Cm)
        h4 = jnp.dot(x4_ref[0, r0:r0 + g].reshape(g * W4, C4), w4_ref[...],
                     preferred_element_type=jnp.float32)
        h4 = jnp.maximum(h4 * s4_ref[...] + b4_ref[...], 0.0)       # (g*W4, 8)
        cat = jnp.concatenate([up, h4], axis=-1)                    # (g*W4, 72)
        o_ref[0, r0:r0 + g] = cat.reshape(g, W4, Ccat).astype(o_ref.dtype)


def _conv3x3_bn_relu_cls_kernel(xlo_ref, xh1_ref, xh2_ref, w_ref, s_ref, b_ref,
                                wcls_ref, bcls_ref, o_ref):
    """3x3 conv (72ch) + BN + ReLU + fused 1x1 classifier, per row block."""
    rb, Cin = xlo_ref.shape[1], xlo_ref.shape[3]
    W, Ncls = o_ref.shape[2], o_ref.shape[3]
    Cmid = w_ref.shape[2]
    xfull = jnp.concatenate([xlo_ref[0], xh1_ref[0], xh2_ref[0]], axis=0)
    acc = jnp.zeros((rb * W, Cmid), jnp.float32)
    for dy in range(3):
        for dx in range(3):
            patch = xfull[dy:dy + rb, dx:dx + W].reshape(rb * W, Cin)
            acc = acc + jnp.dot(patch, w_ref[dy * 3 + dx],
                                preferred_element_type=jnp.float32)
    y = jnp.maximum(acc * s_ref[...] + b_ref[...], 0.0)
    logits = jnp.dot(y.astype(jnp.bfloat16), wcls_ref[...],
                     preferred_element_type=jnp.float32) + bcls_ref[...]
    # TODO(synk): pad Ncls toward a lane-dense layout (and slice in the wrapper)
    # for unmasked stores at production sizes.
    o_ref[0] = logits.reshape(rb, W, Ncls).astype(o_ref.dtype)


# ---------------------------------------------------------------------------
# Pallas wrappers
# ---------------------------------------------------------------------------

def fused_head_upsample_add(x16, x8, w16, s16, b16, w8, s8, b8):
    N, H16, W16, C16 = x16.shape
    _, H8, W8, C8 = x8.shape
    C = w16.shape[1]
    g = _row_group(H8, W8)
    h_taps = _interp_taps(H8, H16)
    bd = jnp.kron(jnp.eye(g, dtype=jnp.float32), _interp_matrix(W8, W16))
    kernel = functools.partial(_head_up_add_kernel, g=g, h_taps=h_taps)
    # TODO(synk): at very large images, add a row-block grid axis here too so the
    # whole-image blocks do not crowd v7x's 64 MiB VMEM.
    return pl.pallas_call(
        kernel,
        out_shape=jax.ShapeDtypeStruct((N, H8, W8, C), _BF16),
        grid=(N,),
        in_specs=[
            pl.BlockSpec((1, H16, W16, C16), lambda n: (n, 0, 0, 0)),
            pl.BlockSpec((1, H8, W8, C8), lambda n: (n, 0, 0, 0)),
            pl.BlockSpec((C16, C), lambda n: (0, 0)),
            pl.BlockSpec((1, C), lambda n: (0, 0)),
            pl.BlockSpec((1, C), lambda n: (0, 0)),
            pl.BlockSpec((C8, C), lambda n: (0, 0)),
            pl.BlockSpec((1, C), lambda n: (0, 0)),
            pl.BlockSpec((1, C), lambda n: (0, 0)),
            pl.BlockSpec((g * W8, g * W16), lambda n: (0, 0)),
        ],
        out_specs=pl.BlockSpec((1, H8, W8, C), lambda n: (n, 0, 0, 0)),
        compiler_params=pltpu.CompilerParams(
            dimension_semantics=("parallel",),
            vmem_limit_bytes=32 * 1024 * 1024),
    )(x16.astype(_BF16), x8.astype(_BF16), w16.astype(_BF16),
      s16.reshape(1, -1), b16.reshape(1, -1), w8.astype(_BF16),
      s8.reshape(1, -1), b8.reshape(1, -1), bd)


def conv3x3_bn_relu(x, w_hwio, scale, bias, rb=8):
    """3x3 stride-1 pad-1 conv + folded BN + ReLU, row-block grid with halo."""
    N, H, W, Cin = x.shape
    Cout = w_hwio.shape[-1]
    rb = _row_block(H, rb)
    nblk = H // rb
    hp = H + max(rb, 2)
    # TODO(synk): replace the padded copy with manual DMA of unpadded rows and an
    # in-kernel zero halo to save one HBM write+read of the conv input.
    xp = jnp.pad(x.astype(_BF16), ((0, 0), (1, hp - H - 1), (1, 1), (0, 0)))
    w3 = w_hwio.astype(_BF16).reshape(3, 3 * Cin, Cout)  # dx-combined taps
    return pl.pallas_call(
        _conv3x3_bn_relu_kernel,
        out_shape=jax.ShapeDtypeStruct((N, H, W, Cout), _BF16),
        grid=(N, nblk),
        in_specs=[
            pl.BlockSpec((1, rb, W + 2, Cin), lambda n, i: (n, i, 0, 0)),
            pl.BlockSpec((1, 1, W + 2, Cin), lambda n, i: (n, i * rb + rb, 0, 0)),
            pl.BlockSpec((1, 1, W + 2, Cin),
                         lambda n, i: (n, i * rb + rb + 1, 0, 0)),
            pl.BlockSpec((3, 3 * Cin, Cout), lambda n, i: (0, 0, 0)),
            pl.BlockSpec((1, Cout), lambda n, i: (0, 0)),
            pl.BlockSpec((1, Cout), lambda n, i: (0, 0)),
        ],
        out_specs=pl.BlockSpec((1, rb, W, Cout), lambda n, i: (n, i, 0, 0)),
        compiler_params=pltpu.CompilerParams(
            dimension_semantics=("parallel", "parallel")),
    )(xp, xp, xp, w3, scale.reshape(1, -1), bias.reshape(1, -1))


def fused_upsample_head4_concat(c8, x4, w4, s4, b4):
    N, H8, W8, Cm = c8.shape
    _, H4, W4, C4 = x4.shape
    Ch4 = w4.shape[1]
    g = _row_group(H4, W4)
    h_taps = _interp_taps(H4, H8)
    bd = jnp.kron(jnp.eye(g, dtype=jnp.float32), _interp_matrix(W4, W8))
    kernel = functools.partial(_up_head4_cat_kernel, g=g, h_taps=h_taps)
    return pl.pallas_call(
        kernel,
        out_shape=jax.ShapeDtypeStruct((N, H4, W4, Cm + Ch4), _BF16),
        grid=(N,),
        in_specs=[
            pl.BlockSpec((1, H8, W8, Cm), lambda n: (n, 0, 0, 0)),
            pl.BlockSpec((1, H4, W4, C4), lambda n: (n, 0, 0, 0)),
            pl.BlockSpec((C4, Ch4), lambda n: (0, 0)),
            pl.BlockSpec((1, Ch4), lambda n: (0, 0)),
            pl.BlockSpec((1, Ch4), lambda n: (0, 0)),
            pl.BlockSpec((g * W4, g * W8), lambda n: (0, 0)),
        ],
        out_specs=pl.BlockSpec((1, H4, W4, Cm + Ch4), lambda n: (n, 0, 0, 0)),
        compiler_params=pltpu.CompilerParams(
            dimension_semantics=("parallel",),
            vmem_limit_bytes=32 * 1024 * 1024),
    )(c8.astype(_BF16), x4.astype(_BF16), w4.astype(_BF16),
      s4.reshape(1, -1), b4.reshape(1, -1), bd)


def conv3x3_bn_relu_classifier(x, w_hwio, scale, bias, wcls, bcls, rb=8):
    """3x3 conv(72ch) + BN + ReLU + fused 1x1 classifier, row-block grid."""
    N, H, W, Cin = x.shape
    Cmid = w_hwio.shape[-1]
    Ncls = wcls.shape[-1]
    rb = _row_block(H, rb)
    nblk = H // rb
    hp = H + max(rb, 2)
    xp = jnp.pad(x.astype(_BF16), ((0, 0), (1, hp - H - 1), (1, 1), (0, 0)))
    w9 = w_hwio.astype(_BF16).reshape(9, Cin, Cmid)
    return pl.pallas_call(
        _conv3x3_bn_relu_cls_kernel,
        out_shape=jax.ShapeDtypeStruct((N, H, W, Ncls), jnp.float32),
        grid=(N, nblk),
        in_specs=[
            pl.BlockSpec((1, rb, W + 2, Cin), lambda n, i: (n, i, 0, 0)),
            pl.BlockSpec((1, 1, W + 2, Cin), lambda n, i: (n, i * rb + rb, 0, 0)),
            pl.BlockSpec((1, 1, W + 2, Cin),
                         lambda n, i: (n, i * rb + rb + 1, 0, 0)),
            pl.BlockSpec((9, Cin, Cmid), lambda n, i: (0, 0, 0)),
            pl.BlockSpec((1, Cmid), lambda n, i: (0, 0)),
            pl.BlockSpec((1, Cmid), lambda n, i: (0, 0)),
            pl.BlockSpec((Cmid, Ncls), lambda n, i: (0, 0)),
            pl.BlockSpec((1, Ncls), lambda n, i: (0, 0)),
        ],
        out_specs=pl.BlockSpec((1, rb, W, Ncls), lambda n, i: (n, i, 0, 0)),
        compiler_params=pltpu.CompilerParams(
            dimension_semantics=("parallel", "parallel")),
    )(xp, xp, xp, w9, scale.reshape(1, -1), bias.reshape(1, -1),
      wcls.astype(_BF16), bcls.reshape(1, -1))


# ---------------------------------------------------------------------------
# Decoder forward (NCHW in, NCHW out — matches the PyTorch module)
# ---------------------------------------------------------------------------

def exp2_decoder26_forward(x4_nchw, x8_nchw, x16_nchw, p):
    x4 = jnp.transpose(x4_nchw, (0, 2, 3, 1))     # NCHW -> NHWC
    x8 = jnp.transpose(x8_nchw, (0, 2, 3, 1))
    x16 = jnp.transpose(x16_nchw, (0, 2, 3, 1))

    # head16 + bilinear up + head8 + residual add, fully fused (1 pallas_call).
    s8 = fused_head_upsample_add(x16, x8, p['w16'], p['s16'], p['b16'],
                                 p['w8'], p['s8'], p['b8'])          # (N,H8,W8,128)
    # 3x3 conv + BN + ReLU on a haloed row-block grid.
    c8 = conv3x3_bn_relu(s8, p['wc8'], p['sc8'], p['bc8'])            # (N,H8,W8,64)
    # bilinear up + head4 + channel concat, fused (1 pallas_call).
    cat4 = fused_upsample_head4_concat(c8, x4, p['w4'], p['s4'], p['b4'])  # (...,72)
    # 3x3 conv + BN + ReLU + fused 1x1 classifier on a haloed row-block grid.
    logits = conv3x3_bn_relu_classifier(cat4, p['wc4'], p['sc4'], p['bc4'],
                                        p['wcls'], p['bcls'])          # (N,H4,W4,ncls)
    return jnp.transpose(logits, (0, 3, 1, 2))                         # NHWC -> NCHW


# ---------------------------------------------------------------------------
# Deterministic parameter construction (BN folded to scale/bias, eval mode)
# ---------------------------------------------------------------------------

def init_params(key, c4, c8, c16, num_classes):
    ks = jax.random.split(key, 12)

    def bn_fold(k, c):
        k1, k2, k3, k4 = jax.random.split(k, 4)
        gamma = 1.0 + 0.1 * jax.random.normal(k1, (c,), jnp.float32)
        beta = 0.1 * jax.random.normal(k2, (c,), jnp.float32)
        mean = 0.1 * jax.random.normal(k3, (c,), jnp.float32)
        var = jax.random.uniform(k4, (c,), jnp.float32, 0.5, 1.5)
        scale = gamma / jnp.sqrt(var + 1e-5)
        bias = beta - mean * scale
        return scale, bias

    p = {}
    p['w16'] = 0.1 * jax.random.normal(ks[0], (c16, 128), jnp.float32)        # (Cin,Cout)
    p['w8'] = 0.1 * jax.random.normal(ks[1], (c8, 128), jnp.float32)
    p['w4'] = 0.1 * jax.random.normal(ks[2], (c4, 8), jnp.float32)
    p['wc8'] = 0.05 * jax.random.normal(ks[3], (3, 3, 128, 64), jnp.float32)  # HWIO
    p['wc4'] = 0.05 * jax.random.normal(ks[4], (3, 3, 64 + 8, 64), jnp.float32)
    p['wcls'] = 0.1 * jax.random.normal(ks[5], (64, num_classes), jnp.float32)
    p['bcls'] = 0.1 * jax.random.normal(ks[6], (num_classes,), jnp.float32)
    p['s16'], p['b16'] = bn_fold(ks[7], 128)
    p['s8'], p['b8'] = bn_fold(ks[8], 128)
    p['s4'], p['b4'] = bn_fold(ks[9], 8)
    p['sc8'], p['bc8'] = bn_fold(ks[10], 64)
    p['sc4'], p['bc4'] = bn_fold(ks[11], 64)
    return p


# ---------------------------------------------------------------------------
# Pure-JAX reference (f32, XLA ops) for correctness checking
# ---------------------------------------------------------------------------

def reference_forward(x4_nchw, x8_nchw, x16_nchw, p):
    hi = jax.lax.Precision.HIGHEST
    x4 = jnp.transpose(x4_nchw, (0, 2, 3, 1))
    x8 = jnp.transpose(x8_nchw, (0, 2, 3, 1))
    x16 = jnp.transpose(x16_nchw, (0, 2, 3, 1))

    def pw(x, w, s, b, relu=True):
        y = jnp.einsum('nhwc,cd->nhwd', x, w, precision=hi) * s + b
        return jnp.maximum(y, 0.0) if relu else y

    def up(x, hw):
        A = _interp_matrix(hw[0], x.shape[1])
        Bt = _interp_matrix(hw[1], x.shape[2])
        return jnp.einsum('oh,pw,nhwc->nopc', A, Bt, x, precision=hi)

    def conv3(x, w, s, b):
        y = jax.lax.conv_general_dilated(
            x, w, (1, 1), 'SAME',
            dimension_numbers=('NHWC', 'HWIO', 'NHWC'), precision=hi)
        return jnp.maximum(y * s + b, 0.0)

    h16 = pw(x16, p['w16'], p['s16'], p['b16'])
    h8 = pw(x8, p['w8'], p['s8'], p['b8'])
    h4 = pw(x4, p['w4'], p['s4'], p['b4'])
    s8 = h8 + up(h16, x8.shape[1:3])
    c8 = conv3(s8, p['wc8'], p['sc8'], p['bc8'])
    c8u = up(c8, x4.shape[1:3])
    cat = jnp.concatenate([c8u, h4], axis=-1)
    c4 = conv3(cat, p['wc4'], p['sc4'], p['bc4'])
    logits = jnp.einsum('nhwc,cd->nhwd', c4, p['wcls'], precision=hi) + p['bcls']
    return jnp.transpose(logits, (0, 3, 1, 2))


# ---------------------------------------------------------------------------

if __name__ == "__main__":
    key = jax.random.PRNGKey(0)
    k1, k2, k3, k4 = jax.random.split(key, 4)

    channels = {'4': 32, '8': 48, '16': 64}
    num_classes = 19
    N = 2
    H4, W4 = 32, 32
    H8, W8 = 16, 16
    H16, W16 = 8, 8

    x4 = jax.random.normal(k1, (N, channels['4'], H4, W4), jnp.float32)
    x8 = jax.random.normal(k2, (N, channels['8'], H8, W8), jnp.float32)
    x16 = jax.random.normal(k3, (N, channels['16'], H16, W16), jnp.float32)
    params = init_params(k4, channels['4'], channels['8'], channels['16'],
                         num_classes)

    fwd = jax.jit(exp2_decoder26_forward)
    out = jax.block_until_ready(fwd(x4, x8, x16, params))
    assert out.shape == (N, num_classes, H4, W4), out.shape

    ref = reference_forward(x4, x8, x16, params)
    max_err = float(jnp.max(jnp.abs(out - ref)))
    # bf16 matmul operands with f32 accumulation across 5 layers -> relaxed tol.
    assert jnp.allclose(out, ref, atol=7.5e-2, rtol=5e-2), f"max abs err {max_err}"

    print("KERNEL_OK")
</pallas_src>

<mosaic_0001>
module attributes {stable_mosaic.version = 11 : i64} {
  func.func @_head_up_add_kernel(%arg0: i32, %arg1: memref<1x8x8x64xbf16, #tpu.memory_space<vmem>>, %arg2: memref<1x16x16x48xbf16, #tpu.memory_space<vmem>>, %arg3: memref<64x128xbf16, #tpu.memory_space<vmem>>, %arg4: memref<1x128xf32, #tpu.memory_space<vmem>>, %arg5: memref<1x128xf32, #tpu.memory_space<vmem>>, %arg6: memref<48x128xbf16, #tpu.memory_space<vmem>>, %arg7: memref<1x128xf32, #tpu.memory_space<vmem>>, %arg8: memref<1x128xf32, #tpu.memory_space<vmem>>, %arg9: memref<128x64xf32, #tpu.memory_space<vmem>>, %arg10: memref<1x16x16x128xbf16, #tpu.memory_space<vmem>>) attributes {dimension_semantics = [#tpu.dimension_semantics<parallel>], iteration_bounds = array<i64: 2>, scalar_prefetch = 0 : i64, scratch_operands = 0 : i64, tpu.core_type = #tpu.core_type<tc>, window_params = [{transform_indices = @transform_0, window_bounds = array<i64: 1, 8, 8, 64>}, {transform_indices = @transform_1, window_bounds = array<i64: 1, 16, 16, 48>}, {pipeline_mode = #tpu.pipeline_mode<synchronous>, transform_indices = @transform_2, window_bounds = array<i64: 64, 128>}, {pipeline_mode = #tpu.pipeline_mode<synchronous>, transform_indices = @transform_3, window_bounds = array<i64: 1, 128>}, {pipeline_mode = #tpu.pipeline_mode<synchronous>, transform_indices = @transform_4, window_bounds = array<i64: 1, 128>}, {pipeline_mode = #tpu.pipeline_mode<synchronous>, transform_indices = @transform_5, window_bounds = array<i64: 48, 128>}, {pipeline_mode = #tpu.pipeline_mode<synchronous>, transform_indices = @transform_6, window_bounds = array<i64: 1, 128>}, {pipeline_mode = #tpu.pipeline_mode<synchronous>, transform_indices = @transform_7, window_bounds = array<i64: 1, 128>}, {pipeline_mode = #tpu.pipeline_mode<synchronous>, transform_indices = @transform_8, window_bounds = array<i64: 128, 64>}, {transform_indices = @transform_9, window_bounds = array<i64: 1, 16, 16, 128>}]} {
    %c0 = arith.constant 0 : index
    %c0_0 = arith.constant 0 : index
    %c0_1 = arith.constant 0 : index
    %c0_2 = arith.constant 0 : index
    %0 = vector.load %arg1[%c0, %c0_0, %c0_1, %c0_2] : memref<1x8x8x64xbf16, #tpu.memory_space<vmem>>, vector<1x8x8x64xbf16>
    %1 = vector.shape_cast %0 : vector<1x8x8x64xbf16> to vector<8x8x64xbf16>
    %2 = vector.shape_cast %1 : vector<8x8x64xbf16> to vector<64x64xbf16>
    %c0_3 = arith.constant 0 : index
    %c0_4 = arith.constant 0 : index
    %3 = vector.load %arg3[%c0_3, %c0_4] : memref<64x128xbf16, #tpu.memory_space<vmem>>, vector<64x128xbf16>
    %cst = arith.constant dense<0.000000e+00> : vector<64x128xf32>
    %4 = tpu.matmul %2, %3, %cst {dimension_numbers = #tpu.dot_dimension_numbers<[1], [0], [0], [1], [0, 0, 1, 1], [], []>} : vector<64x64xbf16>, vector<64x128xbf16>, vector<64x128xf32> -> vector<64x128xf32>
    %c0_5 = arith.constant 0 : index
    %c0_6 = arith.constant 0 : index
    %5 = vector.load %arg4[%c0_5, %c0_6] : memref<1x128xf32, #tpu.memory_space<vmem>>, vector<1x128xf32>
    %6 = vector.broadcast %5 : vector<1x128xf32> to vector<64x128xf32>
    %7 = arith.mulf %4, %6 : vector<64x128xf32>
    %c0_7 = arith.constant 0 : index
    %c0_8 = arith.constant 0 : index
    %8 = vector.load %arg5[%c0_7, %c0_8] : memref<1x128xf32, #tpu.memory_space<vmem>>, vector<1x128xf32>
    %9 = vector.broadcast %8 : vector<1x128xf32> to vector<64x128xf32>
    %10 = arith.addf %7, %9 : vector<64x128xf32>
    %cst_9 = arith.constant 0.000000e+00 : f32
    %11 = vector.broadcast %cst_9 : f32 to vector<64x128xf32>
    %12 = arith.maximumf %10, %11 : vector<64x128xf32>
    %13 = vector.shape_cast %12 : vector<64x128xf32> to vector<8x8x128xf32>
    %14 = vector.extract_strided_slice %13 {offsets = [0, 0, 0], sizes = [1, 8, 128], strides = [1, 1, 1]} : vector<8x8x128xf32> to vector<1x8x128xf32>
    %15 = vector.shape_cast %14 : vector<1x8x128xf32> to vector<8x128xf32>
    %cst_10 = arith.constant 1.000000e+00 : f32
    %16 = vector.broadcast %cst_10 : f32 to vector<8x128xf32>
    %17 = arith.mulf %16, %15 : vector<8x128xf32>
    %18 = vector.extract_strided_slice %13 {offsets = [1, 0, 0], sizes = [1, 8, 128], strides = [1, 1, 1]} : vector<8x8x128xf32> to vector<1x8x128xf32>
    %19 = vector.shape_cast %18 : vector<1x8x128xf32> to vector<8x128xf32>
    %cst_11 = arith.constant 0.000000e+00 : f32
    %20 = vector.broadcast %cst_11 : f32 to vector<8x128xf32>
    %21 = arith.mulf %20, %19 : vector<8x128xf32>
    %22 = arith.addf %17, %21 : vector<8x128xf32>
    %23 = vector.extract_strided_slice %13 {offsets = [0, 0, 0], sizes = [1, 8, 128], strides = [1, 1, 1]} : vector<8x8x128xf32> to vector<1x8x128xf32>
    %24 = vector.shape_cast %23 : vector<1x8x128xf32> to vector<8x128xf32>
    %cst_12 = arith.constant 7.500000e-01 : f32
    %25 = vector.broadcast %cst_12 : f32 to vector<8x128xf32>
    %26 = arith.mulf %25, %24 : vector<8x128xf32>
    %27 = vector.extract_strided_slice %13 {offsets = [1, 0, 0], sizes = [1, 8, 128], strides = [1, 1, 1]} : vector<8x8x128xf32> to vector<1x8x128xf32>
    %28 = vector.shape_cast %27 : vector<1x8x128xf32> to vector<8x128xf32>
    %cst_13 = arith.constant 2.500000e-01 : f32
    %29 = vector.broadcast %cst_13 : f32 to vector<8x128xf32>
    %30 = arith.mulf %29, %28 : vector<8x128xf32>
    %31 = arith.addf %26, %30 : vector<8x128xf32>
    %32 = vector.extract_strided_slice %13 {offsets = [0, 0, 0], sizes = [1, 8, 128], strides = [1, 1, 1]} : vector<8x8x128xf32> to vector<1x8x128xf32>
    %33 = vector.shape_cast %32 : vector<1x8x128xf32> to vector<8x128xf32>
    %cst_14 = arith.constant 2.500000e-01 : f32
    %34 = vector.broadcast %cst_14 : f32 to vector<8x128xf32>
    %35 = arith.mulf %34, %33 : vector<8x128xf32>
    %36 = vector.extract_strided_slice %13 {offsets = [1, 0, 0], sizes = [1, 8, 128], strides = [1, 1, 1]} : vector<8x8x128xf32> to vector<1x8x128xf32>
    %37 = vector.shape_cast %36 : vector<1x8x128xf32> to vector<8x128xf32>
    %cst_15 = arith.constant 7.500000e-01 : f32
    %38 = vector.broadcast %cst_15 : f32 to vector<8x128xf32>
    %39 = arith.mulf %38, %37 : vector<8x128xf32>
    %40 = arith.addf %35, %39 : vector<8x128xf32>
    %41 = vector.extract_strided_slice %13 {offsets = [1, 0, 0], sizes = [1, 8, 128], strides = [1, 1, 1]} : vector<8x8x128xf32> to vector<1x8x128xf32>
    %42 = vector.shape_cast %41 : vector<1x8x128xf32> to vector<8x128xf32>
    %cst_16 = arith.constant 7.500000e-01 : f32
    %43 = vector.broadcast %cst_16 : f32 to vector<8x128xf32>
    %44 = arith.mulf %43, %42 : vector<8x128xf32>
    %45 = vector.extract_strided_slice %13 {offsets = [2, 0, 0], sizes = [1, 8, 128], strides = [1, 1, 1]} : vector<8x8x128xf32> to vector<1x8x128xf32>
    %46 = vector.shape_cast %45 : vector<1x8x128xf32> to vector<8x128xf32>
    %cst_17 = arith.constant 2.500000e-01 : f32
    %47 = vector.broadcast %cst_17 : f32 to vector<8x128xf32>
    %48 = arith.mulf %47, %46 : vector<8x128xf32>
    %49 = arith.addf %44, %48 : vector<8x128xf32>
    %50 = vector.extract_strided_slice %13 {offsets = [1, 0, 0], sizes = [1, 8, 128], strides = [1, 1, 1]} : vector<8x8x128xf32> to vector<1x8x128xf32>
    %51 = vector.shape_cast %50 : vector<1x8x128xf32> to vector<8x128xf32>
    %cst_18 = arith.constant 2.500000e-01 : f32
    %52 = vector.broadcast %cst_18 : f32 to vector<8x128xf32>
    %53 = arith.mulf %52, %51 : vector<8x128xf32>
    %54 = vector.extract_strided_slice %13 {offsets = [2, 0, 0], sizes = [1, 8, 128], strides = [1, 1, 1]} : vector<8x8x128xf32> to vector<1x8x128xf32>
    %55 = vector.shape_cast %54 : vector<1x8x128xf32> to vector<8x128xf32>
    %cst_19 = arith.constant 7.500000e-01 : f32
    %56 = vector.broadcast %cst_19 : f32 to vector<8x128xf32>
    %57 = arith.mulf %56, %55 : vector<8x128xf32>
    %58 = arith.addf %53, %57 : vector<8x128xf32>
    %59 = vector.extract_strided_slice %13 {offsets = [2, 0, 0], sizes = [1, 8, 128], strides = [1, 1, 1]} : vector<8x8x128xf32> to vector<1x8x128xf32>
    %60 = vector.shape_cast %59 : vector<1x8x128xf32> to vector<8x128xf32>
    %cst_20 = arith.constant 7.500000e-01 : f32
    %61 = vector.broadcast %cst_20 : f32 to vector<8x128xf32>
    %62 = arith.mulf %61, %60 : vector<8x128xf32>
    %63 = vector.extract_strided_slice %13 {offsets = [3, 0, 0], sizes = [1, 8, 128], strides = [1, 1, 1]} : vector<8x8x128xf32> to vector<1x8x128xf32>
    %64 = vector.shape_cast %63 : vector<1x8x128xf32> to vector<8x128xf32>
    %cst_21 = arith.constant 2.500000e-01 : f32
    %65 = vector.broadcast %cst_21 : f32 to vector<8x128xf32>
    %66 = arith.mulf %65, %64 : vector<8x128xf32>
    %67 = arith.addf %62, %66 : vector<8x128xf32>
    %68 = vector.extract_strided_slice %13 {offsets = [2, 0, 0], sizes = [1, 8, 128], strides = [1, 1, 1]} : vector<8x8x128xf32> to vector<1x8x128xf32>
    %69 = vector.shape_cast %68 : vector<1x8x128xf32> to vector<8x128xf32>
    %cst_22 = arith.constant 2.500000e-01 : f32
    %70 = vector.broadcast %cst_22 : f32 to vector<8x128xf32>
    %71 = arith.mulf %70, %69 : vector<8x128xf32>
    %72 = vector.extract_strided_slice %13 {offsets = [3, 0, 0], sizes = [1, 8, 128], strides = [1, 1, 1]} : vector<8x8x128xf32> to vector<1x8x128xf32>
    %73 = vector.shape_cast %72 : vector<1x8x128xf32> to vector<8x128xf32>
    %cst_23 = arith.constant 7.500000e-01 : f32
    %74 = vector.broadcast %cst_23 : f32 to vector<8x128xf32>
    %75 = arith.mulf %74, %73 : vector<8x128xf32>
    %76 = arith.addf %71, %75 : vector<8x128xf32>
    %77 = vector.extract_strided_slice %13 {offsets = [3, 0, 0], sizes = [1, 8, 128], strides = [1, 1, 1]} : vector<8x8x128xf32> to vector<1x8x128xf32>
    %78 = vector.shape_cast %77 : vector<1x8x128xf32> to vector<8x128xf32>
    %cst_24 = arith.constant 7.500000e-01 : f32
    %79 = vector.broadcast %cst_24 : f32 to vector<8x128xf32>
    %80 = arith.mulf %79, %78 : vector<8x128xf32>
    %81 = vector.extract_strided_slice %13 {offsets = [4, 0, 0], sizes = [1, 8, 128], strides = [1, 1, 1]} : vector<8x8x128xf32> to vector<1x8x128xf32>
    %82 = vector.shape_cast %81 : vector<1x8x128xf32> to vector<8x128xf32>
    %cst_25 = arith.constant 2.500000e-01 : f32
    %83 = vector.broadcast %cst_25 : f32 to vector<8x128xf32>
    %84 = arith.mulf %83, %82 : vector<8x128xf32>
    %85 = arith.addf %80, %84 : vector<8x128xf32>
    %86 = vector.shape_cast %22 : vector<8x128xf32> to vector<1x8x128xf32>
    %87 = vector.shape_cast %31 : vector<8x128xf32> to vector<1x8x128xf32>
    %88 = vector.shape_cast %40 : vector<8x128xf32> to vector<1x8x128xf32>
    %89 = vector.shape_cast %49 : vector<8x128xf32> to vector<1x8x128xf32>
    %90 = vector.shape_cast %58 : vector<8x128xf32> to vector<1x8x128xf32>
    %91 = vector.shape_cast %67 : vector<8x128xf32> to vector<1x8x128xf32>
    %92 = vector.shape_cast %76 : vector<8x128xf32> to vector<1x8x128xf32>
    %93 = vector.shape_cast %85 : vector<8x128xf32> to vector<1x8x128xf32>
    %94 = tpu.concatenate %86, %87, %88, %89, %90, %91, %92, %93 in 0 : vector<1x8x128xf32>, vector<1x8x128xf32>, vector<1x8x128xf32>, vector<1x8x128xf32>, vector<1x8x128xf32>, vector<1x8x128xf32>, vector<1x8x128xf32>, vector<1x8x128xf32> -> vector<8x8x128xf32>
    %c0_26 = arith.constant 0 : index
    %c0_27 = arith.constant 0 : index
    %95 = vector.load %arg9[%c0_26, %c0_27] : memref<128x64xf32, #tpu.memory_space<vmem>>, vector<128x64xf32>
    %96 = vector.shape_cast %94 : vector<8x8x128xf32> to vector<64x128xf32>
    %cst_28 = arith.constant dense<0.000000e+00> : vector<128x128xf32>
    %97 = tpu.matmul %95, %96, %cst_28 {dimension_numbers = #tpu.dot_dimension_numbers<[1], [0], [0], [1], [0, 0, 1, 1], [], []>} : vector<128x64xf32>, vector<64x128xf32>, vector<128x128xf32> -> vector<128x128xf32>
    %c0_29 = arith.constant 0 : index
    %c0_30 = arith.constant 0 : index
    %c0_31 = arith.constant 0 : index
    %c0_32 = arith.constant 0 : index
    %98 = vector.load %arg2[%c0_29, %c0_30, %c0_31, %c0_32] : memref<1x16x16x48xbf16, #tpu.memory_space<vmem>>, vector<1x8x16x48xbf16>
    %99 = vector.shape_cast %98 : vector<1x8x16x48xbf16> to vector<8x16x48xbf16>
    %100 = vector.shape_cast %99 : vector<8x16x48xbf16> to vector<128x48xbf16>
    %c0_33 = arith.constant 0 : index
    %c0_34 = arith.constant 0 : index
    %101 = vector.load %arg6[%c0_33, %c0_34] : memref<48x128xbf16, #tpu.memory_space<vmem>>, vector<48x128xbf16>
    %cst_35 = arith.constant dense<0.000000e+00> : vector<128x128xf32>
    %102 = tpu.matmul %100, %101, %cst_35 {dimension_numbers = #tpu.dot_dimension_numbers<[1], [0], [0], [1], [0, 0, 1, 1], [], []>} : vector<128x48xbf16>, vector<48x128xbf16>, vector<128x128xf32> -> vector<128x128xf32>
    %c0_36 = arith.constant 0 : index
    %c0_37 = arith.constant 0 : index
    %103 = vector.load %arg7[%c0_36, %c0_37] : memref<1x128xf32, #tpu.memory_space<vmem>>, vector<1x128xf32>
    %104 = vector.broadcast %103 : vector<1x128xf32> to vector<128x128xf32>
    %105 = arith.mulf %102, %104 : vector<128x128xf32>
    %c0_38 = arith.constant 0 : index
    %c0_39 = arith.constant 0 : index
    %106 = vector.load %arg8[%c0_38, %c0_39] : memref<1x128xf32, #tpu.memory_space<vmem>>, vector<1x128xf32>
    %107 = vector.broadcast %106 : vector<1x128xf32> to vector<128x128xf32>
    %108 = arith.addf %105, %107 : vector<128x128xf32>
    %cst_40 = arith.constant 0.000000e+00 : f32
    %109 = vector.broadcast %cst_40 : f32 to vector<128x128xf32>
    %110 = arith.maximumf %108, %109 : vector<128x128xf32>
    %111 = arith.addf %97, %110 : vector<128x128xf32>
    %112 = vector.shape_cast %111 : vector<128x128xf32> to vector<8x16x128xf32>
    %113 = arith.truncf %112 : vector<8x16x128xf32> to vector<8x16x128xbf16>
    %c0_41 = arith.constant 0 : index
    %c0_42 = arith.constant 0 : index
    %c0_43 = arith.constant 0 : index
    %c0_44 = arith.constant 0 : index
    %114 = vector.load %arg10[%c0_41, %c0_42, %c0_43, %c0_44] : memref<1x16x16x128xbf16, #tpu.memory_space<vmem>>, vector<1x8x16x128xbf16>
    %115 = vector.shape_cast %114 : vector<1x8x16x128xbf16> to vector<8x16x128xbf16>
    %116 = vector.shape_cast %113 : vector<8x16x128xbf16> to vector<1x8x16x128xbf16>
    tpu.vector_store %arg10[%c0_41, %c0_42, %c0_43, %c0_44], %116 {strides = array<i32>} : memref<1x16x16x128xbf16, #tpu.memory_space<vmem>>, vector<1x8x16x128xbf16>,
    %117 = vector.extract_strided_slice %13 {offsets = [3, 0, 0], sizes = [1, 8, 128], strides = [1, 1, 1]} : vector<8x8x128xf32> to vector<1x8x128xf32>
    %118 = vector.shape_cast %117 : vector<1x8x128xf32> to vector<8x128xf32>
    %cst_45 = arith.constant 2.500000e-01 : f32
    %119 = vector.broadcast %cst_45 : f32 to vector<8x128xf32>
    %120 = arith.mulf %119, %118 : vector<8x128xf32>
    %121 = vector.extract_strided_slice %13 {offsets = [4, 0, 0], sizes = [1, 8, 128], strides = [1, 1, 1]} : vector<8x8x128xf32> to vector<1x8x128xf32>
    %122 = vector.shape_cast %121 : vector<1x8x128xf32> to vector<8x128xf32>
    %cst_46 = arith.constant 7.500000e-01 : f32
    %123 = vector.broadcast %cst_46 : f32 to vector<8x128xf32>
    %124 = arith.mulf %123, %122 : vector<8x128xf32>
    %125 = arith.addf %120, %124 : vector<8x128xf32>
    %126 = vector.extract_strided_slice %13 {offsets = [4, 0, 0], sizes = [1, 8, 128], strides = [1, 1, 1]} : vector<8x8x128xf32> to vector<1x8x128xf32>
    %127 = vector.shape_cast %126 : vector<1x8x128xf32> to vector<8x128xf32>
    %cst_47 = arith.constant 7.500000e-01 : f32
    %128 = vector.broadcast %cst_47 : f32 to vector<8x128xf32>
    %129 = arith.mulf %128, %127 : vector<8x128xf32>
    %130 = vector.extract_strided_slice %13 {offsets = [5, 0, 0], sizes = [1, 8, 128], strides = [1, 1, 1]} : vector<8x8x128xf32> to vector<1x8x128xf32>
    %131 = vector.shape_cast %130 : vector<1x8x128xf32> to vector<8x128xf32>
    %cst_48 = arith.constant 2.500000e-01 : f32
    %132 = vector.broadcast %cst_48 : f32 to vector<8x128xf32>
    %133 = arith.mulf %132, %131 : vector<8x128xf32>
    %134 = arith.addf %129, %133 : vector<8x128xf32>
    %135 = vector.extract_strided_slice %13 {offsets = [4, 0, 0], sizes = [1, 8, 128], strides = [1, 1, 1]} : vector<8x8x128xf32> to vector<1x8x128xf32>
    %136 = vector.shape_cast %135 : vector<1x8x128xf32> to vector<8x128xf32>
    %cst_49 = arith.constant 2.500000e-01 : f32
    %137 = vector.broadcast %cst_49 : f32 to vector<8x128xf32>
    %138 = arith.mulf %137, %136 : vector<8x128xf32>
    %139 = vector.extract_strided_slice %13 {offsets = [5, 0, 0], sizes = [1, 8, 128], strides = [1, 1, 1]} : vector<8x8x128xf32> to vector<1x8x128xf32>
    %140 = vector.shape_cast %139 : vector<1x8x128xf32> to vector<8x128xf32>
    %cst_50 = arith.constant 7.500000e-01 : f32
    %141 = vector.broadcast %cst_50 : f32 to vector<8x128xf32>
    %142 = arith.mulf %141, %140 : vector<8x128xf32>
    %143 = arith.addf %138, %142 : vector<8x128xf32>
    %144 = vector.extract_strided_slice %13 {offsets = [5, 0, 0], sizes = [1, 8, 128], strides = [1, 1, 1]} : vector<8x8x128xf32> to vector<1x8x128xf32>
    %145 = vector.shape_cast %144 : vector<1x8x128xf32> to vector<8x128xf32>
    %cst_51 = arith.constant 7.500000e-01 : f32
    %146 = vector.broadcast %cst_51 : f32 to vector<8x128xf32>
    %147 = arith.mulf %146, %145 : vector<8x128xf32>
    %148 = vector.extract_strided_slice %13 {offsets = [6, 0, 0], sizes = [1, 8, 128], strides = [1, 1, 1]} : vector<8x8x128xf32> to vector<1x8x128xf32>
    %149 = vector.shape_cast %148 : vector<1x8x128xf32> to vector<8x128xf32>
    %cst_52 = arith.constant 2.500000e-01 : f32
    %150 = vector.broadcast %cst_52 : f32 to vector<8x128xf32>
    %151 = arith.mulf %150, %149 : vector<8x128xf32>
    %152 = arith.addf %147, %151 : vector<8x128xf32>
    %153 = vector.extract_strided_slice %13 {offsets = [5, 0, 0], sizes = [1, 8, 128], strides = [1, 1, 1]} : vector<8x8x128xf32> to vector<1x8x128xf32>
    %154 = vector.shape_cast %153 : vector<1x8x128xf32> to vector<8x128xf32>
    %cst_53 = arith.constant 2.500000e-01 : f32
    %155 = vector.broadcast %cst_53 : f32 to vector<8x128xf32>
    %156 = arith.mulf %155, %154 : vector<8x128xf32>
    %157 = vector.extract_strided_slice %13 {offsets = [6, 0, 0], sizes = [1, 8, 128], strides = [1, 1, 1]} : vector<8x8x128xf32> to vector<1x8x128xf32>
    %158 = vector.shape_cast %157 : vector<1x8x128xf32> to vector<8x128xf32>
    %cst_54 = arith.constant 7.500000e-01 : f32
    %159 = vector.broadcast %cst_54 : f32 to vector<8x128xf32>
    %160 = arith.mulf %159, %158 : vector<8x128xf32>
    %161 = arith.addf %156, %160 : vector<8x128xf32>
    %162 = vector.extract_strided_slice %13 {offsets = [6, 0, 0], sizes = [1, 8, 128], strides = [1, 1, 1]} : vector<8x8x128xf32> to vector<1x8x128xf32>
    %163 = vector.shape_cast %162 : vector<1x8x128xf32> to vector<8x128xf32>
    %cst_55 = arith.constant 7.500000e-01 : f32
    %164 = vector.broadcast %cst_55 : f32 to vector<8x128xf32>
    %165 = arith.mulf %164, %163 : vector<8x128xf32>
    %166 = vector.extract_strided_slice %13 {offsets = [7, 0, 0], sizes = [1, 8, 128], strides = [1, 1, 1]} : vector<8x8x128xf32> to vector<1x8x128xf32>
    %167 = vector.shape_cast %166 : vector<1x8x128xf32> to vector<8x128xf32>
    %cst_56 = arith.constant 2.500000e-01 : f32
    %168 = vector.broadcast %cst_56 : f32 to vector<8x128xf32>
    %169 = arith.mulf %168, %167 : vector<8x128xf32>
    %170 = arith.addf %165, %169 : vector<8x128xf32>
    %171 = vector.extract_strided_slice %13 {offsets = [6, 0, 0], sizes = [1, 8, 128], strides = [1, 1, 1]} : vector<8x8x128xf32> to vector<1x8x128xf32>
    %172 = vector.shape_cast %171 : vector<1x8x128xf32> to vector<8x128xf32>
    %cst_57 = arith.constant 2.500000e-01 : f32
    %173 = vector.broadcast %cst_57 : f32 to vector<8x128xf32>
    %174 = arith.mulf %173, %172 : vector<8x128xf32>
    %175 = vector.extract_strided_slice %13 {offsets = [7, 0, 0], sizes = [1, 8, 128], strides = [1, 1, 1]} : vector<8x8x128xf32> to vector<1x8x128xf32>
    %176 = vector.shape_cast %175 : vector<1x8x128xf32> to vector<8x128xf32>
    %cst_58 = arith.constant 7.500000e-01 : f32
    %177 = vector.broadcast %cst_58 : f32 to vector<8x128xf32>
    %178 = arith.mulf %177, %176 : vector<8x128xf32>
    %179 = arith.addf %174, %178 : vector<8x128xf32>
    %180 = vector.extract_strided_slice %13 {offsets = [7, 0, 0], sizes = [1, 8, 128], strides = [1, 1, 1]} : vector<8x8x128xf32> to vector<1x8x128xf32>
    %181 = vector.shape_cast %180 : vector<1x8x128xf32> to vector<8x128xf32>
    %cst_59 = arith.constant 7.500000e-01 : f32
    %182 = vector.broadcast %cst_59 : f32 to vector<8x128xf32>
    %183 = arith.mulf %182, %181 : vector<8x128xf32>
    %184 = vector.extract_strided_slice %13 {offsets = [7, 0, 0], sizes = [1, 8, 128], strides = [1, 1, 1]} : vector<8x8x128xf32> to vector<1x8x128xf32>
    %185 = vector.shape_cast %184 : vector<1x8x128xf32> to vector<8x128xf32>
    %cst_60 = arith.constant 2.500000e-01 : f32
    %186 = vector.broadcast %cst_60 : f32 to vector<8x128xf32>
    %187 = arith.mulf %186, %185 : vector<8x128xf32>
    %188 = arith.addf %183, %187 : vector<8x128xf32>
    %189 = vector.shape_cast %125 : vector<8x128xf32> to vector<1x8x128xf32>
    %190 = vector.shape_cast %134 : vector<8x128xf32> to vector<1x8x128xf32>
    %191 = vector.shape_cast %143 : vector<8x128xf32> to vector<1x8x128xf32>
    %192 = vector.shape_cast %152 : vector<8x128xf32> to vector<1x8x128xf32>
    %193 = vector.shape_cast %161 : vector<8x128xf32> to vector<1x8x128xf32>
    %194 = vector.shape_cast %170 : vector<8x128xf32> to vector<1x8x128xf32>
    %195 = vector.shape_cast %179 : vector<8x128xf32> to vector<1x8x128xf32>
    %196 = vector.shape_cast %188 : vector<8x128xf32> to vector<1x8x128xf32>
    %197 = tpu.concatenate %189, %190, %191, %192, %193, %194, %195, %196 in 0 : vector<1x8x128xf32>, vector<1x8x128xf32>, vector<1x8x128xf32>, vector<1x8x128xf32>, vector<1x8x128xf32>, vector<1x8x128xf32>, vector<1x8x128xf32>, vector<1x8x128xf32> -> vector<8x8x128xf32>
    %c0_61 = arith.constant 0 : index
    %c0_62 = arith.constant 0 : index
    %198 = vector.load %arg9[%c0_61, %c0_62] : memref<128x64xf32, #tpu.memory_space<vmem>>, vector<128x64xf32>
    %199 = vector.shape_cast %197 : vector<8x8x128xf32> to vector<64x128xf32>
    %cst_63 = arith.constant dense<0.000000e+00> : vector<128x128xf32>
    %200 = tpu.matmul %198, %199, %cst_63 {dimension_numbers = #tpu.dot_dimension_numbers<[1], [0], [0], [1], [0, 0, 1, 1], [], []>} : vector<128x64xf32>, vector<64x128xf32>, vector<128x128xf32> -> vector<128x128xf32>
    %c0_64 = arith.constant 0 : index
    %c8 = arith.constant 8 : index
    %c0_65 = arith.constant 0 : index
    %c0_66 = arith.constant 0 : index
    %201 = vector.load %arg2[%c0_64, %c8, %c0_65, %c0_66] : memref<1x16x16x48xbf16, #tpu.memory_space<vmem>>, vector<1x8x16x48xbf16>
    %202 = vector.shape_cast %201 : vector<1x8x16x48xbf16> to vector<8x16x48xbf16>
    %203 = vector.shape_cast %202 : vector<8x16x48xbf16> to vector<128x48xbf16>
    %c0_67 = arith.constant 0 : index
    %c0_68 = arith.constant 0 : index
    %204 = vector.load %arg6[%c0_67, %c0_68] : memref<48x128xbf16, #tpu.memory_space<vmem>>, vector<48x128xbf16>
    %cst_69 = arith.constant dense<0.000000e+00> : vector<128x128xf32>
    %205 = tpu.matmul %203, %204, %cst_69 {dimension_numbers = #tpu.dot_dimension_numbers<[1], [0], [0], [1], [0, 0, 1, 1], [], []>} : vector<128x48xbf16>, vector<48x128xbf16>, vector<128x128xf32> -> vector<128x128xf32>
    %c0_70 = arith.constant 0 : index
    %c0_71 = arith.constant 0 : index
    %206 = vector.load %arg7[%c0_70, %c0_71] : memref<1x128xf32, #tpu.memory_space<vmem>>, vector<1x128xf32>
    %207 = vector.broadcast %206 : vector<1x128xf32> to vector<128x128xf32>
    %208 = arith.mulf %205, %207 : vector<128x128xf32>
    %c0_72 = arith.constant 0 : index
    %c0_73 = arith.constant 0 : index
    %209 = vector.load %arg8[%c0_72, %c0_73] : memref<1x128xf32, #tpu.memory_space<vmem>>, vector<1x128xf32>
    %210 = vector.broadcast %209 : vector<1x128xf32> to vector<128x128xf32>
    %211 = arith.addf %208, %210 : vector<128x128xf32>
    %cst_74 = arith.constant 0.000000e+00 : f32
    %212 = vector.broadcast %cst_74 : f32 to vector<128x128xf32>
    %213 = arith.maximumf %211, %212 : vector<128x128xf32>
    %214 = arith.addf %200, %213 : vector<128x128xf32>
    %215 = vector.shape_cast %214 : vector<128x128xf32> to vector<8x16x128xf32>
    %216 = arith.truncf %215 : vector<8x16x128xf32> to vector<8x16x128xbf16>
    %c0_75 = arith.constant 0 : index
    %c8_76 = arith.constant 8 : index
    %c0_77 = arith.constant 0 : index
    %c0_78 = arith.constant 0 : index
    %217 = vector.load %arg10[%c0_75, %c8_76, %c0_77, %c0_78] : memref<1x16x16x128xbf16, #tpu.memory_space<vmem>>, vector<1x8x16x128xbf16>
    %218 = vector.shape_cast %217 : vector<1x8x16x128xbf16> to vector<8x16x128xbf16>
    %219 = vector.shape_cast %216 : vector<8x16x128xbf16> to vector<1x8x16x128xbf16>
    tpu.vector_store %arg10[%c0_75, %c8_76, %c0_77, %c0_78], %219 {strides = array<i32>} : memref<1x16x16x128xbf16, #tpu.memory_space<vmem>>, vector<1x8x16x128xbf16>,
    return
  }
  func.func @transform_0(%arg0: i32) -> (i32, i32, i32, i32) {
    %c0_i32 = arith.constant 0 : i32
    %c0_i32_0 = arith.constant 0 : i32
    %c0_i32_1 = arith.constant 0 : i32
    %c0_i32_2 = arith.constant 0 : i32
    return %arg0, %c0_i32, %c0_i32_0, %c0_i32_1 : i32, i32, i32, i32
  }
  func.func @transform_1(%arg0: i32) -> (i32, i32, i32, i32) {
    %c0_i32 = arith.constant 0 : i32
    %c0_i32_0 = arith.constant 0 : i32
    %c0_i32_1 = arith.constant 0 : i32
    %c0_i32_2 = arith.constant 0 : i32
    return %arg0, %c0_i32, %c0_i32_0, %c0_i32_1 : i32, i32, i32, i32
  }
  func.func @transform_2(%arg0: i32) -> (i32, i32) {
    %c0_i32 = arith.constant 0 : i32
    %c0_i32_0 = arith.constant 0 : i32
    %c0_i32_1 = arith.constant 0 : i32
    return %c0_i32, %c0_i32_0 : i32, i32
  }
  func.func @transform_3(%arg0: i32) -> (i32, i32) {
    %c0_i32 = arith.constant 0 : i32
    %c0_i32_0 = arith.constant 0 : i32
    %c0_i32_1 = arith.constant 0 : i32
    return %c0_i32, %c0_i32_0 : i32, i32
  }
  func.func @transform_4(%arg0: i32) -> (i32, i32) {
    %c0_i32 = arith.constant 0 : i32
    %c0_i32_0 = arith.constant 0 : i32
    %c0_i32_1 = arith.constant 0 : i32
    return %c0_i32, %c0_i32_0 : i32, i32
  }
  func.func @transform_5(%arg0: i32) -> (i32, i32) {
    %c0_i32 = arith.constant 0 : i32
    %c0_i32_0 = arith.constant 0 : i32
    %c0_i32_1 = arith.constant 0 : i32
    return %c0_i32, %c0_i32_0 : i32, i32
  }
  func.func @transform_6(%arg0: i32) -> (i32, i32) {
    %c0_i32 = arith.constant 0 : i32
    %c0_i32_0 = arith.constant 0 : i32
    %c0_i32_1 = arith.constant 0 : i32
    return %c0_i32, %c0_i32_0 : i32, i32
  }
  func.func @transform_7(%arg0: i32) -> (i32, i32) {
    %c0_i32 = arith.constant 0 : i32
    %c0_i32_0 = arith.constant 0 : i32
    %c0_i32_1 = arith.constant 0 : i32
    return %c0_i32, %c0_i32_0 : i32, i32
  }
  func.func @transform_8(%arg0: i32) -> (i32, i32) {
    %c0_i32 = arith.constant 0 : i32
    %c0_i32_0 = arith.constant 0 : i32
    %c0_i32_1 = arith.constant 0 : i32
    return %c0_i32, %c0_i32_0 : i32, i32
  }
  func.func @transform_9(%arg0: i32) -> (i32, i32, i32, i32) {
    %c0_i32 = arith.constant 0 : i32
    %c0_i32_0 = arith.constant 0 : i32
    %c0_i32_1 = arith.constant 0 : i32
    %c0_i32_2 = arith.constant 0 : i32
    return %arg0, %c0_i32, %c0_i32_0, %c0_i32_1 : i32, i32, i32, i32
  }
}

module attributes {stable_mosaic.version = 11 : i64} {
  func.func @_conv3x3_bn_relu_kernel(%arg0: i32, %arg1: i32, %arg2: memref<1x8x18x128xbf16, #tpu.memory_space<vmem>>, %arg3: memref<1x1x18x128xbf16, #tpu.memory_space<vmem>>, %arg4: memref<1x1x18x128xbf16, #tpu.memory_space<vmem>>, %arg5: memref<3x384x64xbf16, #tpu.memory_space<vmem>>, %arg6: memref<1x64xf32, #tpu.memory_space<vmem>>, %arg7: memref<1x64xf32, #tpu.memory_space<vmem>>, %arg8: memref<1x8x16x64xbf16, #tpu.memory_space<vmem>>) attributes {dimension_semantics = [#tpu.dimension_semantics<parallel>, #tpu.dimension_semantics<parallel>], iteration_bounds = array<i64: 2, 2>, scalar_prefetch = 0 : i64, scratch_operands = 0 : i64, tpu.core_type = #tpu.core_type<tc>, window_params = [{transform_indices = @transform_0, window_bounds = array<i64: 1, 8, 18, 128>}, {transform_indices = @transform_1, window_bounds = array<i64: 1, 1, 18, 128>}, {transform_indices = @transform_2, window_bounds = array<i64: 1, 1, 18, 128>}, {pipeline_mode = #tpu.pipeline_mode<synchronous>, transform_indices = @transform_3, window_bounds = array<i64: 3, 384, 64>}, {pipeline_mode = #tpu.pipeline_mode<synchronous>, transform_indices = @transform_4, window_bounds = array<i64: 1, 64>}, {pipeline_mode = #tpu.pipeline_mode<synchronous>, transform_indices = @transform_5, window_bounds = array<i64: 1, 64>}, {transform_indices = @transform_6, window_bounds = array<i64: 1, 8, 16, 64>}]} {
    %c0 = arith.constant 0 : index
    %c0_0 = arith.constant 0 : index
    %c0_1 = arith.constant 0 : index
    %c0_2 = arith.constant 0 : index
    %0 = vector.load %arg2[%c0, %c0_0, %c0_1, %c0_2] : memref<1x8x18x128xbf16, #tpu.memory_space<vmem>>, vector<1x8x18x128xbf16>
    %1 = vector.shape_cast %0 : vector<1x8x18x128xbf16> to vector<8x18x128xbf16>
    %c0_3 = arith.constant 0 : index
    %c0_4 = arith.constant 0 : index
    %c0_5 = arith.constant 0 : index
    %c0_6 = arith.constant 0 : index
    %2 = vector.load %arg3[%c0_3, %c0_4, %c0_5, %c0_6] : memref<1x1x18x128xbf16, #tpu.memory_space<vmem>>, vector<1x1x18x128xbf16>
    %3 = vector.shape_cast %2 : vector<1x1x18x128xbf16> to vector<1x18x128xbf16>
    %c0_7 = arith.constant 0 : index
    %c0_8 = arith.constant 0 : index
    %c0_9 = arith.constant 0 : index
    %c0_10 = arith.constant 0 : index
    %4 = vector.load %arg4[%c0_7, %c0_8, %c0_9, %c0_10] : memref<1x1x18x128xbf16, #tpu.memory_space<vmem>>, vector<1x1x18x128xbf16>
    %5 = vector.shape_cast %4 : vector<1x1x18x128xbf16> to vector<1x18x128xbf16>
    %6 = tpu.concatenate %1, %3, %5 in 0 : vector<8x18x128xbf16>, vector<1x18x128xbf16>, vector<1x18x128xbf16> -> vector<10x18x128xbf16>
    %cst = arith.constant 0.000000e+00 : f32
    %7 = vector.broadcast %cst : f32 to vector<128x64xf32>
    %8 = vector.extract_strided_slice %6 {offsets = [0, 0, 0], sizes = [8, 18, 128], strides = [1, 1, 1]} : vector<10x18x128xbf16> to vector<8x18x128xbf16>
    %9 = vector.extract_strided_slice %8 {offsets = [0, 0, 0], sizes = [8, 16, 128], strides = [1, 1, 1]} : vector<8x18x128xbf16> to vector<8x16x128xbf16>
    %10 = vector.extract_strided_slice %8 {offsets = [0, 1, 0], sizes = [8, 16, 128], strides = [1, 1, 1]} : vector<8x18x128xbf16> to vector<8x16x128xbf16>
    %11 = vector.extract_strided_slice %8 {offsets = [0, 2, 0], sizes = [8, 16, 128], strides = [1, 1, 1]} : vector<8x18x128xbf16> to vector<8x16x128xbf16>
    %12 = tpu.concatenate %9, %10, %11 in 2 : vector<8x16x128xbf16>, vector<8x16x128xbf16>, vector<8x16x128xbf16> -> vector<8x16x384xbf16>
    %13 = vector.shape_cast %12 : vector<8x16x384xbf16> to vector<128x384xbf16>
    %c0_11 = arith.constant 0 : index
    %c0_12 = arith.constant 0 : index
    %c0_13 = arith.constant 0 : index
    %14 = vector.load %arg5[%c0_11, %c0_12, %c0_13] : memref<3x384x64xbf16, #tpu.memory_space<vmem>>, vector<1x384x64xbf16>
    %15 = vector.shape_cast %14 : vector<1x384x64xbf16> to vector<384x64xbf16>
    %cst_14 = arith.constant dense<0.000000e+00> : vector<128x64xf32>
    %16 = tpu.matmul %13, %15, %cst_14 {dimension_numbers = #tpu.dot_dimension_numbers<[1], [0], [0], [1], [0, 0, 1, 1], [], []>} : vector<128x384xbf16>, vector<384x64xbf16>, vector<128x64xf32> -> vector<128x64xf32>
    %17 = arith.addf %7, %16 : vector<128x64xf32>
    %18 = vector.extract_strided_slice %6 {offsets = [1, 0, 0], sizes = [8, 18, 128], strides = [1, 1, 1]} : vector<10x18x128xbf16> to vector<8x18x128xbf16>
    %19 = vector.extract_strided_slice %18 {offsets = [0, 0, 0], sizes = [8, 16, 128], strides = [1, 1, 1]} : vector<8x18x128xbf16> to vector<8x16x128xbf16>
    %20 = vector.extract_strided_slice %18 {offsets = [0, 1, 0], sizes = [8, 16, 128], strides = [1, 1, 1]} : vector<8x18x128xbf16> to vector<8x16x128xbf16>
    %21 = vector.extract_strided_slice %18 {offsets = [0, 2, 0], sizes = [8, 16, 128], strides = [1, 1, 1]} : vector<8x18x128xbf16> to vector<8x16x128xbf16>
    %22 = tpu.concatenate %19, %20, %21 in 2 : vector<8x16x128xbf16>, vector<8x16x128xbf16>, vector<8x16x128xbf16> -> vector<8x16x384xbf16>
    %23 = vector.shape_cast %22 : vector<8x16x384xbf16> to vector<128x384xbf16>
    %c1 = arith.constant 1 : index
    %c0_15 = arith.constant 0 : index
    %c0_16 = arith.constant 0 : index
    %24 = vector.load %arg5[%c1, %c0_15, %c0_16] : memref<3x384x64xbf16, #tpu.memory_space<vmem>>, vector<1x384x64xbf16>
    %25 = vector.shape_cast %24 : vector<1x384x64xbf16> to vector<384x64xbf16>
    %cst_17 = arith.constant dense<0.000000e+00> : vector<128x64xf32>
    %26 = tpu.matmul %23, %25, %cst_17 {dimension_numbers = #tpu.dot_dimension_numbers<[1], [0], [0], [1], [0, 0, 1, 1], [], []>} : vector<128x384xbf16>, vector<384x64xbf16>, vector<128x64xf32> -> vector<128x64xf32>
    %27 = arith.addf %17, %26 : vector<128x64xf32>
    %28 = vector.extract_strided_slice %6 {offsets = [2, 0, 0], sizes = [8, 18, 128], strides = [1, 1, 1]} : vector<10x18x128xbf16> to vector<8x18x128xbf16>
    %29 = vector.extract_strided_slice %28 {offsets = [0, 0, 0], sizes = [8, 16, 128], strides = [1, 1, 1]} : vector<8x18x128xbf16> to vector<8x16x128xbf16>
    %30 = vector.extract_strided_slice %28 {offsets = [0, 1, 0], sizes = [8, 16, 128], strides = [1, 1, 1]} : vector<8x18x128xbf16> to vector<8x16x128xbf16>
    %31 = vector.extract_strided_slice %28 {offsets = [0, 2, 0], sizes = [8, 16, 128], strides = [1, 1, 1]} : vector<8x18x128xbf16> to vector<8x16x128xbf16>
    %32 = tpu.concatenate %29, %30, %31 in 2 : vector<8x16x128xbf16>, vector<8x16x128xbf16>, vector<8x16x128xbf16> -> vector<8x16x384xbf16>
    %33 = vector.shape_cast %32 : vector<8x16x384xbf16> to vector<128x384xbf16>
    %c2 = arith.constant 2 : index
    %c0_18 = arith.constant 0 : index
    %c0_19 = arith.constant 0 : index
    %34 = vector.load %arg5[%c2, %c0_18, %c0_19] : memref<3x384x64xbf16, #tpu.memory_space<vmem>>, vector<1x384x64xbf16>
    %35 = vector.shape_cast %34 : vector<1x384x64xbf16> to vector<384x64xbf16>
    %cst_20 = arith.constant dense<0.000000e+00> : vector<128x64xf32>
    %36 = tpu.matmul %33, %35, %cst_20 {dimension_numbers = #tpu.dot_dimension_numbers<[1], [0], [0], [1], [0, 0, 1, 1], [], []>} : vector<128x384xbf16>, vector<384x64xbf16>, vector<128x64xf32> -> vector<128x64xf32>
    %37 = arith.addf %27, %36 : vector<128x64xf32>
    %c0_21 = arith.constant 0 : index
    %c0_22 = arith.constant 0 : index
    %38 = vector.load %arg6[%c0_21, %c0_22] : memref<1x64xf32, #tpu.memory_space<vmem>>, vector<1x64xf32>
    %39 = vector.broadcast %38 : vector<1x64xf32> to vector<128x64xf32>
    %40 = arith.mulf %37, %39 : vector<128x64xf32>
    %c0_23 = arith.constant 0 : index
    %c0_24 = arith.constant 0 : index
    %41 = vector.load %arg7[%c0_23, %c0_24] : memref<1x64xf32, #tpu.memory_space<vmem>>, vector<1x64xf32>
    %42 = vector.broadcast %41 : vector<1x64xf32> to vector<128x64xf32>
    %43 = arith.addf %40, %42 : vector<128x64xf32>
    %cst_25 = arith.constant 0.000000e+00 : f32
    %44 = vector.broadcast %cst_25 : f32 to vector<128x64xf32>
    %45 = arith.maximumf %43, %44 : vector<128x64xf32>
    %46 = vector.shape_cast %45 : vector<128x64xf32> to vector<8x16x64xf32>
    %47 = arith.truncf %46 : vector<8x16x64xf32> to vector<8x16x64xbf16>
    %c0_26 = arith.constant 0 : index
    %c0_27 = arith.constant 0 : index
    %c0_28 = arith.constant 0 : index
    %c0_29 = arith.constant 0 : index
    %48 = vector.load %arg8[%c0_26, %c0_27, %c0_28, %c0_29] : memref<1x8x16x64xbf16, #tpu.memory_space<vmem>>, vector<1x8x16x64xbf16>
    %49 = vector.shape_cast %48 : vector<1x8x16x64xbf16> to vector<8x16x64xbf16>
    %50 = vector.shape_cast %47 : vector<8x16x64xbf16> to vector<1x8x16x64xbf16>
    tpu.vector_store %arg8[%c0_26, %c0_27, %c0_28, %c0_29], %50 {strides = array<i32>} : memref<1x8x16x64xbf16, #tpu.memory_space<vmem>>, vector<1x8x16x64xbf16>,
    return
  }
  func.func @transform_0(%arg0: i32, %arg1: i32) -> (i32, i32, i32, i32) {
    %c0_i32 = arith.constant 0 : i32
    %c0_i32_0 = arith.constant 0 : i32
    %c0_i32_1 = arith.constant 0 : i32
    return %arg0, %arg1, %c0_i32, %c0_i32_0 : i32, i32, i32, i32
  }
  func.func @transform_1(%arg0: i32, %arg1: i32) -> (i32, i32, i32, i32) {
    %c8_i32 = arith.constant 8 : i32
    %0 = arith.muli %arg1, %c8_i32 : i32
    %c8_i32_0 = arith.constant 8 : i32
    %1 = arith.addi %0, %c8_i32_0 : i32
    %c0_i32 = arith.constant 0 : i32
    %c0_i32_1 = arith.constant 0 : i32
    %c0_i32_2 = arith.constant 0 : i32
    return %arg0, %1, %c0_i32, %c0_i32_1 : i32, i32, i32, i32
  }
  func.func @transform_2(%arg0: i32, %arg1: i32) -> (i32, i32, i32, i32) {
    %c8_i32 = arith.constant 8 : i32
    %0 = arith.muli %arg1, %c8_i32 : i32
    %c8_i32_0 = arith.constant 8 : i32
    %1 = arith.addi %0, %c8_i32_0 : i32
    %c1_i32 = arith.constant 1 : i32
    %2 = arith.addi %1, %c1_i32 : i32
    %c0_i32 = arith.constant 0 : i32
    %c0_i32_1 = arith.constant 0 : i32
    %c0_i32_2 = arith.constant 0 : i32
    return %arg0, %2, %c0_i32, %c0_i32_1 : i32, i32, i32, i32
  }
  func.func @transform_3(%arg0: i32, %arg1: i32) -> (i32, i32, i32) {
    %c0_i32 = arith.constant 0 : i32
    %c0_i32_0 = arith.constant 0 : i32
    %c0_i32_1 = arith.constant 0 : i32
    %c0_i32_2 = arith.constant 0 : i32
    return %c0_i32, %c0_i32_0, %c0_i32_1 : i32, i32, i32
  }
  func.func @transform_4(%arg0: i32, %arg1: i32) -> (i32, i32) {
    %c0_i32 = arith.constant 0 : i32
    %c0_i32_0 = arith.constant 0 : i32
    %c0_i32_1 = arith.constant 0 : i32
    return %c0_i32, %c0_i32_0 : i32, i32
  }
  func.func @transform_5(%arg0: i32, %arg1: i32) -> (i32, i32) {
    %c0_i32 = arith.constant 0 : i32
    %c0_i32_0 = arith.constant 0 : i32
    %c0_i32_1 = arith.constant 0 : i32
    return %c0_i32, %c0_i32_0 : i32, i32
  }
  func.func @transform_6(%arg0: i32, %arg1: i32) -> (i32, i32, i32, i32) {
    %c0_i32 = arith.constant 0 : i32
    %c0_i32_0 = arith.constant 0 : i32
    %c0_i32_1 = arith.constant 0 : i32
    return %arg0, %arg1, %c0_i32, %c0_i32_0 : i32, i32, i32, i32
  }
}

module attributes {stable_mosaic.version = 11 : i64} {
  func.func @_up_head4_cat_kernel(%arg0: i32, %arg1: memref<1x16x16x64xbf16, #tpu.memory_space<vmem>>, %arg2: memref<1x32x32x32xbf16, #tpu.memory_space<vmem>>, %arg3: memref<32x8xbf16, #tpu.memory_space<vmem>>, %arg4: memref<1x8xf32, #tpu.memory_space<vmem>>, %arg5: memref<1x8xf32, #tpu.memory_space<vmem>>, %arg6: memref<128x64xf32, #tpu.memory_space<vmem>>, %arg7: memref<1x32x32x72xbf16, #tpu.memory_space<vmem>>) attributes {dimension_semantics = [#tpu.dimension_semantics<parallel>], iteration_bounds = array<i64: 2>, scalar_prefetch = 0 : i64, scratch_operands = 0 : i64, tpu.core_type = #tpu.core_type<tc>, window_params = [{transform_indices = @transform_0, window_bounds = array<i64: 1, 16, 16, 64>}, {transform_indices = @transform_1, window_bounds = array<i64: 1, 32, 32, 32>}, {pipeline_mode = #tpu.pipeline_mode<synchronous>, transform_indices = @transform_2, window_bounds = array<i64: 32, 8>}, {pipeline_mode = #tpu.pipeline_mode<synchronous>, transform_indices = @transform_3, window_bounds = array<i64: 1, 8>}, {pipeline_mode = #tpu.pipeline_mode<synchronous>, transform_indices = @transform_4, window_bounds = array<i64: 1, 8>}, {pipeline_mode = #tpu.pipeline_mode<synchronous>, transform_indices = @transform_5, window_bounds = array<i64: 128, 64>}, {transform_indices = @transform_6, window_bounds = array<i64: 1, 32, 32, 72>}]} {
    %c0 = arith.constant 0 : index
    %c0_0 = arith.constant 0 : index
    %c0_1 = arith.constant 0 : index
    %c0_2 = arith.constant 0 : index
    %0 = vector.load %arg1[%c0, %c0_0, %c0_1, %c0_2] : memref<1x16x16x64xbf16, #tpu.memory_space<vmem>>, vector<1x16x16x64xbf16>
    %1 = vector.shape_cast %0 : vector<1x16x16x64xbf16> to vector<16x16x64xbf16>
    %2 = vector.extract_strided_slice %1 {offsets = [0, 0, 0], sizes = [1, 16, 64], strides = [1, 1, 1]} : vector<16x16x64xbf16> to vector<1x16x64xbf16>
    %3 = vector.shape_cast %2 : vector<1x16x64xbf16> to vector<16x64xbf16>
    %4 = arith.extf %3 : vector<16x64xbf16> to vector<16x64xf32>
    %cst = arith.constant 1.000000e+00 : f32
    %5 = vector.broadcast %cst : f32 to vector<16x64xf32>
    %6 = arith.mulf %5, %4 : vector<16x64xf32>
    %7 = vector.extract_strided_slice %1 {offsets = [1, 0, 0], sizes = [1, 16, 64], strides = [1, 1, 1]} : vector<16x16x64xbf16> to vector<1x16x64xbf16>
    %8 = vector.shape_cast %7 : vector<1x16x64xbf16> to vector<16x64xbf16>
    %9 = arith.extf %8 : vector<16x64xbf16> to vector<16x64xf32>
    %cst_3 = arith.constant 0.000000e+00 : f32
    %10 = vector.broadcast %cst_3 : f32 to vector<16x64xf32>
    %11 = arith.mulf %10, %9 : vector<16x64xf32>
    %12 = arith.addf %6, %11 : vector<16x64xf32>
    %13 = vector.extract_strided_slice %1 {offsets = [0, 0, 0], sizes = [1, 16, 64], strides = [1, 1, 1]} : vector<16x16x64xbf16> to vector<1x16x64xbf16>
    %14 = vector.shape_cast %13 : vector<1x16x64xbf16> to vector<16x64xbf16>
    %15 = arith.extf %14 : vector<16x64xbf16> to vector<16x64xf32>
    %cst_4 = arith.constant 7.500000e-01 : f32
    %16 = vector.broadcast %cst_4 : f32 to vector<16x64xf32>
    %17 = arith.mulf %16, %15 : vector<16x64xf32>
    %18 = vector.extract_strided_slice %1 {offsets = [1, 0, 0], sizes = [1, 16, 64], strides = [1, 1, 1]} : vector<16x16x64xbf16> to vector<1x16x64xbf16>
    %19 = vector.shape_cast %18 : vector<1x16x64xbf16> to vector<16x64xbf16>
    %20 = arith.extf %19 : vector<16x64xbf16> to vector<16x64xf32>
    %cst_5 = arith.constant 2.500000e-01 : f32
    %21 = vector.broadcast %cst_5 : f32 to vector<16x64xf32>
    %22 = arith.mulf %21, %20 : vector<16x64xf32>
    %23 = arith.addf %17, %22 : vector<16x64xf32>
    %24 = vector.extract_strided_slice %1 {offsets = [0, 0, 0], sizes = [1, 16, 64], strides = [1, 1, 1]} : vector<16x16x64xbf16> to vector<1x16x64xbf16>
    %25 = vector.shape_cast %24 : vector<1x16x64xbf16> to vector<16x64xbf16>
    %26 = arith.extf %25 : vector<16x64xbf16> to vector<16x64xf32>
    %cst_6 = arith.constant 2.500000e-01 : f32
    %27 = vector.broadcast %cst_6 : f32 to vector<16x64xf32>
    %28 = arith.mulf %27, %26 : vector<16x64xf32>
    %29 = vector.extract_strided_slice %1 {offsets = [1, 0, 0], sizes = [1, 16, 64], strides = [1, 1, 1]} : vector<16x16x64xbf16> to vector<1x16x64xbf16>
    %30 = vector.shape_cast %29 : vector<1x16x64xbf16> to vector<16x64xbf16>
    %31 = arith.extf %30 : vector<16x64xbf16> to vector<16x64xf32>
    %cst_7 = arith.constant 7.500000e-01 : f32
    %32 = vector.broadcast %cst_7 : f32 to vector<16x64xf32>
    %33 = arith.mulf %32, %31 : vector<16x64xf32>
    %34 = arith.addf %28, %33 : vector<16x64xf32>
    %35 = vector.extract_strided_slice %1 {offsets = [1, 0, 0], sizes = [1, 16, 64], strides = [1, 1, 1]} : vector<16x16x64xbf16> to vector<1x16x64xbf16>
    %36 = vector.shape_cast %35 : vector<1x16x64xbf16> to vector<16x64xbf16>
    %37 = arith.extf %36 : vector<16x64xbf16> to vector<16x64xf32>
    %cst_8 = arith.constant 7.500000e-01 : f32
    %38 = vector.broadcast %cst_8 : f32 to vector<16x64xf32>
    %39 = arith.mulf %38, %37 : vector<16x64xf32>
    %40 = vector.extract_strided_slice %1 {offsets = [2, 0, 0], sizes = [1, 16, 64], strides = [1, 1, 1]} : vector<16x16x64xbf16> to vector<1x16x64xbf16>
    %41 = vector.shape_cast %40 : vector<1x16x64xbf16> to vector<16x64xbf16>
    %42 = arith.extf %41 : vector<16x64xbf16> to vector<16x64xf32>
    %cst_9 = arith.constant 2.500000e-01 : f32
    %43 = vector.broadcast %cst_9 : f32 to vector<16x64xf32>
    %44 = arith.mulf %43, %42 : vector<16x64xf32>
    %45 = arith.addf %39, %44 : vector<16x64xf32>
    %46 = vector.shape_cast %12 : vector<16x64xf32> to vector<1x16x64xf32>
    %47 = vector.shape_cast %23 : vector<16x64xf32> to vector<1x16x64xf32>
    %48 = vector.shape_cast %34 : vector<16x64xf32> to vector<1x16x64xf32>
    %49 = vector.shape_cast %45 : vector<16x64xf32> to vector<1x16x64xf32>
    %50 = tpu.concatenate %46, %47, %48, %49 in 0 : vector<1x16x64xf32>, vector<1x16x64xf32>, vector<1x16x64xf32>, vector<1x16x64xf32> -> vector<4x16x64xf32>
    %c0_10 = arith.constant 0 : index
    %c0_11 = arith.constant 0 : index
    %51 = vector.load %arg6[%c0_10, %c0_11] : memref<128x64xf32, #tpu.memory_space<vmem>>, vector<128x64xf32>
    %52 = vector.shape_cast %50 : vector<4x16x64xf32> to vector<64x64xf32>
    %cst_12 = arith.constant dense<0.000000e+00> : vector<128x64xf32>
    %53 = tpu.matmul %51, %52, %cst_12 {dimension_numbers = #tpu.dot_dimension_numbers<[1], [0], [0], [1], [0, 0, 1, 1], [], []>} : vector<128x64xf32>, vector<64x64xf32>, vector<128x64xf32> -> vector<128x64xf32>
    %c0_13 = arith.constant 0 : index
    %c0_14 = arith.constant 0 : index
    %c0_15 = arith.constant 0 : index
    %c0_16 = arith.constant 0 : index
    %54 = vector.load %arg2[%c0_13, %c0_14, %c0_15, %c0_16] : memref<1x32x32x32xbf16, #tpu.memory_space<vmem>>, vector<1x4x32x32xbf16>
    %55 = vector.shape_cast %54 : vector<1x4x32x32xbf16> to vector<4x32x32xbf16>
    %56 = vector.shape_cast %55 : vector<4x32x32xbf16> to vector<128x32xbf16>
    %c0_17 = arith.constant 0 : index
    %c0_18 = arith.constant 0 : index
    %57 = vector.load %arg3[%c0_17, %c0_18] : memref<32x8xbf16, #tpu.memory_space<vmem>>, vector<32x8xbf16>
    %cst_19 = arith.constant dense<0.000000e+00> : vector<128x8xf32>
    %58 = tpu.matmul %56, %57, %cst_19 {dimension_numbers = #tpu.dot_dimension_numbers<[1], [0], [0], [1], [0, 0, 1, 1], [], []>} : vector<128x32xbf16>, vector<32x8xbf16>, vector<128x8xf32> -> vector<128x8xf32>
    %c0_20 = arith.constant 0 : index
    %c0_21 = arith.constant 0 : index
    %59 = vector.load %arg4[%c0_20, %c0_21] : memref<1x8xf32, #tpu.memory_space<vmem>>, vector<1x8xf32>
    %60 = vector.broadcast %59 : vector<1x8xf32> to vector<128x8xf32>
    %61 = arith.mulf %58, %60 : vector<128x8xf32>
    %c0_22 = arith.constant 0 : index
    %c0_23 = arith.constant 0 : index
    %62 = vector.load %arg5[%c0_22, %c0_23] : memref<1x8xf32, #tpu.memory_space<vmem>>, vector<1x8xf32>
    %63 = vector.broadcast %62 : vector<1x8xf32> to vector<128x8xf32>
    %64 = arith.addf %61, %63 : vector<128x8xf32>
    %cst_24 = arith.constant 0.000000e+00 : f32
    %65 = vector.broadcast %cst_24 : f32 to vector<128x8xf32>
    %66 = arith.maximumf %64, %65 : vector<128x8xf32>
    %67 = tpu.concatenate %53, %66 in 1 : vector<128x64xf32>, vector<128x8xf32> -> vector<128x72xf32>
    %68 = vector.shape_cast %67 : vector<128x72xf32> to vector<4x32x72xf32>
    %69 = arith.truncf %68 : vector<4x32x72xf32> to vector<4x32x72xbf16>
    %c0_25 = arith.constant 0 : index
    %c0_26 = arith.constant 0 : index
    %c0_27 = arith.constant 0 : index
    %c0_28 = arith.constant 0 : index
    %70 = vector.load %arg7[%c0_25, %c0_26, %c0_27, %c0_28] : memref<1x32x32x72xbf16, #tpu.memory_space<vmem>>, vector<1x4x32x72xbf16>
    %71 = vector.shape_cast %70 : vector<1x4x32x72xbf16> to vector<4x32x72xbf16>
    %72 = vector.shape_cast %69 : vector<4x32x72xbf16> to vector<1x4x32x72xbf16>
    tpu.vector_store %arg7[%c0_25, %c0_26, %c0_27, %c0_28], %72 {strides = array<i32>} : memref<1x32x32x72xbf16, #tpu.memory_space<vmem>>, vector<1x4x32x72xbf16>,
    %73 = vector.extract_strided_slice %1 {offsets = [1, 0, 0], sizes = [1, 16, 64], strides = [1, 1, 1]} : vector<16x16x64xbf16> to vector<1x16x64xbf16>
    %74 = vector.shape_cast %73 : vector<1x16x64xbf16> to vector<16x64xbf16>
    %75 = arith.extf %74 : vector<16x64xbf16> to vector<16x64xf32>
    %cst_29 = arith.constant 2.500000e-01 : f32
    %76 = vector.broadcast %cst_29 : f32 to vector<16x64xf32>
    %77 = arith.mulf %76, %75 : vector<16x64xf32>
    %78 = vector.extract_strided_slice %1 {offsets = [2, 0, 0], sizes = [1, 16, 64], strides = [1, 1, 1]} : vector<16x16x64xbf16> to vector<1x16x64xbf16>
    %79 = vector.shape_cast %78 : vector<1x16x64xbf16> to vector<16x64xbf16>
    %80 = arith.extf %79 : vector<16x64xbf16> to vector<16x64xf32>
    %cst_30 = arith.constant 7.500000e-01 : f32
    %81 = vector.broadcast %cst_30 : f32 to vector<16x64xf32>
    %82 = arith.mulf %81, %80 : vector<16x64xf32>
    %83 = arith.addf %77, %82 : vector<16x64xf32>
    %84 = vector.extract_strided_slice %1 {offsets = [2, 0, 0], sizes = [1, 16, 64], strides = [1, 1, 1]} : vector<16x16x64xbf16> to vector<1x16x64xbf16>
    %85 = vector.shape_cast %84 : vector<1x16x64xbf16> to vector<16x64xbf16>
    %86 = arith.extf %85 : vector<16x64xbf16> to vector<16x64xf32>
    %cst_31 = arith.constant 7.500000e-01 : f32
    %87 = vector.broadcast %cst_31 : f32 to vector<16x64xf32>
    %88 = arith.mulf %87, %86 : vector<16x64xf32>
    %89 = vector.extract_strided_slice %1 {offsets = [3, 0, 0], sizes = [1, 16, 64], strides = [1, 1, 1]} : vector<16x16x64xbf16> to vector<1x16x64xbf16>
    %90 = vector.shape_cast %89 : vector<1x16x64xbf16> to vector<16x64xbf16>
    %91 = arith.extf %90 : vector<16x64xbf16> to vector<16x64xf32>
    %cst_32 = arith.constant 2.500000e-01 : f32
    %92 = vector.broadcast %cst_32 : f32 to vector<16x64xf32>
    %93 = arith.mulf %92, %91 : vector<16x64xf32>
    %94 = arith.addf %88, %93 : vector<16x64xf32>
    %95 = vector.extract_strided_slice %1 {offsets = [2, 0, 0], sizes = [1, 16, 64], strides = [1, 1, 1]} : vector<16x16x64xbf16> to vector<1x16x64xbf16>
    %96 = vector.shape_cast %95 : vector<1x16x64xbf16> to vector<16x64xbf16>
    %97 = arith.extf %96 : vector<16x64xbf16> to vector<16x64xf32>
    %cst_33 = arith.constant 2.500000e-01 : f32
    %98 = vector.broadcast %cst_33 : f32 to vector<16x64xf32>
    %99 = arith.mulf %98, %97 : vector<16x64xf32>
    %100 = vector.extract_strided_slice %1 {offsets = [3, 0, 0], sizes = [1, 16, 64], strides = [1, 1, 1]} : vector<16x16x64xbf16> to vector<1x16x64xbf16>
    %101 = vector.shape_cast %100 : vector<1x16x64xbf16> to vector<16x64xbf16>
    %102 = arith.extf %101 : vector<16x64xbf16> to vector<16x64xf32>
    %cst_34 = arith.constant 7.500000e-01 : f32
    %103 = vector.broadcast %cst_34 : f32 to vector<16x64xf32>
    %104 = arith.mulf %103, %102 : vector<16x64xf32>
    %105 = arith.addf %99, %104 : vector<16x64xf32>
    %106 = vector.extract_strided_slice %1 {offsets = [3, 0, 0], sizes = [1, 16, 64], strides = [1, 1, 1]} : vector<16x16x64xbf16> to vector<1x16x64xbf16>
    %107 = vector.shape_cast %106 : vector<1x16x64xbf16> to vector<16x64xbf16>
    %108 = arith.extf %107 : vector<16x64xbf16> to vector<16x64xf32>
    %cst_35 = arith.constant 7.500000e-01 : f32
    %109 = vector.broadcast %cst_35 : f32 to vector<16x64xf32>
    %110 = arith.mulf %109, %108 : vector<16x64xf32>
    %111 = vector.extract_strided_slice %1 {offsets = [4, 0, 0], sizes = [1, 16, 64], strides = [1, 1, 1]} : vector<16x16x64xbf16> to vector<1x16x64xbf16>
    %112 = vector.shape_cast %111 : vector<1x16x64xbf16> to vector<16x64xbf16>
    %113 = arith.extf %112 : vector<16x64xbf16> to vector<16x64xf32>
    %cst_36 = arith.constant 2.500000e-01 : f32
    %114 = vector.broadcast %cst_36 : f32 to vector<16x64xf32>
    %115 = arith.mulf %114, %113 : vector<16x64xf32>
    %116 = arith.addf %110, %115 : vector<16x64xf32>
    %117 = vector.shape_cast %83 : vector<16x64xf32> to vector<1x16x64xf32>
    %118 = vector.shape_cast %94 : vector<16x64xf32> to vector<1x16x64xf32>
    %119 = vector.shape_cast %105 : vector<16x64xf32> to vector<1x16x64xf32>
    %120 = vector.shape_cast %116 : vector<16x64xf32> to vector<1x16x64xf32>
    %121 = tpu.concatenate %117, %118, %119, %120 in 0 : vector<1x16x64xf32>, vector<1x16x64xf32>, vector<1x16x64xf32>, vector<1x16x64xf32> -> vector<4x16x64xf32>
    %c0_37 = arith.constant 0 : index
    %c0_38 = arith.constant 0 : index
    %122 = vector.load %arg6[%c0_37, %c0_38] : memref<128x64xf32, #tpu.memory_space<vmem>>, vector<128x64xf32>
    %123 = vector.shape_cast %121 : vector<4x16x64xf32> to vector<64x64xf32>
    %cst_39 = arith.constant dense<0.000000e+00> : vector<128x64xf32>
    %124 = tpu.matmul %122, %123, %cst_39 {dimension_numbers = #tpu.dot_dimension_numbers<[1], [0], [0], [1], [0, 0, 1, 1], [], []>} : vector<128x64xf32>, vector<64x64xf32>, vector<128x64xf32> -> vector<128x64xf32>
    %c0_40 = arith.constant 0 : index
    %c4 = arith.constant 4 : index
    %c0_41 = arith.constant 0 : index
    %c0_42 = arith.constant 0 : index
    %125 = vector.load %arg2[%c0_40, %c4, %c0_41, %c0_42] : memref<1x32x32x32xbf16, #tpu.memory_space<vmem>>, vector<1x4x32x32xbf16>
    %126 = vector.shape_cast %125 : vector<1x4x32x32xbf16> to vector<4x32x32xbf16>
    %127 = vector.shape_cast %126 : vector<4x32x32xbf16> to vector<128x32xbf16>
    %c0_43 = arith.constant 0 : index
    %c0_44 = arith.constant 0 : index
    %128 = vector.load %arg3[%c0_43, %c0_44] : memref<32x8xbf16, #tpu.memory_space<vmem>>, vector<32x8xbf16>
    %cst_45 = arith.constant dense<0.000000e+00> : vector<128x8xf32>
    %129 = tpu.matmul %127, %128, %cst_45 {dimension_numbers = #tpu.dot_dimension_numbers<[1], [0], [0], [1], [0, 0, 1, 1], [], []>} : vector<128x32xbf16>, vector<32x8xbf16>, vector<128x8xf32> -> vector<128x8xf32>
    %c0_46 = arith.constant 0 : index
    %c0_47 = arith.constant 0 : index
    %130 = vector.load %arg4[%c0_46, %c0_47] : memref<1x8xf32, #tpu.memory_space<vmem>>, vector<1x8xf32>
    %131 = vector.broadcast %130 : vector<1x8xf32> to vector<128x8xf32>
    %132 = arith.mulf %129, %131 : vector<128x8xf32>
    %c0_48 = arith.constant 0 : index
    %c0_49 = arith.constant 0 : index
    %133 = vector.load %arg5[%c0_48, %c0_49] : memref<1x8xf32, #tpu.memory_space<vmem>>, vector<1x8xf32>
    %134 = vector.broadcast %133 : vector<1x8xf32> to vector<128x8xf32>
    %135 = arith.addf %132, %134 : vector<128x8xf32>
    %cst_50 = arith.constant 0.000000e+00 : f32
    %136 = vector.broadcast %cst_50 : f32 to vector<128x8xf32>
    %137 = arith.maximumf %135, %136 : vector<128x8xf32>
    %138 = tpu.concatenate %124, %137 in 1 : vector<128x64xf32>, vector<128x8xf32> -> vector<128x72xf32>
    %139 = vector.shape_cast %138 : vector<128x72xf32> to vector<4x32x72xf32>
    %140 = arith.truncf %139 : vector<4x32x72xf32> to vector<4x32x72xbf16>
    %c0_51 = arith.constant 0 : index
    %c4_52 = arith.constant 4 : index
    %c0_53 = arith.constant 0 : index
    %c0_54 = arith.constant 0 : index
    %141 = vector.load %arg7[%c0_51, %c4_52, %c0_53, %c0_54] : memref<1x32x32x72xbf16, #tpu.memory_space<vmem>>, vector<1x4x32x72xbf16>
    %142 = vector.shape_cast %141 : vector<1x4x32x72xbf16> to vector<4x32x72xbf16>
    %143 = vector.shape_cast %140 : vector<4x32x72xbf16> to vector<1x4x32x72xbf16>
    tpu.vector_store %arg7[%c0_51, %c4_52, %c0_53, %c0_54], %143 {strides = array<i32>} : memref<1x32x32x72xbf16, #tpu.memory_space<vmem>>, vector<1x4x32x72xbf16>,
    %144 = vector.extract_strided_slice %1 {offsets = [3, 0, 0], sizes = [1, 16, 64], strides = [1, 1, 1]} : vector<16x16x64xbf16> to vector<1x16x64xbf16>
    %145 = vector.shape_cast %144 : vector<1x16x64xbf16> to vector<16x64xbf16>
    %146 = arith.extf %145 : vector<16x64xbf16> to vector<16x64xf32>
    %cst_55 = arith.constant 2.500000e-01 : f32
    %147 = vector.broadcast %cst_55 : f32 to vector<16x64xf32>
    %148 = arith.mulf %147, %146 : vector<16x64xf32>
    %149 = vector.extract_strided_slice %1 {offsets = [4, 0, 0], sizes = [1, 16, 64], strides = [1, 1, 1]} : vector<16x16x64xbf16> to vector<1x16x64xbf16>
    %150 = vector.shape_cast %149 : vector<1x16x64xbf16> to vector<16x64xbf16>
    %151 = arith.extf %150 : vector<16x64xbf16> to vector<16x64xf32>
    %cst_56 = arith.constant 7.500000e-01 : f32
    %152 = vector.broadcast %cst_56 : f32 to vector<16x64xf32>
    %153 = arith.mulf %152, %151 : vector<16x64xf32>
    %154 = arith.addf %148, %153 : vector<16x64xf32>
    %155 = vector.extract_strided_slice %1 {offsets = [4, 0, 0], sizes = [1, 16, 64], strides = [1, 1, 1]} : vector<16x16x64xbf16> to vector<1x16x64xbf16>
    %156 = vector.shape_cast %155 : vector<1x16x64xbf16> to vector<16x64xbf16>
    %157 = arith.extf %156 : vector<16x64xbf16> to vector<16x64xf32>
    %cst_57 = arith.constant 7.500000e-01 : f32
    %158 = vector.broadcast %cst_57 : f32 to vector<16x64xf32>
    %159 = arith.mulf %158, %157 : vector<16x64xf32>
    %160 = vector.extract_strided_slice %1 {offsets = [5, 0, 0], sizes = [1, 16, 64], strides = [1, 1, 1]} : vector<16x16x64xbf16> to vector<1x16x64xbf16>
    %161 = vector.shape_cast %160 : vector<1x16x64xbf16> to vector<16x64xbf16>
    %162 = arith.extf %161 : vector<16x64xbf16> to vector<16x64xf32>
    %cst_58 = arith.constant 2.500000e-01 : f32
    %163 = vector.broadcast %cst_58 : f32 to vector<16x64xf32>
    %164 = arith.mulf %163, %162 : vector<16x64xf32>
    %165 = arith.addf %159, %164 : vector<16x64xf32>
    %166 = vector.extract_strided_slice %1 {offsets = [4, 0, 0], sizes = [1, 16, 64], strides = [1, 1, 1]} : vector<16x16x64xbf16> to vector<1x16x64xbf16>
    %167 = vector.shape_cast %166 : vector<1x16x64xbf16> to vector<16x64xbf16>
    %168 = arith.extf %167 : vector<16x64xbf16> to vector<16x64xf32>
    %cst_59 = arith.constant 2.500000e-01 : f32
    %169 = vector.broadcast %cst_59 : f32 to vector<16x64xf32>
    %170 = arith.mulf %169, %168 : vector<16x64xf32>
    %171 = vector.extract_strided_slice %1 {offsets = [5, 0, 0], sizes = [1, 16, 64], strides = [1, 1, 1]} : vector<16x16x64xbf16> to vector<1x16x64xbf16>
    %172 = vector.shape_cast %171 : vector<1x16x64xbf16> to vector<16x64xbf16>
    %173 = arith.extf %172 : vector<16x64xbf16> to vector<16x64xf32>
    %cst_60 = arith.constant 7.500000e-01 : f32
    %174 = vector.broadcast %cst_60 : f32 to vector<16x64xf32>
    %175 = arith.mulf %174, %173 : vector<16x64xf32>
    %176 = arith.addf %170, %175 : vector<16x64xf32>
    %177 = vector.extract_strided_slice %1 {offsets = [5, 0, 0], sizes = [1, 16, 64], strides = [1, 1, 1]} : vector<16x16x64xbf16> to vector<1x16x64xbf16>
    %178 = vector.shape_cast %177 : vector<1x16x64xbf16> to vector<16x64xbf16>
    %179 = arith.extf %178 : vector<16x64xbf16> to vector<16x64xf32>
    %cst_61 = arith.constant 7.500000e-01 : f32
    %180 = vector.broadcast %cst_61 : f32 to vector<16x64xf32>
    %181 = arith.mulf %180, %179 : vector<16x64xf32>
    %182 = vector.extract_strided_slice %1 {offsets = [6, 0, 0], sizes = [1, 16, 64], strides = [1, 1, 1]} : vector<16x16x64xbf16> to vector<1x16x64xbf16>
    %183 = vector.shape_cast %182 : vector<1x16x64xbf16> to vector<16x64xbf16>
    %184 = arith.extf %183 : vector<16x64xbf16> to vector<16x64xf32>
    %cst_62 = arith.constant 2.500000e-01 : f32
    %185 = vector.broadcast %cst_62 : f32 to vector<16x64xf32>
    %186 = arith.mulf %185, %184 : vector<16x64xf32>
    %187 = arith.addf %181, %186 : vector<16x64xf32>
    %188 = vector.shape_cast %154 : vector<16x64xf32> to vector<1x16x64xf32>
    %189 = vector.shape_cast %165 : vector<16x64xf32> to vector<1x16x64xf32>
    %190 = vector.shape_cast %176 : vector<16x64xf32> to vector<1x16x64xf32>
    %191 = vector.shape_cast %187 : vector<16x64xf32> to vector<1x16x64xf32>
    %192 = tpu.concatenate %188, %189, %190, %191 in 0 : vector<1x16x64xf32>, vector<1x16x64xf32>, vector<1x16x64xf32>, vector<1x16x64xf32> -> vector<4x16x64xf32>
    %c0_63 = arith.constant 0 : index
    %c0_64 = arith.constant 0 : index
    %193 = vector.load %arg6[%c0_63, %c0_64] : memref<128x64xf32, #tpu.memory_space<vmem>>, vector<128x64xf32>
    %194 = vector.shape_cast %192 : vector<4x16x64xf32> to vector<64x64xf32>
    %cst_65 = arith.constant dense<0.000000e+00> : vector<128x64xf32>
    %195 = tpu.matmul %193, %194, %cst_65 {dimension_numbers = #tpu.dot_dimension_numbers<[1], [0], [0], [1], [0, 0, 1, 1], [], []>} : vector<128x64xf32>, vector<64x64xf32>, vector<128x64xf32> -> vector<128x64xf32>
    %c0_66 = arith.constant 0 : index
    %c8 = arith.constant 8 : index
    %c0_67 = arith.constant 0 : index
    %c0_68 = arith.constant 0 : index
    %196 = vector.load %arg2[%c0_66, %c8, %c0_67, %c0_68] : memref<1x32x32x32xbf16, #tpu.memory_space<vmem>>, vector<1x4x32x32xbf16>
    %197 = vector.shape_cast %196 : vector<1x4x32x32xbf16> to vector<4x32x32xbf16>
    %198 = vector.shape_cast %197 : vector<4x32x32xbf16> to vector<128x32xbf16>
    %c0_69 = arith.constant 0 : index
    %c0_70 = arith.constant 0 : index
    %199 = vector.load %arg3[%c0_69, %c0_70] : memref<32x8xbf16, #tpu.memory_space<vmem>>, vector<32x8xbf16>
    %cst_71 = arith.constant dense<0.000000e+00> : vector<128x8xf32>
    %200 = tpu.matmul %198, %199, %cst_71 {dimension_numbers = #tpu.dot_dimension_numbers<[1], [0], [0], [1], [0, 0, 1, 1], [], []>} : vector<128x32xbf16>, vector<32x8xbf16>, vector<128x8xf32> -> vector<128x8xf32>
    %c0_72 = arith.constant 0 : index
    %c0_73 = arith.constant 0 : index
    %201 = vector.load %arg4[%c0_72, %c0_73] : memref<1x8xf32, #tpu.memory_space<vmem>>, vector<1x8xf32>
    %202 = vector.broadcast %201 : vector<1x8xf32> to vector<128x8xf32>
    %203 = arith.mulf %200, %202 : vector<128x8xf32>
    %c0_74 = arith.constant 0 : index
    %c0_75 = arith.constant 0 : index
    %204 = vector.load %arg5[%c0_74, %c0_75] : memref<1x8xf32, #tpu.memory_space<vmem>>, vector<1x8xf32>
    %205 = vector.broadcast %204 : vector<1x8xf32> to vector<128x8xf32>
    %206 = arith.addf %203, %205 : vector<128x8xf32>
    %cst_76 = arith.constant 0.000000e+00 : f32
    %207 = vector.broadcast %cst_76 : f32 to vector<128x8xf32>
    %208 = arith.maximumf %206, %207 : vector<128x8xf32>
    %209 = tpu.concatenate %195, %208 in 1 : vector<128x64xf32>, vector<128x8xf32> -> vector<128x72xf32>
    %210 = vector.shape_cast %209 : vector<128x72xf32> to vector<4x32x72xf32>
    %211 = arith.truncf %210 : vector<4x32x72xf32> to vector<4x32x72xbf16>
    %c0_77 = arith.constant 0 : index
    %c8_78 = arith.constant 8 : index
    %c0_79 = arith.constant 0 : index
    %c0_80 = arith.constant 0 : index
    %212 = vector.load %arg7[%c0_77, %c8_78, %c0_79, %c0_80] : memref<1x32x32x72xbf16, #tpu.memory_space<vmem>>, vector<1x4x32x72xbf16>
    %213 = vector.shape_cast %212 : vector<1x4x32x72xbf16> to vector<4x32x72xbf16>
    %214 = vector.shape_cast %211 : vector<4x32x72xbf16> to vector<1x4x32x72xbf16>
    tpu.vector_store %arg7[%c0_77, %c8_78, %c0_79, %c0_80], %214 {strides = array<i32>} : memref<1x32x32x72xbf16, #tpu.memory_space<vmem>>, vector<1x4x32x72xbf16>,
    %215 = vector.extract_strided_slice %1 {offsets = [5, 0, 0], sizes = [1, 16, 64], strides = [1, 1, 1]} : vector<16x16x64xbf16> to vector<1x16x64xbf16>
    %216 = vector.shape_cast %215 : vector<1x16x64xbf16> to vector<16x64xbf16>
    %217 = arith.extf %216 : vector<16x64xbf16> to vector<16x64xf32>
    %cst_81 = arith.constant 2.500000e-01 : f32
    %218 = vector.broadcast %cst_81 : f32 to vector<16x64xf32>
    %219 = arith.mulf %218, %217 : vector<16x64xf32>
    %220 = vector.extract_strided_slice %1 {offsets = [6, 0, 0], sizes = [1, 16, 64], strides = [1, 1, 1]} : vector<16x16x64xbf16> to vector<1x16x64xbf16>
    %221 = vector.shape_cast %220 : vector<1x16x64xbf16> to vector<16x64xbf16>
    %222 = arith.extf %221 : vector<16x64xbf16> to vector<16x64xf32>
    %cst_82 = arith.constant 7.500000e-01 : f32
    %223 = vector.broadcast %cst_82 : f32 to vector<16x64xf32>
    %224 = arith.mulf %223, %222 : vector<16x64xf32>
    %225 = arith.addf %219, %224 : vector<16x64xf32>
    %226 = vector.extract_strided_slice %1 {offsets = [6, 0, 0], sizes = [1, 16, 64], strides = [1, 1, 1]} : vector<16x16x64xbf16> to vector<1x16x64xbf16>
    %227 = vector.shape_cast %226 : vector<1x16x64xbf16> to vector<16x64xbf16>
    %228 = arith.extf %227 : vector<16x64xbf16> to vector<16x64xf32>
    %cst_83 = arith.constant 7.500000e-01 : f32
    %229 = vector.broadcast %cst_83 : f32 to vector<16x64xf32>
    %230 = arith.mulf %229, %228 : vector<16x64xf32>
    %231 = vector.extract_strided_slice %1 {offsets = [7, 0, 0], sizes = [1, 16, 64], strides = [1, 1, 1]} : vector<16x16x64xbf16> to vector<1x16x64xbf16>
    %232 = vector.shape_cast %231 : vector<1x16x64xbf16> to vector<16x64xbf16>
    %233 = arith.extf %232 : vector<16x64xbf16> to vector<16x64xf32>
    %cst_84 = arith.constant 2.500000e-01 : f32
    %234 = vector.broadcast %cst_84 : f32 to vector<16x64xf32>
    %235 = arith.mulf %234, %233 : vector<16x64xf32>
    %236 = arith.addf %230, %235 : vector<16x64xf32>
    %237 = vector.extract_strided_slice %1 {offsets = [6, 0, 0], sizes = [1, 16, 64], strides = [1, 1, 1]} : vector<16x16x64xbf16> to vector<1x16x64xbf16>
    %238 = vector.shape_cast %237 : vector<1x16x64xbf16> to vector<16x64xbf16>
    %239 = arith.extf %238 : vector<16x64xbf16> to vector<16x64xf32>
    %cst_85 = arith.constant 2.500000e-01 : f32
    %240 = vector.broadcast %cst_85 : f32 to vector<16x64xf32>
    %241 = arith.mulf %240, %239 : vector<16x64xf32>
    %242 = vector.extract_strided_slice %1 {offsets = [7, 0, 0], sizes = [1, 16, 64], strides = [1, 1, 1]} : vector<16x16x64xbf16> to vector<1x16x64xbf16>
    %243 = vector.shape_cast %242 : vector<1x16x64xbf16> to vector<16x64xbf16>
    %244 = arith.extf %243 : vector<16x64xbf16> to vector<16x64xf32>
    %cst_86 = arith.constant 7.500000e-01 : f32
    %245 = vector.broadcast %cst_86 : f32 to vector<16x64xf32>
    %246 = arith.mulf %245, %244 : vector<16x64xf32>
    %247 = arith.addf %241, %246 : vector<16x64xf32>
    %248 = vector.extract_strided_slice %1 {offsets = [7, 0, 0], sizes = [1, 16, 64], strides = [1, 1, 1]} : vector<16x16x64xbf16> to vector<1x16x64xbf16>
    %249 = vector.shape_cast %248 : vector<1x16x64xbf16> to vector<16x64xbf16>
    %250 = arith.extf %249 : vector<16x64xbf16> to vector<16x64xf32>
    %cst_87 = arith.constant 7.500000e-01 : f32
    %251 = vector.broadcast %cst_87 : f32 to vector<16x64xf32>
    %252 = arith.mulf %251, %250 : vector<16x64xf32>
    %253 = vector.extract_strided_slice %1 {offsets = [8, 0, 0], sizes = [1, 16, 64], strides = [1, 1, 1]} : vector<16x16x64xbf16> to vector<1x16x64xbf16>
    %254 = vector.shape_cast %253 : vector<1x16x64xbf16> to vector<16x64xbf16>
    %255 = arith.extf %254 : vector<16x64xbf16> to vector<16x64xf32>
    %cst_88 = arith.constant 2.500000e-01 : f32
    %256 = vector.broadcast %cst_88 : f32 to vector<16x64xf32>
    %257 = arith.mulf %256, %255 : vector<16x64xf32>
    %258 = arith.addf %252, %257 : vector<16x64xf32>
    %259 = vector.shape_cast %225 : vector<16x64xf32> to vector<1x16x64xf32>
    %260 = vector.shape_cast %236 : vector<16x64xf32> to vector<1x16x64xf32>
    %261 = vector.shape_cast %247 : vector<16x64xf32> to vector<1x16x64xf32>
    %262 = vector.shape_cast %258 : vector<16x64xf32> to vector<1x16x64xf32>
    %263 = tpu.concatenate %259, %260, %261, %262 in 0 : vector<1x16x64xf32>, vector<1x16x64xf32>, vector<1x16x64xf32>, vector<1x16x64xf32> -> vector<4x16x64xf32>
    %c0_89 = arith.constant 0 : index
    %c0_90 = arith.constant 0 : index
    %264 = vector.load %arg6[%c0_89, %c0_90] : memref<128x64xf32, #tpu.memory_space<vmem>>, vector<128x64xf32>
    %265 = vector.shape_cast %263 : vector<4x16x64xf32> to vector<64x64xf32>
    %cst_91 = arith.constant dense<0.000000e+00> : vector<128x64xf32>
    %266 = tpu.matmul %264, %265, %cst_91 {dimension_numbers = #tpu.dot_dimension_numbers<[1], [0], [0], [1], [0, 0, 1, 1], [], []>} : vector<128x64xf32>, vector<64x64xf32>, vector<128x64xf32> -> vector<128x64xf32>
    %c0_92 = arith.constant 0 : index
    %c12 = arith.constant 12 : index
    %c0_93 = arith.constant 0 : index
    %c0_94 = arith.constant 0 : index
    %267 = vector.load %arg2[%c0_92, %c12, %c0_93, %c0_94] : memref<1x32x32x32xbf16, #tpu.memory_space<vmem>>, vector<1x4x32x32xbf16>
    %268 = vector.shape_cast %267 : vector<1x4x32x32xbf16> to vector<4x32x32xbf16>
    %269 = vector.shape_cast %268 : vector<4x32x32xbf16> to vector<128x32xbf16>
    %c0_95 = arith.constant 0 : index
    %c0_96 = arith.constant 0 : index
    %270 = vector.load %arg3[%c0_95, %c0_96] : memref<32x8xbf16, #tpu.memory_space<vmem>>, vector<32x8xbf16>
    %cst_97 = arith.constant dense<0.000000e+00> : vector<128x8xf32>
    %271 = tpu.matmul %269, %270, %cst_97 {dimension_numbers = #tpu.dot_dimension_numbers<[1], [0], [0], [1], [0, 0, 1, 1], [], []>} : vector<128x32xbf16>, vector<32x8xbf16>, vector<128x8xf32> -> vector<128x8xf32>
    %c0_98 = arith.constant 0 : index
    %c0_99 = arith.constant 0 : index
    %272 = vector.load %arg4[%c0_98, %c0_99] : memref<1x8xf32, #tpu.memory_space<vmem>>, vector<1x8xf32>
    %273 = vector.broadcast %272 : vector<1x8xf32> to vector<128x8xf32>
    %274 = arith.mulf %271, %273 : vector<128x8xf32>
    %c0_100 = arith.constant 0 : index
    %c0_101 = arith.constant 0 : index
    %275 = vector.load %arg5[%c0_100, %c0_101] : memref<1x8xf32, #tpu.memory_space<vmem>>, vector<1x8xf32>
    %276 = vector.broadcast %275 : vector<1x8xf32> to vector<128x8xf32>
    %277 = arith.addf %274, %276 : vector<128x8xf32>
    %cst_102 = arith.constant 0.000000e+00 : f32
    %278 = vector.broadcast %cst_102 : f32 to vector<128x8xf32>
    %279 = arith.maximumf %277, %278 : vector<128x8xf32>
    %280 = tpu.concatenate %266, %279 in 1 : vector<128x64xf32>, vector<128x8xf32> -> vector<128x72xf32>
    %281 = vector.shape_cast %280 : vector<128x72xf32> to vector<4x32x72xf32>
    %282 = arith.truncf %281 : vector<4x32x72xf32> to vector<4x32x72xbf16>
    %c0_103 = arith.constant 0 : index
    %c12_104 = arith.constant 12 : index
    %c0_105 = arith.constant 0 : index
    %c0_106 = arith.constant 0 : index
    %283 = vector.load %arg7[%c0_103, %c12_104, %c0_105, %c0_106] : memref<1x32x32x72xbf16, #tpu.memory_space<vmem>>, vector<1x4x32x72xbf16>
    %284 = vector.shape_cast %283 : vector<1x4x32x72xbf16> to vector<4x32x72xbf16>
    %285 = vector.shape_cast %282 : vector<4x32x72xbf16> to vector<1x4x32x72xbf16>
    tpu.vector_store %arg7[%c0_103, %c12_104, %c0_105, %c0_106], %285 {strides = array<i32>} : memref<1x32x32x72xbf16, #tpu.memory_space<vmem>>, vector<1x4x32x72xbf16>,
    %286 = vector.extract_strided_slice %1 {offsets = [7, 0, 0], sizes = [1, 16, 64], strides = [1, 1, 1]} : vector<16x16x64xbf16> to vector<1x16x64xbf16>
    %287 = vector.shape_cast %286 : vector<1x16x64xbf16> to vector<16x64xbf16>
    %288 = arith.extf %287 : vector<16x64xbf16> to vector<16x64xf32>
    %cst_107 = arith.constant 2.500000e-01 : f32
    %289 = vector.broadcast %cst_107 : f32 to vector<16x64xf32>
    %290 = arith.mulf %289, %288 : vector<16x64xf32>
    %291 = vector.extract_strided_slice %1 {offsets = [8, 0, 0], sizes = [1, 16, 64], strides = [1, 1, 1]} : vector<16x16x64xbf16> to vector<1x16x64xbf16>
    %292 = vector.shape_cast %291 : vector<1x16x64xbf16> to vector<16x64xbf16>
    %293 = arith.extf %292 : vector<16x64xbf16> to vector<16x64xf32>
    %cst_108 = arith.constant 7.500000e-01 : f32
    %294 = vector.broadcast %cst_108 : f32 to vector<16x64xf32>
    %295 = arith.mulf %294, %293 : vector<16x64xf32>
    %296 = arith.addf %290, %295 : vector<16x64xf32>
    %297 = vector.extract_strided_slice %1 {offsets = [8, 0, 0], sizes = [1, 16, 64], strides = [1, 1, 1]} : vector<16x16x64xbf16> to vector<1x16x64xbf16>
    %298 = vector.shape_cast %297 : vector<1x16x64xbf16> to vector<16x64xbf16>
    %299 = arith.extf %298 : vector<16x64xbf16> to vector<16x64xf32>
    %cst_109 = arith.constant 7.500000e-01 : f32
    %300 = vector.broadcast %cst_109 : f32 to vector<16x64xf32>
    %301 = arith.mulf %300, %299 : vector<16x64xf32>
    %302 = vector.extract_strided_slice %1 {offsets = [9, 0, 0], sizes = [1, 16, 64], strides = [1, 1, 1]} : vector<16x16x64xbf16> to vector<1x16x64xbf16>
    %303 = vector.shape_cast %302 : vector<1x16x64xbf16> to vector<16x64xbf16>
    %304 = arith.extf %303 : vector<16x64xbf16> to vector<16x64xf32>
    %cst_110 = arith.constant 2.500000e-01 : f32
    %305 = vector.broadcast %cst_110 : f32 to vector<16x64xf32>
    %306 = arith.mulf %305, %304 : vector<16x64xf32>
    %307 = arith.addf %301, %306 : vector<16x64xf32>
    %308 = vector.extract_strided_slice %1 {offsets = [8, 0, 0], sizes = [1, 16, 64], strides = [1, 1, 1]} : vector<16x16x64xbf16> to vector<1x16x64xbf16>
    %309 = vector.shape_cast %308 : vector<1x16x64xbf16> to vector<16x64xbf16>
    %310 = arith.extf %309 : vector<16x64xbf16> to vector<16x64xf32>
    %cst_111 = arith.constant 2.500000e-01 : f32
    %311 = vector.broadcast %cst_111 : f32 to vector<16x64xf32>
    %312 = arith.mulf %311, %310 : vector<16x64xf32>
    %313 = vector.extract_strided_slice %1 {offsets = [9, 0, 0], sizes = [1, 16, 64], strides = [1, 1, 1]} : vector<16x16x64xbf16> to vector<1x16x64xbf16>
    %314 = vector.shape_cast %313 : vector<1x16x64xbf16> to vector<16x64xbf16>
    %315 = arith.extf %314 : vector<16x64xbf16> to vector<16x64xf32>
    %cst_112 = arith.constant 7.500000e-01 : f32
    %316 = vector.broadcast %cst_112 : f32 to vector<16x64xf32>
    %317 = arith.mulf %316, %315 : vector<16x64xf32>
    %318 = arith.addf %312, %317 : vector<16x64xf32>
    %319 = vector.extract_strided_slice %1 {offsets = [9, 0, 0], sizes = [1, 16, 64], strides = [1, 1, 1]} : vector<16x16x64xbf16> to vector<1x16x64xbf16>
    %320 = vector.shape_cast %319 : vector<1x16x64xbf16> to vector<16x64xbf16>
    %321 = arith.extf %320 : vector<16x64xbf16> to vector<16x64xf32>
    %cst_113 = arith.constant 7.500000e-01 : f32
    %322 = vector.broadcast %cst_113 : f32 to vector<16x64xf32>
    %323 = arith.mulf %322, %321 : vector<16x64xf32>
    %324 = vector.extract_strided_slice %1 {offsets = [10, 0, 0], sizes = [1, 16, 64], strides = [1, 1, 1]} : vector<16x16x64xbf16> to vector<1x16x64xbf16>
    %325 = vector.shape_cast %324 : vector<1x16x64xbf16> to vector<16x64xbf16>
    %326 = arith.extf %325 : vector<16x64xbf16> to vector<16x64xf32>
    %cst_114 = arith.constant 2.500000e-01 : f32
    %327 = vector.broadcast %cst_114 : f32 to vector<16x64xf32>
    %328 = arith.mulf %327, %326 : vector<16x64xf32>
    %329 = arith.addf %323, %328 : vector<16x64xf32>
    %330 = vector.shape_cast %296 : vector<16x64xf32> to vector<1x16x64xf32>
    %331 = vector.shape_cast %307 : vector<16x64xf32> to vector<1x16x64xf32>
    %332 = vector.shape_cast %318 : vector<16x64xf32> to vector<1x16x64xf32>
    %333 = vector.shape_cast %329 : vector<16x64xf32> to vector<1x16x64xf32>
    %334 = tpu.concatenate %330, %331, %332, %333 in 0 : vector<1x16x64xf32>, vector<1x16x64xf32>, vector<1x16x64xf32>, vector<1x16x64xf32> -> vector<4x16x64xf32>
    %c0_115 = arith.constant 0 : index
    %c0_116 = arith.constant 0 : index
    %335 = vector.load %arg6[%c0_115, %c0_116] : memref<128x64xf32, #tpu.memory_space<vmem>>, vector<128x64xf32>
    %336 = vector.shape_cast %334 : vector<4x16x64xf32> to vector<64x64xf32>
    %cst_117 = arith.constant dense<0.000000e+00> : vector<128x64xf32>
    %337 = tpu.matmul %335, %336, %cst_117 {dimension_numbers = #tpu.dot_dimension_numbers<[1], [0], [0], [1], [0, 0, 1, 1], [], []>} : vector<128x64xf32>, vector<64x64xf32>, vector<128x64xf32> -> vector<128x64xf32>
    %c0_118 = arith.constant 0 : index
    %c16 = arith.constant 16 : index
    %c0_119 = arith.constant 0 : index
    %c0_120 = arith.constant 0 : index
    %338 = vector.load %arg2[%c0_118, %c16, %c0_119, %c0_120] : memref<1x32x32x32xbf16, #tpu.memory_space<vmem>>, vector<1x4x32x32xbf16>
    %339 = vector.shape_cast %338 : vector<1x4x32x32xbf16> to vector<4x32x32xbf16>
    %340 = vector.shape_cast %339 : vector<4x32x32xbf16> to vector<128x32xbf16>
    %c0_121 = arith.constant 0 : index
    %c0_122 = arith.constant 0 : index
    %341 = vector.load %arg3[%c0_121, %c0_122] : memref<32x8xbf16, #tpu.memory_space<vmem>>, vector<32x8xbf16>
    %cst_123 = arith.constant dense<0.000000e+00> : vector<128x8xf32>
    %342 = tpu.matmul %340, %341, %cst_123 {dimension_numbers = #tpu.dot_dimension_numbers<[1], [0], [0], [1], [0, 0, 1, 1], [], []>} : vector<128x32xbf16>, vector<32x8xbf16>, vector<128x8xf32> -> vector<128x8xf32>
    %c0_124 = arith.constant 0 : index
    %c0_125 = arith.constant 0 : index
    %343 = vector.load %arg4[%c0_124, %c0_125] : memref<1x8xf32, #tpu.memory_space<vmem>>, vector<1x8xf32>
    %344 = vector.broadcast %343 : vector<1x8xf32> to vector<128x8xf32>
    %345 = arith.mulf %342, %344 : vector<128x8xf32>
    %c0_126 = arith.constant 0 : index
    %c0_127 = arith.constant 0 : index
    %346 = vector.load %arg5[%c0_126, %c0_127] : memref<1x8xf32, #tpu.memory_space<vmem>>, vector<1x8xf32>
    %347 = vector.broadcast %346 : vector<1x8xf32> to vector<128x8xf32>
    %348 = arith.addf %345, %347 : vector<128x8xf32>
    %cst_128 = arith.constant 0.000000e+00 : f32
    %349 = vector.broadcast %cst_128 : f32 to vector<128x8xf32>
    %350 = arith.maximumf %348, %349 : vector<128x8xf32>
    %351 = tpu.concatenate %337, %350 in 1 : vector<128x64xf32>, vector<128x8xf32> -> vector<128x72xf32>
    %352 = vector.shape_cast %351 : vector<128x72xf32> to vector<4x32x72xf32>
    %353 = arith.truncf %352 : vector<4x32x72xf32> to vector<4x32x72xbf16>
    %c0_129 = arith.constant 0 : index
    %c16_130 = arith.constant 16 : index
    %c0_131 = arith.constant 0 : index
    %c0_132 = arith.constant 0 : index
    %354 = vector.load %arg7[%c0_129, %c16_130, %c0_131, %c0_132] : memref<1x32x32x72xbf16, #tpu.memory_space<vmem>>, vector<1x4x32x72xbf16>
    %355 = vector.shape_cast %354 : vector<1x4x32x72xbf16> to vector<4x32x72xbf16>
    %356 = vector.shape_cast %353 : vector<4x32x72xbf16> to vector<1x4x32x72xbf16>
    tpu.vector_store %arg7[%c0_129, %c16_130, %c0_131, %c0_132], %356 {strides = array<i32>} : memref<1x32x32x72xbf16, #tpu.memory_space<vmem>>, vector<1x4x32x72xbf16>,
    %357 = vector.extract_strided_slice %1 {offsets = [9, 0, 0], sizes = [1, 16, 64], strides = [1, 1, 1]} : vector<16x16x64xbf16> to vector<1x16x64xbf16>
    %358 = vector.shape_cast %357 : vector<1x16x64xbf16> to vector<16x64xbf16>
    %359 = arith.extf %358 : vector<16x64xbf16> to vector<16x64xf32>
    %cst_133 = arith.constant 2.500000e-01 : f32
    %360 = vector.broadcast %cst_133 : f32 to vector<16x64xf32>
    %361 = arith.mulf %360, %359 : vector<16x64xf32>
    %362 = vector.extract_strided_slice %1 {offsets = [10, 0, 0], sizes = [1, 16, 64], strides = [1, 1, 1]} : vector<16x16x64xbf16> to vector<1x16x64xbf16>
    %363 = vector.shape_cast %362 : vector<1x16x64xbf16> to vector<16x64xbf16>
    %364 = arith.extf %363 : vector<16x64xbf16> to vector<16x64xf32>
    %cst_134 = arith.constant 7.500000e-01 : f32
    %365 = vector.broadcast %cst_134 : f32 to vector<16x64xf32>
    %366 = arith.mulf %365, %364 : vector<16x64xf32>
    %367 = arith.addf %361, %366 : vector<16x64xf32>
    %368 = vector.extract_strided_slice %1 {offsets = [10, 0, 0], sizes = [1, 16, 64], strides = [1, 1, 1]} : vector<16x16x64xbf16> to vector<1x16x64xbf16>
    %369 = vector.shape_cast %368 : vector<1x16x64xbf16> to vector<16x64xbf16>
    %370 = arith.extf %369 : vector<16x64xbf16> to vector<16x64xf32>
    %cst_135 = arith.constant 7.500000e-01 : f32
    %371 = vector.broadcast %cst_135 : f32 to vector<16x64xf32>
    %372 = arith.mulf %371, %370 : vector<16x64xf32>
    %373 = vector.extract_strided_slice %1 {offsets = [11, 0, 0], sizes = [1, 16, 64], strides = [1, 1, 1]} : vector<16x16x64xbf16> to vector<1x16x64xbf16>
    %374 = vector.shape_cast %373 : vector<1x16x64xbf16> to vector<16x64xbf16>
    %375 = arith.extf %374 : vector<16x64xbf16> to vector<16x64xf32>
    %cst_136 = arith.constant 2.500000e-01 : f32
    %376 = vector.broadcast %cst_136 : f32 to vector<16x64xf32>
    %377 = arith.mulf %376, %375 : vector<16x64xf32>
    %378 = arith.addf %372, %377 : vector<16x64xf32>
    %379 = vector.extract_strided_slice %1 {offsets = [10, 0, 0], sizes = [1, 16, 64], strides = [1, 1, 1]} : vector<16x16x64xbf16> to vector<1x16x64xbf16>
    %380 = vector.shape_cast %379 : vector<1x16x64xbf16> to vector<16x64xbf16>
    %381 = arith.extf %380 : vector<16x64xbf16> to vector<16x64xf32>
    %cst_137 = arith.constant 2.500000e-01 : f32
    %382 = vector.broadcast %cst_137 : f32 to vector<16x64xf32>
    %383 = arith.mulf %382, %381 : vector<16x64xf32>
    %384 = vector.extract_strided_slice %1 {offsets = [11, 0, 0], sizes = [1, 16, 64], strides = [1, 1, 1]} : vector<16x16x64xbf16> to vector<1x16x64xbf16>
    %385 = vector.shape_cast %384 : vector<1x16x64xbf16> to vector<16x64xbf16>
    %386 = arith.extf %385 : vector<16x64xbf16> to vector<16x64xf32>
    %cst_138 = arith.constant 7.500000e-01 : f32
    %387 = vector.broadcast %cst_138 : f32 to vector<16x64xf32>
    %388 = arith.mulf %387, %386 : vector<16x64xf32>
    %389 = arith.addf %383, %388 : vector<16x64xf32>
    %390 = vector.extract_strided_slice %1 {offsets = [11, 0, 0], sizes = [1, 16, 64], strides = [1, 1, 1]} : vector<16x16x64xbf16> to vector<1x16x64xbf16>
    %391 = vector.shape_cast %390 : vector<1x16x64xbf16> to vector<16x64xbf16>
    %392 = arith.extf %391 : vector<16x64xbf16> to vector<16x64xf32>
    %cst_139 = arith.constant 7.500000e-01 : f32
    %393 = vector.broadcast %cst_139 : f32 to vector<16x64xf32>
    %394 = arith.mulf %393, %392 : vector<16x64xf32>
    %395 = vector.extract_strided_slice %1 {offsets = [12, 0, 0], sizes = [1, 16, 64], strides = [1, 1, 1]} : vector<16x16x64xbf16> to vector<1x16x64xbf16>
    %396 = vector.shape_cast %395 : vector<1x16x64xbf16> to vector<16x64xbf16>
    %397 = arith.extf %396 : vector<16x64xbf16> to vector<16x64xf32>
    %cst_140 = arith.constant 2.500000e-01 : f32
    %398 = vector.broadcast %cst_140 : f32 to vector<16x64xf32>
    %399 = arith.mulf %398, %397 : vector<16x64xf32>
    %400 = arith.addf %394, %399 : vector<16x64xf32>
    %401 = vector.shape_cast %367 : vector<16x64xf32> to vector<1x16x64xf32>
    %402 = vector.shape_cast %378 : vector<16x64xf32> to vector<1x16x64xf32>
    %403 = vector.shape_cast %389 : vector<16x64xf32> to vector<1x16x64xf32>
    %404 = vector.shape_cast %400 : vector<16x64xf32> to vector<1x16x64xf32>
    %405 = tpu.concatenate %401, %402, %403, %404 in 0 : vector<1x16x64xf32>, vector<1x16x64xf32>, vector<1x16x64xf32>, vector<1x16x64xf32> -> vector<4x16x64xf32>
    %c0_141 = arith.constant 0 : index
    %c0_142 = arith.constant 0 : index
    %406 = vector.load %arg6[%c0_141, %c0_142] : memref<128x64xf32, #tpu.memory_space<vmem>>, vector<128x64xf32>
    %407 = vector.shape_cast %405 : vector<4x16x64xf32> to vector<64x64xf32>
    %cst_143 = arith.constant dense<0.000000e+00> : vector<128x64xf32>
    %408 = tpu.matmul %406, %407, %cst_143 {dimension_numbers = #tpu.dot_dimension_numbers<[1], [0], [0], [1], [0, 0, 1, 1], [], []>} : vector<128x64xf32>, vector<64x64xf32>, vector<128x64xf32> -> vector<128x64xf32>
    %c0_144 = arith.constant 0 : index
    %c20 = arith.constant 20 : index
    %c0_145 = arith.constant 0 : index
    %c0_146 = arith.constant 0 : index
    %409 = vector.load %arg2[%c0_144, %c20, %c0_145, %c0_146] : memref<1x32x32x32xbf16, #tpu.memory_space<vmem>>, vector<1x4x32x32xbf16>
    %410 = vector.shape_cast %409 : vector<1x4x32x32xbf16> to vector<4x32x32xbf16>
    %411 = vector.shape_cast %410 : vector<4x32x32xbf16> to vector<128x32xbf16>
    %c0_147 = arith.constant 0 : index
    %c0_148 = arith.constant 0 : index
    %412 = vector.load %arg3[%c0_147, %c0_148] : memref<32x8xbf16, #tpu.memory_space<vmem>>, vector<32x8xbf16>
    %cst_149 = arith.constant dense<0.000000e+00> : vector<128x8xf32>
    %413 = tpu.matmul %411, %412, %cst_149 {dimension_numbers = #tpu.dot_dimension_numbers<[1], [0], [0], [1], [0, 0, 1, 1], [], []>} : vector<128x32xbf16>, vector<32x8xbf16>, vector<128x8xf32> -> vector<128x8xf32>
    %c0_150 = arith.constant 0 : index
    %c0_151 = arith.constant 0 : index
    %414 = vector.load %arg4[%c0_150, %c0_151] : memref<1x8xf32, #tpu.memory_space<vmem>>, vector<1x8xf32>
    %415 = vector.broadcast %414 : vector<1x8xf32> to vector<128x8xf32>
    %416 = arith.mulf %413, %415 : vector<128x8xf32>
    %c0_152 = arith.constant 0 : index
    %c0_153 = arith.constant 0 : index
    %417 = vector.load %arg5[%c0_152, %c0_153] : memref<1x8xf32, #tpu.memory_space<vmem>>, vector<1x8xf32>
    %418 = vector.broadcast %417 : vector<1x8xf32> to vector<128x8xf32>
    %419 = arith.addf %416, %418 : vector<128x8xf32>
    %cst_154 = arith.constant 0.000000e+00 : f32
    %420 = vector.broadcast %cst_154 : f32 to vector<128x8xf32>
    %421 = arith.maximumf %419, %420 : vector<128x8xf32>
    %422 = tpu.concatenate %408, %421 in 1 : vector<128x64xf32>, vector<128x8xf32> -> vector<128x72xf32>
    %423 = vector.shape_cast %422 : vector<128x72xf32> to vector<4x32x72xf32>
    %424 = arith.truncf %423 : vector<4x32x72xf32> to vector<4x32x72xbf16>
    %c0_155 = arith.constant 0 : index
    %c20_156 = arith.constant 20 : index
    %c0_157 = arith.constant 0 : index
    %c0_158 = arith.constant 0 : index
    %425 = vector.load %arg7[%c0_155, %c20_156, %c0_157, %c0_158] : memref<1x32x32x72xbf16, #tpu.memory_space<vmem>>, vector<1x4x32x72xbf16>
    %426 = vector.shape_cast %425 : vector<1x4x32x72xbf16> to vector<4x32x72xbf16>
    %427 = vector.shape_cast %424 : vector<4x32x72xbf16> to vector<1x4x32x72xbf16>
    tpu.vector_store %arg7[%c0_155, %c20_156, %c0_157, %c0_158], %427 {strides = array<i32>} : memref<1x32x32x72xbf16, #tpu.memory_space<vmem>>, vector<1x4x32x72xbf16>,
    %428 = vector.extract_strided_slice %1 {offsets = [11, 0, 0], sizes = [1, 16, 64], strides = [1, 1, 1]} : vector<16x16x64xbf16> to vector<1x16x64xbf16>
    %429 = vector.shape_cast %428 : vector<1x16x64xbf16> to vector<16x64xbf16>
    %430 = arith.extf %429 : vector<16x64xbf16> to vector<16x64xf32>
    %cst_159 = arith.constant 2.500000e-01 : f32
    %431 = vector.broadcast %cst_159 : f32 to vector<16x64xf32>
    %432 = arith.mulf %431, %430 : vector<16x64xf32>
    %433 = vector.extract_strided_slice %1 {offsets = [12, 0, 0], sizes = [1, 16, 64], strides = [1, 1, 1]} : vector<16x16x64xbf16> to vector<1x16x64xbf16>
    %434 = vector.shape_cast %433 : vector<1x16x64xbf16> to vector<16x64xbf16>
    %435 = arith.extf %434 : vector<16x64xbf16> to vector<16x64xf32>
    %cst_160 = arith.constant 7.500000e-01 : f32
    %436 = vector.broadcast %cst_160 : f32 to vector<16x64xf32>
    %437 = arith.mulf %436, %435 : vector<16x64xf32>
    %438 = arith.addf %432, %437 : vector<16x64xf32>
    %439 = vector.extract_strided_slice %1 {offsets = [12, 0, 0], sizes = [1, 16, 64], strides = [1, 1, 1]} : vector<16x16x64xbf16> to vector<1x16x64xbf16>
    %440 = vector.shape_cast %439 : vector<1x16x64xbf16> to vector<16x64xbf16>
    %441 = arith.extf %440 : vector<16x64xbf16> to vector<16x64xf32>
    %cst_161 = arith.constant 7.500000e-01 : f32
    %442 = vector.broadcast %cst_161 : f32 to vector<16x64xf32>
    %443 = arith.mulf %442, %441 : vector<16x64xf32>
    %444 = vector.extract_strided_slice %1 {offsets = [13, 0, 0], sizes = [1, 16, 64], strides = [1, 1, 1]} : vector<16x16x64xbf16> to vector<1x16x64xbf16>
    %445 = vector.shape_cast %444 : vector<1x16x64xbf16> to vector<16x64xbf16>
    %446 = arith.extf %445 : vector<16x64xbf16> to vector<16x64xf32>
    %cst_162 = arith.constant 2.500000e-01 : f32
    %447 = vector.broadcast %cst_162 : f32 to vector<16x64xf32>
    %448 = arith.mulf %447, %446 : vector<16x64xf32>
    %449 = arith.addf %443, %448 : vector<16x64xf32>
    %450 = vector.extract_strided_slice %1 {offsets = [12, 0, 0], sizes = [1, 16, 64], strides = [1, 1, 1]} : vector<16x16x64xbf16> to vector<1x16x64xbf16>
    %451 = vector.shape_cast %450 : vector<1x16x64xbf16> to vector<16x64xbf16>
    %452 = arith.extf %451 : vector<16x64xbf16> to vector<16x64xf32>
    %cst_163 = arith.constant 2.500000e-01 : f32
    %453 = vector.broadcast %cst_163 : f32 to vector<16x64xf32>
    %454 = arith.mulf %453, %452 : vector<16x64xf32>
    %455 = vector.extract_strided_slice %1 {offsets = [13, 0, 0], sizes = [1, 16, 64], strides = [1, 1, 1]} : vector<16x16x64xbf16> to vector<1x16x64xbf16>
    %456 = vector.shape_cast %455 : vector<1x16x64xbf16> to vector<16x64xbf16>
    %457 = arith.extf %456 : vector<16x64xbf16> to vector<16x64xf32>
    %cst_164 = arith.constant 7.500000e-01 : f32
    %458 = vector.broadcast %cst_164 : f32 to vector<16x64xf32>
    %459 = arith.mulf %458, %457 : vector<16x64xf32>
    %460 = arith.addf %454, %459 : vector<16x64xf32>
    %461 = vector.extract_strided_slice %1 {offsets = [13, 0, 0], sizes = [1, 16, 64], strides = [1, 1, 1]} : vector<16x16x64xbf16> to vector<1x16x64xbf16>
    %462 = vector.shape_cast %461 : vector<1x16x64xbf16> to vector<16x64xbf16>
    %463 = arith.extf %462 : vector<16x64xbf16> to vector<16x64xf32>
    %cst_165 = arith.constant 7.500000e-01 : f32
    %464 = vector.broadcast %cst_165 : f32 to vector<16x64xf32>
    %465 = arith.mulf %464, %463 : vector<16x64xf32>
    %466 = vector.extract_strided_slice %1 {offsets = [14, 0, 0], sizes = [1, 16, 64], strides = [1, 1, 1]} : vector<16x16x64xbf16> to vector<1x16x64xbf16>
    %467 = vector.shape_cast %466 : vector<1x16x64xbf16> to vector<16x64xbf16>
    %468 = arith.extf %467 : vector<16x64xbf16> to vector<16x64xf32>
    %cst_166 = arith.constant 2.500000e-01 : f32
    %469 = vector.broadcast %cst_166 : f32 to vector<16x64xf32>
    %470 = arith.mulf %469, %468 : vector<16x64xf32>
    %471 = arith.addf %465, %470 : vector<16x64xf32>
    %472 = vector.shape_cast %438 : vector<16x64xf32> to vector<1x16x64xf32>
    %473 = vector.shape_cast %449 : vector<16x64xf32> to vector<1x16x64xf32>
    %474 = vector.shape_cast %460 : vector<16x64xf32> to vector<1x16x64xf32>
    %475 = vector.shape_cast %471 : vector<16x64xf32> to vector<1x16x64xf32>
    %476 = tpu.concatenate %472, %473, %474, %475 in 0 : vector<1x16x64xf32>, vector<1x16x64xf32>, vector<1x16x64xf32>, vector<1x16x64xf32> -> vector<4x16x64xf32>
    %c0_167 = arith.constant 0 : index
    %c0_168 = arith.constant 0 : index
    %477 = vector.load %arg6[%c0_167, %c0_168] : memref<128x64xf32, #tpu.memory_space<vmem>>, vector<128x64xf32>
    %478 = vector.shape_cast %476 : vector<4x16x64xf32> to vector<64x64xf32>
    %cst_169 = arith.constant dense<0.000000e+00> : vector<128x64xf32>
    %479 = tpu.matmul %477, %478, %cst_169 {dimension_numbers = #tpu.dot_dimension_numbers<[1], [0], [0], [1], [0, 0, 1, 1], [], []>} : vector<128x64xf32>, vector<64x64xf32>, vector<128x64xf32> -> vector<128x64xf32>
    %c0_170 = arith.constant 0 : index
    %c24 = arith.constant 24 : index
    %c0_171 = arith.constant 0 : index
    %c0_172 = arith.constant 0 : index
    %480 = vector.load %arg2[%c0_170, %c24, %c0_171, %c0_172] : memref<1x32x32x32xbf16, #tpu.memory_space<vmem>>, vector<1x4x32x32xbf16>
    %481 = vector.shape_cast %480 : vector<1x4x32x32xbf16> to vector<4x32x32xbf16>
    %482 = vector.shape_cast %481 : vector<4x32x32xbf16> to vector<128x32xbf16>
    %c0_173 = arith.constant 0 : index
    %c0_174 = arith.constant 0 : index
    %483 = vector.load %arg3[%c0_173, %c0_174] : memref<32x8xbf16, #tpu.memory_space<vmem>>, vector<32x8xbf16>
    %cst_175 = arith.constant dense<0.000000e+00> : vector<128x8xf32>
    %484 = tpu.matmul %482, %483, %cst_175 {dimension_numbers = #tpu.dot_dimension_numbers<[1], [0], [0], [1], [0, 0, 1, 1], [], []>} : vector<128x32xbf16>, vector<32x8xbf16>, vector<128x8xf32> -> vector<128x8xf32>
    %c0_176 = arith.constant 0 : index
    %c0_177 = arith.constant 0 : index
    %485 = vector.load %arg4[%c0_176, %c0_177] : memref<1x8xf32, #tpu.memory_space<vmem>>, vector<1x8xf32>
    %486 = vector.broadcast %485 : vector<1x8xf32> to vector<128x8xf32>
    %487 = arith.mulf %484, %486 : vector<128x8xf32>
    %c0_178 = arith.constant 0 : index
    %c0_179 = arith.constant 0 : index
    %488 = vector.load %arg5[%c0_178, %c0_179] : memref<1x8xf32, #tpu.memory_space<vmem>>, vector<1x8xf32>
    %489 = vector.broadcast %488 : vector<1x8xf32> to vector<128x8xf32>
    %490 = arith.addf %487, %489 : vector<128x8xf32>
    %cst_180 = arith.constant 0.000000e+00 : f32
    %491 = vector.broadcast %cst_180 : f32 to vector<128x8xf32>
    %492 = arith.maximumf %490, %491 : vector<128x8xf32>
    %493 = tpu.concatenate %479, %492 in 1 : vector<128x64xf32>, vector<128x8xf32> -> vector<128x72xf32>
    %494 = vector.shape_cast %493 : vector<128x72xf32> to vector<4x32x72xf32>
    %495 = arith.truncf %494 : vector<4x32x72xf32> to vector<4x32x72xbf16>
    %c0_181 = arith.constant 0 : index
    %c24_182 = arith.constant 24 : index
    %c0_183 = arith.constant 0 : index
    %c0_184 = arith.constant 0 : index
    %496 = vector.load %arg7[%c0_181, %c24_182, %c0_183, %c0_184] : memref<1x32x32x72xbf16, #tpu.memory_space<vmem>>, vector<1x4x32x72xbf16>
    %497 = vector.shape_cast %496 : vector<1x4x32x72xbf16> to vector<4x32x72xbf16>
    %498 = vector.shape_cast %495 : vector<4x32x72xbf16> to vector<1x4x32x72xbf16>
    tpu.vector_store %arg7[%c0_181, %c24_182, %c0_183, %c0_184], %498 {strides = array<i32>} : memref<1x32x32x72xbf16, #tpu.memory_space<vmem>>, vector<1x4x32x72xbf16>,
    %499 = vector.extract_strided_slice %1 {offsets = [13, 0, 0], sizes = [1, 16, 64], strides = [1, 1, 1]} : vector<16x16x64xbf16> to vector<1x16x64xbf16>
    %500 = vector.shape_cast %499 : vector<1x16x64xbf16> to vector<16x64xbf16>
    %501 = arith.extf %500 : vector<16x64xbf16> to vector<16x64xf32>
    %cst_185 = arith.constant 2.500000e-01 : f32
    %502 = vector.broadcast %cst_185 : f32 to vector<16x64xf32>
    %503 = arith.mulf %502, %501 : vector<16x64xf32>
    %504 = vector.extract_strided_slice %1 {offsets = [14, 0, 0], sizes = [1, 16, 64], strides = [1, 1, 1]} : vector<16x16x64xbf16> to vector<1x16x64xbf16>
    %505 = vector.shape_cast %504 : vector<1x16x64xbf16> to vector<16x64xbf16>
    %506 = arith.extf %505 : vector<16x64xbf16> to vector<16x64xf32>
    %cst_186 = arith.constant 7.500000e-01 : f32
    %507 = vector.broadcast %cst_186 : f32 to vector<16x64xf32>
    %508 = arith.mulf %507, %506 : vector<16x64xf32>
    %509 = arith.addf %503, %508 : vector<16x64xf32>
    %510 = vector.extract_strided_slice %1 {offsets = [14, 0, 0], sizes = [1, 16, 64], strides = [1, 1, 1]} : vector<16x16x64xbf16> to vector<1x16x64xbf16>
    %511 = vector.shape_cast %510 : vector<1x16x64xbf16> to vector<16x64xbf16>
    %512 = arith.extf %511 : vector<16x64xbf16> to vector<16x64xf32>
    %cst_187 = arith.constant 7.500000e-01 : f32
    %513 = vector.broadcast %cst_187 : f32 to vector<16x64xf32>
    %514 = arith.mulf %513, %512 : vector<16x64xf32>
    %515 = vector.extract_strided_slice %1 {offsets = [15, 0, 0], sizes = [1, 16, 64], strides = [1, 1, 1]} : vector<16x16x64xbf16> to vector<1x16x64xbf16>
    %516 = vector.shape_cast %515 : vector<1x16x64xbf16> to vector<16x64xbf16>
    %517 = arith.extf %516 : vector<16x64xbf16> to vector<16x64xf32>
    %cst_188 = arith.constant 2.500000e-01 : f32
    %518 = vector.broadcast %cst_188 : f32 to vector<16x64xf32>
    %519 = arith.mulf %518, %517 : vector<16x64xf32>
    %520 = arith.addf %514, %519 : vector<16x64xf32>
    %521 = vector.extract_strided_slice %1 {offsets = [14, 0, 0], sizes = [1, 16, 64], strides = [1, 1, 1]} : vector<16x16x64xbf16> to vector<1x16x64xbf16>
    %522 = vector.shape_cast %521 : vector<1x16x64xbf16> to vector<16x64xbf16>
    %523 = arith.extf %522 : vector<16x64xbf16> to vector<16x64xf32>
    %cst_189 = arith.constant 2.500000e-01 : f32
    %524 = vector.broadcast %cst_189 : f32 to vector<16x64xf32>
    %525 = arith.mulf %524, %523 : vector<16x64xf32>
    %526 = vector.extract_strided_slice %1 {offsets = [15, 0, 0], sizes = [1, 16, 64], strides = [1, 1, 1]} : vector<16x16x64xbf16> to vector<1x16x64xbf16>
    %527 = vector.shape_cast %526 : vector<1x16x64xbf16> to vector<16x64xbf16>
    %528 = arith.extf %527 : vector<16x64xbf16> to vector<16x64xf32>
    %cst_190 = arith.constant 7.500000e-01 : f32
    %529 = vector.broadcast %cst_190 : f32 to vector<16x64xf32>
    %530 = arith.mulf %529, %528 : vector<16x64xf32>
    %531 = arith.addf %525, %530 : vector<16x64xf32>
    %532 = vector.extract_strided_slice %1 {offsets = [15, 0, 0], sizes = [1, 16, 64], strides = [1, 1, 1]} : vector<16x16x64xbf16> to vector<1x16x64xbf16>
    %533 = vector.shape_cast %532 : vector<1x16x64xbf16> to vector<16x64xbf16>
    %534 = arith.extf %533 : vector<16x64xbf16> to vector<16x64xf32>
    %cst_191 = arith.constant 7.500000e-01 : f32
    %535 = vector.broadcast %cst_191 : f32 to vector<16x64xf32>
    %536 = arith.mulf %535, %534 : vector<16x64xf32>
    %537 = vector.extract_strided_slice %1 {offsets = [15, 0, 0], sizes = [1, 16, 64], strides = [1, 1, 1]} : vector<16x16x64xbf16> to vector<1x16x64xbf16>
    %538 = vector.shape_cast %537 : vector<1x16x64xbf16> to vector<16x64xbf16>
    %539 = arith.extf %538 : vector<16x64xbf16> to vector<16x64xf32>
    %cst_192 = arith.constant 2.500000e-01 : f32
    %540 = vector.broadcast %cst_192 : f32 to vector<16x64xf32>
    %541 = arith.mulf %540, %539 : vector<16x64xf32>
    %542 = arith.addf %536, %541 : vector<16x64xf32>
    %543 = vector.shape_cast %509 : vector<16x64xf32> to vector<1x16x64xf32>
    %544 = vector.shape_cast %520 : vector<16x64xf32> to vector<1x16x64xf32>
    %545 = vector.shape_cast %531 : vector<16x64xf32> to vector<1x16x64xf32>
    %546 = vector.shape_cast %542 : vector<16x64xf32> to vector<1x16x64xf32>
    %547 = tpu.concatenate %543, %544, %545, %546 in 0 : vector<1x16x64xf32>, vector<1x16x64xf32>, vector<1x16x64xf32>, vector<1x16x64xf32> -> vector<4x16x64xf32>
    %c0_193 = arith.constant 0 : index
    %c0_194 = arith.constant 0 : index
    %548 = vector.load %arg6[%c0_193, %c0_194] : memref<128x64xf32, #tpu.memory_space<vmem>>, vector<128x64xf32>
    %549 = vector.shape_cast %547 : vector<4x16x64xf32> to vector<64x64xf32>
    %cst_195 = arith.constant dense<0.000000e+00> : vector<128x64xf32>
    %550 = tpu.matmul %548, %549, %cst_195 {dimension_numbers = #tpu.dot_dimension_numbers<[1], [0], [0], [1], [0, 0, 1, 1], [], []>} : vector<128x64xf32>, vector<64x64xf32>, vector<128x64xf32> -> vector<128x64xf32>
    %c0_196 = arith.constant 0 : index
    %c28 = arith.constant 28 : index
    %c0_197 = arith.constant 0 : index
    %c0_198 = arith.constant 0 : index
    %551 = vector.load %arg2[%c0_196, %c28, %c0_197, %c0_198] : memref<1x32x32x32xbf16, #tpu.memory_space<vmem>>, vector<1x4x32x32xbf16>
    %552 = vector.shape_cast %551 : vector<1x4x32x32xbf16> to vector<4x32x32xbf16>
    %553 = vector.shape_cast %552 : vector<4x32x32xbf16> to vector<128x32xbf16>
    %c0_199 = arith.constant 0 : index
    %c0_200 = arith.constant 0 : index
    %554 = vector.load %arg3[%c0_199, %c0_200] : memref<32x8xbf16, #tpu.memory_space<vmem>>, vector<32x8xbf16>
    %cst_201 = arith.constant dense<0.000000e+00> : vector<128x8xf32>
    %555 = tpu.matmul %553, %554, %cst_201 {dimension_numbers = #tpu.dot_dimension_numbers<[1], [0], [0], [1], [0, 0, 1, 1], [], []>} : vector<128x32xbf16>, vector<32x8xbf16>, vector<128x8xf32> -> vector<128x8xf32>
    %c0_202 = arith.constant 0 : index
    %c0_203 = arith.constant 0 : index
    %556 = vector.load %arg4[%c0_202, %c0_203] : memref<1x8xf32, #tpu.memory_space<vmem>>, vector<1x8xf32>
    %557 = vector.broadcast %556 : vector<1x8xf32> to vector<128x8xf32>
    %558 = arith.mulf %555, %557 : vector<128x8xf32>
    %c0_204 = arith.constant 0 : index
    %c0_205 = arith.constant 0 : index
    %559 = vector.load %arg5[%c0_204, %c0_205] : memref<1x8xf32, #tpu.memory_space<vmem>>, vector<1x8xf32>
    %560 = vector.broadcast %559 : vector<1x8xf32> to vector<128x8xf32>
    %561 = arith.addf %558, %560 : vector<128x8xf32>
    %cst_206 = arith.constant 0.000000e+00 : f32
    %562 = vector.broadcast %cst_206 : f32 to vector<128x8xf32>
    %563 = arith.maximumf %561, %562 : vector<128x8xf32>
    %564 = tpu.concatenate %550, %563 in 1 : vector<128x64xf32>, vector<128x8xf32> -> vector<128x72xf32>
    %565 = vector.shape_cast %564 : vector<128x72xf32> to vector<4x32x72xf32>
    %566 = arith.truncf %565 : vector<4x32x72xf32> to vector<4x32x72xbf16>
    %c0_207 = arith.constant 0 : index
    %c28_208 = arith.constant 28 : index
    %c0_209 = arith.constant 0 : index
    %c0_210 = arith.constant 0 : index
    %567 = vector.load %arg7[%c0_207, %c28_208, %c0_209, %c0_210] : memref<1x32x32x72xbf16, #tpu.memory_space<vmem>>, vector<1x4x32x72xbf16>
    %568 = vector.shape_cast %567 : vector<1x4x32x72xbf16> to vector<4x32x72xbf16>
    %569 = vector.shape_cast %566 : vector<4x32x72xbf16> to vector<1x4x32x72xbf16>
    tpu.vector_store %arg7[%c0_207, %c28_208, %c0_209, %c0_210], %569 {strides = array<i32>} : memref<1x32x32x72xbf16, #tpu.memory_space<vmem>>, vector<1x4x32x72xbf16>,
    return
  }
  func.func @transform_0(%arg0: i32) -> (i32, i32, i32, i32) {
    %c0_i32 = arith.constant 0 : i32
    %c0_i32_0 = arith.constant 0 : i32
    %c0_i32_1 = arith.constant 0 : i32
    %c0_i32_2 = arith.constant 0 : i32
    return %arg0, %c0_i32, %c0_i32_0, %c0_i32_1 : i32, i32, i32, i32
  }
  func.func @transform_1(%arg0: i32) -> (i32, i32, i32, i32) {
    %c0_i32 = arith.constant 0 : i32
    %c0_i32_0 = arith.constant 0 : i32
    %c0_i32_1 = arith.constant 0 : i32
    %c0_i32_2 = arith.constant 0 : i32
    return %arg0, %c0_i32, %c0_i32_0, %c0_i32_1 : i32, i32, i32, i32
  }
  func.func @transform_2(%arg0: i32) -> (i32, i32) {
    %c0_i32 = arith.constant 0 : i32
    %c0_i32_0 = arith.constant 0 : i32
    %c0_i32_1 = arith.constant 0 : i32
    return %c0_i32, %c0_i32_0 : i32, i32
  }
  func.func @transform_3(%arg0: i32) -> (i32, i32) {
    %c0_i32 = arith.constant 0 : i32
    %c0_i32_0 = arith.constant 0 : i32
    %c0_i32_1 = arith.constant 0 : i32
    return %c0_i32, %c0_i32_0 : i32, i32
  }
  func.func @transform_4(%arg0: i32) -> (i32, i32) {
    %c0_i32 = arith.constant 0 : i32
    %c0_i32_0 = arith.constant 0 : i32
    %c0_i32_1 = arith.constant 0 : i32
    return %c0_i32, %c0_i32_0 : i32, i32
  }
  func.func @transform_5(%arg0: i32) -> (i32, i32) {
    %c0_i32 = arith.constant 0 : i32
    %c0_i32_0 = arith.constant 0 : i32
    %c0_i32_1 = arith.constant 0 : i32
    return %c0_i32, %c0_i32_0 : i32, i32
  }
  func.func @transform_6(%arg0: i32) -> (i32, i32, i32, i32) {
    %c0_i32 = arith.constant 0 : i32
    %c0_i32_0 = arith.constant 0 : i32
    %c0_i32_1 = arith.constant 0 : i32
    %c0_i32_2 = arith.constant 0 : i32
    return %arg0, %c0_i32, %c0_i32_0, %c0_i32_1 : i32, i32, i32, i32
  }
}

module attributes {stable_mosaic.version = 11 : i64} {
  func.func @_conv3x3_bn_relu_cls_kernel(%arg0: i32, %arg1: i32, %arg2: memref<1x8x34x72xbf16, #tpu.memory_space<vmem>>, %arg3: memref<1x1x34x72xbf16, #tpu.memory_space<vmem>>, %arg4: memref<1x1x34x72xbf16, #tpu.memory_space<vmem>>, %arg5: memref<9x72x64xbf16, #tpu.memory_space<vmem>>, %arg6: memref<1x64xf32, #tpu.memory_space<vmem>>, %arg7: memref<1x64xf32, #tpu.memory_space<vmem>>, %arg8: memref<64x19xbf16, #tpu.memory_space<vmem>>, %arg9: memref<1x19xf32, #tpu.memory_space<vmem>>, %arg10: memref<1x8x32x19xf32, #tpu.memory_space<vmem>>) attributes {dimension_semantics = [#tpu.dimension_semantics<parallel>, #tpu.dimension_semantics<parallel>], iteration_bounds = array<i64: 2, 4>, scalar_prefetch = 0 : i64, scratch_operands = 0 : i64, tpu.core_type = #tpu.core_type<tc>, window_params = [{transform_indices = @transform_0, window_bounds = array<i64: 1, 8, 34, 72>}, {transform_indices = @transform_1, window_bounds = array<i64: 1, 1, 34, 72>}, {transform_indices = @transform_2, window_bounds = array<i64: 1, 1, 34, 72>}, {pipeline_mode = #tpu.pipeline_mode<synchronous>, transform_indices = @transform_3, window_bounds = array<i64: 9, 72, 64>}, {pipeline_mode = #tpu.pipeline_mode<synchronous>, transform_indices = @transform_4, window_bounds = array<i64: 1, 64>}, {pipeline_mode = #tpu.pipeline_mode<synchronous>, transform_indices = @transform_5, window_bounds = array<i64: 1, 64>}, {pipeline_mode = #tpu.pipeline_mode<synchronous>, transform_indices = @transform_6, window_bounds = array<i64: 64, 19>}, {pipeline_mode = #tpu.pipeline_mode<synchronous>, transform_indices = @transform_7, window_bounds = array<i64: 1, 19>}, {transform_indices = @transform_8, window_bounds = array<i64: 1, 8, 32, 19>}]} {
    %c0 = arith.constant 0 : index
    %c0_0 = arith.constant 0 : index
    %c0_1 = arith.constant 0 : index
    %c0_2 = arith.constant 0 : index
    %0 = vector.load %arg2[%c0, %c0_0, %c0_1, %c0_2] : memref<1x8x34x72xbf16, #tpu.memory_space<vmem>>, vector<1x8x34x72xbf16>
    %1 = vector.shape_cast %0 : vector<1x8x34x72xbf16> to vector<8x34x72xbf16>
    %c0_3 = arith.constant 0 : index
    %c0_4 = arith.constant 0 : index
    %c0_5 = arith.constant 0 : index
    %c0_6 = arith.constant 0 : index
    %2 = vector.load %arg3[%c0_3, %c0_4, %c0_5, %c0_6] : memref<1x1x34x72xbf16, #tpu.memory_space<vmem>>, vector<1x1x34x72xbf16>
    %3 = vector.shape_cast %2 : vector<1x1x34x72xbf16> to vector<1x34x72xbf16>
    %c0_7 = arith.constant 0 : index
    %c0_8 = arith.constant 0 : index
    %c0_9 = arith.constant 0 : index
    %c0_10 = arith.constant 0 : index
    %4 = vector.load %arg4[%c0_7, %c0_8, %c0_9, %c0_10] : memref<1x1x34x72xbf16, #tpu.memory_space<vmem>>, vector<1x1x34x72xbf16>
    %5 = vector.shape_cast %4 : vector<1x1x34x72xbf16> to vector<1x34x72xbf16>
    %6 = tpu.concatenate %1, %3, %5 in 0 : vector<8x34x72xbf16>, vector<1x34x72xbf16>, vector<1x34x72xbf16> -> vector<10x34x72xbf16>
    %cst = arith.constant 0.000000e+00 : f32
    %7 = vector.broadcast %cst : f32 to vector<256x64xf32>
    %8 = vector.extract_strided_slice %6 {offsets = [0, 0, 0], sizes = [8, 32, 72], strides = [1, 1, 1]} : vector<10x34x72xbf16> to vector<8x32x72xbf16>
    %9 = vector.shape_cast %8 : vector<8x32x72xbf16> to vector<256x72xbf16>
    %c0_11 = arith.constant 0 : index
    %c0_12 = arith.constant 0 : index
    %c0_13 = arith.constant 0 : index
    %10 = vector.load %arg5[%c0_11, %c0_12, %c0_13] : memref<9x72x64xbf16, #tpu.memory_space<vmem>>, vector<1x72x64xbf16>
    %11 = vector.shape_cast %10 : vector<1x72x64xbf16> to vector<72x64xbf16>
    %cst_14 = arith.constant dense<0.000000e+00> : vector<256x64xf32>
    %12 = tpu.matmul %9, %11, %cst_14 {dimension_numbers = #tpu.dot_dimension_numbers<[1], [0], [0], [1], [0, 0, 1, 1], [], []>} : vector<256x72xbf16>, vector<72x64xbf16>, vector<256x64xf32> -> vector<256x64xf32>
    %13 = arith.addf %7, %12 : vector<256x64xf32>
    %14 = vector.extract_strided_slice %6 {offsets = [0, 1, 0], sizes = [8, 32, 72], strides = [1, 1, 1]} : vector<10x34x72xbf16> to vector<8x32x72xbf16>
    %15 = vector.shape_cast %14 : vector<8x32x72xbf16> to vector<256x72xbf16>
    %c1 = arith.constant 1 : index
    %c0_15 = arith.constant 0 : index
    %c0_16 = arith.constant 0 : index
    %16 = vector.load %arg5[%c1, %c0_15, %c0_16] : memref<9x72x64xbf16, #tpu.memory_space<vmem>>, vector<1x72x64xbf16>
    %17 = vector.shape_cast %16 : vector<1x72x64xbf16> to vector<72x64xbf16>
    %cst_17 = arith.constant dense<0.000000e+00> : vector<256x64xf32>
    %18 = tpu.matmul %15, %17, %cst_17 {dimension_numbers = #tpu.dot_dimension_numbers<[1], [0], [0], [1], [0, 0, 1, 1], [], []>} : vector<256x72xbf16>, vector<72x64xbf16>, vector<256x64xf32> -> vector<256x64xf32>
    %19 = arith.addf %13, %18 : vector<256x64xf32>
    %20 = vector.extract_strided_slice %6 {offsets = [0, 2, 0], sizes = [8, 32, 72], strides = [1, 1, 1]} : vector<10x34x72xbf16> to vector<8x32x72xbf16>
    %21 = vector.shape_cast %20 : vector<8x32x72xbf16> to vector<256x72xbf16>
    %c2 = arith.constant 2 : index
    %c0_18 = arith.constant 0 : index
    %c0_19 = arith.constant 0 : index
    %22 = vector.load %arg5[%c2, %c0_18, %c0_19] : memref<9x72x64xbf16, #tpu.memory_space<vmem>>, vector<1x72x64xbf16>
    %23 = vector.shape_cast %22 : vector<1x72x64xbf16> to vector<72x64xbf16>
    %cst_20 = arith.constant dense<0.000000e+00> : vector<256x64xf32>
    %24 = tpu.matmul %21, %23, %cst_20 {dimension_numbers = #tpu.dot_dimension_numbers<[1], [0], [0], [1], [0, 0, 1, 1], [], []>} : vector<256x72xbf16>, vector<72x64xbf16>, vector<256x64xf32> -> vector<256x64xf32>
    %25 = arith.addf %19, %24 : vector<256x64xf32>
    %26 = vector.extract_strided_slice %6 {offsets = [1, 0, 0], sizes = [8, 32, 72], strides = [1, 1, 1]} : vector<10x34x72xbf16> to vector<8x32x72xbf16>
    %27 = vector.shape_cast %26 : vector<8x32x72xbf16> to vector<256x72xbf16>
    %c3 = arith.constant 3 : index
    %c0_21 = arith.constant 0 : index
    %c0_22 = arith.constant 0 : index
    %28 = vector.load %arg5[%c3, %c0_21, %c0_22] : memref<9x72x64xbf16, #tpu.memory_space<vmem>>, vector<1x72x64xbf16>
    %29 = vector.shape_cast %28 : vector<1x72x64xbf16> to vector<72x64xbf16>
    %cst_23 = arith.constant dense<0.000000e+00> : vector<256x64xf32>
    %30 = tpu.matmul %27, %29, %cst_23 {dimension_numbers = #tpu.dot_dimension_numbers<[1], [0], [0], [1], [0, 0, 1, 1], [], []>} : vector<256x72xbf16>, vector<72x64xbf16>, vector<256x64xf32> -> vector<256x64xf32>
    %31 = arith.addf %25, %30 : vector<256x64xf32>
    %32 = vector.extract_strided_slice %6 {offsets = [1, 1, 0], sizes = [8, 32, 72], strides = [1, 1, 1]} : vector<10x34x72xbf16> to vector<8x32x72xbf16>
    %33 = vector.shape_cast %32 : vector<8x32x72xbf16> to vector<256x72xbf16>
    %c4 = arith.constant 4 : index
    %c0_24 = arith.constant 0 : index
    %c0_25 = arith.constant 0 : index
    %34 = vector.load %arg5[%c4, %c0_24, %c0_25] : memref<9x72x64xbf16, #tpu.memory_space<vmem>>, vector<1x72x64xbf16>
    %35 = vector.shape_cast %34 : vector<1x72x64xbf16> to vector<72x64xbf16>
    %cst_26 = arith.constant dense<0.000000e+00> : vector<256x64xf32>
    %36 = tpu.matmul %33, %35, %cst_26 {dimension_numbers = #tpu.dot_dimension_numbers<[1], [0], [0], [1], [0, 0, 1, 1], [], []>} : vector<256x72xbf16>, vector<72x64xbf16>, vector<256x64xf32> -> vector<256x64xf32>
    %37 = arith.addf %31, %36 : vector<256x64xf32>
    %38 = vector.extract_strided_slice %6 {offsets = [1, 2, 0], sizes = [8, 32, 72], strides = [1, 1, 1]} : vector<10x34x72xbf16> to vector<8x32x72xbf16>
    %39 = vector.shape_cast %38 : vector<8x32x72xbf16> to vector<256x72xbf16>
    %c5 = arith.constant 5 : index
    %c0_27 = arith.constant 0 : index
    %c0_28 = arith.constant 0 : index
    %40 = vector.load %arg5[%c5, %c0_27, %c0_28] : memref<9x72x64xbf16, #tpu.memory_space<vmem>>, vector<1x72x64xbf16>
    %41 = vector.shape_cast %40 : vector<1x72x64xbf16> to vector<72x64xbf16>
    %cst_29 = arith.constant dense<0.000000e+00> : vector<256x64xf32>
    %42 = tpu.matmul %39, %41, %cst_29 {dimension_numbers = #tpu.dot_dimension_numbers<[1], [0], [0], [1], [0, 0, 1, 1], [], []>} : vector<256x72xbf16>, vector<72x64xbf16>, vector<256x64xf32> -> vector<256x64xf32>
    %43 = arith.addf %37, %42 : vector<256x64xf32>
    %44 = vector.extract_strided_slice %6 {offsets = [2, 0, 0], sizes = [8, 32, 72], strides = [1, 1, 1]} : vector<10x34x72xbf16> to vector<8x32x72xbf16>
    %45 = vector.shape_cast %44 : vector<8x32x72xbf16> to vector<256x72xbf16>
    %c6 = arith.constant 6 : index
    %c0_30 = arith.constant 0 : index
    %c0_31 = arith.constant 0 : index
    %46 = vector.load %arg5[%c6, %c0_30, %c0_31] : memref<9x72x64xbf16, #tpu.memory_space<vmem>>, vector<1x72x64xbf16>
    %47 = vector.shape_cast %46 : vector<1x72x64xbf16> to vector<72x64xbf16>
    %cst_32 = arith.constant dense<0.000000e+00> : vector<256x64xf32>
    %48 = tpu.matmul %45, %47, %cst_32 {dimension_numbers = #tpu.dot_dimension_numbers<[1], [0], [0], [1], [0, 0, 1, 1], [], []>} : vector<256x72xbf16>, vector<72x64xbf16>, vector<256x64xf32> -> vector<256x64xf32>
    %49 = arith.addf %43, %48 : vector<256x64xf32>
    %50 = vector.extract_strided_slice %6 {offsets = [2, 1, 0], sizes = [8, 32, 72], strides = [1, 1, 1]} : vector<10x34x72xbf16> to vector<8x32x72xbf16>
    %51 = vector.shape_cast %50 : vector<8x32x72xbf16> to vector<256x72xbf16>
    %c7 = arith.constant 7 : index
    %c0_33 = arith.constant 0 : index
    %c0_34 = arith.constant 0 : index
    %52 = vector.load %arg5[%c7, %c0_33, %c0_34] : memref<9x72x64xbf16, #tpu.memory_space<vmem>>, vector<1x72x64xbf16>
    %53 = vector.shape_cast %52 : vector<1x72x64xbf16> to vector<72x64xbf16>
    %cst_35 = arith.constant dense<0.000000e+00> : vector<256x64xf32>
    %54 = tpu.matmul %51, %53, %cst_35 {dimension_numbers = #tpu.dot_dimension_numbers<[1], [0], [0], [1], [0, 0, 1, 1], [], []>} : vector<256x72xbf16>, vector<72x64xbf16>, vector<256x64xf32> -> vector<256x64xf32>
    %55 = arith.addf %49, %54 : vector<256x64xf32>
    %56 = vector.extract_strided_slice %6 {offsets = [2, 2, 0], sizes = [8, 32, 72], strides = [1, 1, 1]} : vector<10x34x72xbf16> to vector<8x32x72xbf16>
    %57 = vector.shape_cast %56 : vector<8x32x72xbf16> to vector<256x72xbf16>
    %c8 = arith.constant 8 : index
    %c0_36 = arith.constant 0 : index
    %c0_37 = arith.constant 0 : index
    %58 = vector.load %arg5[%c8, %c0_36, %c0_37] : memref<9x72x64xbf16, #tpu.memory_space<vmem>>, vector<1x72x64xbf16>
    %59 = vector.shape_cast %58 : vector<1x72x64xbf16> to vector<72x64xbf16>
    %cst_38 = arith.constant dense<0.000000e+00> : vector<256x64xf32>
    %60 = tpu.matmul %57, %59, %cst_38 {dimension_numbers = #tpu.dot_dimension_numbers<[1], [0], [0], [1], [0, 0, 1, 1], [], []>} : vector<256x72xbf16>, vector<72x64xbf16>, vector<256x64xf32> -> vector<256x64xf32>
    %61 = arith.addf %55, %60 : vector<256x64xf32>
    %c0_39 = arith.constant 0 : index
    %c0_40 = arith.constant 0 : index
    %62 = vector.load %arg6[%c0_39, %c0_40] : memref<1x64xf32, #tpu.memory_space<vmem>>, vector<1x64xf32>
    %63 = vector.broadcast %62 : vector<1x64xf32> to vector<256x64xf32>
    %64 = arith.mulf %61, %63 : vector<256x64xf32>
    %c0_41 = arith.constant 0 : index
    %c0_42 = arith.constant 0 : index
    %65 = vector.load %arg7[%c0_41, %c0_42] : memref<1x64xf32, #tpu.memory_space<vmem>>, vector<1x64xf32>
    %66 = vector.broadcast %65 : vector<1x64xf32> to vector<256x64xf32>
    %67 = arith.addf %64, %66 : vector<256x64xf32>
    %cst_43 = arith.constant 0.000000e+00 : f32
    %68 = vector.broadcast %cst_43 : f32 to vector<256x64xf32>
    %69 = arith.maximumf %67, %68 : vector<256x64xf32>
    %70 = arith.truncf %69 : vector<256x64xf32> to vector<256x64xbf16>
    %c0_44 = arith.constant 0 : index
    %c0_45 = arith.constant 0 : index
    %71 = vector.load %arg8[%c0_44, %c0_45] : memref<64x19xbf16, #tpu.memory_space<vmem>>, vector<64x19xbf16>
    %cst_46 = arith.constant dense<0.000000e+00> : vector<256x19xf32>
    %72 = tpu.matmul %70, %71, %cst_46 {dimension_numbers = #tpu.dot_dimension_numbers<[1], [0], [0], [1], [0, 0, 1, 1], [], []>} : vector<256x64xbf16>, vector<64x19xbf16>, vector<256x19xf32> -> vector<256x19xf32>
    %c0_47 = arith.constant 0 : index
    %c0_48 = arith.constant 0 : index
    %73 = vector.load %arg9[%c0_47, %c0_48] : memref<1x19xf32, #tpu.memory_space<vmem>>, vector<1x19xf32>
    %74 = vector.broadcast %73 : vector<1x19xf32> to vector<256x19xf32>
    %75 = arith.addf %72, %74 : vector<256x19xf32>
    %76 = vector.shape_cast %75 : vector<256x19xf32> to vector<8x32x19xf32>
    %c0_49 = arith.constant 0 : index
    %c0_50 = arith.constant 0 : index
    %c0_51 = arith.constant 0 : index
    %c0_52 = arith.constant 0 : index
    %77 = vector.load %arg10[%c0_49, %c0_50, %c0_51, %c0_52] : memref<1x8x32x19xf32, #tpu.memory_space<vmem>>, vector<1x8x32x19xf32>
    %78 = vector.shape_cast %77 : vector<1x8x32x19xf32> to vector<8x32x19xf32>
    %79 = vector.shape_cast %76 : vector<8x32x19xf32> to vector<1x8x32x19xf32>
    tpu.vector_store %arg10[%c0_49, %c0_50, %c0_51, %c0_52], %79 {strides = array<i32>} : memref<1x8x32x19xf32, #tpu.memory_space<vmem>>, vector<1x8x32x19xf32>,
    return
  }
  func.func @transform_0(%arg0: i32, %arg1: i32) -> (i32, i32, i32, i32) {
    %c0_i32 = arith.constant 0 : i32
    %c0_i32_0 = arith.constant 0 : i32
    %c0_i32_1 = arith.constant 0 : i32
    return %arg0, %arg1, %c0_i32, %c0_i32_0 : i32, i32, i32, i32
  }
  func.func @transform_1(%arg0: i32, %arg1: i32) -> (i32, i32, i32, i32) {
    %c8_i32 = arith.constant 8 : i32
    %0 = arith.muli %arg1, %c8_i32 : i32
    %c8_i32_0 = arith.constant 8 : i32
    %1 = arith.addi %0, %c8_i32_0 : i32
    %c0_i32 = arith.constant 0 : i32
    %c0_i32_1 = arith.constant 0 : i32
    %c0_i32_2 = arith.constant 0 : i32
    return %arg0, %1, %c0_i32, %c0_i32_1 : i32, i32, i32, i32
  }
  func.func @transform_2(%arg0: i32, %arg1: i32) -> (i32, i32, i32, i32) {
    %c8_i32 = arith.constant 8 : i32
    %0 = arith.muli %arg1, %c8_i32 : i32
    %c8_i32_0 = arith.constant 8 : i32
    %1 = arith.addi %0, %c8_i32_0 : i32
    %c1_i32 = arith.constant 1 : i32
    %2 = arith.addi %1, %c1_i32 : i32
    %c0_i32 = arith.constant 0 : i32
    %c0_i32_1 = arith.constant 0 : i32
    %c0_i32_2 = arith.constant 0 : i32
    return %arg0, %2, %c0_i32, %c0_i32_1 : i32, i32, i32, i32
  }
  func.func @transform_3(%arg0: i32, %arg1: i32) -> (i32, i32, i32) {
    %c0_i32 = arith.constant 0 : i32
    %c0_i32_0 = arith.constant 0 : i32
    %c0_i32_1 = arith.constant 0 : i32
    %c0_i32_2 = arith.constant 0 : i32
    return %c0_i32, %c0_i32_0, %c0_i32_1 : i32, i32, i32
  }
  func.func @transform_4(%arg0: i32, %arg1: i32) -> (i32, i32) {
    %c0_i32 = arith.constant 0 : i32
    %c0_i32_0 = arith.constant 0 : i32
    %c0_i32_1 = arith.constant 0 : i32
    return %c0_i32, %c0_i32_0 : i32, i32
  }
  func.func @transform_5(%arg0: i32, %arg1: i32) -> (i32, i32) {
    %c0_i32 = arith.constant 0 : i32
    %c0_i32_0 = arith.constant 0 : i32
    %c0_i32_1 = arith.constant 0 : i32
    return %c0_i32, %c0_i32_0 : i32, i32
  }
  func.func @transform_6(%arg0: i32, %arg1: i32) -> (i32, i32) {
    %c0_i32 = arith.constant 0 : i32
    %c0_i32_0 = arith.constant 0 : i32
    %c0_i32_1 = arith.constant 0 : i32
    return %c0_i32, %c0_i32_0 : i32, i32
  }
  func.func @transform_7(%arg0: i32, %arg1: i32) -> (i32, i32) {
    %c0_i32 = arith.constant 0 : i32
    %c0_i32_0 = arith.constant 0 : i32
    %c0_i32_1 = arith.constant 0 : i32
    return %c0_i32, %c0_i32_0 : i32, i32
  }
  func.func @transform_8(%arg0: i32, %arg1: i32) -> (i32, i32, i32, i32) {
    %c0_i32 = arith.constant 0 : i32
    %c0_i32_0 = arith.constant 0 : i32
    %c0_i32_1 = arith.constant 0 : i32
    return %arg0, %arg1, %c0_i32, %c0_i32_0 : i32, i32, i32, i32
  }
}

</mosaic_0001>

<bundles_post_ra>
// kernel: exp2_decoder26_forward.4
= control target key start
LH: loop header
LB: loop body
LE: loop exit
PB: predicated region body
PF: predicated region fallthrough
CT: control target
= control target key end

     0   :  { %s1772_s30 = smov 0   ;;  %s2114_s0 = inlined_call_operand.vmem [shape: bf16[2,8,8,64], index: 0, kind: input, shape index: {}]   ;;  %s2115_s1 = inlined_call_operand.vmem [shape: bf16[2,16,16,48], index: 1, kind: input, shape index: {}]   ;;  %s2116_s2 = inlined_call_operand.vmem [shape: bf16[64,128], index: 2, kind: input, shape index: {}]   ;;  %s2117_s3 = inlined_call_operand.vmem [shape: f32[1,128], index: 3, kind: input, shape index: {}]   ;;  %s2118_s4 = inlined_call_operand.vmem [shape: f32[1,128], index: 4, kind: input, shape index: {}]   ;;  %s2119_s5 = inlined_call_operand.vmem [shape: bf16[48,128], index: 5, kind: input, shape index: {}]   ;;  %s2120_s6 = inlined_call_operand.vmem [shape: f32[1,128], index: 6, kind: input, shape index: {}]   ;;  %s2121_s7 = inlined_call_operand.vmem [shape: f32[1,128], index: 7, kind: input, shape index: {}]   ;;  %s2122_s8 = inlined_call_operand.vmem [shape: f32[128,64], index: 8, kind: input, shape index: {}]   ;;  %s2123_s9 = inlined_call_operand.vmem [shape: bf16[2,16,16,128], index: 9, kind: output, shape index: {}]  }
   0x1 LB: > { %s1331_s10 = sadd.s32 4294967295, %s1720_s30   ;;  %p1335_p0 = scmp.ge.s32.totalorder %s1720_s30, 1  ;;  %s1720_s30 = sphi %s1772_s30, %s19_s30  }
   0x2   : > { %p297_p1 = scmp.lt.s32.totalorder %s1720_s30, 3 }
   0x4   : > { %p298_p2 = pnand %p1335_p0, %p297_p1 }
   0x5   : > { %p338_p3 = scmp.lt.s32.totalorder (!%p298_p2), %s1331_s10, 1 }
   0x6   : > { %301 = sbr.rel (%p298_p2) target bundleno = 484 (0x1e4), region = 56 }
   0xb   : > { %v1558_v0 = vld [vmem:[%s2116_s2 + $0x18] sm:$0xff]  ;;  %v1557_v1 = vld [vmem:[%s2116_s2 + $0x10] sm:$0xff]  ;;  %s2125_s10 = smov (!%p338_p3, %s1331_s10), 1  ;;  %v1556_v2 = vld [vmem:[%s2116_s2 + $0x8] sm:$0xff]  ;;  %vm414_vm0 = vcmask 523264   ;;  %vm602_vm1 = vcmask 392192  }
   0xc   : > { %431 = vmatpush.bf16.msra.mxu0 %v1558_v0  ;;  %s1548_s17 = sshll.u32 %s2125_s10, 5  ;;  %v1555_v3 = vld [vmem:[%s2116_s2] sm:$0xff]  ;;  %v1569_v8 = vld [vmem:[%s2119_s5 + $0x10] sm:$0xff]  ;;  %v1568_v9 = vld [vmem:[%s2119_s5 + $0x8] sm:$0xff]  ;;  %s1549_s27 = sshll.u32 %s2125_s10, 7 }
   0xd   : > { %s342_s22 = scalar_lea.vmem %s2114_s0, %s1548_s17  ;;  %632 = vmatpush.bf16.msra.mxu1 %v1569_v8  ;;  %s1814_s11 = scalar_lea.vmem %s2115_s1, %s1549_s27  ;;  %v1567_v10 = vld [vmem:[%s2119_s5] sm:$0xff]  ;;  %v1580_v11 = vld [vmem:[%s2119_s5 + $0x10] sm:$0xff]  ;;  %v1579_v13 = vld [vmem:[%s2119_s5 + $0x8] sm:$0xff] }
   0xe   : > { %v1551_v4 = vld [vmem:[%s342_s22] sm:$0xff]  ;;  %v1552_v5 = vld [vmem:[%s342_s22 + $0x8] sm:$0xff]  ;;  %v1553_v6 = vld [vmem:[%s342_s22 + $0x10] sm:$0xff]  ;;  %1018 = vmatpush.bf16.msra.mxu3 %v1580_v11 }
   0xf   : > { %v1554_v7 = vld [vmem:[%s342_s22 + $0x18] sm:$0xff]  ;;  %v1559_v12 = vld [vmem:[%s1814_s11] sm:$0xff]  ;;  %v1560_v16 = vld [vmem:[%s1814_s11 + $0x8] sm:$0xff] }
  0x10   : > { %432 = vmatpush.bf16.msra.mxu0 %v1557_v1  ;;  %v1578_v14 = vld [vmem:[%s2119_s5] sm:$0xff]  ;;  %v1571_v18 = vld [vmem:[%s1814_s11 + $0x48] sm:$0xff]  ;;  %v1561_v20 = vld [vmem:[%s1814_s11 + $0x10] sm:$0xff] }
  0x11   : > { %633 = vmatpush.bf16.msra.mxu1 %v1568_v9  ;;  %v1570_v15 = vld [vmem:[%s1814_s11 + $0x40] sm:$0xff]  ;;  %v1572_v22 = vld [vmem:[%s1814_s11 + $0x50] sm:$0xff]  ;;  %v1562_v28 = vld [vmem:[%s1814_s11 + $0x18] sm:$0xff] }
  0x12   : > { %1019 = vmatpush.bf16.msra.mxu3 %v1579_v13  ;;  %v1708_v24 = vld [vmem:[%s2117_s3] ss:$0 sm:$0xff]  ;;  %v1573_v44 = vld [vmem:[%s1814_s11 + $0x58] sm:$0xff] }
  0x13   : > { %v1709_v26 = vld [vmem:[%s2118_s4] ss:$0 sm:$0xff] }
  0x14   : > { %433 = vmatpush.bf16.msra.mxu0 %v1556_v2  ;;  %v1563_v54 = vld [vmem:[%s1814_s11 + $0x20] sm:$0xff] }
  0x15   : > { %634 = vmatpush.bf16.msra.mxu1 %v1567_v10 }
  0x16   : > { %1020 = vmatpush.bf16.msra.mxu3 %v1578_v14 }
  0x18   : > { %434 = vmatpush.bf16.msra.mxu0 %v1555_v3  ;;  %1422 = vmatmul.msk.bf16.vlgmr.msra.gmra.mxu1 %vm602_vm1, %v1559_v12  ;;  %v1866_v3 = vld [vmem:[%s2122_s8] sm:$0xff]  ;;  %v1564_v12 = vld [vmem:[%s1814_s11 + $0x28] sm:$0xff] }
  0x19   : > { %1506 = vmatmul.msk.bf16.vlgmr.msra.gmra.mxu3 %vm602_vm1, %v1570_v15 }
  0x1b   : > { %1374 = vmatmul.msk.bf16.vlgmr.msra.gmra.mxu0 %vm414_vm0, %v1551_v4 }
  0x28   : > { %1423 = vmatmul.msk.bf16.gmra.mxu1 %vm602_vm1, %v1560_v16  ;;  %v507_v16 = vld [vmem:[%s2122_s8 + $0x8] sm:$0xff] }
  0x29   : > { %1507 = vmatmul.msk.bf16.gmra.mxu3 %vm602_vm1, %v1571_v18 }
  0x2b   : > { %1375 = vmatmul.msk.bf16.gmra.mxu0 %vm414_vm0, %v1552_v5  ;;  %v1574_v5 = vld [vmem:[%s1814_s11 + $0x60] sm:$0xff] }
  0x38   : > { %1424 = vmatmul.msk.bf16.gmra.mxu1 %vm602_vm1, %v1561_v20 }
  0x39   : > { %1508 = vmatmul.msk.bf16.gmra.mxu3 %vm602_vm1, %v1572_v22 }
  0x3b   : > { %1376 = vmatmul.msk.bf16.gmra.mxu0 %vm414_vm0, %v1553_v6 }
  0x48   : > { %1425 = vmatmul.msk.bf16.gmra.mxu1 %vm602_vm1, %v1562_v28 }
  0x49   : > { %1509 = vmatmul.msk.bf16.gmra.mxu3 %vm602_vm1, %v1573_v44  ;;  %v515_v44 = vld [vmem:[%s2122_s8 + $0x48] sm:$0xff] }
  0x4b   : > { %1377 = vmatmul.msk.bf16.gmra.mxu0 %vm414_vm0, %v1554_v7 }
  0x58   : > { %1426 = vmatmul.msk.bf16.gmra.mxu1 %vm602_vm1, %v1563_v54 }
  0x59   : > { %1510 = vmatmul.msk.bf16.gmra.mxu3 %vm602_vm1, %v1574_v5 }
  0x68   : > { %1427 = vmatmul.msk.bf16.gmra.mxu1 %vm602_vm1, %v1564_v12 }
  0x98   : > { %v436_v17 = vpop.f32.mrf.mxu0 }
  0x99   : > { %v460_v36 = vmul.f32 %v1708_v24, %v436_v17 }
  0x9b   : > { %v472_v42 = vadd.f32 %v1709_v26, %v460_v36  ;;  %v1576_v36 = vld [vmem:[%s1814_s11 + $0x70] sm:$0xff] }
  0x9d   : > { %v480_v51 = vmax.f32 %v472_v42, 0.0  ;;  %v514_v42 = vld [vmem:[%s2122_s8 + $0x40] sm:$0xff] }
  0x9f   : > { %v493_v59 = vmul.f32 0.25, %v480_v51  ;;  %v490_v62 = vmul.f32 0.75, %v480_v51 }
  0xa0   : > { %v438_v19 = vpop.f32.mrf.mxu0 }
  0xa1   : > { %v461_v31 = vmul.f32 %v1708_v24, %v438_v19 }
  0xa3   : > { %v473_v37 = vadd.f32 %v1709_v26, %v461_v31  ;;  %v509_v31 = vld [vmem:[%s2122_s8 + $0x18] sm:$0xff] }
  0xa5   : > { %v481_v45 = vmax.f32 %v473_v37, 0.0  ;;  %v1566_v37 = vld [vmem:[%s1814_s11 + $0x38] sm:$0xff] }
  0xa7   : > { %v491_v53 = vmul.f32 0.25, %v481_v45  ;;  %v494_v56 = vmul.f32 0.75, %v481_v45  ;;  %v488_v63 = vmul.f32 0.0, %v481_v45  ;;  %v519_v45 = vld [vmem:[%s2122_s8 + $0x68] sm:$0xff] }
  0xa8   : > { %v441_v21 = vpop.f32.mrf.mxu0 }
  0xa9   : > { %v462_v27 = vmul.f32 %v1708_v24, %v441_v21  ;;  %v495_v61 = vadd.f32 %v494_v56, %v493_v59  ;;  %v492_v0 = vadd.f32 %v491_v53, %v490_v62  ;;  %v489_v2 = vadd.f32 %v488_v63, %v480_v51  ;;  %v636_v51 = vpop.f32.mrf.mxu1  ;;  %v1984_v63 = vld [vmem:[%s2121_s7] ss:$0 sm:$0xff] }
  0xab   : > { %v474_v32 = vadd.f32 %v1709_v26, %v462_v27 }
  0xad   : > { %v482_v38 = vmax.f32 %v474_v32, 0.0  ;;  %v1575_v32 = vld [vmem:[%s1814_s11 + $0x68] sm:$0xff] }
  0xae   : > { %1511 = vmatmul.msk.bf16.gmra.mxu3 %vm602_vm1, %v1575_v32 }
  0xaf   : > { %v496_v47 = vmul.f32 0.25, %v482_v38  ;;  %v498_v50 = vmul.f32 0.75, %v482_v38  ;;  %v512_v38 = vld [vmem:[%s2122_s8 + $0x30] sm:$0xff] }
  0xb0   : > { %v443_v23 = vpop.f32.mrf.mxu0 }
  0xb1   : > { %v463_v25 = vmul.f32 %v1708_v24, %v443_v23  ;;  %v499_v55 = vadd.f32 %v498_v50, %v491_v53  ;;  %v497_v58 = vadd.f32 %v496_v47, %v494_v56  ;;  %v518_v53 = vld [vmem:[%s2122_s8 + $0x60] sm:$0xff] }
  0xb3   : > { %v475_v29 = vadd.f32 %v1709_v26, %v463_v25  ;;  %v508_v25 = vld [vmem:[%s2122_s8 + $0x10] sm:$0xff] }
  0xb5   : > { %v483_v34 = vmax.f32 %v475_v29, 0.0 }
  0xb7   : > { %v502_v40 = vmul.f32 0.75, %v483_v34  ;;  %v1857_v48 = vmul.f32 0.25, %v483_v34  ;;  %v510_v34 = vld [vmem:[%s2122_s8 + $0x20] sm:$0xff] }
  0xb8   : > { %v446_v30 = vpop.f32.mrf.mxu0 }
  0xb9   : > { %v464_v33 = vmul.f32 %v1708_v24, %v446_v30  ;;  %v503_v49 = vadd.f32 %v502_v40, %v496_v47  ;;  %v501_v52 = vadd.f32 %v1857_v48, %v498_v50  ;;  %v520_v47 = vld [vmem:[%s2122_s8 + $0x70] sm:$0xff]  ;;  %v521_v50 = vld [vmem:[%s2122_s8 + $0x78] sm:$0xff] }
  0xbb   : > { %v1848_v35 = vadd.f32 %v1709_v26, %v464_v33  ;;  %v1565_v33 = vld [vmem:[%s1814_s11 + $0x30] sm:$0xff] }
  0xbc   : > { %1428 = vmatmul.msk.bf16.gmra.mxu1 %vm602_vm1, %v1565_v33 }
  0xbd   : > { %v484_v39 = vmax.f32 %v1848_v35, 0.0  ;;  %v511_v35 = vld [vmem:[%s2122_s8 + $0x28] sm:$0xff] }
  0xbe   : > { %1512 = vmatmul.msk.bf16.gmra.mxu3 %vm602_vm1, %v1576_v36 }
  0xbf   : > { %v1853_v41 = vmul.f32 0.25, %v484_v39  ;;  %v877_v27 = vmul.f32 0.75, %v484_v39  ;;  %v513_v39 = vld [vmem:[%s2122_s8 + $0x38] sm:$0xff] }
  0xc0   : > { %v448_v43 = vpop.f32.mrf.mxu0 }
  0xc1   : > { %v505_v46 = vadd.f32 %v1853_v41, %v502_v40  ;;  %v465_v6 = vmul.f32 %v1708_v24, %v448_v43  ;;  %v878_v30 = vadd.f32 %v877_v27, %v1857_v48  ;;  %v1577_v40 = vld [vmem:[%s1814_s11 + $0x78] sm:$0xff]  ;;  %v1022_v43 = vpop.f32.mrf.mxu3  ;;  %s1998_s11 = scalar_lea.vmem %s2123_s9, %s1549_s27 }
  0xc3   : > { %788 = vmatpush.msra.mxu2 %v505_v46  ;;  %v477_v10 = vadd.f32 %v1709_v26, %v465_v6 }
  0xc5   : > { %789 = vmatpush.msra.mxu2 %v503_v49  ;;  %v485_v17 = vmax.f32 %v477_v10, 0.0  ;;  %v517_v49 = vld [vmem:[%s2122_s8 + $0x58] sm:$0xff] }
  0xc7   : > { %790 = vmatpush.msra.mxu2 %v501_v52  ;;  %v879_v22 = vmul.f32 0.25, %v485_v17  ;;  %v881_v23 = vmul.f32 0.75, %v485_v17 }
  0xc8   : > { %v451_v57 = vpop.f32.mrf.mxu0 }
  0xc9   : > { %791 = vmatpush.msra.mxu2 %v499_v55  ;;  %v466_v60 = vmul.f32 %v1708_v24, %v451_v57  ;;  %v882_v28 = vadd.f32 %v881_v23, %v1853_v41  ;;  %v880_v29 = vadd.f32 %v879_v22, %v877_v27  ;;  %v516_v41 = vld [vmem:[%s2122_s8 + $0x50] sm:$0xff]  ;;  %v1024_v46 = vpop.f32.mrf.mxu3  ;;  %v638_v55 = vpop.f32.mrf.mxu1 }
  0xcb   : > { %792 = vmatpush.msra.mxu2 %v497_v58  ;;  %v478_v1 = vadd.f32 %v1709_v26, %v466_v60  ;;  %v1976_v60 = vld [vmem:[%s2120_s6] ss:$0 sm:$0xff] }
  0xcc   : > { %1429 = vmatmul.msk.bf16.gmra.mxu1 %vm602_vm1, %v1566_v37  ;;  %v680_v62 = vmul.f32 %v1976_v60, %v636_v51 }
  0xcd   : > { %793 = vmatpush.msra.mxu2 %v495_v61  ;;  %v486_v8 = vmax.f32 %v478_v1, 0.0 }
  0xce   : > { %1513 = vmatmul.msk.bf16.gmra.mxu3 %vm602_vm1, %v1577_v40 }
  0xcf   : > { %794 = vmatpush.msra.mxu2 %v492_v0  ;;  %v883_v13 = vmul.f32 0.25, %v486_v8  ;;  %v885_v18 = vmul.f32 0.75, %v486_v8  ;;  %v681_v0 = vmul.f32 %v1976_v60, %v638_v55 }
  0xd0   : > { %v453_v4 = vpop.f32.mrf.mxu0 }
  0xd1   : > { %v467_v7 = vmul.f32 %v1708_v24, %v453_v4  ;;  %795 = vmatpush.msra.mxu2 %v489_v2  ;;  %v886_v24 = vadd.f32 %v885_v18, %v879_v22  ;;  %v1946_v48 = vpop.f32.mrf.mxu3  ;;  %v641_v57 = vpop.f32.mrf.mxu1  ;;  %v701_v4 = vadd.f32 %v1984_v63, %v681_v0 }
  0xd2   : > { %1430 = vmatmul.msk.f32.vlgmr.msra.gmra.mxu2 %vm414_vm0, %v1866_v3 }
  0xd3   : > { %v479_v9 = vadd.f32 %v1709_v26, %v467_v7  ;;  %v884_v26 = vadd.f32 %v883_v13, %v881_v23  ;;  %v717_v6 = vmax.f32 %v701_v4, 0.0 }
  0xd5   : > { %v487_v11 = vmax.f32 %v479_v9, 0.0 }
  0xd7   : > { %v887_v14 = vmul.f32 0.25, %v487_v11  ;;  %v889_v15 = vmul.f32 0.75, %v487_v11 }
  0xd9   : > { %v890_v19 = vadd.f32 %v889_v15, %v883_v13  ;;  %v891_v20 = vadd.f32 %v889_v15, %v887_v14  ;;  %v888_v21 = vadd.f32 %v887_v14, %v885_v18  ;;  %v1957_v52 = vpop.f32.mrf.mxu3  ;;  %v643_v59 = vpop.f32.mrf.mxu1  ;;  %v682_v13 = vmul.f32 %v1976_v60, %v641_v57  ;;  %v2006_v15 = vld [vmem:[%s2120_s6] ss:$0 sm:$0xff] }
  0xda   : > { %1431 = vmatmul.msk.f32.gmra.mxu2 %vm414_vm0, %v507_v16  ;;  %v683_v14 = vmul.f32 %v1976_v60, %v643_v59  ;;  %v1067_v22 = vmul.f32 %v2006_v15, %v1024_v46 }
  0xdb   : > { %1174 = vmatpush.msrb.mxu0 %v891_v20  ;;  %1676 = vmatpush.msrb.mxu1 %v891_v20  ;;  %v702_v18 = vadd.f32 %v1984_v63, %v682_v13 }
  0xdc   : > { %1677 = vmatpush.msrb.mxu2 %v891_v20  ;;  %1678 = vmatpush.msrb.mxu3 %v891_v20  ;;  %v1066_v20 = vmul.f32 %v2006_v15, %v1022_v43 }
  0xdd   : > { %1175 = vmatpush.msrb.mxu0 %v890_v19  ;;  %1679 = vmatpush.msrb.mxu1 %v890_v19 }
  0xde   : > { %1680 = vmatpush.msrb.mxu2 %v890_v19  ;;  %1681 = vmatpush.msrb.mxu3 %v890_v19  ;;  %v703_v19 = vadd.f32 %v1984_v63, %v683_v14 }
  0xdf   : > { %1176 = vmatpush.msrb.mxu0 %v888_v21  ;;  %1682 = vmatpush.msrb.mxu1 %v888_v21 }
  0xe0   : > { %1683 = vmatpush.msrb.mxu2 %v888_v21  ;;  %1684 = vmatpush.msrb.mxu3 %v888_v21  ;;  %v2016_v21 = vld [vmem:[%s2121_s7] ss:$0 sm:$0xff] }
  0xe1   : > { %1177 = vmatpush.msrb.mxu0 %v886_v24  ;;  %1685 = vmatpush.msrb.mxu1 %v886_v24  ;;  %v1964_v54 = vpop.f32.mrf.mxu3  ;;  %v646_v1 = vpop.f32.mrf.mxu1  ;;  %v1086_v27 = vadd.f32 %v2016_v21, %v1066_v20 }
  0xe2   : > { %1686 = vmatpush.msrb.mxu2 %v886_v24  ;;  %1687 = vmatpush.msrb.mxu3 %v886_v24  ;;  %v684_v40 = vmul.f32 %v1976_v60, %v646_v1 }
  0xe3   : > { %1432 = vmatmul.msk.f32.gmra.mxu2 %vm414_vm0, %v508_v25  ;;  %1178 = vmatpush.msrb.mxu0 %v884_v26  ;;  %v1102_v33 = vmax.f32 %v1086_v27, 0.0 }
  0xe4   : > { %1688 = vmatpush.msrb.mxu1 %v884_v26  ;;  %1689 = vmatpush.msrb.mxu2 %v884_v26 }
  0xe5   : > { %1690 = vmatpush.msrb.mxu3 %v884_v26  ;;  %1179 = vmatpush.msrb.mxu0 %v882_v28  ;;  %v719_v26 = vmax.f32 %v703_v19, 0.0 }
  0xe6   : > { %1691 = vmatpush.msrb.mxu1 %v882_v28  ;;  %1692 = vmatpush.msrb.mxu2 %v882_v28 }
  0xe7   : > { %1693 = vmatpush.msrb.mxu3 %v882_v28  ;;  %1180 = vmatpush.msrb.mxu0 %v880_v29  ;;  %v1087_v28 = vadd.f32 %v2016_v21, %v1067_v22 }
  0xe8   : > { %1694 = vmatpush.msrb.mxu1 %v880_v29  ;;  %1695 = vmatpush.msrb.mxu2 %v880_v29 }
  0xe9   : > { %1696 = vmatpush.msrb.mxu3 %v880_v29  ;;  %1181 = vmatpush.msrb.mxu0 %v878_v30  ;;  %v1967_v56 = vpop.f32.mrf.mxu3  ;;  %v648_v10 = vpop.f32.mrf.mxu1 }
  0xea   : > { %1697 = vmatpush.msrb.mxu1 %v878_v30  ;;  %1698 = vmatpush.msrb.mxu2 %v878_v30  ;;  %v1071_v19 = vmul.f32 %v2006_v15, %v1967_v56 }
  0xeb   : > { %1699 = vmatpush.msrb.mxu3 %v878_v30  ;;  %1433 = vmatmul.msk.f32.gmra.mxu2 %vm414_vm0, %v509_v31 }
  0xec   : > { %1514 = vmatmul.msk.f32.vlgmr.msrb.gmra.mxu0 %vm414_vm0, %v1866_v3  ;;  %1524 = vmatmul.msk.f32.vlgmr.msrb.gmra.mxu1 %vm414_vm0, %v516_v41  ;;  %v700_v3 = vadd.f32 %v1984_v63, %v680_v62 }
  0xed   : > { %1527 = vmatmul.msk.f32.vlgmr.msrb.gmra.mxu3 %vm414_vm0, %v519_v45 }
  0xee   : > { %v716_v5 = vmax.f32 %v700_v3, 0.0 }
  0xf1   : > { %v1970_v58 = vpop.f32.mrf.mxu3  ;;  %v651_v23 = vpop.f32.mrf.mxu1 }
  0xf3   : > { %1434 = vmatmul.msk.f32.gmra.mxu2 %vm414_vm0, %v510_v34 }
  0xf4   : > { %1515 = vmatmul.msk.f32.gmra.mxu0 %vm414_vm0, %v507_v16 }
  0xf5   : > { %1528 = vmatmul.msk.f32.gmra.mxu3 %vm414_vm0, %v520_v47 }
  0xf9   : > { %v1978_v61 = vpop.f32.mrf.mxu3 }
  0xfb   : > { %1435 = vmatmul.msk.f32.gmra.mxu2 %vm414_vm0, %v511_v35 }
  0xfc   : > { %1516 = vmatmul.msk.f32.gmra.mxu0 %vm414_vm0, %v508_v25  ;;  %v718_v25 = vmax.f32 %v702_v18, 0.0  ;;  %v1070_v18 = vmul.f32 %v2006_v15, %v1964_v54 }
  0xfd   : > { %1529 = vmatmul.msk.f32.gmra.mxu3 %vm414_vm0, %v521_v50 }
 0x101   : > { %v1991_v7 = vpop.f32.mrf.mxu3 }
 0x103   : > { %1436 = vmatmul.msk.f32.gmra.mxu2 %vm414_vm0, %v512_v38 }
 0x104   : > { %1517 = vmatmul.msk.f32.gmra.mxu0 %vm414_vm0, %v509_v31 }
 0x109   : > { %v2008_v16 = vpop.f32.mrf.mxu3 }
 0x10b   : > { %1437 = vmatmul.msk.f32.gmra.mxu2 %vm414_vm0, %v513_v39 }
 0x10c   : > { %1518 = vmatmul.msk.f32.gmra.mxu0 %vm414_vm0, %v510_v34  ;;  %v1103_v34 = vmax.f32 %v1087_v28, 0.0 }
 0x113   : > { %1438 = vmatmul.msk.f32.gmra.mxu2 %vm414_vm0, %v514_v42 }
 0x114   : > { %1519 = vmatmul.msk.f32.gmra.mxu0 %vm414_vm0, %v511_v35 }
 0x11b   : > { %1439 = vmatmul.msk.f32.gmra.mxu2 %vm414_vm0, %v515_v44 }
 0x11c   : > { %1520 = vmatmul.msk.f32.gmra.mxu0 %vm414_vm0, %v512_v38  ;;  %v653_v38 = vpop.f32.mrf.mxu1 }
 0x123   : > { %1440 = vmatmul.msk.f32.gmra.mxu2 %vm414_vm0, %v516_v41  ;;  %v685_v41 = vmul.f32 %v1976_v60, %v648_v10 }
 0x124   : > { %1521 = vmatmul.msk.f32.gmra.mxu0 %vm414_vm0, %v513_v39  ;;  %v656_v59 = vpop.f32.mrf.mxu1 }
 0x12b   : > { %1441 = vmatmul.msk.f32.gmra.mxu2 %vm414_vm0, %v517_v49 }
 0x12c   : > { %1522 = vmatmul.msk.f32.gmra.mxu0 %vm414_vm0, %v514_v42 }
 0x131   : > { %v2021_v32 = vpop.f32.mrf.mxu3 }
 0x133   : > { %1442 = vmatmul.msk.f32.gmra.mxu2 %vm414_vm0, %v518_v53 }
 0x134   : > { %1523 = vmatmul.msk.f32.gmra.mxu0 %vm414_vm0, %v515_v44  ;;  %v704_v44 = vadd.f32 %v1984_v63, %v684_v40 }
 0x136   : > { %v720_v51 = vmax.f32 %v704_v44, 0.0  ;;  %v1073_v44 = vmul.f32 %v2006_v15, %v1978_v61 }
 0x139   : > { %v2029_v46 = vpop.f32.mrf.mxu3 }
 0x13b   : > { %1443 = vmatmul.msk.f32.gmra.mxu2 %vm414_vm0, %v519_v45  ;;  %v705_v45 = vadd.f32 %v1984_v63, %v685_v41 }
 0x143   : > { %1444 = vmatmul.msk.f32.gmra.mxu2 %vm414_vm0, %v520_v47  ;;  %v1068_v47 = vmul.f32 %v2006_v15, %v1946_v48 }
 0x145   : > { %v1088_v55 = vadd.f32 %v2016_v21, %v1068_v47 }
 0x147   : > { %v1104_v3 = vmax.f32 %v1088_v55, 0.0 }
 0x14b   : > { %1445 = vmatmul.msk.f32.gmra.mxu2 %vm414_vm0, %v521_v50 }
 0x153   : > { %1525 = vmatmul.msk.f32.vlgmr.msrb.gmra.mxu2 %vm414_vm0, %v517_v49  ;;  %v1069_v49 = vmul.f32 %v2006_v15, %v1957_v52 }
 0x155   : > { %v797_v2 = vpop.f32.mrf.mxu2  ;;  %v1089_v57 = vadd.f32 %v2016_v21, %v1069_v49 }
 0x156   : > { %v798_v9 = vadd.f32 %v797_v2, %v716_v5  ;;  %v2037_v2 = vpop.f32.mrf.mxu3 }
 0x157   : > { %v1105_v48 = vmax.f32 %v1089_v57, 0.0 }
 0x15b   : > { %1526 = vmatmul.msk.f32.gmra.mxu2 %vm414_vm0, %v518_v53  ;;  %v721_v53 = vmax.f32 %v705_v45, 0.0 }
 0x15d   : > { %v800_v8 = vpop.f32.mrf.mxu2 }
 0x15e   : > { %v801_v11 = vadd.f32 %v800_v8, %v717_v6  ;;  %v686_v8 = vmul.f32 %v1976_v60, %v651_v23 }
 0x160   : > { %v1584_v12 = vpack.c.bf16 %v801_v11, %v798_v9  ;;  %v687_v9 = vmul.f32 %v1976_v60, %v653_v38  ;;  %v658_v11 = vpop.f32.mrf.mxu1  ;;  %v706_v13 = vadd.f32 %v1984_v63, %v686_v8 }
 0x162   : > { %1585 = vst [vmem:[%s1998_s11] sm:$0xff] %v1584_v12   ;;  %v707_v14 = vadd.f32 %v1984_v63, %v687_v9  ;;  %v722_v22 = vmax.f32 %v706_v13, 0.0 }
 0x164   : > { %v723_v23 = vmax.f32 %v707_v14, 0.0 }
 0x166   : > { %v803_v17 = vpop.f32.mrf.mxu2 }
 0x167   : > { %v804_v30 = vadd.f32 %v803_v17, %v718_v25  ;;  %v2045_v17 = vpop.f32.mrf.mxu3  ;;  %v1091_v25 = vadd.f32 %v2016_v21, %v1071_v19  ;;  %v1075_v19 = vmul.f32 %v2006_v15, %v2008_v16 }
 0x169   : > { %v1183_v24 = vpop.f32.mrf.mxu0 }
 0x16a   : > { %v1184_v37 = vadd.f32 %v1183_v24, %v1102_v33  ;;  %v1090_v24 = vadd.f32 %v2016_v21, %v1070_v18  ;;  %v1107_v33 = vmax.f32 %v1091_v25, 0.0  ;;  %v1074_v18 = vmul.f32 %v2006_v15, %v1991_v7 }
 0x16e   : > { %v806_v29 = vpop.f32.mrf.mxu2 }
 0x16f   : > { %v807_v31 = vadd.f32 %v806_v29, %v719_v26  ;;  %v1057_v29 = vpop.f32.mrf.mxu3 }
 0x171   : > { %v1589_v35 = vpack.c.bf16 %v807_v31, %v804_v30  ;;  %v1186_v36 = vpop.f32.mrf.mxu0  ;;  %v661_v30 = vpop.f32.mrf.mxu1  ;;  %v1106_v31 = vmax.f32 %v1090_v24, 0.0 }
 0x172   : > { %v1187_v39 = vadd.f32 %v1186_v36, %v1103_v34  ;;  %v688_v36 = vmul.f32 %v1976_v60, %v656_v59 }
 0x173   : > { %1661 = vst [vmem:[%s1998_s11 + $0x8] sm:$0xff] %v1589_v35  }
 0x174   : > { %v1624_v42 = vpack.c.bf16 %v1187_v39, %v1184_v37  ;;  %v689_v37 = vmul.f32 %v1976_v60, %v658_v11  ;;  %v708_v40 = vadd.f32 %v1984_v63, %v688_v36 }
 0x176   : > { %1668 = vst [vmem:[%s1998_s11 + $0x40] sm:$0xff] %v1624_v42   ;;  %v809_v43 = vpop.f32.mrf.mxu2  ;;  %v709_v41 = vadd.f32 %v1984_v63, %v689_v37  ;;  %v724_v49 = vmax.f32 %v708_v40, 0.0 }
 0x177   : > { %v810_v0 = vadd.f32 %v809_v43, %v720_v51  ;;  %v1059_v42 = vpop.f32.mrf.mxu3  ;;  %v1072_v43 = vmul.f32 %v2006_v15, %v1970_v58 }
 0x178   : > { %v1081_v9 = vmul.f32 %v2006_v15, %v1059_v42 }
 0x179   : > { %v1189_v50 = vpop.f32.mrf.mxu0  ;;  %v663_v47 = vpop.f32.mrf.mxu1  ;;  %v1092_v51 = vadd.f32 %v2016_v21, %v1072_v43 }
 0x17a   : > { %v1190_v52 = vadd.f32 %v1189_v50, %v1104_v3  ;;  %v725_v50 = vmax.f32 %v709_v41, 0.0 }
 0x17e   : > { %v812_v62 = vpop.f32.mrf.mxu2 }
 0x17f   : > { %v813_v1 = vadd.f32 %v812_v62, %v721_v53  ;;  %v1093_v53 = vadd.f32 %v2016_v21, %v1073_v44  ;;  %v2065_v62 = vpop.f32.mrf.mxu3 }
 0x181   : > { %v1594_v4 = vpack.c.bf16 %v813_v1, %v810_v0  ;;  %v1192_v5 = vpop.f32.mrf.mxu0  ;;  %v1108_v0 = vmax.f32 %v1092_v51, 0.0  ;;  %v1109_v58 = vmax.f32 %v1093_v53, 0.0 }
 0x182   : > { %v1193_v6 = vadd.f32 %v1192_v5, %v1105_v48  ;;  %v690_v5 = vmul.f32 %v1976_v60, %v661_v30 }
 0x183   : > { %1662 = vst [vmem:[%s1998_s11 + $0x10] sm:$0xff] %v1594_v4   ;;  %v1080_v4 = vmul.f32 %v2006_v15, %v1057_v29 }
 0x184   : > { %v1629_v10 = vpack.c.bf16 %v1193_v6, %v1190_v52  ;;  %v691_v52 = vmul.f32 %v1976_v60, %v663_v47  ;;  %v666_v6 = vpop.f32.mrf.mxu1 }
 0x185   : > { %v1100_v11 = vadd.f32 %v2016_v21, %v1080_v4  ;;  %v692_v40 = vmul.f32 %v1976_v60, %v666_v6 }
 0x186   : > { %1669 = vst [vmem:[%s1998_s11 + $0x48] sm:$0xff] %v1629_v10   ;;  %v815_v12 = vpop.f32.mrf.mxu2  ;;  %v711_v13 = vadd.f32 %v1984_v63, %v691_v52  ;;  %v1077_v52 = vmul.f32 %v2006_v15, %v2029_v46 }
 0x187   : > { %v816_v27 = vadd.f32 %v815_v12, %v722_v22  ;;  %v710_v12 = vadd.f32 %v1984_v63, %v690_v5  ;;  %v1225_v14 = vpop.f32.mrf.mxu3  ;;  %v712_v44 = vadd.f32 %v1984_v63, %v692_v40 }
 0x188   : > { %v727_v25 = vmax.f32 %v711_v13, 0.0  ;;  %v1078_v13 = vmul.f32 %v2006_v15, %v2037_v2 }
 0x189   : > { %v1195_v20 = vpop.f32.mrf.mxu0  ;;  %v726_v24 = vmax.f32 %v710_v12, 0.0 }
 0x18a   : > { %v1196_v35 = vadd.f32 %v1195_v20, %v1106_v31  ;;  %v1101_v20 = vadd.f32 %v2016_v21, %v1081_v9 }
 0x18c   : > { %v668_v29 = vpop.f32.mrf.mxu1 }
 0x18d   : > { %v693_v41 = vmul.f32 %v1976_v60, %v668_v29 }
 0x18e   : > { %v818_v26 = vpop.f32.mrf.mxu2 }
 0x18f   : > { %v819_v28 = vadd.f32 %v818_v26, %v723_v23  ;;  %v1116_v23 = vmax.f32 %v1100_v11, 0.0  ;;  %v1094_v26 = vadd.f32 %v2016_v21, %v1074_v18  ;;  %v1228_v16 = vpop.f32.mrf.mxu3 }
 0x191   : > { %v1599_v54 = vpack.c.bf16 %v819_v28, %v816_v27  ;;  %v1198_v34 = vpop.f32.mrf.mxu0  ;;  %v1095_v27 = vadd.f32 %v2016_v21, %v1075_v19  ;;  %v1117_v28 = vmax.f32 %v1101_v20, 0.0  ;;  %v1226_v31 = vadd.f32 %v1225_v14, %v1116_v23 }
 0x192   : > { %v1199_v56 = vadd.f32 %v1198_v34, %v1107_v33 }
 0x193   : > { %1663 = vst [vmem:[%s1998_s11 + $0x18] sm:$0xff] %v1599_v54   ;;  %v1110_v54 = vmax.f32 %v1094_v26, 0.0  ;;  %v1111_v34 = vmax.f32 %v1095_v27, 0.0 }
 0x194   : > { %v1634_v38 = vpack.c.bf16 %v1199_v56, %v1196_v35  ;;  %v1229_v35 = vadd.f32 %v1228_v16, %v1117_v28  ;;  %v671_v47 = vpop.f32.mrf.mxu1 }
 0x196   : > { %1670 = vst [vmem:[%s1998_s11 + $0x50] sm:$0xff] %v1634_v38   ;;  %v821_v39 = vpop.f32.mrf.mxu2 }
 0x197   : > { %v822_v57 = vadd.f32 %v821_v39, %v724_v49  ;;  %v1659_v39 = vpack.c.bf16 %v1229_v35, %v1226_v31  ;;  %v728_v49 = vmax.f32 %v712_v44, 0.0 }
 0x199   : > { %v1201_v45 = vpop.f32.mrf.mxu0  ;;  %1675 = vst [vmem:[%s1998_s11 + $0x78] sm:$0xff] %v1659_v39  }
 0x19a   : > { %v1202_v61 = vadd.f32 %v1201_v45, %v1108_v0  ;;  %v713_v45 = vadd.f32 %v1984_v63, %v693_v41  ;;  %v694_v0 = vmul.f32 %v1976_v60, %v671_v47 }
 0x19e   : > { %v824_v55 = vpop.f32.mrf.mxu2 }
 0x19f   : > { %v825_v59 = vadd.f32 %v824_v55, %v725_v50  ;;  %v729_v50 = vmax.f32 %v713_v45, 0.0 }
 0x1a1   : > { %v1604_v1 = vpack.c.bf16 %v825_v59, %v822_v57  ;;  %v1204_v3 = vpop.f32.mrf.mxu0  ;;  %v673_v59 = vpop.f32.mrf.mxu1 }
 0x1a2   : > { %v1205_v48 = vadd.f32 %v1204_v3, %v1109_v58  ;;  %v695_v58 = vmul.f32 %v1976_v60, %v673_v59  ;;  %v714_v3 = vadd.f32 %v1984_v63, %v694_v0 }
 0x1a3   : > { %1664 = vst [vmem:[%s1998_s11 + $0x20] sm:$0xff] %v1604_v1  }
 0x1a4   : > { %v1639_v8 = vpack.c.bf16 %v1205_v48, %v1202_v61  ;;  %v715_v61 = vadd.f32 %v1984_v63, %v695_v58  ;;  %v1076_v48 = vmul.f32 %v2006_v15, %v2021_v32  ;;  %v730_v4 = vmax.f32 %v714_v3, 0.0 }
 0x1a5   : > { %v1079_v63 = vmul.f32 %v2006_v15, %v2045_v17 }
 0x1a6   : > { %1671 = vst [vmem:[%s1998_s11 + $0x58] sm:$0xff] %v1639_v8   ;;  %v827_v10 = vpop.f32.mrf.mxu2  ;;  %v731_v5 = vmax.f32 %v715_v61, 0.0  ;;  %v1096_v8 = vadd.f32 %v2016_v21, %v1076_v48 }
 0x1a7   : > { %v828_v7 = vadd.f32 %v827_v10, %v726_v24  ;;  %v1097_v10 = vadd.f32 %v2016_v21, %v1077_v52  ;;  %v1099_v18 = vadd.f32 %v2016_v21, %v1079_v63 }
 0x1a8   : > { %v1112_v12 = vmax.f32 %v1096_v8, 0.0 }
 0x1a9   : > { %v1207_v22 = vpop.f32.mrf.mxu0  ;;  %v1213_v32 = vpop.f32.mrf.mxu1  ;;  %v1113_v46 = vmax.f32 %v1097_v10, 0.0  ;;  %v1115_v24 = vmax.f32 %v1099_v18, 0.0 }
 0x1aa   : > { %v1208_v37 = vadd.f32 %v1207_v22, %v1110_v54  ;;  %v1214_v19 = vadd.f32 %v1213_v32, %v1112_v12  ;;  %v1098_v22 = vadd.f32 %v2016_v21, %v1078_v13 }
 0x1ab   : > { %v1223_v26 = vadd.f32 %v2065_v62, %v1115_v24 }
 0x1ae   : > { %v830_v30 = vpop.f32.mrf.mxu2 }
 0x1af   : > { %v831_v33 = vadd.f32 %v830_v30, %v727_v25  ;;  %v1114_v25 = vmax.f32 %v1098_v22, 0.0 }
 0x1b1   : > { %v1609_v56 = vpack.c.bf16 %v831_v33, %v828_v7  ;;  %v1210_v36 = vpop.f32.mrf.mxu0 }
 0x1b2   : > { %v1211_v38 = vadd.f32 %v1210_v36, %v1111_v34 }
 0x1b3   : > { %1665 = vst [vmem:[%s1998_s11 + $0x28] sm:$0xff] %v1609_v56  }
 0x1b4   : > { %v1644_v42 = vpack.c.bf16 %v1211_v38, %v1208_v37 }
 0x1b6   : > { %1672 = vst [vmem:[%s1998_s11 + $0x60] sm:$0xff] %v1644_v42   ;;  %v833_v43 = vpop.f32.mrf.mxu2 }
 0x1b7   : > { %v834_v53 = vadd.f32 %v833_v43, %v728_v49 }
 0x1be   : > { %v836_v51 = vpop.f32.mrf.mxu2 }
 0x1bf   : > { %v837_v55 = vadd.f32 %v836_v51, %v729_v50 }
 0x1c1   : > { %v1614_v57 = vpack.c.bf16 %v837_v55, %v834_v53 }
 0x1c3   : > { %1666 = vst [vmem:[%s1998_s11 + $0x30] sm:$0xff] %v1614_v57  }
 0x1c6   : > { %v839_v1 = vpop.f32.mrf.mxu2 }
 0x1c7   : > { %v840_v9 = vadd.f32 %v839_v1, %v730_v4 }
 0x1ce   : > { %v842_v6 = vpop.f32.mrf.mxu2 }
 0x1cf   : > { %v843_v60 = vadd.f32 %v842_v6, %v731_v5 }
 0x1d1   : > { %v1619_v11 = vpack.c.bf16 %v843_v60, %v840_v9 }
 0x1d3   : > { %1667 = vst [vmem:[%s1998_s11 + $0x38] sm:$0xff] %v1619_v11  }
 0x1d6   : > { %v1216_v14 = vpop.f32.mrf.mxu2 }
 0x1d7   : > { %v1217_v20 = vadd.f32 %v1216_v14, %v1113_v46 }
 0x1d9   : > { %v1649_v23 = vpack.c.bf16 %v1217_v20, %v1214_v19 }
 0x1db   : > { %1673 = vst [vmem:[%s1998_s11 + $0x68] sm:$0xff] %v1649_v23  }
 0x1de   : > { %v1219_v17 = vpop.f32.mrf.mxu2 }
 0x1df   : > { %v1220_v27 = vadd.f32 %v1219_v17, %v1114_v25 }
 0x1e1   : > { %v1654_v28 = vpack.c.bf16 %v1223_v26, %v1220_v27 }
 0x1e3   : > { %1674 = vst [vmem:[%s1998_s11 + $0x70] sm:$0xff] %v1654_v28  }
 0x1e4 PF: > { %s19_s30 = sadd.s32 1, %s1720_s30  }
 0x1e5   : > { %p16_p4 = scmp.ge.s32.totalorder %s19_s30, 4  }
 0x1e7   :  { %18 = sbr.rel (!%p16_p4) target bundleno = 1 (0x1), region = 91 }

// kernel: exp2_decoder26_forward.5
= control target key start
LH: loop header
LB: loop body
LE: loop exit
PB: predicated region body
PF: predicated region fallthrough
CT: control target
= control target key end

     0   :  { %s2621_s21 = smov 0   ;;  %s2623_s22 = smov 0   ;;  %s3261_s0 = inlined_call_operand.vmem [shape: bf16[2,24,18,128], index: 0, kind: input, shape index: {}, may-alias: {0,1,2}]   ;;  %s3262_s1 = inlined_call_operand.vmem [shape: bf16[2,24,18,128], index: 1, kind: input, shape index: {}, may-alias: {0,1,2}]   ;;  %s3263_s2 = inlined_call_operand.vmem [shape: bf16[2,24,18,128], index: 2, kind: input, shape index: {}, may-alias: {0,1,2}]   ;;  %s3264_s3 = inlined_call_operand.vmem [shape: bf16[3,384,64], index: 3, kind: input, shape index: {}]   ;;  %s3265_s4 = inlined_call_operand.vmem [shape: f32[1,64], index: 4, kind: input, shape index: {}]   ;;  %s3266_s5 = inlined_call_operand.vmem [shape: f32[1,64], index: 5, kind: input, shape index: {}]   ;;  %s3267_s6 = inlined_call_operand.vmem [shape: bf16[2,16,16,64], index: 6, kind: output, shape index: {}]  }
   0x1   :  { %s2625_s23 = smov 0   ;;  %s2627_s24 = smov 0  }
   0x2   :  { %s2629_s25 = smov 0  }
   0x3 LB: > { %s25_s26 = sadd.s32 1, %s2576_s23  ;;  %s28_s27 = sadd.s32 1, %s2580_s24  ;;  %s2584_s25 = sphi %s2629_s25, %s16_s25   ;;  %s2580_s24 = sphi %s2627_s24, %s3271_s24   ;;  %s2576_s23 = sphi %s2625_s23, %s3270_s23   ;;  %s2572_s22 = sphi %s2623_s22, %s3269_s22   ;;  %s2568_s21 = sphi %s2621_s21, %s3268_s21  }
   0x4   : > { %p26_p0 = scmp.ge.s32.totalorder %s25_s26, 2  ;;  %p1957_p1 = scmp.ge.s32.totalorder %s2584_s25, 1 }
   0x5   : > { %p282_p2 = scmp.lt.s32.totalorder %s2584_s25, 5 }
   0x6   : > { %s3273_s26 = smov (%p26_p0, %s25_s26), 0  ;;  %s3275_s27 = smov (!%p26_p0, %s28_s27), %s2580_s24 }
   0x7   : > { %p283_p3 = pnand %p1957_p1, %p282_p2  ;;  %p30_p4 = scmp.ge.s32.totalorder %s3275_s27, 2 }
   0x8   : > { %s2659_s8 = sshll.u32 (!%p283_p3), %s2568_s21, 3  ;;  %p345_p5 = scmp.lt.s32.totalorder (!%p283_p3), %s2572_s22, 1 }
   0x9   : > { %s3277_s27 = smov (%p30_p4, %s3275_s27), 0  ;;  %286 = sbr.rel (%p283_p3) target bundleno = 474 (0x1da), region = 44 }
   0xa   : > { %p347_p6 = scmp.lt.s32.totalorder (!%p283_p3), %s2659_s8, 23  ;;  %s356_s29 = sadd.s32 (!%p283_p3), 8, %s2659_s8 }
   0xb   : > { %p359_p7 = scmp.lt.s32.totalorder (!%p283_p3), %s356_s29, 23  ;;  %p384_p9 = scmp.lt.s32.totalorder (!%p283_p3), %s2659_s8, 15 }
   0xe   : > { %v2435_v0 = vld [vmem:[%s3264_s3 + $0xf8] sm:$0xff]  ;;  %v2434_v1 = vld [vmem:[%s3264_s3 + $0xf0] sm:$0xff]  ;;  %v2433_v2 = vld [vmem:[%s3264_s3 + $0xe8] sm:$0xff]  ;;  %s3279_s22 = smov (!%p345_p5, %s2572_s22), 1  ;;  %s3281_s29 = smov (!%p359_p7, %s356_s29), 23  ;;  %vm599_vm1 = vcmask 1046528  }
   0xf   : > { %899 = vmatpush.bf16.msra.mxu0 %v2435_v0  ;;  %2476 = vmatpush.bf16.msra.mxu1 %v2435_v0  ;;  %v2432_v3 = vld [vmem:[%s3264_s3 + $0xe0] sm:$0xff]  ;;  %s348_s13 = scalar_select %p347_p6, %s2659_s8, 23  ;;  %v2431_v4 = vld [vmem:[%s3264_s3 + $0xd8] sm:$0xff]  ;;  %v2430_v5 = vld [vmem:[%s3264_s3 + $0xd0] sm:$0xff]  ;;  %vm494_vm0 = vsmask.f32 7424 }
  0x10   : > { %2477 = vmatpush.bf16.msra.mxu2 %v2435_v0  ;;  %2478 = vmatpush.bf16.msra.mxu3 %v2435_v0  ;;  %s2677_s16 = smul.u32 72, %s3279_s22  ;;  %v2429_v6 = vld [vmem:[%s3264_s3 + $0xc8] sm:$0xff]  ;;  %v2428_v7 = vld [vmem:[%s3264_s3 + $0xc0] sm:$0xff]  ;;  %v2451_v8 = vld [vmem:[%s3264_s3 + $0x178] sm:$0xff]  ;;  %s1966_s9 = sshll.u32 %s3279_s22, 5  ;;  %vm1791_vm2 = vcmask 519168  }
  0x11   : > { %s2500_s17 = smul.u32 3, %s348_s13  ;;  %v2411_v9 = vld [vmem:[%s3264_s3 + $0x38] sm:$0xff]  ;;  %v2450_v16 = vld [vmem:[%s3264_s3 + $0x170] sm:$0xff]  ;;  %v2449_v20 = vld [vmem:[%s3264_s3 + $0x168] sm:$0xff] }
  0x12   : > { %v2443_v14 = vld [vmem:[%s3264_s3 + $0x138] sm:$0xff]  ;;  %v2410_v17 = vld [vmem:[%s3264_s3 + $0x30] sm:$0xff]  ;;  %s2502_s10 = smul.u32 3, %s3281_s29  ;;  %v2409_v21 = vld [vmem:[%s3264_s3 + $0x28] sm:$0xff] }
  0x13   : > { %900 = vmatpush.bf16.msra.mxu0 %v2434_v1  ;;  %2479 = vmatpush.bf16.msra.mxu1 %v2434_v1  ;;  %s351_s20 = sadd.s32 %s2677_s16, %s2500_s17  ;;  %v2419_v15 = vld [vmem:[%s3264_s3 + $0x78] sm:$0xff]  ;;  %v2442_v18 = vld [vmem:[%s3264_s3 + $0x130] sm:$0xff]  ;;  %v2441_v22 = vld [vmem:[%s3264_s3 + $0x128] sm:$0xff] }
  0x14   : > { %2480 = vmatpush.bf16.msra.mxu2 %v2434_v1  ;;  %2481 = vmatpush.bf16.msra.mxu3 %v2434_v1  ;;  %s1959_s30 = sshll.u32 %s351_s20, 2  ;;  %v2418_v19 = vld [vmem:[%s3264_s3 + $0x70] sm:$0xff]  ;;  %s363_s20 = sadd.s32 %s2502_s10, %s2677_s16  ;;  %v2417_v23 = vld [vmem:[%s3264_s3 + $0x68] sm:$0xff]  ;;  %v2448_v24 = vld [vmem:[%s3264_s3 + $0x160] sm:$0xff] }
  0x15   : > { %s2693_s12 = scalar_lea.vmem %s3261_s0, %s1959_s30  ;;  %v2408_v25 = vld [vmem:[%s3264_s3 + $0x20] sm:$0xff]  ;;  %s1961_s14 = sshll.u32 %s363_s20, 2  ;;  %v2447_v28 = vld [vmem:[%s3264_s3 + $0x158] sm:$0xff]  ;;  %v2446_v39 = vld [vmem:[%s3264_s3 + $0x150] sm:$0xff] }
  0x16   : > { %v2702_v10 = vld [vmem:[%s2693_s12 + $0xc] sm:$0xff]  ;;  %v2705_v11 = vld [vmem:[%s2693_s12 + $0x24] sm:$0xff]  ;;  %v2708_v12 = vld [vmem:[%s2693_s12 + $0x3c] sm:$0xff]  ;;  %s2763_s28 = scalar_lea.vmem %s3262_s1, %s1961_s14 }
  0x17   : > { %901 = vmatpush.bf16.msra.mxu0 %v2433_v2  ;;  %2482 = vmatpush.bf16.msra.mxu1 %v2433_v2  ;;  %v2711_v13 = vld [vmem:[%s2693_s12 + $0x54] sm:$0xff]  ;;  %v2440_v26 = vld [vmem:[%s3264_s3 + $0x120] sm:$0xff]  ;;  %v394_v33 = vld [vmem:[%s2693_s12 + $0x8] sm:$0x1]  ;;  %v510_v46 = vshll.u32 %v2702_v10, 16  ;;  %v508_v53 = vshrl.u32 %v2702_v10, 16 }
  0x18   : > { %2483 = vmatpush.bf16.msra.mxu2 %v2433_v2  ;;  %2484 = vmatpush.bf16.msra.mxu3 %v2433_v2  ;;  %v2416_v27 = vld [vmem:[%s3264_s3 + $0x60] sm:$0xff]  ;;  %v2407_v29 = vld [vmem:[%s3264_s3 + $0x18] sm:$0xff]  ;;  %v397_v30 = vld [vmem:[%s2693_s12 + $0x14] sm:$0x1]  ;;  %v478_v42 = vunpack.c.l.b16 %v394_v33 }
  0x19   : > { %v2773_v31 = vld [vmem:[%s2693_s12 + $0x18] sm:$0xff]  ;;  %v2776_v32 = vld [vmem:[%s2693_s12 + $0x30] sm:$0xff]  ;;  %v2780_v34 = vld [vmem:[%s2693_s12 + $0x48] sm:$0xff]  ;;  %v479_v38 = vunpack.c.l.b16 %v397_v30  ;;  %v512_v54 = vrot.slane %v510_v46, 1 }
  0x1a   : > { %v2783_v35 = vld [vmem:[%s2763_s28] sm:$0xff]  ;;  %v2439_v36 = vld [vmem:[%s3264_s3 + $0x118] sm:$0xff]  ;;  %v2406_v40 = vld [vmem:[%s3264_s3 + $0x10] sm:$0xff]  ;;  %v2817_v49 = vpack.c.b16 %v478_v42, %v478_v42 }
  0x1b   : > { %902 = vmatpush.bf16.msra.mxu0 %v2432_v3  ;;  %2485 = vmatpush.bf16.msra.mxu1 %v2432_v3  ;;  %v2415_v37 = vld [vmem:[%s3264_s3 + $0x58] sm:$0xff]  ;;  %v2798_v41 = vld [vmem:[%s2693_s12] sm:$0xff]  ;;  %v2438_v43 = vld [vmem:[%s3264_s3 + $0x110] sm:$0xff]  ;;  %v487_v45 = vpack.c.b16 %v479_v38, %v479_v38  ;;  %v513_v1 = vor.u32 %v512_v54, %v508_v53 }
  0x1c   : > { %2486 = vmatpush.bf16.msra.mxu2 %v2432_v3  ;;  %2487 = vmatpush.bf16.msra.mxu3 %v2432_v3  ;;  %v2414_v44 = vld [vmem:[%s3264_s3 + $0x50] sm:$0xff]  ;;  %v2445_v47 = vld [vmem:[%s3264_s3 + $0x148] sm:$0xff]  ;;  %v498_v50 = vshll.u32 %v2798_v41, 16  ;;  %v2444_v56 = vld [vmem:[%s3264_s3 + $0x140] sm:$0xff]  ;;  %v496_v58 = vshrl.u32 %v2798_v41, 16  ;;  %v503_v60 = vshll.u32 %v2817_v49, 16 }
  0x1d   : > { %v2405_v48 = vld [vmem:[%s3264_s3 + $0x8] sm:$0xff]  ;;  %v515_v55 = vshll.u32 %v487_v45, 16  ;;  %v2404_v57 = vld [vmem:[%s3264_s3] sm:$0xff]  ;;  %v2459_v61 = vld [vmem:[%s3264_s3 + $0x1b8] sm:$0xff]  ;;  %v603_v3 = vrot.slane %v2702_v10, 1 }
  0x1e   : > { %v2437_v51 = vld [vmem:[%s3264_s3 + $0x108] sm:$0xff]  ;;  %v500_v59 = vrot.slane %v498_v50, 1  ;;  %v2467_v62 = vld [vmem:[%s3264_s3 + $0x1f8] sm:$0xff]  ;;  %v2436_v63 = vld [vmem:[%s3264_s3 + $0x100] sm:$0xff]  ;;  %v532_v50 = vshrl.u32 %v2705_v11, 16 }
  0x1f   : > { %903 = vmatpush.bf16.msra.mxu0 %v2431_v4  ;;  %2488 = vmatpush.bf16.msra.mxu1 %v2431_v4  ;;  %v2413_v52 = vld [vmem:[%s3264_s3 + $0x48] sm:$0xff]  ;;  %v2412_v0 = vld [vmem:[%s3264_s3 + $0x40] sm:$0xff]  ;;  %v517_v2 = vrot.slane %v515_v55, 1  ;;  %v609_v55 = vrot.slane %v2705_v11, 1 }
  0x20   : > { %2489 = vmatpush.bf16.msra.mxu2 %v2431_v4  ;;  %2490 = vmatpush.bf16.msra.mxu3 %v2431_v4  ;;  %v604_v4 = vrot.slane %v487_v45, 1  ;;  %v534_v45 = vshll.u32 %v2705_v11, 16  ;;  %v2456_v46 = vld [vmem:[%s3264_s3 + $0x1a0] sm:$0xff] }
  0x23   : > { %904 = vmatpush.bf16.msra.mxu0 %v2430_v5  ;;  %2491 = vmatpush.bf16.msra.mxu1 %v2430_v5 }
  0x24   : > { %2492 = vmatpush.bf16.msra.mxu2 %v2430_v5  ;;  %2493 = vmatpush.bf16.msra.mxu3 %v2430_v5  ;;  %v501_v5 = vor.u32 %v500_v59, %v496_v58 }
  0x27   : > { %905 = vmatpush.bf16.msra.mxu0 %v2429_v6  ;;  %2494 = vmatpush.bf16.msra.mxu1 %v2429_v6 }
  0x28   : > { %2495 = vmatpush.bf16.msra.mxu2 %v2429_v6  ;;  %2496 = vmatpush.bf16.msra.mxu3 %v2429_v6  ;;  %v505_v6 = vrot.slane %v503_v60, 1 }
  0x2b   : > { %906 = vmatpush.bf16.msra.mxu0 %v2428_v7  ;;  %2497 = vmatpush.bf16.msra.mxu1 %v2428_v7 }
  0x2c   : > { %2498 = vmatpush.bf16.msra.mxu2 %v2428_v7  ;;  %2499 = vmatpush.bf16.msra.mxu3 %v2428_v7  ;;  %v2427_v7 = vld [vmem:[%s3264_s3 + $0xb8] sm:$0xff] }
  0x2e   : > { %907 = vmatmul.bf16.vlgmr.msra.gmra.mxu0 %v2702_v10  ;;  %917 = vmatmul.bf16.vlgmr.msra.gmra.mxu1 %v2705_v11 }
  0x2f   : > { %927 = vmatmul.bf16.vlgmr.msra.gmra.mxu2 %v2708_v12  ;;  %937 = vmatmul.bf16.vlgmr.msra.gmra.mxu3 %v2711_v13 }
  0x30   : > { %997 = vmatpush.bf16.msrb.mxu2 %v2451_v8  ;;  %1190 = vmatpush.bf16.msrb.mxu3 %v2411_v9  ;;  %v2475_v8 = vld [vmem:[%s3264_s3 + $0x238] sm:$0xff]  ;;  %v400_v9 = vld [vmem:[%s2693_s12 + $0x20] sm:$0x1] }
  0x31   : > { %948 = vmatpush.bf16.msrb.mxu1 %v2443_v14  ;;  %1239 = vmatpush.bf16.msrb.mxu0 %v2419_v15  ;;  %v2458_v14 = vld [vmem:[%s3264_s3 + $0x1b0] sm:$0xff] }
  0x32   : > { %v2466_v15 = vld [vmem:[%s3264_s3 + $0x1f0] sm:$0xff] }
  0x34   : > { %998 = vmatpush.bf16.msrb.mxu2 %v2450_v16  ;;  %1191 = vmatpush.bf16.msrb.mxu3 %v2410_v17  ;;  %v518_v16 = vsel %vm494_vm0, %v513_v1, %v517_v2  ;;  %v2863_v17 = vsel %vm599_vm1, %v603_v3, %v604_v4  ;;  %v2423_v1 = vld [vmem:[%s3264_s3 + $0x98] sm:$0xff]  ;;  %v544_v3 = vshrl.u32 %v2776_v32, 16 }
  0x35   : > { %949 = vmatpush.bf16.msrb.mxu1 %v2442_v18  ;;  %1240 = vmatpush.bf16.msrb.mxu0 %v2418_v19  ;;  %v480_v18 = vunpack.c.l.b16 %v400_v9  ;;  %v506_v19 = vsel %vm494_vm0, %v501_v5, %v505_v6  ;;  %v2471_v2 = vld [vmem:[%s3264_s3 + $0x218] sm:$0xff] }
  0x38   : > { %999 = vmatpush.bf16.msrb.mxu2 %v2449_v20  ;;  %1192 = vmatpush.bf16.msrb.mxu3 %v2409_v21  ;;  %v2426_v20 = vld [vmem:[%s3264_s3 + $0xb0] sm:$0xff] }
  0x39   : > { %950 = vmatpush.bf16.msrb.mxu1 %v2441_v22  ;;  %1241 = vmatpush.bf16.msrb.mxu0 %v2417_v23  ;;  %v2474_v21 = vld [vmem:[%s3264_s3 + $0x230] sm:$0xff]  ;;  %v488_v22 = vpack.c.b16 %v480_v18, %v480_v18  ;;  %v522_v23 = vshll.u32 %v2773_v31, 16 }
  0x3b   : > { %v527_v30 = vshll.u32 %v488_v22, 16  ;;  %v607_v38 = vrot.slane %v488_v22, 1  ;;  %v2462_v22 = vld [vmem:[%s3264_s3 + $0x1d0] sm:$0xff] }
  0x3c   : > { %1000 = vmatpush.bf16.msrb.mxu2 %v2448_v24  ;;  %1193 = vmatpush.bf16.msrb.mxu3 %v2408_v25  ;;  %v2457_v24 = vld [vmem:[%s3264_s3 + $0x1a8] sm:$0xff] }
  0x3d   : > { %951 = vmatpush.bf16.msrb.mxu1 %v2440_v26  ;;  %1242 = vmatpush.bf16.msrb.mxu0 %v2416_v27  ;;  %v2465_v25 = vld [vmem:[%s3264_s3 + $0x1e8] sm:$0xff] }
  0x3e   : > { %912 = vmatmul.bf16.gmra.mxu0 %v2773_v31  ;;  %922 = vmatmul.bf16.gmra.mxu1 %v2776_v32  ;;  %v2425_v26 = vld [vmem:[%s3264_s3 + $0xa8] sm:$0xff] }
  0x3f   : > { %932 = vmatmul.bf16.gmra.mxu2 %v2780_v34  ;;  %942 = vmatmul.bf16.gmra.mxu3 %v2783_v35  ;;  %v2473_v27 = vld [vmem:[%s3264_s3 + $0x228] sm:$0xff] }
  0x40   : > { %1001 = vmatpush.bf16.msrb.mxu2 %v2447_v28  ;;  %1194 = vmatpush.bf16.msrb.mxu3 %v2407_v29  ;;  %v520_v28 = vshrl.u32 %v2773_v31, 16  ;;  %v524_v29 = vrot.slane %v522_v23, 1  ;;  %v2422_v23 = vld [vmem:[%s3264_s3 + $0x90] sm:$0xff] }
  0x41   : > { %952 = vmatpush.bf16.msrb.mxu1 %v2439_v36  ;;  %1243 = vmatpush.bf16.msrb.mxu0 %v2415_v37  ;;  %v529_v36 = vrot.slane %v527_v30, 1  ;;  %v606_v37 = vrot.slane %v2773_v31, 1  ;;  %v615_v30 = vrot.slane %v2708_v12, 1 }
  0x42   : > { %v525_v33 = vor.u32 %v524_v29, %v520_v28 }
  0x43   : > { %v2894_v42 = vsel %vm599_vm1, %v606_v37, %v607_v38 }
  0x44   : > { %1002 = vmatpush.bf16.msrb.mxu2 %v2446_v39  ;;  %1195 = vmatpush.bf16.msrb.mxu3 %v2406_v40  ;;  %v403_v39 = vld [vmem:[%s2693_s12 + $0x2c] sm:$0x1]  ;;  %v2891_v40 = vsel %vm494_vm0, %v525_v33, %v529_v36  ;;  %v412_v36 = vld [vmem:[%s2693_s12 + $0x50] sm:$0x1] }
  0x45   : > { %953 = vmatpush.bf16.msrb.mxu1 %v2438_v43  ;;  %1244 = vmatpush.bf16.msrb.mxu0 %v2414_v44  ;;  %v481_v43 = vunpack.c.l.b16 %v403_v39  ;;  %v484_v39 = vunpack.c.l.b16 %v412_v36 }
  0x47   : > { %v489_v44 = vpack.c.b16 %v481_v43, %v481_v43  ;;  %v492_v43 = vpack.c.b16 %v484_v39, %v484_v39 }
  0x48   : > { %1003 = vmatpush.bf16.msrb.mxu2 %v2445_v47  ;;  %1196 = vmatpush.bf16.msrb.mxu3 %v2405_v48  ;;  %v2464_v47 = vld [vmem:[%s3264_s3 + $0x1e0] sm:$0xff] }
  0x49   : > { %954 = vmatpush.bf16.msrb.mxu1 %v2437_v51  ;;  %1245 = vmatpush.bf16.msrb.mxu0 %v2413_v52  ;;  %v2424_v48 = vld [vmem:[%s3264_s3 + $0xa0] sm:$0xff]  ;;  %v536_v51 = vrot.slane %v534_v45, 1  ;;  %v539_v52 = vshll.u32 %v489_v44, 16  ;;  %v2453_v45 = vld [vmem:[%s3264_s3 + $0x188] sm:$0xff] }
  0x4b   : > { %v537_v53 = vor.u32 %v536_v51, %v532_v50  ;;  %v541_v54 = vrot.slane %v539_v52, 1  ;;  %v575_v51 = vshll.u32 %v492_v43, 16 }
  0x4c   : > { %1004 = vmatpush.bf16.msrb.mxu2 %v2444_v56  ;;  %1197 = vmatpush.bf16.msrb.mxu3 %v2404_v57  ;;  %v610_v56 = vrot.slane %v489_v44, 1  ;;  %v406_v57 = vld [vmem:[%s2693_s12 + $0x38] sm:$0x1]  ;;  %v570_v44 = vshll.u32 %v2780_v34, 16 }
  0x4d   : > { %955 = vmatpush.bf16.msrb.mxu1 %v2436_v63  ;;  %1246 = vmatpush.bf16.msrb.mxu0 %v2412_v0  ;;  %v2916_v58 = vsel %vm494_vm0, %v537_v53, %v541_v54  ;;  %v482_v60 = vunpack.c.l.b16 %v406_v57  ;;  %v2455_v63 = vld [vmem:[%s3264_s3 + $0x198] sm:$0xff]  ;;  %v577_v53 = vrot.slane %v575_v51, 1  ;;  %v618_v54 = vrot.slane %v2780_v34, 1 }
  0x4e   : > { %v2919_v59 = vsel %vm599_vm1, %v609_v55, %v610_v56  ;;  %v2463_v0 = vld [vmem:[%s3264_s3 + $0x1d8] sm:$0xff]  ;;  %v572_v50 = vrot.slane %v570_v44, 1  ;;  %v619_v55 = vrot.slane %v492_v43, 1  ;;  %v702_v44 = vrot.slane %v2783_v35, 1 }
  0x4f   : > { %1005 = vmatmul.bf16.vlgmr.msrb.gmra.mxu2 %v2863_v17  ;;  %1198 = vmatmul.bf16.vlgmr.msrb.gmra.mxu3 %v2798_v41  ;;  %v415_v56 = vld [vmem:[%s2693_s12 + $0x5c] sm:$0x1] }
  0x50   : > { %1556 = vmatpush.bf16.msra.mxu2 %v2459_v61  ;;  %1605 = vmatpush.bf16.msra.mxu3 %v2467_v62  ;;  %v490_v61 = vpack.c.b16 %v482_v60, %v482_v60  ;;  %v546_v62 = vshll.u32 %v2776_v32, 16  ;;  %v2997_v60 = vsel %vm599_vm1, %v618_v54, %v619_v55 }
  0x51   : > { %1288 = vmatpush.bf16.msra.mxu1 %v2427_v7  ;;  %1654 = vmatpush.bf16.msra.mxu0 %v2475_v8  ;;  %v612_v8 = vrot.slane %v2776_v32, 1 }
  0x52   : > { %956 = vmatmul.bf16.vlgmr.msrb.gmra.mxu1 %v518_v16  ;;  %1247 = vmatmul.bf16.vlgmr.msrb.gmra.mxu0 %v506_v19  ;;  %v548_v4 = vrot.slane %v546_v62, 1  ;;  %v551_v5 = vshll.u32 %v490_v61, 16  ;;  %v613_v9 = vrot.slane %v490_v61, 1  ;;  %v485_v61 = vunpack.c.l.b16 %v415_v56 }
  0x53   : > { %v600_v56 = vrot.slane %v2798_v41, 1 }
  0x54   : > { %1557 = vmatpush.bf16.msra.mxu2 %v2458_v14  ;;  %1606 = vmatpush.bf16.msra.mxu3 %v2466_v15  ;;  %v549_v6 = vor.u32 %v548_v4, %v544_v3  ;;  %v553_v7 = vrot.slane %v551_v5, 1  ;;  %v409_v14 = vld [vmem:[%s2693_s12 + $0x44] sm:$0x1]  ;;  %v493_v62 = vpack.c.b16 %v485_v61, %v485_v61  ;;  %v580_v4 = vshrl.u32 %v2711_v13, 16 }
  0x55   : > { %1289 = vmatpush.bf16.msra.mxu1 %v2426_v20  ;;  %1655 = vmatpush.bf16.msra.mxu0 %v2474_v21  ;;  %v483_v18 = vunpack.c.l.b16 %v409_v14  ;;  %v558_v20 = vshll.u32 %v2708_v12, 16  ;;  %v2454_v21 = vld [vmem:[%s3264_s3 + $0x190] sm:$0xff]  ;;  %v2468_v3 = vld [vmem:[%s3264_s3 + $0x200] sm:$0xff]  ;;  %v601_v61 = vrot.slane %v2817_v49, 1 }
  0x56   : > { %v2942_v15 = vsel %vm494_vm0, %v549_v6, %v553_v7  ;;  %v587_v6 = vshll.u32 %v493_v62, 16  ;;  %v622_v14 = vrot.slane %v493_v62, 1 }
  0x57   : > { %v491_v19 = vpack.c.b16 %v483_v18, %v483_v18  ;;  %v418_v18 = vld [vmem:[%s2763_s28 + $0x8] sm:$0x1]  ;;  %s369_s28 = sadd.s32 9, %s2659_s8  ;;  %s3285_s8 = smov (!%p384_p9, %s2659_s8), 15 }
  0x58   : > { %1558 = vmatpush.bf16.msra.mxu2 %v2457_v24  ;;  %1607 = vmatpush.bf16.msra.mxu3 %v2465_v25  ;;  %v2470_v24 = vld [vmem:[%s3264_s3 + $0x210] sm:$0xff]  ;;  %v556_v25 = vshrl.u32 %v2708_v12, 16  ;;  %p372_p8 = scmp.lt.s32.totalorder %s369_s28, 23 }
  0x59   : > { %1290 = vmatpush.bf16.msra.mxu1 %v2425_v26  ;;  %1656 = vmatpush.bf16.msra.mxu0 %v2473_v27  ;;  %v560_v26 = vrot.slane %v558_v20, 1  ;;  %v563_v27 = vshll.u32 %v491_v19, 16  ;;  %v616_v33 = vrot.slane %v491_v19, 1 }
  0x5a   : > { %s3283_s28 = smov (!%p372_p8, %s369_s28), 23 }
  0x5b   : > { %v561_v28 = vor.u32 %v560_v26, %v556_v25  ;;  %v565_v29 = vrot.slane %v563_v27, 1  ;;  %v2971_v38 = vsel %vm599_vm1, %v615_v30, %v616_v33  ;;  %v692_v25 = vshll.u32 %v2783_v35, 16  ;;  %s2503_s29 = smul.u32 3, %s3283_s28 }
  0x5c   : > { %1559 = vmatpush.bf16.msra.mxu2 %v2456_v46  ;;  %1608 = vmatpush.bf16.msra.mxu3 %v2464_v47  ;;  %v2461_v46 = vld [vmem:[%s3264_s3 + $0x1c8] sm:$0xff]  ;;  %v690_v30 = vshrl.u32 %v2783_v35, 16 }
  0x5d   : > { %1291 = vmatpush.bf16.msra.mxu1 %v2424_v48  ;;  %v2968_v37 = vsel %vm494_vm0, %v561_v28, %v565_v29  ;;  %v2421_v47 = vld [vmem:[%s3264_s3 + $0x88] sm:$0xff]  ;;  %v694_v33 = vrot.slane %v692_v25, 1  ;;  %s376_s19 = sadd.s32 %s2503_s29, %s2677_s16  ;;  %s1965_s16 = sshll.u32 %s3285_s8, 1 }
  0x5e   : > { %v2469_v48 = vld [vmem:[%s3264_s3 + $0x208] sm:$0xff]  ;;  %s1963_s21 = sshll.u32 %s376_s19, 2  ;;  %s388_s14 = sadd.s32 %s1966_s9, %s1965_s16 }
  0x5f   : > { %1010 = vmatmul.bf16.gmra.mxu2 %v2894_v42  ;;  %1203 = vmatmul.bf16.gmra.mxu3 %v2702_v10  ;;  %v2472_v10 = vld [vmem:[%s3264_s3 + $0x220] sm:$0xff]  ;;  %v695_v39 = vor.u32 %v694_v33, %v690_v30  ;;  %s378_s7 = scalar_lea.vmem %s3263_s2, %s1963_s21  ;;  %s1967_s15 = sshll.u32 %s388_s14, 2 }
  0x60   : > { %1657 = vmatpush.bf16.msra.mxu0 %v2472_v10  ;;  %1560 = vmatpush.bf16.msra.mxu2 %v2455_v63  ;;  %v568_v10 = vshrl.u32 %v2780_v34, 16  ;;  %v582_v63 = vshll.u32 %v2711_v13, 16  ;;  %s3168_s17 = scalar_lea.vmem %s3267_s6, %s1967_s15 }
  0x61   : > { %1609 = vmatpush.bf16.msra.mxu3 %v2463_v0  ;;  %1292 = vmatpush.bf16.msra.mxu1 %v2423_v1  ;;  %v2452_v0 = vld [vmem:[%s3264_s3 + $0x180] sm:$0xff] }
  0x62   : > { %961 = vmatmul.bf16.gmra.mxu1 %v2891_v40  ;;  %1252 = vmatmul.bf16.gmra.mxu0 %v518_v16  ;;  %v2945_v16 = vsel %vm599_vm1, %v612_v8, %v613_v9  ;;  %v573_v52 = vor.u32 %v572_v50, %v568_v10  ;;  %v2460_v1 = vld [vmem:[%s3264_s3 + $0x1c0] sm:$0xff]  ;;  %v584_v5 = vrot.slane %v582_v63, 1  ;;  %v589_v8 = vrot.slane %v587_v6, 1 }
  0x63   : > { %v621_v9 = vrot.slane %v2711_v13, 1 }
  0x64   : > { %1658 = vmatpush.bf16.msra.mxu0 %v2471_v2  ;;  %1561 = vmatpush.bf16.msra.mxu2 %v2454_v21  ;;  %v2994_v57 = vsel %vm494_vm0, %v573_v52, %v577_v53  ;;  %v2420_v2 = vld [vmem:[%s3264_s3 + $0x80] sm:$0xff]  ;;  %v585_v7 = vor.u32 %v584_v5, %v580_v4 }
  0x65   : > { %1610 = vmatpush.bf16.msra.mxu3 %v2462_v22  ;;  %1293 = vmatpush.bf16.msra.mxu1 %v2422_v23  ;;  %v3025_v22 = vsel %vm599_vm1, %v621_v9, %v622_v14  ;;  %v687_v23 = vunpack.c.l.b16 %v418_v18 }
  0x66   : > { %v3022_v21 = vsel %vm494_vm0, %v585_v7, %v589_v8 }
  0x68   : > { %1659 = vmatpush.bf16.msra.mxu0 %v2470_v24  ;;  %1562 = vmatpush.bf16.msra.mxu2 %v2453_v45  ;;  %v688_v24 = vpack.c.b16 %v687_v23, %v687_v23 }
  0x69   : > { %1611 = vmatpush.bf16.msra.mxu3 %v2461_v46  ;;  %1294 = vmatpush.bf16.msra.mxu1 %v2421_v47 }
  0x6a   : > { %v697_v36 = vshll.u32 %v688_v24, 16  ;;  %v703_v45 = vrot.slane %v688_v24, 1 }
  0x6c   : > { %1660 = vmatpush.bf16.msra.mxu0 %v2469_v48  ;;  %1563 = vmatpush.bf16.msra.mxu2 %v2452_v0  ;;  %v699_v43 = vrot.slane %v697_v36, 1  ;;  %v3050_v51 = vsel %vm599_vm1, %v702_v44, %v703_v45 }
  0x6d   : > { %1612 = vmatpush.bf16.msra.mxu3 %v2460_v1  ;;  %1295 = vmatpush.bf16.msra.mxu1 %v2420_v2  ;;  %v602_v1 = vsel %vm599_vm1, %v600_v56, %v601_v61 }
  0x6e   : > { %v3047_v50 = vsel %vm494_vm0, %v695_v39, %v699_v43 }
  0x6f   : > { %1015 = vmatmul.bf16.gmra.mxu2 %v2919_v59  ;;  %1208 = vmatmul.bf16.gmra.mxu3 %v2773_v31 }
  0x70   : > { %1661 = vmatpush.bf16.msra.mxu0 %v2468_v3 }
  0x72   : > { %966 = vmatmul.bf16.gmra.mxu1 %v2916_v58  ;;  %1257 = vmatmul.bf16.gmra.mxu0 %v2891_v40 }
  0x7f   : > { %1020 = vmatmul.bf16.gmra.mxu2 %v2945_v16  ;;  %1213 = vmatmul.bf16.gmra.mxu3 %v2705_v11 }
  0x82   : > { %971 = vmatmul.bf16.gmra.mxu1 %v2942_v15  ;;  %1262 = vmatmul.bf16.gmra.mxu0 %v2916_v58 }
  0x8f   : > { %1025 = vmatmul.bf16.gmra.mxu2 %v2971_v38  ;;  %1218 = vmatmul.bf16.gmra.mxu3 %v2776_v32 }
  0x92   : > { %976 = vmatmul.bf16.gmra.mxu1 %v2968_v37  ;;  %1267 = vmatmul.bf16.gmra.mxu0 %v2942_v15 }
  0x9f   : > { %1030 = vmatmul.bf16.gmra.mxu2 %v2997_v60  ;;  %1223 = vmatmul.bf16.gmra.mxu3 %v2708_v12 }
  0xa2   : > { %981 = vmatmul.bf16.gmra.mxu1 %v2994_v57  ;;  %1272 = vmatmul.bf16.gmra.mxu0 %v2968_v37 }
  0xab   : > { %v908_v19 = vpop.f32.mrf.mxu0  ;;  %v3019_v20 = vpop.f32.mrf.mxu1 }
  0xaf   : > { %1035 = vmatmul.bf16.gmra.mxu2 %v3025_v22  ;;  %1228 = vmatmul.bf16.gmra.mxu3 %v2780_v34 }
  0xb2   : > { %986 = vmatmul.bf16.gmra.mxu1 %v3022_v21  ;;  %1277 = vmatmul.bf16.gmra.mxu0 %v2994_v57  ;;  %v3032_v26 = vpop.f32.mrf.mxu2  ;;  %v3034_v27 = vpop.f32.mrf.mxu3 }
  0xb3   : > { %v910_v28 = vpop.f32.mrf.mxu0  ;;  %v3036_v29 = vpop.f32.mrf.mxu1 }
  0xba   : > { %v3040_v46 = vpop.f32.mrf.mxu2  ;;  %v3042_v47 = vpop.f32.mrf.mxu3 }
  0xbb   : > { %v913_v48 = vpop.f32.mrf.mxu0  ;;  %v3044_v10 = vpop.f32.mrf.mxu1 }
  0xbf   : > { %1040 = vmatmul.bf16.gmra.mxu2 %v3050_v51  ;;  %1233 = vmatmul.bf16.gmra.mxu3 %v2711_v13 }
  0xc2   : > { %991 = vmatmul.bf16.gmra.mxu1 %v3047_v50  ;;  %1282 = vmatmul.bf16.gmra.mxu0 %v3022_v21  ;;  %v3056_v52 = vpop.f32.mrf.mxu2  ;;  %v3058_v53 = vpop.f32.mrf.mxu3 }
  0xc3   : > { %v915_v54 = vpop.f32.mrf.mxu0  ;;  %v3060_v55 = vpop.f32.mrf.mxu1 }
  0xca   : > { %v3064_v62 = vpop.f32.mrf.mxu2  ;;  %v3066_v63 = vpop.f32.mrf.mxu3 }
  0xcf   : > { %v957_v0 = vpop.f32.mrf.mxu1  ;;  %v1248_v3 = vpop.f32.mrf.mxu0  ;;  %1564 = vmatmul.bf16.vlgmr.msra.gmra.mxu2 %v2773_v31  ;;  %1613 = vmatmul.bf16.vlgmr.msra.gmra.mxu3 %v2891_v40 }
  0xd0   : > { %v958_v2 = vadd.f32 %v957_v0, %v908_v19 }
  0xd2   : > { %1296 = vmatmul.bf16.vlgmr.msra.gmra.mxu1 %v602_v1  ;;  %1662 = vmatmul.bf16.vlgmr.msra.gmra.mxu0 %v2894_v42  ;;  %v1006_v4 = vpop.f32.mrf.mxu2  ;;  %v1199_v5 = vpop.f32.mrf.mxu3 }
  0xd3   : > { %v1007_v41 = vadd.f32 %v1006_v4, %v958_v2 }
  0xd5   : > { %v1200_v6 = vadd.f32 %v1199_v5, %v1007_v41 }
  0xd7   : > { %v959_v49 = vpop.f32.mrf.mxu1  ;;  %v1250_v8 = vpop.f32.mrf.mxu0  ;;  %v3072_v9 = vadd.f32 %v1248_v3, %v1200_v6 }
  0xd8   : > { %v960_v7 = vadd.f32 %v959_v49, %v910_v28 }
  0xda   : > { %v1008_v14 = vpop.f32.mrf.mxu2  ;;  %v1201_v19 = vpop.f32.mrf.mxu3 }
  0xdb   : > { %v1009_v18 = vadd.f32 %v1008_v14, %v960_v7 }
  0xdd   : > { %v1202_v24 = vadd.f32 %v1201_v19, %v1009_v18 }
  0xdf   : > { %v962_v23 = vpop.f32.mrf.mxu1  ;;  %v1253_v31 = vpop.f32.mrf.mxu0  ;;  %1569 = vmatmul.bf16.gmra.mxu2 %v2705_v11  ;;  %v3076_v40 = vadd.f32 %v1250_v8, %v1202_v24  ;;  %1618 = vmatmul.bf16.gmra.mxu3 %v2916_v58 }
  0xe0   : > { %v963_v25 = vadd.f32 %v962_v23, %v913_v48 }
  0xe2   : > { %1301 = vmatmul.bf16.gmra.mxu1 %v2863_v17  ;;  %1667 = vmatmul.bf16.gmra.mxu0 %v2919_v59  ;;  %v1011_v28 = vpop.f32.mrf.mxu2  ;;  %v1204_v33 = vpop.f32.mrf.mxu3 }
  0xe3   : > { %v1012_v30 = vadd.f32 %v1011_v28, %v963_v25 }
  0xe5   : > { %v1205_v39 = vadd.f32 %v1204_v33, %v1012_v30 }
  0xe7   : > { %v964_v36 = vpop.f32.mrf.mxu1  ;;  %v1255_v44 = vpop.f32.mrf.mxu0  ;;  %v3080_v45 = vadd.f32 %v1253_v31, %v1205_v39 }
  0xe8   : > { %v965_v43 = vadd.f32 %v964_v36, %v915_v54 }
  0xea   : > { %v1013_v48 = vpop.f32.mrf.mxu2  ;;  %v1206_v17 = vpop.f32.mrf.mxu3 }
  0xeb   : > { %v1014_v56 = vadd.f32 %v1013_v48, %v965_v43 }
  0xed   : > { %v1207_v11 = vadd.f32 %v1206_v17, %v1014_v56 }
  0xef   : > { %v967_v61 = vpop.f32.mrf.mxu1  ;;  %v1258_v1 = vpop.f32.mrf.mxu0  ;;  %1574 = vmatmul.bf16.gmra.mxu2 %v2776_v32  ;;  %v3085_v58 = vadd.f32 %v1255_v44, %v1207_v11  ;;  %1623 = vmatmul.bf16.gmra.mxu3 %v2942_v15 }
  0xf0   : > { %v968_v0 = vadd.f32 %v967_v61, %v3019_v20 }
  0xf2   : > { %1306 = vmatmul.bf16.gmra.mxu1 %v2894_v42  ;;  %1672 = vmatmul.bf16.gmra.mxu0 %v2945_v16  ;;  %v1016_v54 = vpop.f32.mrf.mxu2  ;;  %v1209_v3 = vpop.f32.mrf.mxu3 }
  0xf3   : > { %v1017_v2 = vadd.f32 %v1016_v54, %v968_v0 }
  0xf5   : > { %v1210_v41 = vadd.f32 %v1209_v3, %v1017_v2 }
  0xf7   : > { %v969_v4 = vpop.f32.mrf.mxu1  ;;  %v1260_v49 = vpop.f32.mrf.mxu0  ;;  %v3090_v20 = vadd.f32 %v1258_v1, %v1210_v41 }
  0xf8   : > { %v970_v5 = vadd.f32 %v969_v4, %v3036_v29 }
  0xfa   : > { %v1018_v6 = vpop.f32.mrf.mxu2  ;;  %v1211_v7 = vpop.f32.mrf.mxu3 }
  0xfb   : > { %v1019_v42 = vadd.f32 %v1018_v6, %v970_v5 }
  0xfd   : > { %v1212_v8 = vadd.f32 %v1211_v7, %v1019_v42  ;;  %v421_v42 = vld [vmem:[%s378_s7 + $0x8] sm:$0x1] }
  0xff   : > { %v972_v32 = vpop.f32.mrf.mxu1  ;;  %v1263_v15 = vpop.f32.mrf.mxu0  ;;  %1579 = vmatmul.bf16.gmra.mxu2 %v2708_v12  ;;  %v3095_v18 = vadd.f32 %v1260_v49, %v1212_v8  ;;  %1628 = vmatmul.bf16.gmra.mxu3 %v2968_v37  ;;  %v2403_v8 = vld [vmem:[%s378_s7] sm:$0xff] }
 0x100   : > { %v973_v14 = vadd.f32 %v972_v32, %v3044_v10 }
 0x102   : > { %1311 = vmatmul.bf16.gmra.mxu1 %v2919_v59  ;;  %1677 = vmatmul.bf16.gmra.mxu0 %v2971_v38  ;;  %v1021_v29 = vpop.f32.mrf.mxu2  ;;  %v1214_v23 = vpop.f32.mrf.mxu3 }
 0x103   : > { %v1022_v19 = vadd.f32 %v1021_v29, %v973_v14  ;;  %v1344_v29 = vunpack.c.l.b16 %v421_v42 }
 0x105   : > { %v1215_v25 = vadd.f32 %v1214_v23, %v1022_v19 }
 0x107   : > { %v974_v24 = vpop.f32.mrf.mxu1  ;;  %v1265_v10 = vpop.f32.mrf.mxu0  ;;  %v3100_v28 = vadd.f32 %v1263_v15, %v1215_v25 }
 0x108   : > { %v975_v31 = vadd.f32 %v974_v24, %v3060_v55  ;;  %v1345_v24 = vpack.c.b16 %v1344_v29, %v1344_v29 }
 0x10a   : > { %v1023_v59 = vpop.f32.mrf.mxu2  ;;  %v1216_v12 = vpop.f32.mrf.mxu3 }
 0x10b   : > { %v1024_v30 = vadd.f32 %v1023_v59, %v975_v31 }
 0x10d   : > { %v1217_v36 = vadd.f32 %v1216_v12, %v1024_v30  ;;  %v1347_v30 = vshrl.u32 %v2403_v8, 16 }
 0x10f   : > { %v977_v33 = vpop.f32.mrf.mxu1  ;;  %v1268_v39 = vpop.f32.mrf.mxu0  ;;  %1584 = vmatmul.bf16.gmra.mxu2 %v2780_v34  ;;  %v3104_v37 = vadd.f32 %v1265_v10, %v1217_v36  ;;  %1633 = vmatmul.bf16.gmra.mxu3 %v2994_v57  ;;  %v1354_v36 = vshll.u32 %v1345_v24, 16 }
 0x110   : > { %v978_v55 = vadd.f32 %v977_v33, %v3032_v26 }
 0x112   : > { %1316 = vmatmul.bf16.gmra.mxu1 %v2945_v16  ;;  %1682 = vmatmul.bf16.gmra.mxu0 %v2997_v60  ;;  %v1026_v43 = vpop.f32.mrf.mxu2  ;;  %v1219_v48 = vpop.f32.mrf.mxu3 }
 0x113   : > { %v1027_v44 = vadd.f32 %v1026_v43, %v978_v55  ;;  %v1356_v55 = vrot.slane %v1354_v36, 1  ;;  %v1360_v43 = vrot.slane %v1345_v24, 1 }
 0x115   : > { %v1220_v17 = vadd.f32 %v1219_v48, %v1027_v44 }
 0x117   : > { %v979_v56 = vpop.f32.mrf.mxu1  ;;  %v1270_v61 = vpop.f32.mrf.mxu0  ;;  %v3110_v11 = vadd.f32 %v1268_v39, %v1220_v17 }
 0x118   : > { %v980_v34 = vadd.f32 %v979_v56, %v3040_v46 }
 0x11a   : > { %v1028_v16 = vpop.f32.mrf.mxu2  ;;  %v1221_v0 = vpop.f32.mrf.mxu3 }
 0x11b   : > { %v1029_v57 = vadd.f32 %v1028_v16, %v980_v34 }
 0x11d   : > { %v1222_v54 = vadd.f32 %v1221_v0, %v1029_v57 }
 0x11f   : > { %v982_v1 = vpop.f32.mrf.mxu1  ;;  %v1273_v26 = vpop.f32.mrf.mxu0  ;;  %1589 = vmatmul.bf16.gmra.mxu2 %v2711_v13  ;;  %v3115_v2 = vadd.f32 %v1270_v61, %v1222_v54  ;;  %1638 = vmatmul.bf16.gmra.mxu3 %v3022_v21 }
 0x120   : > { %v983_v46 = vadd.f32 %v982_v1, %v3056_v52 }
 0x122   : > { %1321 = vmatmul.bf16.gmra.mxu1 %v2971_v38  ;;  %1687 = vmatmul.bf16.gmra.mxu0 %v3025_v22  ;;  %v1031_v3 = vpop.f32.mrf.mxu2  ;;  %v1224_v41 = vpop.f32.mrf.mxu3 }
 0x123   : > { %v1032_v4 = vadd.f32 %v1031_v3, %v983_v46 }
 0x125   : > { %v1225_v49 = vadd.f32 %v1224_v41, %v1032_v4 }
 0x127   : > { %v984_v5 = vpop.f32.mrf.mxu1  ;;  %v1275_v6 = vpop.f32.mrf.mxu0  ;;  %v3124_v13 = vadd.f32 %v1273_v26, %v1225_v49 }
 0x128   : > { %v985_v38 = vadd.f32 %v984_v5, %v3064_v62  ;;  %v1349_v62 = vshll.u32 %v2403_v8, 16 }
 0x12a   : > { %v1033_v21 = vpop.f32.mrf.mxu2  ;;  %v1226_v52 = vpop.f32.mrf.mxu3  ;;  %v1351_v12 = vrot.slane %v1349_v62, 1  ;;  %v3160_v62 = vld [vmem:[%s3266_s5] ss:$0 sm:$0xff] }
 0x12b   : > { %v1034_v7 = vadd.f32 %v1033_v21, %v985_v38 }
 0x12c   : > { %v1352_v39 = vor.u32 %v1351_v12, %v1347_v30 }
 0x12d   : > { %v1227_v14 = vadd.f32 %v1226_v52, %v1034_v7 }
 0x12e   : > { %v1357_v34 = vsel %vm494_vm0, %v1352_v39, %v1356_v55 }
 0x12f   : > { %v987_v32 = vpop.f32.mrf.mxu1  ;;  %v1278_v15 = vpop.f32.mrf.mxu0  ;;  %1594 = vmatmul.bf16.gmra.mxu2 %v2783_v35  ;;  %v3129_v19 = vadd.f32 %v1275_v6, %v1227_v14  ;;  %1643 = vmatmul.bf16.gmra.mxu3 %v3047_v50 }
 0x130   : > { %v988_v23 = vadd.f32 %v987_v32, %v3034_v27 }
 0x132   : > { %1326 = vmatmul.bf16.gmra.mxu1 %v2997_v60  ;;  %1692 = vmatmul.bf16.gmra.mxu0 %v3050_v51  ;;  %v1036_v25 = vpop.f32.mrf.mxu2  ;;  %v1229_v10 = vpop.f32.mrf.mxu3  ;;  %v1359_v51 = vrot.slane %v2403_v8, 1 }
 0x133   : > { %v1037_v31 = vadd.f32 %v1036_v25, %v988_v23 }
 0x134   : > { %v1361_v16 = vsel %vm599_vm1, %v1359_v51, %v1360_v43 }
 0x135   : > { %v1230_v33 = vadd.f32 %v1229_v10, %v1037_v31 }
 0x137   : > { %v989_v59 = vpop.f32.mrf.mxu1  ;;  %v1280_v60 = vpop.f32.mrf.mxu0  ;;  %v3134_v35 = vadd.f32 %v1278_v15, %v1230_v33  ;;  %v3155_v15 = vld [vmem:[%s3265_s4] ss:$0 sm:$0xff] }
 0x138   : > { %v990_v50 = vadd.f32 %v989_v59, %v3042_v47 }
 0x13a   : > { %v1038_v44 = vpop.f32.mrf.mxu2  ;;  %v1231_v48 = vpop.f32.mrf.mxu3 }
 0x13b   : > { %v1039_v27 = vadd.f32 %v1038_v44, %v990_v50 }
 0x13d   : > { %v1232_v17 = vadd.f32 %v1231_v48, %v1039_v27 }
 0x13f   : > { %v992_v56 = vpop.f32.mrf.mxu1  ;;  %v1283_v61 = vpop.f32.mrf.mxu0  ;;  %1599 = vmatmul.bf16.gmra.mxu2 %v2403_v8  ;;  %v3140_v57 = vadd.f32 %v1280_v60, %v1232_v17  ;;  %1648 = vmatmul.bf16.gmra.mxu3 %v1357_v34 }
 0x140   : > { %v993_v47 = vadd.f32 %v992_v56, %v3058_v53 }
 0x142   : > { %1331 = vmatmul.bf16.gmra.mxu1 %v3025_v22  ;;  %1697 = vmatmul.bf16.gmra.mxu0 %v1361_v16  ;;  %v1041_v0 = vpop.f32.mrf.mxu2  ;;  %v1234_v54 = vpop.f32.mrf.mxu3 }
 0x143   : > { %v1042_v1 = vadd.f32 %v1041_v0, %v993_v47 }
 0x145   : > { %v1235_v46 = vadd.f32 %v1234_v54, %v1042_v1 }
 0x147   : > { %v994_v26 = vpop.f32.mrf.mxu1  ;;  %v1285_v3 = vpop.f32.mrf.mxu0  ;;  %v3143_v4 = vadd.f32 %v1283_v61, %v1235_v46 }
 0x148   : > { %v995_v41 = vadd.f32 %v994_v26, %v3066_v63 }
 0x14a   : > { %v1043_v22 = vpop.f32.mrf.mxu2  ;;  %v1236_v49 = vpop.f32.mrf.mxu3 }
 0x14b   : > { %v1044_v5 = vadd.f32 %v1043_v22, %v995_v41 }
 0x14d   : > { %v1237_v38 = vadd.f32 %v1236_v49, %v1044_v5 }
 0x14f   : > { %v1297_v6 = vpop.f32.mrf.mxu1  ;;  %v1663_v21 = vpop.f32.mrf.mxu0  ;;  %v3147_v53 = vadd.f32 %v1285_v3, %v1237_v38 }
 0x150   : > { %v1298_v14 = vadd.f32 %v1297_v6, %v3072_v9 }
 0x152   : > { %v1565_v42 = vpop.f32.mrf.mxu2  ;;  %v1614_v7 = vpop.f32.mrf.mxu3 }
 0x153   : > { %v1615_v52 = vadd.f32 %v1614_v7, %v1565_v42 }
 0x155   : > { %v1664_v63 = vadd.f32 %v1663_v21, %v1615_v52 }
 0x157   : > { %v1299_v32 = vpop.f32.mrf.mxu1  ;;  %v1665_v8 = vpop.f32.mrf.mxu0  ;;  %v1703_v29 = vadd.f32 %v1664_v63, %v1298_v14 }
 0x158   : > { %v1300_v12 = vadd.f32 %v1299_v32, %v3076_v40 }
 0x159   : > { %v1723_v23 = vmul.f32 %v3155_v15, %v1703_v29 }
 0x15a   : > { %v1567_v24 = vpop.f32.mrf.mxu2  ;;  %v1616_v25 = vpop.f32.mrf.mxu3 }
 0x15b   : > { %v1743_v9 = vadd.f32 %v3160_v62, %v1723_v23  ;;  %v1617_v31 = vadd.f32 %v1616_v25, %v1567_v24 }
 0x15d   : > { %v1759_v30 = vmax.f32 %v1743_v9, 0.0  ;;  %v1666_v33 = vadd.f32 %v1665_v8, %v1617_v31 }
 0x15f   : > { %v1302_v10 = vpop.f32.mrf.mxu1  ;;  %v1668_v59 = vpop.f32.mrf.mxu0  ;;  %v1775_v60 = vpack.c.bf16 %v1759_v30, %v1759_v30  ;;  %v1704_v36 = vadd.f32 %v1666_v33, %v1300_v12 }
 0x160   : > { %v1303_v48 = vadd.f32 %v1302_v10, %v3080_v45 }
 0x161   : > { %1792 = vst.msk [vmem:[%s3168_s17] sm:$0xf] %vm1791_vm2, %v1775_v60  ;;  %v1724_v39 = vmul.f32 %v3155_v15, %v1704_v36 }
 0x162   : > { %v1570_v50 = vpop.f32.mrf.mxu2  ;;  %v1619_v55 = vpop.f32.mrf.mxu3 }
 0x163   : > { %v1744_v51 = vadd.f32 %v3160_v62, %v1724_v39  ;;  %v1620_v40 = vadd.f32 %v1619_v55, %v1570_v50 }
 0x165   : > { %v1760_v27 = vmax.f32 %v1744_v51, 0.0  ;;  %v1669_v56 = vadd.f32 %v1668_v59, %v1620_v40 }
 0x167   : > { %v1304_v43 = vpop.f32.mrf.mxu1  ;;  %v1670_v44 = vpop.f32.mrf.mxu0  ;;  %v1776_v17 = vpack.c.bf16 %v1760_v27, %v1760_v27  ;;  %v1705_v61 = vadd.f32 %v1669_v56, %v1303_v48 }
 0x168   : > { %v1305_v3 = vadd.f32 %v1304_v43, %v3085_v58 }
 0x169   : > { %1793 = vst.msk [vmem:[%s3168_s17 + $0x4] sm:$0xf] %vm1791_vm2, %v1776_v17  ;;  %v1725_v34 = vmul.f32 %v3155_v15, %v1705_v61 }
 0x16a   : > { %v1572_v16 = vpop.f32.mrf.mxu2  ;;  %v1621_v47 = vpop.f32.mrf.mxu3 }
 0x16b   : > { %v1745_v0 = vadd.f32 %v3160_v62, %v1725_v34  ;;  %v1622_v1 = vadd.f32 %v1621_v47, %v1572_v16 }
 0x16d   : > { %v1761_v46 = vmax.f32 %v1745_v0, 0.0  ;;  %v1671_v41 = vadd.f32 %v1670_v44, %v1622_v1 }
 0x16f   : > { %v1307_v54 = vpop.f32.mrf.mxu1  ;;  %v1673_v26 = vpop.f32.mrf.mxu0  ;;  %v1777_v45 = vpack.c.bf16 %v1761_v46, %v1761_v46  ;;  %v1706_v22 = vadd.f32 %v1671_v41, %v1305_v3 }
 0x170   : > { %v1308_v32 = vadd.f32 %v1307_v54, %v3090_v20 }
 0x171   : > { %1794 = vst.msk [vmem:[%s3168_s17 + $0x8] sm:$0xf] %vm1791_vm2, %v1777_v45  ;;  %v1726_v5 = vmul.f32 %v3155_v15, %v1706_v22 }
 0x172   : > { %v1575_v49 = vpop.f32.mrf.mxu2  ;;  %v1624_v6 = vpop.f32.mrf.mxu3 }
 0x173   : > { %v1746_v38 = vadd.f32 %v3160_v62, %v1726_v5  ;;  %v1625_v21 = vadd.f32 %v1624_v6, %v1575_v49 }
 0x175   : > { %v1762_v52 = vmax.f32 %v1746_v38, 0.0  ;;  %v1674_v8 = vadd.f32 %v1673_v26, %v1625_v21 }
 0x177   : > { %v1309_v42 = vpop.f32.mrf.mxu1  ;;  %v1675_v7 = vpop.f32.mrf.mxu0  ;;  %v1778_v58 = vpack.c.bf16 %v1762_v52, %v1762_v52  ;;  %v1707_v14 = vadd.f32 %v1674_v8, %v1308_v32 }
 0x178   : > { %v1310_v59 = vadd.f32 %v1309_v42, %v3095_v18 }
 0x179   : > { %1795 = vst.msk [vmem:[%s3168_s17 + $0xc] sm:$0xf] %vm1791_vm2, %v1778_v58  ;;  %v1727_v63 = vmul.f32 %v3155_v15, %v1707_v14 }
 0x17a   : > { %v1577_v29 = vpop.f32.mrf.mxu2  ;;  %v1626_v23 = vpop.f32.mrf.mxu3 }
 0x17b   : > { %v1747_v24 = vadd.f32 %v3160_v62, %v1727_v63  ;;  %v1627_v25 = vadd.f32 %v1626_v23, %v1577_v29 }
 0x17d   : > { %v1763_v10 = vmax.f32 %v1747_v24, 0.0  ;;  %v1676_v30 = vadd.f32 %v1675_v7, %v1627_v25 }
 0x17f   : > { %v1312_v9 = vpop.f32.mrf.mxu1  ;;  %v1678_v31 = vpop.f32.mrf.mxu0  ;;  %v1779_v20 = vpack.c.bf16 %v1763_v10, %v1763_v10  ;;  %v1708_v12 = vadd.f32 %v1676_v30, %v1310_v59 }
 0x180   : > { %v1313_v43 = vadd.f32 %v1312_v9, %v3100_v28 }
 0x181   : > { %1796 = vst.msk [vmem:[%s3168_s17 + $0x10] sm:$0xf] %vm1791_vm2, %v1779_v20  ;;  %v1728_v33 = vmul.f32 %v3155_v15, %v1708_v12 }
 0x182   : > { %v1580_v60 = vpop.f32.mrf.mxu2  ;;  %v1629_v36 = vpop.f32.mrf.mxu3 }
 0x183   : > { %v1748_v39 = vadd.f32 %v3160_v62, %v1728_v33  ;;  %v1630_v50 = vadd.f32 %v1629_v36, %v1580_v60 }
 0x185   : > { %v1764_v40 = vmax.f32 %v1748_v39, 0.0  ;;  %v1679_v44 = vadd.f32 %v1678_v31, %v1630_v50 }
 0x187   : > { %v1314_v55 = vpop.f32.mrf.mxu1  ;;  %v1680_v51 = vpop.f32.mrf.mxu0  ;;  %v1780_v18 = vpack.c.bf16 %v1764_v40, %v1764_v40  ;;  %v1709_v27 = vadd.f32 %v1679_v44, %v1313_v43 }
 0x188   : > { %v1315_v1 = vadd.f32 %v1314_v55, %v3104_v37 }
 0x189   : > { %1797 = vst.msk [vmem:[%s3168_s17 + $0x14] sm:$0xf] %vm1791_vm2, %v1780_v18  ;;  %v1729_v48 = vmul.f32 %v3155_v15, %v1709_v27 }
 0x18a   : > { %v1582_v56 = vpop.f32.mrf.mxu2  ;;  %v1631_v17 = vpop.f32.mrf.mxu3 }
 0x18b   : > { %v1749_v61 = vadd.f32 %v3160_v62, %v1729_v48  ;;  %v1632_v34 = vadd.f32 %v1631_v17, %v1582_v56 }
 0x18d   : > { %v1765_v0 = vmax.f32 %v1749_v61, 0.0  ;;  %v1681_v54 = vadd.f32 %v1680_v51, %v1632_v34 }
 0x18f   : > { %v1317_v16 = vpop.f32.mrf.mxu1  ;;  %v1683_v47 = vpop.f32.mrf.mxu0  ;;  %v1781_v28 = vpack.c.bf16 %v1765_v0, %v1765_v0  ;;  %v1710_v26 = vadd.f32 %v1681_v54, %v1315_v1 }
 0x190   : > { %v1318_v38 = vadd.f32 %v1317_v16, %v3110_v11 }
 0x191   : > { %1798 = vst.msk [vmem:[%s3168_s17 + $0x18] sm:$0xf] %vm1791_vm2, %v1781_v28  ;;  %v1730_v46 = vmul.f32 %v3155_v15, %v1710_v26 }
 0x192   : > { %v1585_v3 = vpop.f32.mrf.mxu2  ;;  %v1634_v41 = vpop.f32.mrf.mxu3 }
 0x193   : > { %v1750_v45 = vadd.f32 %v3160_v62, %v1730_v46  ;;  %v1635_v22 = vadd.f32 %v1634_v41, %v1585_v3 }
 0x195   : > { %v1766_v6 = vmax.f32 %v1750_v45, 0.0  ;;  %v1684_v21 = vadd.f32 %v1683_v47, %v1635_v22 }
 0x197   : > { %v1319_v5 = vpop.f32.mrf.mxu1  ;;  %v1685_v49 = vpop.f32.mrf.mxu0  ;;  %v1782_v37 = vpack.c.bf16 %v1766_v6, %v1766_v6  ;;  %v1711_v42 = vadd.f32 %v1684_v21, %v1318_v38 }
 0x198   : > { %v1320_v23 = vadd.f32 %v1319_v5, %v3115_v2 }
 0x199   : > { %1799 = vst.msk [vmem:[%s3168_s17 + $0x1c] sm:$0xf] %vm1791_vm2, %v1782_v37  ;;  %v1731_v7 = vmul.f32 %v3155_v15, %v1711_v42 }
 0x19a   : > { %v1587_v52 = vpop.f32.mrf.mxu2  ;;  %v1636_v32 = vpop.f32.mrf.mxu3 }
 0x19b   : > { %v1751_v8 = vadd.f32 %v3160_v62, %v1731_v7  ;;  %v1637_v58 = vadd.f32 %v1636_v32, %v1587_v52 }
 0x19d   : > { %v1767_v29 = vmax.f32 %v1751_v8, 0.0  ;;  %v1686_v24 = vadd.f32 %v1685_v49, %v1637_v58 }
 0x19f   : > { %v1322_v14 = vpop.f32.mrf.mxu1  ;;  %v1688_v63 = vpop.f32.mrf.mxu0  ;;  %v1783_v11 = vpack.c.bf16 %v1767_v29, %v1767_v29  ;;  %v1712_v25 = vadd.f32 %v1686_v24, %v1320_v23 }
 0x1a0   : > { %v1323_v60 = vadd.f32 %v1322_v14, %v3124_v13 }
 0x1a1   : > { %1800 = vst.msk [vmem:[%s3168_s17 + $0x20] sm:$0xf] %vm1791_vm2, %v1783_v11  ;;  %v1732_v9 = vmul.f32 %v3155_v15, %v1712_v25 }
 0x1a2   : > { %v1590_v31 = vpop.f32.mrf.mxu2  ;;  %v1639_v10 = vpop.f32.mrf.mxu3 }
 0x1a3   : > { %v1752_v59 = vadd.f32 %v3160_v62, %v1732_v9  ;;  %v1640_v30 = vadd.f32 %v1639_v10, %v1590_v31 }
 0x1a5   : > { %v1768_v33 = vmax.f32 %v1752_v59, 0.0  ;;  %v1689_v36 = vadd.f32 %v1688_v63, %v1640_v30 }
 0x1a7   : > { %v1324_v20 = vpop.f32.mrf.mxu1  ;;  %v1690_v12 = vpop.f32.mrf.mxu0  ;;  %v1784_v2 = vpack.c.bf16 %v1768_v33, %v1768_v33  ;;  %v1713_v39 = vadd.f32 %v1689_v36, %v1323_v60 }
 0x1a8   : > { %v1325_v27 = vadd.f32 %v1324_v20, %v3129_v19 }
 0x1a9   : > { %1801 = vst.msk [vmem:[%s3168_s17 + $0x24] sm:$0xf] %vm1791_vm2, %v1784_v2  ;;  %v1733_v50 = vmul.f32 %v3155_v15, %v1713_v39 }
 0x1aa   : > { %v1592_v55 = vpop.f32.mrf.mxu2  ;;  %v1641_v51 = vpop.f32.mrf.mxu3 }
 0x1ab   : > { %v1753_v40 = vadd.f32 %v3160_v62, %v1733_v50  ;;  %v1642_v43 = vadd.f32 %v1641_v51, %v1592_v55 }
 0x1ad   : > { %v1769_v18 = vmax.f32 %v1753_v40, 0.0  ;;  %v1691_v48 = vadd.f32 %v1690_v12, %v1642_v43 }
 0x1af   : > { %v1327_v44 = vpop.f32.mrf.mxu1  ;;  %v1693_v56 = vpop.f32.mrf.mxu0  ;;  %v1785_v13 = vpack.c.bf16 %v1769_v18, %v1769_v18  ;;  %v1714_v17 = vadd.f32 %v1691_v48, %v1325_v27 }
 0x1b0   : > { %v1328_v54 = vadd.f32 %v1327_v44, %v3134_v35 }
 0x1b1   : > { %1802 = vst.msk [vmem:[%s3168_s17 + $0x28] sm:$0xf] %vm1791_vm2, %v1785_v13  ;;  %v1734_v61 = vmul.f32 %v3155_v15, %v1714_v17 }
 0x1b2   : > { %v1595_v34 = vpop.f32.mrf.mxu2  ;;  %v1644_v16 = vpop.f32.mrf.mxu3 }
 0x1b3   : > { %v1754_v47 = vadd.f32 %v3160_v62, %v1734_v61  ;;  %v1645_v0 = vadd.f32 %v1644_v16, %v1595_v34 }
 0x1b5   : > { %v1770_v1 = vmax.f32 %v1754_v47, 0.0  ;;  %v1694_v28 = vadd.f32 %v1693_v56, %v1645_v0 }
 0x1b7   : > { %v1329_v26 = vpop.f32.mrf.mxu1  ;;  %v1786_v19 = vpack.c.bf16 %v1770_v1, %v1770_v1  ;;  %v1715_v46 = vadd.f32 %v1694_v28, %v1328_v54  ;;  %v1695_v3 = vpop.f32.mrf.mxu0 }
 0x1b8   : > { %v1330_v38 = vadd.f32 %v1329_v26, %v3140_v57 }
 0x1b9   : > { %1803 = vst.msk [vmem:[%s3168_s17 + $0x2c] sm:$0xf] %vm1791_vm2, %v1786_v19  ;;  %v1735_v41 = vmul.f32 %v3155_v15, %v1715_v46 }
 0x1ba   : > { %v1597_v45 = vpop.f32.mrf.mxu2  ;;  %v1646_v22 = vpop.f32.mrf.mxu3 }
 0x1bb   : > { %v1755_v5 = vadd.f32 %v3160_v62, %v1735_v41  ;;  %v1647_v49 = vadd.f32 %v1646_v22, %v1597_v45 }
 0x1bd   : > { %v1771_v6 = vmax.f32 %v1755_v5, 0.0  ;;  %v1696_v21 = vadd.f32 %v1695_v3, %v1647_v49 }
 0x1bf   : > { %v1787_v35 = vpack.c.bf16 %v1771_v6, %v1771_v6  ;;  %v1716_v37 = vadd.f32 %v1696_v21, %v1330_v38  ;;  %v1332_v42 = vpop.f32.mrf.mxu1  ;;  %v1698_v32 = vpop.f32.mrf.mxu0 }
 0x1c0   : > { %v1333_v29 = vadd.f32 %v1332_v42, %v3143_v4 }
 0x1c1   : > { %1804 = vst.msk [vmem:[%s3168_s17 + $0x30] sm:$0xf] %vm1791_vm2, %v1787_v35  ;;  %v1736_v7 = vmul.f32 %v3155_v15, %v1716_v37 }
 0x1c2   : > { %v1600_v52 = vpop.f32.mrf.mxu2  ;;  %v1649_v8 = vpop.f32.mrf.mxu3 }
 0x1c3   : > { %v1756_v58 = vadd.f32 %v3160_v62, %v1736_v7  ;;  %v1650_v14 = vadd.f32 %v1649_v8, %v1600_v52 }
 0x1c5   : > { %v1772_v63 = vmax.f32 %v1756_v58, 0.0  ;;  %v1699_v23 = vadd.f32 %v1698_v32, %v1650_v14 }
 0x1c7   : > { %v1788_v57 = vpack.c.bf16 %v1772_v63, %v1772_v63  ;;  %v1717_v24 = vadd.f32 %v1699_v23, %v1333_v29  ;;  %v1334_v9 = vpop.f32.mrf.mxu1  ;;  %v1700_v30 = vpop.f32.mrf.mxu0 }
 0x1c8   : > { %v1335_v12 = vadd.f32 %v1334_v9, %v3147_v53 }
 0x1c9   : > { %1805 = vst.msk [vmem:[%s3168_s17 + $0x34] sm:$0xf] %vm1791_vm2, %v1788_v57  ;;  %v1737_v11 = vmul.f32 %v3155_v15, %v1717_v24 }
 0x1ca   : > { %v1602_v25 = vpop.f32.mrf.mxu2  ;;  %v1651_v31 = vpop.f32.mrf.mxu3 }
 0x1cb   : > { %v1757_v10 = vadd.f32 %v3160_v62, %v1737_v11  ;;  %v1652_v59 = vadd.f32 %v1651_v31, %v1602_v25 }
 0x1cd   : > { %v1773_v20 = vmax.f32 %v1757_v10, 0.0  ;;  %v1701_v4 = vadd.f32 %v1700_v30, %v1652_v59 }
 0x1cf   : > { %v1789_v33 = vpack.c.bf16 %v1773_v20, %v1773_v20  ;;  %v1718_v60 = vadd.f32 %v1701_v4, %v1335_v12 }
 0x1d1   : > { %1806 = vst.msk [vmem:[%s3168_s17 + $0x38] sm:$0xf] %vm1791_vm2, %v1789_v33  ;;  %v1738_v36 = vmul.f32 %v3155_v15, %v1718_v60 }
 0x1d3   : > { %v1758_v2 = vadd.f32 %v3160_v62, %v1738_v36 }
 0x1d5   : > { %v1774_v39 = vmax.f32 %v1758_v2, 0.0 }
 0x1d7   : > { %v1790_v50 = vpack.c.bf16 %v1774_v39, %v1774_v39 }
 0x1d9   : > { %1807 = vst.msk [vmem:[%s3168_s17 + $0x3c] sm:$0xf] %vm1791_vm2, %v1790_v50 }
 0x1da PF: > { %s16_s25 = sadd.s32 1, %s2584_s25   ;;  %s3268_s21 = smov %s2576_s23 }
 0x1db   : > { %p13_p10 = scmp.ge.s32.totalorder %s16_s25, 6   ;;  %s3269_s22 = smov %s2580_s24 }
 0x1dc   : > { %s3270_s23 = smov %s3273_s26  ;;  %s3271_s24 = smov %s3277_s27 }
 0x1dd   :  { %15 = sbr.rel (!%p13_p10) target bundleno = 3 (0x3), region = 82 }

// kernel: exp2_decoder26_forward.6
= control target key start
LH: loop header
LB: loop body
LE: loop exit
PB: predicated region body
PF: predicated region fallthrough
CT: control target
= control target key end

     0   :  { %s5387_s21 = smov 0   ;;  %s7544_s0 = inlined_call_operand.vmem [shape: bf16[2,16,16,64], index: 0, kind: input, shape index: {}]   ;;  %s7545_s1 = inlined_call_operand.vmem [shape: bf16[2,32,32,32], index: 1, kind: input, shape index: {}]   ;;  %s7546_s2 = inlined_call_operand.vmem [shape: bf16[32,8], index: 2, kind: input, shape index: {}]   ;;  %s7547_s3 = inlined_call_operand.vmem [shape: f32[1,8], index: 3, kind: input, shape index: {}]   ;;  %s7548_s4 = inlined_call_operand.vmem [shape: f32[1,8], index: 4, kind: input, shape index: {}]   ;;  %s7549_s5 = inlined_call_operand.vmem [shape: f32[128,64], index: 5, kind: input, shape index: {}]   ;;  %s7550_s6 = inlined_call_operand.vmem [shape: bf16[2,32,32,72], index: 6, kind: output, shape index: {}]  }
   0x1 LB: > { %s4087_s22 = sadd.s32 4294967295, %s5349_s21   ;;  %p4091_p0 = scmp.ge.s32.totalorder %s5349_s21, 1  ;;  %s5349_s21 = sphi %s5387_s21, %s16_s21  }
   0x2   : > { %p222_p1 = scmp.lt.s32.totalorder %s5349_s21, 3 }
   0x4   : > { %p223_p2 = pnand %p4091_p0, %p222_p1 }
   0x5   : > { %p257_p3 = scmp.lt.s32.totalorder (!%p223_p2), %s4087_s22, 1  ;;  %s5351_s7 = smov (!%p223_p2), 64  }
   0x6   : > { %226 = sbr.rel (%p223_p2) target bundleno = 804 (0x324), region = 44 }
   0xb   : > { %v4848_v0 = vld [vmem:[%s7546_s2 + $0x8] sm:$0xff]  ;;  %v4847_v2 = vld [vmem:[%s7546_s2] sm:$0xff]  ;;  %s7560_s22 = smov (!%p257_p3, %s4087_s22), 1  ;;  %vm533_vm0 = vcmask 261120   ;;  %vm347_vm1 = vcmask 523264   ;;  %v5500_v46 = vld [vmem:[%s7549_s5 + $0x10] sm:$0xff] }
   0xc   : > { %v4858_v1 = vld [vmem:[%s7546_s2 + $0x8] sm:$0xff]  ;;  %564 = vmatpush.bf16.msra.mxu1 %v4848_v0  ;;  %v4857_v3 = vld [vmem:[%s7546_s2] sm:$0xff]  ;;  %s4837_s9 = sshll.u32 %s7560_s22, 9  ;;  %s4836_s10 = sshll.u32 %s7560_s22, 7  ;;  %v5507_v47 = vld [vmem:[%s7549_s5 + $0x18] sm:$0xff]  ;;  %vm759_vm2 = vcmask 584704  }
   0xd   : > { %1028 = vmatpush.bf16.msra.mxu3 %v4858_v1  ;;  %v4868_v4 = vld [vmem:[%s7546_s2 + $0x8] sm:$0xff]  ;;  %s5419_s13 = scalar_lea.vmem %s7545_s1, %s4837_s9  ;;  %s5426_s16 = scalar_lea.vmem %s7544_s0, %s4836_s10  ;;  %v5479_v41 = vld [vmem:[%s7549_s5] sm:$0xff]  ;;  %v5542_v56 = vld [vmem:[%s7549_s5 + $0x30] sm:$0xff] }
   0xe   : > { %v4839_v5 = vld [vmem:[%s5419_s13] sm:$0xff]  ;;  %v4985_v7 = vld [vmem:[%s5426_s16 + $0x18] sm:$0xff]   ;;  %v4984_v9 = vld [vmem:[%s5426_s16 + $0x10] sm:$0xff]   ;;  %s5950_s23 = scalar_lea.vmem %s7550_s6, %s4837_s9 }
   0xf   : > { %v4849_v6 = vld [vmem:[%s5419_s13 + $0x40] sm:$0xff]  ;;  %v4934_v10 = vunpack.c.h.bf16 %v4985_v7  ;;  %v4933_v12 = vunpack.c.l.bf16 %v4985_v7  ;;  %v4930_v14 = vunpack.c.h.bf16 %v4984_v9  ;;  %v4929_v15 = vunpack.c.l.bf16 %v4984_v9  ;;  %v4983_v21 = vld [vmem:[%s5426_s16 + $0x8] sm:$0xff]   ;;  %v4841_v44 = vld [vmem:[%s5419_s13 + $0x10] sm:$0xff] }
  0x10   : > { %565 = vmatpush.bf16.msra.mxu1 %v4847_v2  ;;  %v5430_v8 = vld [vmem:[%s5426_s16 + $0x20] sm:$0xff]   ;;  %v5455_v28 = vunpack.c.h.bf16 %v4983_v21  ;;  %v5460_v32 = vunpack.c.l.bf16 %v4983_v21  ;;  %v4840_v37 = vld [vmem:[%s5419_s13 + $0x8] sm:$0xff]  ;;  %v4851_v45 = vld [vmem:[%s5419_s13 + $0x50] sm:$0xff] }
  0x11   : > { %1029 = vmatpush.bf16.msra.mxu3 %v4857_v3  ;;  %v4938_v11 = vunpack.c.h.bf16 %v5430_v8  ;;  %v4937_v13 = vunpack.c.l.bf16 %v5430_v8  ;;  %v787_v16 = vmul.f32 0.75, %v4934_v10  ;;  %v786_v18 = vmul.f32 0.75, %v4933_v12  ;;  %v4850_v38 = vld [vmem:[%s5419_s13 + $0x48] sm:$0xff]  ;;  %v4852_v48 = vld [vmem:[%s5419_s13 + $0x58] sm:$0xff]  ;;  %v4867_v50 = vld [vmem:[%s7546_s2] sm:$0xff] }
  0x12   : > { %v5445_v20 = vmul.f32 0.25, %v4930_v14  ;;  %v5450_v24 = vmul.f32 0.25, %v4929_v15  ;;  %v777_v26 = vmul.f32 0.75, %v4930_v14  ;;  %v5453_v27 = vmul.f32 0.25, %v4934_v10  ;;  %v4878_v42 = vld [vmem:[%s7546_s2 + $0x8] sm:$0xff]  ;;  %v4842_v49 = vld [vmem:[%s5419_s13 + $0x18] sm:$0xff] }
  0x13   : > { %4154 = vmatmul.msk.bf16.vlgmr.msra.gmra.mxu1 %vm533_vm0, %v4839_v5  ;;  %v5439_v17 = vmul.f32 0.25, %v4938_v11  ;;  %v5443_v19 = vmul.f32 0.25, %v4937_v13  ;;  %v776_v30 = vmul.f32 0.75, %v4929_v15  ;;  %v5458_v31 = vmul.f32 0.25, %v4933_v12  ;;  %v5489_v43 = vld [vmem:[%s7549_s5 + $0x8] sm:$0xff]  ;;  %v5521_v51 = vld [vmem:[%s7549_s5 + $0x20] sm:$0xff] }
  0x14   : > { %4234 = vmatmul.msk.bf16.vlgmr.msra.gmra.mxu3 %vm533_vm0, %v4849_v6  ;;  %v789_v25 = vadd.f32 %v787_v16, %v5445_v20  ;;  %v788_v29 = vadd.f32 %v786_v18, %v5450_v24  ;;  %v785_v33 = vadd.f32 %v5453_v27, %v777_v26  ;;  %v5464_v34 = vmul.f32 0.25, %v5455_v28  ;;  %v4877_v52 = vld [vmem:[%s7546_s2] sm:$0xff]  ;;  %v5531_v53 = vld [vmem:[%s7549_s5 + $0x28] sm:$0xff]  ;;  %v5549_v57 = vld [vmem:[%s7549_s5 + $0x38] sm:$0xff] }
  0x15   : > { %1492 = vmatpush.bf16.msrb.mxu3 %v4868_v4  ;;  %v795_v22 = vadd.f32 %v5439_v17, %v787_v16  ;;  %v794_v23 = vadd.f32 %v5443_v19, %v786_v18  ;;  %v784_v35 = vadd.f32 %v5458_v31, %v776_v30  ;;  %v5468_v36 = vmul.f32 0.25, %v5460_v32  ;;  %v4853_v54 = vld [vmem:[%s5419_s13 + $0x60] sm:$0xff]  ;;  %v4854_v58 = vld [vmem:[%s5419_s13 + $0x68] sm:$0xff]  ;;  %v4855_v21 = vld [vmem:[%s5419_s13 + $0x70] sm:$0xff] }
  0x16   : > { %v779_v39 = vadd.f32 %v777_v26, %v5464_v34  ;;  %v4843_v55 = vld [vmem:[%s5419_s13 + $0x20] sm:$0xff]  ;;  %v4844_v59 = vld [vmem:[%s5419_s13 + $0x28] sm:$0xff]  ;;  %v322_v60 = vmul.f32 0.75, %v5455_v28  ;;  %v321_v61 = vmul.f32 0.75, %v5460_v32  ;;  %v310_v12 = vmul.f32 0.0, %v5455_v28  ;;  %v4856_v26 = vld [vmem:[%s5419_s13 + $0x78] sm:$0xff] }
  0x17   : > { %868 = vmatpush.msra.mxu2 %v795_v22  ;;  %v778_v40 = vadd.f32 %v776_v30, %v5468_v36  ;;  %v4920_v62 = vld [vmem:[%s5426_s16] sm:$0xff]   ;;  %v5575_v16 = vld [vmem:[%s7549_s5 + $0x48] sm:$0xff]  ;;  %v4845_v22 = vld [vmem:[%s5419_s13 + $0x30] sm:$0xff] }
  0x18   : > { %v330_v63 = vadd.f32 %v5445_v20, %v322_v60  ;;  %v4922_v0 = vunpack.c.h.bf16 %v4920_v62  ;;  %v329_v1 = vadd.f32 %v5450_v24, %v321_v61  ;;  %v4921_v3 = vunpack.c.l.bf16 %v4920_v62  ;;  %v5565_v4 = vld [vmem:[%s7549_s5 + $0x40] sm:$0xff]  ;;  %v5587_v24 = vld [vmem:[%s7549_s5 + $0x50] sm:$0xff]  ;;  %v4846_v28 = vld [vmem:[%s5419_s13 + $0x38] sm:$0xff] }
  0x19   : > { %869 = vmatpush.msra.mxu2 %v794_v23  ;;  %1493 = vmatpush.bf16.msrb.mxu3 %v4867_v50  ;;  %v309_v20 = vmul.f32 0.0, %v5460_v32  ;;  %v5612_v30 = vld [vmem:[%s7549_s5 + $0x60] sm:$0xff]  ;;  %v4898_v32 = vld [vmem:[%s7546_s2 + $0x8] sm:$0xff] }
  0x1a   : > { %v320_v2 = vmul.f32 0.25, %v4922_v0  ;;  %404 = vmatpush.msra.mxu0 %v330_v63  ;;  %v319_v6 = vmul.f32 0.25, %v4921_v3  ;;  %v314_v9 = vmul.f32 0.75, %v4922_v0  ;;  %v313_v10 = vmul.f32 0.75, %v4921_v3  ;;  %v5689_v62 = vld [vmem:[%s7547_s3] ss:$0 sm:$0xff] }
  0x1b   : > { %870 = vmatpush.msra.mxu2 %v789_v25  ;;  %v312_v18 = vadd.f32 %v4922_v0, %v310_v12  ;;  %v311_v23 = vadd.f32 %v4921_v3, %v309_v20  ;;  %v5596_v25 = vld [vmem:[%s7549_s5 + $0x58] sm:$0xff]  ;;  %v5698_v3 = vld [vmem:[%s7548_s4] ss:$0 sm:$0xff] }
  0x1c   : > { %v324_v5 = vadd.f32 %v322_v60, %v320_v2  ;;  %405 = vmatpush.msra.mxu0 %v329_v1  ;;  %v323_v7 = vadd.f32 %v321_v61, %v319_v6  ;;  %v318_v14 = vadd.f32 %v5464_v34, %v314_v9  ;;  %v317_v15 = vadd.f32 %v5468_v36, %v313_v10  ;;  %v5629_v34 = vld [vmem:[%s5426_s16 + $0x28] sm:$0xff]   ;;  %v5635_v36 = vld [vmem:[%s5426_s16 + $0x38] sm:$0xff]   ;;  %v5682_v61 = vld [vmem:[%s7549_s5 + $0x70] sm:$0xff] }
  0x1d   : > { %871 = vmatpush.msra.mxu2 %v788_v29  ;;  %v4888_v29 = vld [vmem:[%s7546_s2 + $0x8] sm:$0xff]  ;;  %v4941_v9 = vunpack.c.l.bf16 %v5629_v34  ;;  %v5707_v12 = vld [vmem:[%s7549_s5 + $0x78] sm:$0xff] }
  0x1e   : > { %406 = vmatpush.msra.mxu0 %v324_v5  ;;  %2420 = vmatpush.bf16.msra.mxu3 %v4888_v29  ;;  %v4860_v29 = vld [vmem:[%s5419_s13 + $0x88] sm:$0xff] }
  0x1f   : > { %872 = vmatpush.msra.mxu2 %v785_v33  ;;  %v5624_v33 = vld [vmem:[%s7549_s5 + $0x68] sm:$0xff] }
  0x20   : > { %407 = vmatpush.msra.mxu0 %v323_v7 }
  0x21   : > { %873 = vmatpush.msra.mxu2 %v784_v35  ;;  %v5632_v35 = vld [vmem:[%s5426_s16 + $0x30] sm:$0xff]  }
  0x22   : > { %408 = vmatpush.msra.mxu0 %v318_v14  ;;  %v4945_v10 = vunpack.c.l.bf16 %v5632_v35  ;;  %v4949_v14 = vunpack.c.l.bf16 %v5635_v36 }
  0x23   : > { %4155 = vmatmul.msk.bf16.gmra.mxu1 %vm533_vm0, %v4840_v37  ;;  %874 = vmatpush.msra.mxu2 %v779_v39  ;;  %v4942_v37 = vunpack.c.h.bf16 %v5629_v34  ;;  %v4950_v39 = vunpack.c.h.bf16 %v5635_v36 }
  0x24   : > { %4235 = vmatmul.msk.bf16.gmra.mxu3 %vm533_vm0, %v4850_v38  ;;  %409 = vmatpush.msra.mxu0 %v317_v15  ;;  %v4946_v38 = vunpack.c.h.bf16 %v5632_v35  ;;  %v5860_v8 = vmul.f32 0.25, %v4949_v14 }
  0x25   : > { %875 = vmatpush.msra.mxu2 %v778_v40  ;;  %v5641_v40 = vld [vmem:[%s5426_s16 + $0x40] sm:$0xff]  }
  0x26   : > { %4162 = vmatmul.msk.f32.vlgmr.msra.gmra.mxu2 %vm347_vm1, %v5479_v41  ;;  %410 = vmatpush.msra.mxu0 %v312_v18  ;;  %v5658_v50 = vmul.f32 0.25, %v4946_v38  ;;  %v4953_v15 = vunpack.c.l.bf16 %v5641_v40 }
  0x27   : > { %1956 = vmatpush.bf16.msrb.mxu2 %v4878_v42  ;;  %v5648_v42 = vld [vmem:[%s7547_s3] ss:$0 sm:$0xff] }
  0x28   : > { %411 = vmatpush.msra.mxu0 %v311_v23 }
  0x29   : > { %4098 = vmatmul.msk.f32.vlgmr.msra.gmra.mxu0 %vm347_vm1, %v5479_v41 }
  0x2b   : > { %1957 = vmatpush.bf16.msrb.mxu2 %v4877_v52  ;;  %v5662_v52 = vmul.f32 0.75, %v4950_v39 }
  0x2e   : > { %4163 = vmatmul.msk.f32.gmra.mxu2 %vm347_vm1, %v5489_v43 }
  0x2f   : > { %2884 = vmatpush.bf16.msra.mxu2 %v4898_v32 }
  0x31   : > { %4099 = vmatmul.msk.f32.gmra.mxu0 %vm347_vm1, %v5489_v43 }
  0x33   : > { %4156 = vmatmul.msk.bf16.gmra.mxu1 %vm533_vm0, %v4841_v44  ;;  %v4859_v44 = vld [vmem:[%s5419_s13 + $0x80] sm:$0xff] }
  0x34   : > { %4236 = vmatmul.msk.bf16.gmra.mxu3 %vm533_vm0, %v4851_v45  ;;  %v4954_v45 = vunpack.c.h.bf16 %v5641_v40 }
  0x36   : > { %4164 = vmatmul.msk.f32.gmra.mxu2 %vm347_vm1, %v5500_v46 }
  0x39   : > { %4100 = vmatmul.msk.f32.gmra.mxu0 %vm347_vm1, %v5500_v46 }
  0x3e   : > { %4165 = vmatmul.msk.f32.gmra.mxu2 %vm347_vm1, %v5507_v47 }
  0x41   : > { %4101 = vmatmul.msk.f32.gmra.mxu0 %vm347_vm1, %v5507_v47 }
  0x43   : > { %4157 = vmatmul.msk.bf16.gmra.mxu1 %vm533_vm0, %v4842_v49  ;;  %v5654_v49 = vmul.f32 0.75, %v4942_v37 }
  0x44   : > { %4237 = vmatmul.msk.bf16.gmra.mxu3 %vm533_vm0, %v4852_v48 }
  0x46   : > { %4166 = vmatmul.msk.f32.gmra.mxu2 %vm347_vm1, %v5521_v51 }
  0x49   : > { %4102 = vmatmul.msk.f32.gmra.mxu0 %vm347_vm1, %v5521_v51 }
  0x4e   : > { %4167 = vmatmul.msk.f32.gmra.mxu2 %vm347_vm1, %v5531_v53 }
  0x51   : > { %4103 = vmatmul.msk.f32.gmra.mxu0 %vm347_vm1, %v5531_v53  ;;  %v5728_v53 = vmul.f32 0.25, %v4953_v15 }
  0x53   : > { %4158 = vmatmul.msk.bf16.gmra.mxu1 %vm533_vm0, %v4843_v55  ;;  %v1259_v55 = vadd.f32 %v5658_v50, %v5654_v49 }
  0x54   : > { %4238 = vmatmul.msk.bf16.gmra.mxu3 %vm533_vm0, %v4853_v54  ;;  %v5666_v54 = vmul.f32 0.25, %v4954_v45 }
  0x55   : > { %1332 = vmatpush.msrb.mxu1 %v1259_v55 }
  0x56   : > { %4168 = vmatmul.msk.f32.gmra.mxu2 %vm347_vm1, %v5542_v56  ;;  %v1723_v60 = vadd.f32 %v5666_v54, %v5662_v52 }
  0x58   : > { %1796 = vmatpush.msrb.mxu0 %v1723_v60 }
  0x59   : > { %4104 = vmatmul.msk.f32.gmra.mxu0 %vm347_vm1, %v5542_v56  ;;  %v1253_v56 = vadd.f32 %v5654_v49, %v5439_v17 }
  0x5e   : > { %4169 = vmatmul.msk.f32.gmra.mxu2 %vm347_vm1, %v5549_v57 }
  0x61   : > { %4105 = vmatmul.msk.f32.gmra.mxu0 %vm347_vm1, %v5549_v57 }
  0x63   : > { %4159 = vmatmul.msk.bf16.gmra.mxu1 %vm533_vm0, %v4844_v59  ;;  %v5674_v59 = vld [vmem:[%s7548_s4] ss:$0 sm:$0xff] }
  0x64   : > { %4239 = vmatmul.msk.bf16.gmra.mxu3 %vm533_vm0, %v4854_v58 }
  0x66   : > { %4170 = vmatmul.msk.f32.gmra.mxu2 %vm347_vm1, %v5565_v4 }
  0x69   : > { %4106 = vmatmul.msk.f32.gmra.mxu0 %vm347_vm1, %v5565_v4 }
  0x6e   : > { %4171 = vmatmul.msk.f32.gmra.mxu2 %vm347_vm1, %v5575_v16 }
  0x71   : > { %4107 = vmatmul.msk.f32.gmra.mxu0 %vm347_vm1, %v5575_v16 }
  0x73   : > { %4160 = vmatmul.msk.bf16.gmra.mxu1 %vm533_vm0, %v4845_v22  ;;  %v5720_v22 = vmul.f32 0.25, %v4945_v10 }
  0x74   : > { %4240 = vmatmul.msk.bf16.gmra.mxu3 %vm533_vm0, %v4855_v21  ;;  %v5716_v21 = vmul.f32 0.75, %v4941_v9 }
  0x76   : > { %4172 = vmatmul.msk.f32.gmra.mxu2 %vm347_vm1, %v5587_v24  ;;  %v1252_v4 = vadd.f32 %v5716_v21, %v5443_v19 }
  0x79   : > { %4108 = vmatmul.msk.f32.gmra.mxu0 %vm347_vm1, %v5587_v24 }
  0x7e   : > { %4173 = vmatmul.msk.f32.gmra.mxu2 %vm347_vm1, %v5596_v25 }
  0x81   : > { %4109 = vmatmul.msk.f32.gmra.mxu0 %vm347_vm1, %v5596_v25 }
  0x83   : > { %4161 = vmatmul.msk.bf16.gmra.mxu1 %vm533_vm0, %v4846_v28 }
  0x84   : > { %4241 = vmatmul.msk.bf16.gmra.mxu3 %vm533_vm0, %v4856_v26  ;;  %v5724_v26 = vmul.f32 0.75, %v4949_v14 }
  0x86   : > { %4174 = vmatmul.msk.f32.gmra.mxu2 %vm347_vm1, %v5612_v30  ;;  %v1722_v55 = vadd.f32 %v5728_v53, %v5724_v26 }
  0x88   : > { %1797 = vmatpush.msrb.mxu0 %v1722_v55 }
  0x89   : > { %4110 = vmatmul.msk.f32.gmra.mxu0 %vm347_vm1, %v5612_v30  ;;  %v1246_v30 = vmul.f32 0.25, %v4941_v9 }
  0x8e   : > { %4175 = vmatmul.msk.f32.gmra.mxu2 %vm347_vm1, %v5624_v33 }
  0x90   : > { %v567_v48 = vpop.f32.mrf.mxu1 }
  0x91   : > { %v611_v58 = vmul.f32 %v5648_v42, %v567_v48  ;;  %4111 = vmatmul.msk.f32.gmra.mxu0 %vm347_vm1, %v5624_v33 }
  0x93   : > { %v631_v0 = vadd.f32 %v5674_v59, %v611_v58 }
  0x94   : > { %4330 = vmatmul.msk.bf16.vlgmr.msrb.gmra.mxu3 %vm533_vm0, %v4859_v44  ;;  %v1258_v44 = vadd.f32 %v5720_v22, %v5716_v21 }
  0x95   : > { %v647_v7 = vmax.f32 %v631_v0, 0.0  ;;  %v4869_v0 = vld [vmem:[%s5419_s13 + $0xc0] sm:$0xff] }
  0x96   : > { %4176 = vmatmul.msk.f32.gmra.mxu2 %vm347_vm1, %v5682_v61  ;;  %1333 = vmatpush.msrb.mxu1 %v1258_v44 }
  0x97   : > { %v1031_v63 = vpop.f32.mrf.mxu3 }
  0x98   : > { %v569_v1 = vpop.f32.mrf.mxu1  ;;  %v1075_v2 = vmul.f32 %v5689_v62, %v1031_v63  ;;  %1334 = vmatpush.msrb.mxu1 %v1253_v56 }
  0x99   : > { %v612_v5 = vmul.f32 %v5648_v42, %v569_v1  ;;  %4112 = vmatmul.msk.f32.gmra.mxu0 %vm347_vm1, %v5682_v61 }
  0x9a   : > { %v1095_v18 = vadd.f32 %v5698_v3, %v1075_v2  ;;  %1335 = vmatpush.msrb.mxu1 %v1252_v4  ;;  %v5821_v4 = vmul.f32 0.75, %v4946_v38 }
  0x9b   : > { %v632_v6 = vadd.f32 %v5674_v59, %v612_v5 }
  0x9c   : > { %v1111_v58 = vmax.f32 %v1095_v18, 0.0 }
  0x9d   : > { %v648_v20 = vmax.f32 %v632_v6, 0.0 }
  0x9e   : > { %4177 = vmatmul.msk.f32.gmra.mxu2 %vm347_vm1, %v5707_v12 }
  0x9f   : > { %v1033_v23 = vpop.f32.mrf.mxu3  ;;  %v5007_v32 = vpack.i.bf16 %v648_v20, %v647_v7 }
  0xa0   : > { %v1076_v28 = vmul.f32 %v5689_v62, %v1033_v23  ;;  %v572_v48 = vpop.f32.mrf.mxu1 }
  0xa1   : > { %5008 = vrot.lane.b32.xlu0 %v5007_v32, %s5351_s7  ;;  %v613_v63 = vmul.f32 %v5648_v42, %v572_v48  ;;  %v1717_v32 = vadd.f32 %v5662_v52, %v5658_v50  ;;  %v4870_v52 = vld [vmem:[%s5419_s13 + $0xc8] sm:$0xff]  ;;  %4113 = vmatmul.msk.f32.gmra.mxu0 %vm347_vm1, %v5707_v12 }
  0xa2   : > { %v1096_v60 = vadd.f32 %v5698_v3, %v1076_v28 }
  0xa3   : > { %v633_v6 = vadd.f32 %v5674_v59, %v613_v63  ;;  %1798 = vmatpush.msrb.mxu0 %v1717_v32  ;;  %v4861_v63 = vld [vmem:[%s5419_s13 + $0x90] sm:$0xff]  ;;  %v1716_v32 = vadd.f32 %v5724_v26, %v5720_v22 }
  0xa4   : > { %4331 = vmatmul.msk.bf16.gmra.mxu3 %vm533_vm0, %v4860_v29  ;;  %v1112_v1 = vmax.f32 %v1096_v60, 0.0 }
  0xa5   : > { %v649_v28 = vmax.f32 %v633_v6, 0.0  ;;  %1799 = vmatpush.msrb.mxu0 %v1716_v32  ;;  %v5825_v32 = vmul.f32 0.25, %v4950_v39 }
  0xa6   : > { %v5012_v2 = vpack.i.bf16 %v1112_v1, %v1111_v58  ;;  %4426 = vmatmul.msk.bf16.vlgmr.msrb.gmra.mxu2 %vm533_vm0, %v4869_v0 }
  0xa7   : > { %v1036_v5 = vpop.f32.mrf.mxu3 }
  0xa8   : > { %5013 = vrot.lane.b32.xlu2 %v5012_v2, %s5351_s7  ;;  %v574_v7 = vpop.f32.mrf.mxu1  ;;  %v1077_v18 = vmul.f32 %v5689_v62, %v1036_v5 }
  0xa9   : > { %v614_v20 = vmul.f32 %v5648_v42, %v574_v7  ;;  %v5750_v23 = vpop.f32.mrf.mxu2 }
  0xaa   : > { %v1097_v44 = vadd.f32 %v5698_v3, %v1077_v18 }
  0xab   : > { %v634_v29 = vadd.f32 %v5674_v59, %v614_v20 }
  0xac   : > { %v1113_v1 = vmax.f32 %v1097_v44, 0.0  ;;  %v4887_v44 = vld [vmem:[%s7546_s2] sm:$0xff] }
  0xad   : > { %v650_v48 = vmax.f32 %v634_v29, 0.0  ;;  %2421 = vmatpush.bf16.msra.mxu3 %v4887_v44 }
  0xaf   : > { %v1038_v55 = vpop.f32.mrf.mxu3  ;;  %v5017_v60 = vpack.i.bf16 %v650_v48, %v649_v28 }
  0xb0   : > { %v1078_v58 = vmul.f32 %v5689_v62, %v1038_v55  ;;  %v577_v0 = vpop.f32.mrf.mxu1 }
  0xb1   : > { %5018 = vrot.lane.b32.xlu0 %v5017_v60, %s5351_s7  ;;  %v5764_v49 = vpop.f32.mrf.mxu2  ;;  %v615_v50 = vmul.f32 %v5648_v42, %v577_v0  ;;  %v4862_v60 = vld [vmem:[%s5419_s13 + $0x98] sm:$0xff] }
  0xb2   : > { %v1098_v17 = vadd.f32 %v5698_v3, %v1078_v58 }
  0xb3   : > { %v635_v6 = vadd.f32 %v5674_v59, %v615_v50 }
  0xb4   : > { %v1114_v57 = vmax.f32 %v1098_v17, 0.0  ;;  %4332 = vmatmul.msk.bf16.gmra.mxu3 %vm533_vm0, %v4861_v63 }
  0xb5   : > { %v651_v56 = vmax.f32 %v635_v6, 0.0 }
  0xb6   : > { %v5022_v2 = vpack.i.bf16 %v1114_v57, %v1113_v1  ;;  %4427 = vmatmul.msk.bf16.gmra.mxu2 %vm533_vm0, %v4870_v52  ;;  %v4871_v1 = vld [vmem:[%s5419_s13 + $0xd0] sm:$0xff] }
  0xb7   : > { %v1041_v5 = vpop.f32.mrf.mxu3 }
  0xb8   : > { %v579_v7 = vpop.f32.mrf.mxu1  ;;  %v1079_v18 = vmul.f32 %v5689_v62, %v1041_v5 }
  0xb9   : > { %v616_v20 = vmul.f32 %v5648_v42, %v579_v7  ;;  %5023 = vrot.lane.b32.xlu0 %v5022_v2, %s5351_s7  ;;  %v5776_v28 = vpop.f32.mrf.mxu2  ;;  %v4897_v2 = vld [vmem:[%s7546_s2] sm:$0xff] }
  0xba   : > { %v1099_v48 = vadd.f32 %v5698_v3, %v1079_v18  ;;  %2885 = vmatpush.bf16.msra.mxu2 %v4897_v2  ;;  %v1240_v2 = vmul.f32 0.75, %v4937_v13 }
  0xbb   : > { %v636_v29 = vadd.f32 %v5674_v59, %v616_v20 }
  0xbc   : > { %v1115_v26 = vmax.f32 %v1099_v48, 0.0  ;;  %v1242_v33 = vadd.f32 %v1240_v2, %v5458_v31 }
  0xbd   : > { %v652_v55 = vmax.f32 %v636_v29, 0.0  ;;  %v1241_v29 = vmul.f32 0.75, %v4938_v11 }
  0xbf   : > { %v1043_v58 = vpop.f32.mrf.mxu3  ;;  %v5027_v21 = vpack.i.bf16 %v652_v55, %v651_v56  ;;  %v5815_v56 = vmul.f32 0.25, %v4942_v37  ;;  %v1713_v37 = vadd.f32 %v5825_v32, %v5821_v4  ;;  %v1243_v13 = vadd.f32 %v1241_v29, %v5453_v27 }
  0xc0   : > { %v1080_v19 = vmul.f32 %v5689_v62, %v1043_v58  ;;  %v582_v22 = vpop.f32.mrf.mxu1  ;;  %v4863_v58 = vld [vmem:[%s5419_s13 + $0xa0] sm:$0xff] }
  0xc1   : > { %5028 = vrot.lane.b32.xlu1 %v5027_v21, %s5351_s7  ;;  %v5793_v0 = vpop.f32.mrf.mxu2  ;;  %v617_v17 = vmul.f32 %v5648_v42, %v582_v22  ;;  %v1249_v11 = vadd.f32 %v5815_v56, %v1241_v29  ;;  %1800 = vmatpush.msrb.mxu0 %v1713_v37  ;;  %v4873_v37 = vld [vmem:[%s5419_s13 + $0xe0] sm:$0xff] }
  0xc2   : > { %v1100_v63 = vadd.f32 %v5698_v3, %v1080_v19 }
  0xc3   : > { %v637_v52 = vadd.f32 %v5674_v59, %v617_v17  ;;  %1336 = vmatpush.msrb.mxu1 %v1249_v11 }
  0xc4   : > { %v1116_v16 = vmax.f32 %v1100_v63, 0.0  ;;  %4333 = vmatmul.msk.bf16.gmra.mxu3 %vm533_vm0, %v4862_v60 }
  0xc5   : > { %v653_v18 = vmax.f32 %v637_v52, 0.0 }
  0xc6   : > { %v5032_v57 = vpack.i.bf16 %v1116_v16, %v1115_v26  ;;  %4428 = vmatmul.msk.bf16.gmra.mxu2 %vm533_vm0, %v4871_v1  ;;  %v4872_v26 = vld [vmem:[%s5419_s13 + $0xd8] sm:$0xff] }
  0xc7   : > { %v1046_v50 = vpop.f32.mrf.mxu3 }
  0xc8   : > { %v584_v5 = vpop.f32.mrf.mxu1  ;;  %v1081_v6 = vmul.f32 %v5689_v62, %v1046_v50 }
  0xc9   : > { %5033 = vrot.lane.b32.xlu1 %v5032_v57, %s5351_s7  ;;  %v618_v7 = vmul.f32 %v5648_v42, %v584_v5  ;;  %v5808_v24 = vpop.f32.mrf.mxu2 }
  0xca   : > { %v1101_v44 = vadd.f32 %v5698_v3, %v1081_v6 }
  0xcb   : > { %v638_v20 = vadd.f32 %v5674_v59, %v618_v7 }
  0xcc   : > { %v1117_v21 = vmax.f32 %v1101_v44, 0.0 }
  0xcd   : > { %v654_v48 = vmax.f32 %v638_v20, 0.0  ;;  %v1704_v20 = vmul.f32 0.75, %v4945_v10  ;;  %v4864_v10 = vld [vmem:[%s5419_s13 + $0xa8] sm:$0xff] }
  0xcf   : > { %v1048_v55 = vpop.f32.mrf.mxu3  ;;  %v5037_v19 = vpack.i.bf16 %v654_v48, %v653_v18  ;;  %v1248_v18 = vadd.f32 %v1246_v30, %v1240_v2  ;;  %v1712_v48 = vadd.f32 %v5860_v8, %v1704_v20  ;;  %v1706_v2 = vadd.f32 %v1704_v20, %v1246_v30 }
  0xd0   : > { %v1082_v25 = vmul.f32 %v5689_v62, %v1048_v55  ;;  %v587_v38 = vpop.f32.mrf.mxu1 }
  0xd1   : > { %5038 = vrot.lane.b32.xlu1 %v5037_v19, %s5351_s7  ;;  %v5835_v60 = vpop.f32.mrf.mxu2  ;;  %v619_v63 = vmul.f32 %v5648_v42, %v587_v38  ;;  %1337 = vmatpush.msrb.mxu1 %v1248_v18 }
  0xd2   : > { %v1102_v39 = vadd.f32 %v5698_v3, %v1082_v25  ;;  %1801 = vmatpush.msrb.mxu0 %v1712_v48 }
  0xd3   : > { %v639_v17 = vadd.f32 %v5674_v59, %v619_v63  ;;  %1338 = vmatpush.msrb.mxu1 %v1243_v13  ;;  %v1707_v63 = vadd.f32 %v5821_v4, %v5815_v56  ;;  %v5898_v56 = vpop.f32.mrf.mxu0  ;;  %v4874_v13 = vld [vmem:[%s5419_s13 + $0xe8] sm:$0xff] }
  0xd4   : > { %v1118_v22 = vmax.f32 %v1102_v39, 0.0  ;;  %4334 = vmatmul.msk.bf16.gmra.mxu3 %vm533_vm0, %v4863_v58 }
  0xd5   : > { %v655_v6 = vmax.f32 %v639_v17, 0.0  ;;  %1339 = vmatpush.msrb.mxu1 %v1242_v33  ;;  %1802 = vmatpush.msrb.mxu0 %v1707_v63  ;;  %v4908_v33 = vld [vmem:[%s7546_s2 + $0x8] sm:$0xff]  ;;  %v4875_v63 = vld [vmem:[%s5419_s13 + $0xf0] sm:$0xff] }
  0xd6   : > { %v5042_v16 = vpack.i.bf16 %v1118_v22, %v1117_v21  ;;  %4429 = vmatmul.msk.bf16.gmra.mxu2 %vm533_vm0, %v4872_v26  ;;  %4258 = vmatmul.msk.f32.vlgmr.msrb.gmra.mxu1 %vm347_vm1, %v5479_v41 }
  0xd7   : > { %v1051_v1 = vpop.f32.mrf.mxu3  ;;  %1803 = vmatpush.msrb.mxu0 %v1706_v2  ;;  %3348 = vmatpush.bf16.msrb.mxu3 %v4908_v33  ;;  %v5996_v33 = vld [vmem:[%s5426_s16 + $0x50] sm:$0xff]  }
  0xd8   : > { %5043 = vrot.lane.b32.xlu2 %v5042_v16, %s5351_s7  ;;  %v589_v57 = vpop.f32.mrf.mxu1  ;;  %v1083_v50 = vmul.f32 %v5689_v62, %v1051_v1  ;;  %4354 = vmatmul.msk.f32.vlgmr.msrb.gmra.mxu0 %vm347_vm1, %v5479_v41 }
  0xd9   : > { %v620_v52 = vmul.f32 %v5648_v42, %v589_v57  ;;  %v5851_v5 = vpop.f32.mrf.mxu2 }
  0xda   : > { %v1103_v34 = vadd.f32 %v5698_v3, %v1083_v50  ;;  %v4865_v50 = vld [vmem:[%s5419_s13 + $0xb0] sm:$0xff] }
  0xdb   : > { %v640_v7 = vadd.f32 %v5674_v59, %v620_v52 }
  0xdc   : > { %v1119_v14 = vmax.f32 %v1103_v34, 0.0 }
  0xdd   : > { %v656_v9 = vmax.f32 %v640_v7, 0.0 }
  0xde   : > { %4259 = vmatmul.msk.f32.gmra.mxu1 %vm347_vm1, %v5489_v43 }
  0xdf   : > { %v1053_v44 = vpop.f32.mrf.mxu3  ;;  %v5047_v11 = vpack.i.bf16 %v656_v9, %v655_v6 }
  0xe0   : > { %v1084_v35 = vmul.f32 %v5689_v62, %v1053_v44  ;;  %v592_v36 = vpop.f32.mrf.mxu1  ;;  %4355 = vmatmul.msk.f32.gmra.mxu0 %vm347_vm1, %v5489_v43  ;;  %v5936_v43 = vld [vmem:[%s7549_s5 + $0x10] sm:$0xff] }
  0xe1   : > { %5048 = vrot.lane.b32.xlu2 %v5047_v11, %s5351_s7  ;;  %v5870_v29 = vpop.f32.mrf.mxu2  ;;  %v621_v25 = vmul.f32 %v5648_v42, %v592_v36 }
  0xe2   : > { %v1104_v27 = vadd.f32 %v5698_v3, %v1084_v35  ;;  %v5914_v35 = vpop.f32.mrf.mxu0 }
  0xe3   : > { %v641_v19 = vadd.f32 %v5674_v59, %v621_v25 }
  0xe4   : > { %v1120_v55 = vmax.f32 %v1104_v27, 0.0  ;;  %4335 = vmatmul.msk.bf16.gmra.mxu3 %vm533_vm0, %v4864_v10 }
  0xe5   : > { %v657_v61 = vmax.f32 %v641_v19, 0.0 }
  0xe6   : > { %v5052_v31 = vpack.i.bf16 %v1120_v55, %v1119_v14  ;;  %4430 = vmatmul.msk.bf16.gmra.mxu2 %vm533_vm0, %v4873_v37  ;;  %4260 = vmatmul.msk.f32.gmra.mxu1 %vm347_vm1, %v5500_v46  ;;  %v4866_v37 = vld [vmem:[%s5419_s13 + $0xb8] sm:$0xff] }
  0xe7   : > { %v1056_v58 = vpop.f32.mrf.mxu3 }
  0xe8   : > { %5053 = vrot.lane.b32.xlu0 %v5052_v31, %s5351_s7  ;;  %v594_v38 = vpop.f32.mrf.mxu1  ;;  %v1085_v21 = vmul.f32 %v5689_v62, %v1056_v58  ;;  %4356 = vmatmul.msk.f32.gmra.mxu0 %vm347_vm1, %v5936_v43 }
  0xe9   : > { %v622_v39 = vmul.f32 %v5648_v42, %v594_v38  ;;  %v5884_v22 = vpop.f32.mrf.mxu2 }
  0xea   : > { %v1105_v16 = vadd.f32 %v5698_v3, %v1085_v21  ;;  %v5931_v38 = vpop.f32.mrf.mxu0 }
  0xeb   : > { %v642_v26 = vadd.f32 %v5674_v59, %v622_v39 }
  0xec   : > { %v1121_v7 = vmax.f32 %v1105_v16, 0.0 }
  0xed   : > { %v658_v1 = vmax.f32 %v642_v26, 0.0 }
  0xee   : > { %4261 = vmatmul.msk.f32.gmra.mxu1 %vm347_vm1, %v5507_v47 }
  0xef   : > { %v1058_v17 = vpop.f32.mrf.mxu3  ;;  %v5057_v52 = vpack.i.bf16 %v658_v1, %v657_v61 }
  0xf0   : > { %v1086_v57 = vmul.f32 %v5689_v62, %v1058_v17  ;;  %v597_v6 = vpop.f32.mrf.mxu1 }
  0xf1   : > { %5058 = vrot.lane.b32.xlu2 %v5057_v52, %s5351_s7  ;;  %v5900_v12 = vpop.f32.mrf.mxu2  ;;  %v623_v30 = vmul.f32 %v5648_v42, %v597_v6 }
  0xf2   : > { %v1106_v18 = vadd.f32 %v5698_v3, %v1086_v57 }
  0xf3   : > { %v643_v9 = vadd.f32 %v5674_v59, %v623_v30 }
  0xf4   : > { %v1122_v4 = vmax.f32 %v1106_v18, 0.0  ;;  %4336 = vmatmul.msk.bf16.gmra.mxu3 %vm533_vm0, %v4865_v50  ;;  %v5972_v18 = vld [vmem:[%s7549_s5 + $0x28] sm:$0xff] }
  0xf5   : > { %v659_v41 = vmax.f32 %v643_v9, 0.0 }
  0xf6   : > { %v5062_v20 = vpack.i.bf16 %v1122_v4, %v1121_v7  ;;  %4431 = vmatmul.msk.bf16.gmra.mxu2 %vm533_vm0, %v4874_v13  ;;  %4262 = vmatmul.msk.f32.gmra.mxu1 %vm347_vm1, %v5521_v51  ;;  %v5967_v7 = vpop.f32.mrf.mxu0  ;;  %v5977_v4 = vld [vmem:[%s7549_s5 + $0x18] sm:$0xff] }
  0xf7   : > { %v1061_v34 = vpop.f32.mrf.mxu3  ;;  %4357 = vmatmul.msk.f32.gmra.mxu0 %vm347_vm1, %v5977_v4 }
  0xf8   : > { %5063 = vrot.lane.b32.xlu1 %v5062_v20, %s5351_s7  ;;  %v599_v44 = vpop.f32.mrf.mxu1  ;;  %v1087_v46 = vmul.f32 %v5689_v62, %v1061_v34 }
  0xf9   : > { %v624_v48 = vmul.f32 %v5648_v42, %v599_v44  ;;  %v5916_v10 = vpop.f32.mrf.mxu2 }
  0xfa   : > { %v1107_v36 = vadd.f32 %v5698_v3, %v1087_v46  ;;  %v4879_v46 = vld [vmem:[%s5419_s13 + $0x100] sm:$0xff] }
  0xfb   : > { %v644_v11 = vadd.f32 %v5674_v59, %v624_v48 }
  0xfc   : > { %v1123_v31 = vmax.f32 %v1107_v36, 0.0  ;;  %v5999_v36 = vld [vmem:[%s5426_s16 + $0x58] sm:$0xff]  }
  0xfd   : > { %v660_v14 = vmax.f32 %v644_v11, 0.0  ;;  %v5993_v11 = vld [vmem:[%s5426_s16 + $0x48] sm:$0xff]  }
  0xfe   : > { %4263 = vmatmul.msk.f32.gmra.mxu1 %vm347_vm1, %v5972_v18 }
  0xff   : > { %v1063_v27 = vpop.f32.mrf.mxu3  ;;  %v5067_v47 = vpack.i.bf16 %v660_v14, %v659_v41  ;;  %v4962_v14 = vunpack.c.h.bf16 %v5996_v33 }
 0x100   : > { %v1088_v55 = vmul.f32 %v5689_v62, %v1063_v27  ;;  %v602_v25 = vpop.f32.mrf.mxu1  ;;  %v4966_v27 = vunpack.c.h.bf16 %v5999_v36 }
 0x101   : > { %5068 = vrot.lane.b32.xlu0 %v5067_v47, %s5351_s7  ;;  %v5938_v21 = vpop.f32.mrf.mxu2  ;;  %v625_v16 = vmul.f32 %v5648_v42, %v602_v25  ;;  %v6010_v25 = vpop.f32.mrf.mxu0 }
 0x102   : > { %v1108_v58 = vadd.f32 %v5698_v3, %v1088_v55  ;;  %v5014_v19 = vpop.permute.xlu2 %5013  ;;  %v6005_v55 = vld [vmem:[%s5426_s16 + $0x60] sm:$0xff]  }
 0x103   : > { %v5016_v39 = vunpack.i.h.bf16 %v5014_v19  ;;  %v5015_v61 = vunpack.i.l.bf16 %v5014_v19  ;;  %v645_v2 = vadd.f32 %v5674_v59, %v625_v16 }
 0x104   : > { %v1124_v26 = vmax.f32 %v1108_v58, 0.0  ;;  %4337 = vmatmul.msk.bf16.gmra.mxu3 %vm533_vm0, %v4866_v37  ;;  %v6020_v58 = vld [vmem:[%s7549_s5 + $0x20] sm:$0xff] }
 0x105   : > { %v1191_v1 = vsel %vm347_vm1, %v5750_v23, %v5015_v61  ;;  %v1192_v51 = vsel %vm347_vm1, %v5764_v49, %v5016_v39  ;;  %v661_v30 = vmax.f32 %v645_v2, 0.0  ;;  %v6030_v39 = vmul.f32 0.25, %v4962_v14  ;;  %4358 = vmatmul.msk.f32.gmra.mxu0 %vm347_vm1, %v6020_v58 }
 0x106   : > { %v1207_v17 = vpack.c.bf16 %v1191_v1, %v1191_v1  ;;  %v1208_v57 = vpack.c.bf16 %v1192_v51, %v1192_v51  ;;  %v5072_v50 = vpack.i.bf16 %v1124_v26, %v1123_v31  ;;  %4432 = vmatmul.msk.bf16.gmra.mxu2 %vm533_vm0, %v4875_v63  ;;  %v6015_v31 = vld [vmem:[%s7549_s5 + $0x30] sm:$0xff]  ;;  %v6034_v61 = vmul.f32 0.75, %v4966_v27  ;;  %v4876_v63 = vld [vmem:[%s5419_s13 + $0xf8] sm:$0xff]  ;;  %v6047_v51 = vld [vmem:[%s7547_s3] ss:$0 sm:$0xff] }
 0x107   : > { %v1066_v52 = vpop.f32.mrf.mxu3  ;;  %4264 = vmatmul.msk.f32.gmra.mxu1 %vm347_vm1, %v6015_v31 }
 0x108   : > { %4242 = vst.msk [vmem:[%s5950_s23 + $0x40] sm:$0xf] %vm759_vm2, %v1207_v17  ;;  %5073 = vrot.lane.b32.xlu2 %v5072_v50, %s5351_s7  ;;  %v604_v23 = vpop.f32.mrf.mxu1  ;;  %v1089_v49 = vmul.f32 %v5689_v62, %v1066_v52 }
 0x109   : > { %4243 = vst.msk [vmem:[%s5950_s23 + $0x44] sm:$0xf] %vm759_vm2, %v1208_v57  ;;  %v626_v6 = vmul.f32 %v5648_v42, %v604_v23  ;;  %v5979_v13 = vpop.f32.mrf.mxu2  ;;  %v4918_v42 = vld [vmem:[%s7546_s2 + $0x8] sm:$0xff] }
 0x10a   : > { %3808 = vmatpush.bf16.msrb.mxu2 %v4918_v42  ;;  %v1109_v34 = vadd.f32 %v5698_v3, %v1089_v49 }
 0x10b   : > { %v646_v20 = vadd.f32 %v5674_v59, %v626_v6  ;;  %v4958_v59 = vunpack.c.h.bf16 %v5993_v11 }
 0x10c   : > { %v1125_v37 = vmax.f32 %v1109_v34, 0.0  ;;  %v6065_v34 = vld [vmem:[%s7548_s4] ss:$0 sm:$0xff] }
 0x10d   : > { %v662_v9 = vmax.f32 %v646_v20, 0.0  ;;  %4359 = vmatmul.msk.f32.gmra.mxu0 %vm347_vm1, %v5972_v18 }
 0x10f   : > { %v1068_v44 = vpop.f32.mrf.mxu3  ;;  %v5077_v41 = vpack.i.bf16 %v662_v9, %v661_v30 }
 0x110   : > { %v1090_v48 = vmul.f32 %v5689_v62, %v1068_v44  ;;  %v7552_v62 = vunpack.c.h.bf16 %v6005_v55 }
 0x111   : > { %5078 = vrot.lane.b32.xlu1 %v5077_v41, %s5351_s7  ;;  %v6022_v19 = vpop.f32.mrf.mxu2  ;;  %v4880_v41 = vld [vmem:[%s5419_s13 + $0x108] sm:$0xff] }
 0x112   : > { %v1110_v47 = vadd.f32 %v5698_v3, %v1090_v48  ;;  %v6026_v3 = vmul.f32 0.75, %v4958_v59  ;;  %v6042_v1 = vmul.f32 0.25, %v7552_v62 }
 0x113   : > { %v5009_v16 = vpop.permute.xlu0 %5008 }
 0x114   : > { %v1126_v26 = vmax.f32 %v1110_v47, 0.0  ;;  %4522 = vmatmul.msk.bf16.vlgmr.msra.gmra.mxu3 %vm533_vm0, %v4879_v46  ;;  %v5011_v17 = vunpack.i.h.bf16 %v5009_v16  ;;  %v5010_v57 = vunpack.i.l.bf16 %v5009_v16  ;;  %v2187_v50 = vadd.f32 %v6030_v39, %v6026_v3 }
 0x115   : > { %v2651_v2 = vadd.f32 %v6042_v1, %v6034_v61  ;;  %v7554_v47 = vunpack.c.l.bf16 %v5996_v33  ;;  %v7551_v16 = vunpack.c.l.bf16 %v6005_v55  ;;  %4360 = vmatmul.msk.f32.gmra.mxu0 %vm347_vm1, %v6015_v31 }
 0x116   : > { %v5082_v52 = vpack.i.bf16 %v1126_v26, %v1125_v37  ;;  %v727_v49 = vsel %vm347_vm1, %v5898_v56, %v5010_v57  ;;  %v728_v6 = vsel %vm347_vm1, %v5914_v35, %v5011_v17  ;;  %2260 = vmatpush.msra.mxu1 %v2187_v50  ;;  %4433 = vmatmul.msk.bf16.gmra.mxu2 %vm533_vm0, %v4876_v63  ;;  %v6069_v56 = vpop.f32.mrf.mxu0  ;;  %v6074_v35 = vld [vmem:[%s7549_s5 + $0x38] sm:$0xff]  ;;  %v4957_v37 = vunpack.c.l.bf16 %v5993_v11 }
 0x117   : > { %v1495_v23 = vpop.f32.mrf.mxu3  ;;  %v743_v42 = vpack.c.bf16 %v727_v49, %v727_v49  ;;  %v744_v30 = vpack.c.bf16 %v728_v6, %v728_v6  ;;  %2724 = vmatpush.msra.mxu0 %v2651_v2  ;;  %4265 = vmatmul.msk.f32.gmra.mxu1 %vm347_vm1, %v6074_v35  ;;  %v7553_v26 = vunpack.c.l.bf16 %v5999_v36  ;;  %v6098_v18 = vmul.f32 0.25, %v7554_v47  ;;  %v6109_v2 = vld [vmem:[%s7549_s5 + $0x40] sm:$0xff] }
 0x118   : > { %5083 = vrot.lane.b32.xlu0 %v5082_v52, %s5351_s7  ;;  %v1539_v20 = vmul.f32 %v6047_v51, %v1495_v23  ;;  %v6094_v57 = vmul.f32 0.75, %v4957_v37  ;;  %v6115_v49 = vmul.f32 0.25, %v7551_v16 }
 0x119   : > { %760 = vst.msk [vmem:[%s5950_s23] sm:$0xf] %vm759_vm2, %v743_v42  ;;  %v6076_v9 = vpop.f32.mrf.mxu2  ;;  %v6102_v50 = vmul.f32 0.75, %v7553_v26 }
 0x11a   : > { %761 = vst.msk [vmem:[%s5950_s23 + $0x4] sm:$0xf] %vm759_vm2, %v744_v30  ;;  %v1559_v44 = vadd.f32 %v6065_v34, %v1539_v20  ;;  %v4889_v30 = vld [vmem:[%s5419_s13 + $0x140] sm:$0xff]  ;;  %v2186_v20 = vadd.f32 %v6098_v18, %v6094_v57 }
 0x11c   : > { %v1575_v63 = vmax.f32 %v1559_v44, 0.0  ;;  %2261 = vmatpush.msra.mxu1 %v2186_v20 }
 0x11d   : > { %4361 = vmatmul.msk.f32.gmra.mxu0 %vm347_vm1, %v6074_v35 }
 0x11e   : > { %v6104_v52 = vpop.f32.mrf.mxu0 }
 0x11f   : > { %v1497_v46 = vpop.f32.mrf.mxu3  ;;  %4266 = vmatmul.msk.f32.gmra.mxu1 %vm347_vm1, %v6109_v2 }
 0x120   : > { %v1540_v48 = vmul.f32 %v6047_v51, %v1497_v46 }
 0x121   : > { %v6111_v23 = vpop.f32.mrf.mxu2 }
 0x122   : > { %v1560_v17 = vadd.f32 %v6065_v34, %v1540_v48  ;;  %v2650_v48 = vadd.f32 %v6115_v49, %v6102_v50 }
 0x123   : > { %v5019_v42 = vpop.permute.xlu0 %5018 }
 0x124   : > { %v1576_v6 = vmax.f32 %v1560_v17, 0.0  ;;  %4523 = vmatmul.msk.bf16.gmra.mxu3 %vm533_vm0, %v4880_v41  ;;  %v5021_v44 = vunpack.i.h.bf16 %v5019_v42  ;;  %v5020_v46 = vunpack.i.l.bf16 %v5019_v42  ;;  %2725 = vmatpush.msra.mxu0 %v2650_v48 }
 0x125   : > { %4362 = vmatmul.msk.f32.gmra.mxu0 %vm347_vm1, %v6109_v2 }
 0x126   : > { %v5087_v16 = vpack.i.bf16 %v1576_v6, %v1575_v63  ;;  %v729_v41 = vsel %vm347_vm1, %v5931_v38, %v5020_v46  ;;  %v730_v17 = vsel %vm347_vm1, %v5967_v7, %v5021_v44  ;;  %4618 = vmatmul.msk.bf16.vlgmr.msra.gmra.mxu2 %vm533_vm0, %v4889_v30  ;;  %v6136_v63 = vpop.f32.mrf.mxu0  ;;  %v6141_v38 = vld [vmem:[%s7549_s5 + $0x48] sm:$0xff]  ;;  %v6163_v46 = vld [vmem:[%s7548_s4] ss:$0 sm:$0xff] }
 0x127   : > { %v1500_v62 = vpop.f32.mrf.mxu3  ;;  %v745_v26 = vpack.c.bf16 %v729_v41, %v729_v41  ;;  %v746_v47 = vpack.c.bf16 %v730_v17, %v730_v17  ;;  %4267 = vmatmul.msk.f32.gmra.mxu1 %vm347_vm1, %v6141_v38 }
 0x128   : > { %5088 = vrot.lane.b32.xlu1 %v5087_v16, %s5351_s7  ;;  %v1541_v31 = vmul.f32 %v6047_v51, %v1500_v62 }
 0x129   : > { %762 = vst.msk [vmem:[%s5950_s23 + $0x8] sm:$0xf] %vm759_vm2, %v745_v26  ;;  %v1959_v7 = vpop.f32.mrf.mxu2  ;;  %v6150_v26 = vld [vmem:[%s7547_s3] ss:$0 sm:$0xff] }
 0x12a   : > { %763 = vst.msk [vmem:[%s5950_s23 + $0xc] sm:$0xf] %vm759_vm2, %v746_v47  ;;  %v1561_v42 = vadd.f32 %v6065_v34, %v1541_v31  ;;  %v2003_v44 = vmul.f32 %v6150_v26, %v1959_v7  ;;  %v4881_v31 = vld [vmem:[%s5419_s13 + $0x110] sm:$0xff] }
 0x12b   : > { %v5024_v62 = vpop.permute.xlu0 %5023 }
 0x12c   : > { %v5026_v16 = vunpack.i.h.bf16 %v5024_v62  ;;  %v5025_v6 = vunpack.i.l.bf16 %v5024_v62  ;;  %v1577_v62 = vmax.f32 %v1561_v42, 0.0 }
 0x12d   : > { %4363 = vmatmul.msk.f32.gmra.mxu0 %vm347_vm1, %v6141_v38 }
 0x12e   : > { %v1193_v47 = vsel %vm347_vm1, %v5776_v28, %v5025_v6  ;;  %v1194_v30 = vsel %vm347_vm1, %v5793_v0, %v5026_v16  ;;  %v2181_v28 = vadd.f32 %v6026_v3, %v5666_v54  ;;  %v2645_v0 = vadd.f32 %v6034_v61, %v6030_v39  ;;  %v437_v6 = vpop.f32.mrf.mxu0 }
 0x12f   : > { %v1502_v20 = vpop.f32.mrf.mxu3  ;;  %v1209_v48 = vpack.c.bf16 %v1193_v47, %v1193_v47  ;;  %v1210_v41 = vpack.c.bf16 %v1194_v30, %v1194_v30  ;;  %v6177_v47 = vld [vmem:[%s7549_s5 + $0x50] sm:$0xff]  ;;  %v2023_v39 = vadd.f32 %v6163_v46, %v2003_v44 }
 0x130   : > { %v1542_v17 = vmul.f32 %v6047_v51, %v1502_v20  ;;  %2262 = vmatpush.msra.mxu1 %v2181_v28  ;;  %2726 = vmatpush.msra.mxu0 %v2645_v0 }
 0x131   : > { %4244 = vst.msk [vmem:[%s5950_s23 + $0x48] sm:$0xf] %vm759_vm2, %v1209_v48  ;;  %v1961_v30 = vpop.f32.mrf.mxu2  ;;  %v4890_v48 = vld [vmem:[%s5419_s13 + $0x148] sm:$0xff]  ;;  %4268 = vmatmul.msk.f32.gmra.mxu1 %vm347_vm1, %v6177_v47 }
 0x132   : > { %v1562_v7 = vadd.f32 %v6065_v34, %v1542_v17  ;;  %v5044_v16 = vpop.permute.xlu2 %5043  ;;  %4245 = vst.msk [vmem:[%s5950_s23 + $0x4c] sm:$0xf] %vm759_vm2, %v1210_v41  ;;  %v2004_v42 = vmul.f32 %v6150_v26, %v1961_v30 }
 0x133   : > { %v5046_v54 = vunpack.i.h.bf16 %v5044_v16  ;;  %v5045_v3 = vunpack.i.l.bf16 %v5044_v16  ;;  %v5029_v20 = vpop.permute.xlu1 %5028 }
 0x134   : > { %v1578_v61 = vmax.f32 %v1562_v7, 0.0  ;;  %4524 = vmatmul.msk.bf16.gmra.mxu3 %vm533_vm0, %v4881_v31  ;;  %v5031_v28 = vunpack.i.h.bf16 %v5029_v20  ;;  %v5030_v44 = vunpack.i.l.bf16 %v5029_v20  ;;  %v2024_v31 = vadd.f32 %v6163_v46, %v2004_v42 }
 0x135   : > { %v1197_v41 = vsel %vm347_vm1, %v5851_v5, %v5045_v3  ;;  %v1198_v17 = vsel %vm347_vm1, %v5870_v29, %v5046_v54  ;;  %v2039_v54 = vmax.f32 %v2023_v39, 0.0  ;;  %4364 = vmatmul.msk.f32.gmra.mxu0 %vm347_vm1, %v6177_v47  ;;  %v4917_v47 = vld [vmem:[%s7546_s2] sm:$0xff] }
 0x136   : > { %v1213_v0 = vpack.c.bf16 %v1197_v41, %v1197_v41  ;;  %v1214_v7 = vpack.c.bf16 %v1198_v17, %v1198_v17  ;;  %v5092_v16 = vpack.i.bf16 %v1578_v61, %v1577_v62  ;;  %v731_v30 = vsel %vm347_vm1, %v6010_v25, %v5030_v44  ;;  %4619 = vmatmul.msk.bf16.gmra.mxu2 %vm533_vm0, %v4890_v48  ;;  %v440_v61 = vpop.f32.mrf.mxu0 }
 0x137   : > { %v732_v5 = vsel %vm347_vm1, %v6069_v56, %v5031_v28  ;;  %v1505_v29 = vpop.f32.mrf.mxu3  ;;  %v2040_v3 = vmax.f32 %v2024_v31, 0.0  ;;  %v747_v20 = vpack.c.bf16 %v731_v30, %v731_v30  ;;  %v6210_v56 = vld [vmem:[%s7549_s5 + $0x58] sm:$0xff]  ;;  %3809 = vmatpush.bf16.msrb.mxu2 %v4917_v47 }
 0x138   : > { %4248 = vst.msk [vmem:[%s5950_s23 + $0x58] sm:$0xf] %vm759_vm2, %v1213_v0  ;;  %v748_v2 = vpack.c.bf16 %v732_v5, %v732_v5  ;;  %5093 = vrot.lane.b32.xlu2 %v5092_v16, %s5351_s7  ;;  %v1543_v25 = vmul.f32 %v6047_v51, %v1505_v29 }
 0x139   : > { %4249 = vst.msk [vmem:[%s5950_s23 + $0x5c] sm:$0xf] %vm759_vm2, %v1214_v7  ;;  %v5097_v62 = vpack.i.bf16 %v2040_v3, %v2039_v54  ;;  %v1964_v39 = vpop.f32.mrf.mxu2  ;;  %4269 = vmatmul.msk.f32.gmra.mxu1 %vm347_vm1, %v6210_v56 }
 0x13a   : > { %764 = vst.msk [vmem:[%s5950_s23 + $0x10] sm:$0xf] %vm759_vm2, %v747_v20  ;;  %v1563_v31 = vadd.f32 %v6065_v34, %v1543_v25  ;;  %v2005_v29 = vmul.f32 %v6150_v26, %v1964_v39  ;;  %v4882_v20 = vld [vmem:[%s5419_s13 + $0x118] sm:$0xff] }
 0x13b   : > { %765 = vst.msk [vmem:[%s5950_s23 + $0x14] sm:$0xf] %vm759_vm2, %v748_v2  ;;  %5098 = vrot.lane.b32.xlu0 %v5097_v62, %s5351_s7  ;;  %v5034_v42 = vpop.permute.xlu1 %5033  ;;  %v5049_v48 = vpop.permute.xlu2 %5048 }
 0x13c   : > { %v5036_v41 = vunpack.i.h.bf16 %v5034_v42  ;;  %v5035_v17 = vunpack.i.l.bf16 %v5034_v42  ;;  %v5051_v28 = vunpack.i.h.bf16 %v5049_v48  ;;  %v5050_v44 = vunpack.i.l.bf16 %v5049_v48  ;;  %v4891_v48 = vld [vmem:[%s5419_s13 + $0x150] sm:$0xff] }
 0x13d   : > { %v1579_v62 = vmax.f32 %v1563_v31, 0.0  ;;  %4365 = vmatmul.msk.f32.gmra.mxu0 %vm347_vm1, %v6210_v56  ;;  %v6293_v56 = vmul.f32 0.25, %v4958_v59 }
 0x13e   : > { %v1195_v0 = vsel %vm347_vm1, %v5808_v24, %v5035_v17  ;;  %v1196_v7 = vsel %vm347_vm1, %v5835_v60, %v5036_v41  ;;  %v735_v30 = vsel %vm347_vm1, %v437_v6, %v5050_v44  ;;  %v736_v5 = vsel %vm347_vm1, %v440_v61, %v5051_v28  ;;  %v4907_v6 = vld [vmem:[%s7546_s2] sm:$0xff]  ;;  %v443_v39 = vpop.f32.mrf.mxu0 }
 0x13f   : > { %v1507_v16 = vpop.f32.mrf.mxu3  ;;  %v1211_v54 = vpack.c.bf16 %v1195_v0, %v1195_v0  ;;  %v1212_v3 = vpack.c.bf16 %v1196_v7, %v1196_v7  ;;  %v751_v2 = vpack.c.bf16 %v735_v30, %v735_v30  ;;  %v752_v25 = vpack.c.bf16 %v736_v5, %v736_v5  ;;  %3349 = vmatpush.bf16.msrb.mxu3 %v4907_v6 }
 0x140   : > { %v1544_v38 = vmul.f32 %v6047_v51, %v1507_v16  ;;  %v2180_v24 = vadd.f32 %v6094_v57, %v5728_v53  ;;  %v2644_v60 = vadd.f32 %v6102_v50, %v6098_v18  ;;  %v6242_v53 = vld [vmem:[%s7549_s5 + $0x60] sm:$0xff]  ;;  %v2025_v18 = vadd.f32 %v6163_v46, %v2005_v29 }
 0x141   : > { %4246 = vst.msk [vmem:[%s5950_s23 + $0x50] sm:$0xf] %vm759_vm2, %v1211_v54  ;;  %v1966_v57 = vpop.f32.mrf.mxu2  ;;  %4270 = vmatmul.msk.f32.gmra.mxu1 %vm347_vm1, %v6242_v53 }
 0x142   : > { %v1564_v61 = vadd.f32 %v6065_v34, %v1544_v38  ;;  %4247 = vst.msk [vmem:[%s5950_s23 + $0x54] sm:$0xf] %vm759_vm2, %v1212_v3  ;;  %2263 = vmatpush.msra.mxu1 %v2180_v24  ;;  %2727 = vmatpush.msra.mxu0 %v2644_v60  ;;  %v2006_v42 = vmul.f32 %v6150_v26, %v1966_v57  ;;  %v2041_v30 = vmax.f32 %v2025_v18, 0.0 }
 0x143   : > { %768 = vst.msk [vmem:[%s5950_s23 + $0x20] sm:$0xf] %vm759_vm2, %v751_v2  ;;  %v5039_v41 = vpop.permute.xlu1 %5038 }
 0x144   : > { %v1580_v50 = vmax.f32 %v1564_v61, 0.0  ;;  %4525 = vmatmul.msk.bf16.gmra.mxu3 %vm533_vm0, %v4882_v20  ;;  %v5041_v17 = vunpack.i.h.bf16 %v5039_v41  ;;  %v5040_v28 = vunpack.i.l.bf16 %v5039_v41  ;;  %769 = vst.msk [vmem:[%s5950_s23 + $0x24] sm:$0xf] %vm759_vm2, %v752_v25  ;;  %v2026_v44 = vadd.f32 %v6163_v46, %v2006_v42 }
 0x145   : > { %v2169_v41 = vmul.f32 0.75, %v4954_v45  ;;  %v6311_v45 = vld [vmem:[%s7549_s5 + $0x70] sm:$0xff]  ;;  %4366 = vmatmul.msk.f32.gmra.mxu0 %vm347_vm1, %v6242_v53  ;;  %v2168_v53 = vmul.f32 0.75, %v4953_v15 }
 0x146   : > { %v5102_v31 = vpack.i.bf16 %v1580_v50, %v1579_v62  ;;  %v733_v7 = vsel %vm347_vm1, %v6104_v52, %v5040_v28  ;;  %v734_v16 = vsel %vm347_vm1, %v6136_v63, %v5041_v17  ;;  %v2042_v5 = vmax.f32 %v2026_v44, 0.0  ;;  %4620 = vmatmul.msk.bf16.gmra.mxu2 %vm533_vm0, %v4891_v48  ;;  %v446_v52 = vpop.f32.mrf.mxu0  ;;  %v6274_v63 = vld [vmem:[%s7549_s5 + $0x68] sm:$0xff]  ;;  %v4883_v50 = vld [vmem:[%s5419_s13 + $0x120] sm:$0xff] }
 0x147   : > { %v1510_v0 = vpop.f32.mrf.mxu3  ;;  %v749_v29 = vpack.c.bf16 %v733_v7, %v733_v7  ;;  %v750_v54 = vpack.c.bf16 %v734_v16, %v734_v16  ;;  %v6301_v17 = vmul.f32 0.25, %v4966_v27 }
 0x148   : > { %5103 = vrot.lane.b32.xlu0 %v5102_v31, %s5351_s7  ;;  %v1545_v3 = vmul.f32 %v6047_v51, %v1510_v0  ;;  %v5107_v38 = vpack.i.bf16 %v2042_v5, %v2041_v30  ;;  %v4892_v30 = vld [vmem:[%s5419_s13 + $0x158] sm:$0xff] }
 0x149   : > { %766 = vst.msk [vmem:[%s5950_s23 + $0x18] sm:$0xf] %vm759_vm2, %v749_v29  ;;  %v1969_v20 = vpop.f32.mrf.mxu2  ;;  %4271 = vmatmul.msk.f32.gmra.mxu1 %vm347_vm1, %v6274_v63 }
 0x14a   : > { %767 = vst.msk [vmem:[%s5950_s23 + $0x1c] sm:$0xf] %vm759_vm2, %v750_v54  ;;  %5108 = vrot.lane.b32.xlu1 %v5107_v38, %s5351_s7  ;;  %v1565_v60 = vadd.f32 %v6065_v34, %v1545_v3  ;;  %v2007_v57 = vmul.f32 %v6150_v26, %v1969_v20 }
 0x14b   : > { %v5059_v2 = vpop.permute.xlu2 %5058 }
 0x14c   : > { %v5061_v25 = vunpack.i.h.bf16 %v5059_v2  ;;  %v5060_v24 = vunpack.i.l.bf16 %v5059_v2  ;;  %v1581_v28 = vmax.f32 %v1565_v60, 0.0  ;;  %v2027_v0 = vadd.f32 %v6163_v46, %v2007_v57 }
 0x14d   : > { %4367 = vmatmul.msk.f32.gmra.mxu0 %vm347_vm1, %v6274_v63 }
 0x14e   : > { %v737_v62 = vsel %vm347_vm1, %v443_v39, %v5060_v24  ;;  %v738_v61 = vsel %vm347_vm1, %v446_v52, %v5061_v25  ;;  %v6297_v39 = vmul.f32 0.75, %v4962_v14  ;;  %v6306_v31 = vpop.f32.mrf.mxu0  ;;  %v2177_v14 = vadd.f32 %v6293_v56, %v2169_v41  ;;  %v6335_v25 = vld [vmem:[%s7549_s5 + $0x78] sm:$0xff] }
 0x14f   : > { %v1512_v6 = vpop.f32.mrf.mxu3  ;;  %v753_v42 = vpack.c.bf16 %v737_v62, %v737_v62  ;;  %v754_v48 = vpack.c.bf16 %v738_v61, %v738_v61  ;;  %v2043_v47 = vmax.f32 %v2027_v0, 0.0  ;;  %v6341_v24 = vmul.f32 0.25, %v4957_v37 }
 0x150   : > { %v1546_v18 = vmul.f32 %v6047_v51, %v1512_v6  ;;  %v2641_v27 = vadd.f32 %v6301_v17, %v6297_v39  ;;  %2264 = vmatpush.msra.mxu1 %v2177_v14 }
 0x151   : > { %770 = vst.msk [vmem:[%s5950_s23 + $0x28] sm:$0xf] %vm759_vm2, %v753_v42  ;;  %v1971_v59 = vpop.f32.mrf.mxu2  ;;  %4272 = vmatmul.msk.f32.gmra.mxu1 %vm347_vm1, %v6311_v45  ;;  %v2176_v61 = vadd.f32 %v6341_v24, %v2168_v53 }
 0x152   : > { %v1566_v44 = vadd.f32 %v6065_v34, %v1546_v18  ;;  %771 = vst.msk [vmem:[%s5950_s23 + $0x2c] sm:$0xf] %vm759_vm2, %v754_v48  ;;  %v2008_v16 = vmul.f32 %v6150_v26, %v1971_v59  ;;  %2728 = vmatpush.msra.mxu0 %v2641_v27  ;;  %v4884_v48 = vld [vmem:[%s5419_s13 + $0x128] sm:$0xff] }
 0x153   : > { %2265 = vmatpush.msra.mxu1 %v2176_v61  ;;  %v6366_v14 = vpop.f32.mrf.mxu1 }
 0x154   : > { %v1582_v7 = vmax.f32 %v1566_v44, 0.0  ;;  %4526 = vmatmul.msk.bf16.gmra.mxu3 %vm533_vm0, %v4883_v50  ;;  %v2028_v5 = vadd.f32 %v6163_v46, %v2008_v16  ;;  %v2171_v50 = vadd.f32 %v2169_v41, %v5825_v32  ;;  %v7556_v44 = vunpack.c.l.bf16 %v5999_v36  ;;  %v6378_v36 = vld [vmem:[%s7549_s5] sm:$0xff] }
 0x155   : > { %v2170_v32 = vadd.f32 %v2168_v53, %v5860_v8  ;;  %4368 = vmatmul.msk.f32.gmra.mxu0 %vm347_vm1, %v6311_v45  ;;  %v2189_v45 = vld [vmem:[%s7549_s5 + $0x8] sm:$0xff] }
 0x156   : > { %v5112_v29 = vpack.i.bf16 %v1582_v7, %v1581_v28  ;;  %v2044_v3 = vmax.f32 %v2028_v5, 0.0  ;;  %4621 = vmatmul.msk.bf16.gmra.mxu2 %vm533_vm0, %v4892_v30  ;;  %v6330_v2 = vpop.f32.mrf.mxu0  ;;  %v6364_v59 = vmul.f32 0.25, %v7556_v44  ;;  %2266 = vmatpush.msra.mxu1 %v2171_v50  ;;  %v2635_v44 = vadd.f32 %v6297_v39, %v6293_v56 }
 0x157   : > { %v1515_v54 = vpop.f32.mrf.mxu3 }
 0x158   : > { %5113 = vrot.lane.b32.xlu1 %v5112_v29, %s5351_s7  ;;  %v1547_v38 = vmul.f32 %v6047_v51, %v1515_v54  ;;  %v5117_v20 = vpack.i.bf16 %v2044_v3, %v2043_v47  ;;  %2267 = vmatpush.msra.mxu1 %v2170_v32  ;;  %v4893_v47 = vld [vmem:[%s5419_s13 + $0x160] sm:$0xff] }
 0x159   : > { %v1974_v60 = vpop.f32.mrf.mxu2  ;;  %4273 = vmatmul.msk.f32.gmra.mxu1 %vm347_vm1, %v6335_v25 }
 0x15a   : > { %v5054_v52 = vpop.permute.xlu0 %5053  ;;  %5118 = vrot.lane.b32.xlu2 %v5117_v20, %s5351_s7  ;;  %v1567_v11 = vadd.f32 %v6065_v34, %v1547_v38  ;;  %v2009_v42 = vmul.f32 %v6150_v26, %v1974_v60 }
 0x15b   : > { %v5056_v6 = vunpack.i.h.bf16 %v5054_v52  ;;  %v5055_v62 = vunpack.i.l.bf16 %v5054_v52 }
 0x15c   : > { %v1583_v41 = vmax.f32 %v1567_v11, 0.0  ;;  %v2029_v29 = vadd.f32 %v6163_v46, %v2009_v42 }
 0x15d   : > { %v1199_v40 = vsel %vm347_vm1, %v5884_v22, %v5055_v62  ;;  %v1200_v15 = vsel %vm347_vm1, %v5900_v12, %v5056_v6  ;;  %v7555_v12 = vunpack.c.l.bf16 %v5996_v33  ;;  %4369 = vmatmul.msk.f32.gmra.mxu0 %vm347_vm1, %v6335_v25 }
 0x15e   : > { %v1215_v37 = vpack.c.bf16 %v1199_v40, %v1199_v40  ;;  %v1216_v57 = vpack.c.bf16 %v1200_v15, %v1200_v15  ;;  %v6373_v33 = vpop.f32.mrf.mxu0  ;;  %v2045_v62 = vmax.f32 %v2029_v29, 0.0  ;;  %v4894_v29 = vld [vmem:[%s5419_s13 + $0x168] sm:$0xff] }
 0x15f   : > { %v1517_v18 = vpop.f32.mrf.mxu3  ;;  %v2632_v28 = vmul.f32 0.75, %v7555_v12 }
 0x160   : > { %4250 = vst.msk [vmem:[%s5950_s23 + $0x60] sm:$0xf] %vm759_vm2, %v1215_v37  ;;  %v1548_v22 = vmul.f32 %v6047_v51, %v1517_v18 }
 0x161   : > { %4251 = vst.msk [vmem:[%s5950_s23 + $0x64] sm:$0xf] %vm759_vm2, %v1216_v57  ;;  %v2640_v7 = vadd.f32 %v6364_v59, %v2632_v28  ;;  %v1976_v16 = vpop.f32.mrf.mxu2  ;;  %4450 = vmatmul.msk.f32.vlgmr.msra.gmra.mxu1 %vm347_vm1, %v6378_v36 }
 0x162   : > { %v1568_v27 = vadd.f32 %v6065_v34, %v1548_v22  ;;  %v5074_v0 = vpop.permute.xlu2 %5073  ;;  %v2010_v54 = vmul.f32 %v6150_v26, %v1976_v16 }
 0x163   : > { %v5076_v30 = vunpack.i.h.bf16 %v5074_v0  ;;  %v5075_v5 = vunpack.i.l.bf16 %v5074_v0  ;;  %2729 = vmatpush.msra.mxu0 %v2640_v7  ;;  %v2634_v0 = vadd.f32 %v2632_v28, %v6341_v24 }
 0x164   : > { %v1584_v8 = vmax.f32 %v1568_v27, 0.0  ;;  %4527 = vmatmul.msk.bf16.gmra.mxu3 %vm533_vm0, %v4884_v48  ;;  %v2030_v52 = vadd.f32 %v6163_v46, %v2010_v54 }
 0x165   : > { %v1203_v3 = vsel %vm347_vm1, %v5979_v13, %v5075_v5  ;;  %v1204_v38 = vsel %vm347_vm1, %v6022_v19, %v5076_v30  ;;  %v6397_v13 = vpop.f32.mrf.mxu1  ;;  %2730 = vmatpush.msra.mxu0 %v2635_v44  ;;  %v4895_v44 = vld [vmem:[%s5419_s13 + $0x170] sm:$0xff] }
 0x166   : > { %v1219_v20 = vpack.c.bf16 %v1203_v3, %v1203_v3  ;;  %v1220_v53 = vpack.c.bf16 %v1204_v38, %v1204_v38  ;;  %v5122_v60 = vpack.i.bf16 %v1584_v8, %v1583_v41  ;;  %v2046_v61 = vmax.f32 %v2030_v52, 0.0  ;;  %4622 = vmatmul.msk.bf16.gmra.mxu2 %vm533_vm0, %v4893_v47  ;;  %v6402_v11 = vpop.f32.mrf.mxu0 }
 0x167   : > { %v1520_v6 = vpop.f32.mrf.mxu3  ;;  %2731 = vmatpush.msra.mxu0 %v2634_v0 }
 0x168   : > { %4254 = vst.msk [vmem:[%s5950_s23 + $0x70] sm:$0xf] %vm759_vm2, %v1219_v20  ;;  %5123 = vrot.lane.b32.xlu2 %v5122_v60, %s5351_s7  ;;  %v1549_v19 = vmul.f32 %v6047_v51, %v1520_v6  ;;  %v5127_v15 = vpack.i.bf16 %v2046_v61, %v2045_v62  ;;  %4546 = vmatmul.msk.f32.vlgmr.msra.gmra.mxu0 %vm347_vm1, %v6378_v36 }
 0x169   : > { %4255 = vst.msk [vmem:[%s5950_s23 + $0x74] sm:$0xf] %vm759_vm2, %v1220_v53  ;;  %v1979_v37 = vpop.f32.mrf.mxu2  ;;  %4451 = vmatmul.msk.f32.gmra.mxu1 %vm347_vm1, %v2189_v45 }
 0x16a   : > { %v5064_v40 = vpop.permute.xlu1 %5063  ;;  %5128 = vrot.lane.b32.xlu0 %v5127_v15, %s5351_s7  ;;  %v1569_v22 = vadd.f32 %v6065_v34, %v1549_v19  ;;  %v2011_v41 = vmul.f32 %v6150_v26, %v1979_v37  ;;  %v4886_v37 = vld [vmem:[%s5419_s13 + $0x138] sm:$0xff] }
 0x16b   : > { %v5066_v57 = vunpack.i.h.bf16 %v5064_v40  ;;  %v5065_v18 = vunpack.i.l.bf16 %v5064_v40 }
 0x16c   : > { %v1585_v25 = vmax.f32 %v1569_v22, 0.0  ;;  %v2031_v16 = vadd.f32 %v6163_v46, %v2011_v41 }
 0x16d   : > { %v1201_v50 = vsel %vm347_vm1, %v5916_v10, %v5065_v18  ;;  %v1202_v42 = vsel %vm347_vm1, %v5938_v21, %v5066_v57  ;;  %v4885_v21 = vld [vmem:[%s5419_s13 + $0x130] sm:$0xff]  ;;  %v6423_v27 = vpop.f32.mrf.mxu1 }
 0x16e   : > { %v1217_v48 = vpack.c.bf16 %v1201_v50, %v1201_v50  ;;  %v1218_v12 = vpack.c.bf16 %v1202_v42, %v1202_v42  ;;  %v6429_v56 = vpop.f32.mrf.mxu0  ;;  %v2047_v20 = vmax.f32 %v2031_v16, 0.0 }
 0x16f   : > { %v1522_v32 = vpop.f32.mrf.mxu3 }
 0x170   : > { %4252 = vst.msk [vmem:[%s5950_s23 + $0x68] sm:$0xf] %vm759_vm2, %v1217_v48  ;;  %v1550_v10 = vmul.f32 %v6047_v51, %v1522_v32  ;;  %4547 = vmatmul.msk.f32.gmra.mxu0 %vm347_vm1, %v2189_v45 }
 0x171   : > { %4253 = vst.msk [vmem:[%s5950_s23 + $0x6c] sm:$0xf] %vm759_vm2, %v1218_v12  ;;  %v1981_v39 = vpop.f32.mrf.mxu2  ;;  %4452 = vmatmul.msk.f32.gmra.mxu1 %vm347_vm1, %v5936_v43 }
 0x172   : > { %v1570_v7 = vadd.f32 %v6065_v34, %v1550_v10  ;;  %v2012_v5 = vmul.f32 %v6150_v26, %v1981_v39 }
 0x173   : > { %v5069_v8 = vpop.permute.xlu0 %5068 }
 0x174   : > { %v1586_v30 = vmax.f32 %v1570_v7, 0.0  ;;  %4528 = vmatmul.msk.bf16.gmra.mxu3 %vm533_vm0, %v4885_v21  ;;  %v5071_v54 = vunpack.i.h.bf16 %v5069_v8  ;;  %v5070_v24 = vunpack.i.l.bf16 %v5069_v8  ;;  %v2032_v28 = vadd.f32 %v6163_v46, %v2012_v5 }
 0x175   : > { %v6446_v6 = vpop.f32.mrf.mxu1 }
 0x176   : > { %v5132_v47 = vpack.i.bf16 %v1586_v30, %v1585_v25  ;;  %v739_v38 = vsel %vm347_vm1, %v6306_v31, %v5070_v24  ;;  %v740_v52 = vsel %vm347_vm1, %v6330_v2, %v5071_v54  ;;  %v2048_v53 = vmax.f32 %v2032_v28, 0.0  ;;  %4623 = vmatmul.msk.bf16.gmra.mxu2 %vm533_vm0, %v4894_v29  ;;  %v6451_v31 = vpop.f32.mrf.mxu0 }
 0x177   : > { %v1525_v3 = vpop.f32.mrf.mxu3  ;;  %v755_v43 = vpack.c.bf16 %v739_v38, %v739_v38  ;;  %v756_v60 = vpack.c.bf16 %v740_v52, %v740_v52  ;;  %v6505_v38 = vld [vmem:[%s7549_s5 + $0x18] sm:$0xff] }
 0x178   : > { %5133 = vrot.lane.b32.xlu0 %v5132_v47, %s5351_s7  ;;  %v1551_v36 = vmul.f32 %v6047_v51, %v1525_v3  ;;  %v5137_v62 = vpack.i.bf16 %v2048_v53, %v2047_v20 }
 0x179   : > { %772 = vst.msk [vmem:[%s5950_s23 + $0x30] sm:$0xf] %vm759_vm2, %v755_v43  ;;  %v1984_v61 = vpop.f32.mrf.mxu2  ;;  %4453 = vmatmul.msk.f32.gmra.mxu1 %vm347_vm1, %v5977_v4  ;;  %v6471_v4 = vld [vmem:[%s7549_s5 + $0x10] sm:$0xff] }
 0x17a   : > { %773 = vst.msk [vmem:[%s5950_s23 + $0x34] sm:$0xf] %vm759_vm2, %v756_v60  ;;  %5138 = vrot.lane.b32.xlu1 %v5137_v62, %s5351_s7  ;;  %v1571_v2 = vadd.f32 %v6065_v34, %v1551_v36  ;;  %v2013_v40 = vmul.f32 %v6150_v26, %v1984_v61  ;;  %4548 = vmatmul.msk.f32.gmra.mxu0 %vm347_vm1, %v6471_v4  ;;  %v4899_v61 = vld [vmem:[%s5419_s13 + $0x180] sm:$0xff] }
 0x17c   : > { %v1587_v18 = vmax.f32 %v1571_v2, 0.0  ;;  %v2033_v45 = vadd.f32 %v6163_v46, %v2013_v40  ;;  %v6523_v2 = vld [vmem:[%s5426_s16 + $0x68] sm:$0xff]  }
 0x17d   : > { %v6463_v57 = vpop.f32.mrf.mxu1  ;;  %v4974_v40 = vunpack.c.h.bf16 %v6523_v2 }
 0x17e   : > { %v6466_v42 = vpop.f32.mrf.mxu0  ;;  %v2049_v16 = vmax.f32 %v2033_v45, 0.0 }
 0x17f   : > { %v1527_v19 = vpop.f32.mrf.mxu3 }
 0x180   : > { %v1552_v15 = vmul.f32 %v6047_v51, %v1527_v19  ;;  %v6529_v19 = vld [vmem:[%s5426_s16 + $0x78] sm:$0xff]  }
 0x181   : > { %v1986_v22 = vpop.f32.mrf.mxu2  ;;  %4454 = vmatmul.msk.f32.gmra.mxu1 %vm347_vm1, %v6020_v58 }
 0x182   : > { %v1572_v50 = vadd.f32 %v6065_v34, %v1552_v15  ;;  %v2014_v12 = vmul.f32 %v6150_v26, %v1986_v22  ;;  %4549 = vmatmul.msk.f32.gmra.mxu0 %vm347_vm1, %v6505_v38 }
 0x183   : > { %v5079_v32 = vpop.permute.xlu1 %5078 }
 0x184   : > { %v1588_v48 = vmax.f32 %v1572_v50, 0.0  ;;  %4529 = vmatmul.msk.bf16.gmra.mxu3 %vm533_vm0, %v4886_v37  ;;  %v5081_v41 = vunpack.i.h.bf16 %v5079_v32  ;;  %v5080_v10 = vunpack.i.l.bf16 %v5079_v32  ;;  %v2034_v21 = vadd.f32 %v6163_v46, %v2014_v12 }
 0x185   : > { %v6488_v29 = vpop.f32.mrf.mxu1  ;;  %v4982_v37 = vunpack.c.h.bf16 %v6529_v19 }
 0x186   : > { %v5142_v0 = vpack.i.bf16 %v1588_v48, %v1587_v18  ;;  %v741_v7 = vsel %vm347_vm1, %v6373_v33, %v5080_v10  ;;  %v742_v39 = vsel %vm347_vm1, %v6402_v11, %v5081_v41  ;;  %v2050_v30 = vmax.f32 %v2034_v21, 0.0  ;;  %4624 = vmatmul.msk.bf16.gmra.mxu2 %vm533_vm0, %v4895_v44  ;;  %v6493_v33 = vpop.f32.mrf.mxu0  ;;  %v6498_v11 = vld [vmem:[%s7549_s5 + $0x28] sm:$0xff]  ;;  %v6562_v21 = vld [vmem:[%s7549_s5 + $0x20] sm:$0xff] }
 0x187   : > { %v1530_v25 = vpop.f32.mrf.mxu3  ;;  %v757_v58 = vpack.c.bf16 %v741_v7, %v741_v7  ;;  %v758_v5 = vpack.c.bf16 %v742_v39, %v742_v39  ;;  %v6544_v44 = vmul.f32 0.75, %v4974_v40  ;;  %v6550_v41 = vmul.f32 0.25, %v4982_v37 }
 0x188   : > { %5143 = vrot.lane.b32.xlu1 %v5142_v0, %s5351_s7  ;;  %v1553_v8 = vmul.f32 %v6047_v51, %v1530_v25  ;;  %v5147_v24 = vpack.i.bf16 %v2050_v30, %v2049_v16  ;;  %v6552_v10 = vmul.f32 0.75, %v4982_v37  ;;  %v4896_v16 = vld [vmem:[%s5419_s13 + $0x178] sm:$0xff] }
 0x189   : > { %774 = vst.msk [vmem:[%s5950_s23 + $0x38] sm:$0xf] %vm759_vm2, %v757_v58  ;;  %v1989_v28 = vpop.f32.mrf.mxu2  ;;  %4455 = vmatmul.msk.f32.gmra.mxu1 %vm347_vm1, %v6498_v11 }
 0x18a   : > { %v5084_v54 = vpop.permute.xlu0 %5083  ;;  %775 = vst.msk [vmem:[%s5950_s23 + $0x3c] sm:$0xf] %vm759_vm2, %v758_v5  ;;  %5148 = vrot.lane.b32.xlu2 %v5147_v24, %s5351_s7  ;;  %v1573_v53 = vadd.f32 %v6065_v34, %v1553_v8  ;;  %v2015_v43 = vmul.f32 %v6150_v26, %v1989_v28  ;;  %v3575_v58 = vadd.f32 %v6552_v10, %v6550_v41  ;;  %v6581_v24 = vld [vmem:[%s7547_s3] ss:$0 sm:$0xff] }
 0x18b   : > { %v5086_v47 = vunpack.i.h.bf16 %v5084_v54  ;;  %v5085_v3 = vunpack.i.l.bf16 %v5084_v54  ;;  %4550 = vmatmul.msk.f32.gmra.mxu0 %vm347_vm1, %v6562_v21 }
 0x18c   : > { %v1589_v50 = vmax.f32 %v1573_v53, 0.0  ;;  %v2035_v22 = vadd.f32 %v6163_v46, %v2015_v43  ;;  %3648 = vmatpush.msrb.mxu0 %v3575_v58  ;;  %v6597_v43 = vld [vmem:[%s7548_s4] ss:$0 sm:$0xff] }
 0x18d   : > { %v1205_v52 = vsel %vm347_vm1, %v6076_v9, %v5085_v3  ;;  %v1206_v20 = vsel %vm347_vm1, %v6111_v23, %v5086_v47  ;;  %v6526_v23 = vld [vmem:[%s5426_s16 + $0x70] sm:$0xff]   ;;  %v6536_v18 = vpop.f32.mrf.mxu1 }
 0x18e   : > { %v1221_v60 = vpack.c.bf16 %v1205_v52, %v1205_v52  ;;  %v1222_v36 = vpack.c.bf16 %v1206_v20, %v1206_v20  ;;  %v4978_v15 = vunpack.c.h.bf16 %v6526_v23  ;;  %v6540_v45 = vpop.f32.mrf.mxu0  ;;  %v2051_v20 = vmax.f32 %v2035_v22, 0.0 }
 0x18f   : > { %v1532_v62 = vpop.f32.mrf.mxu3 }
 0x190   : > { %4256 = vst.msk [vmem:[%s5950_s23 + $0x78] sm:$0xf] %vm759_vm2, %v1221_v60  ;;  %v1554_v9 = vmul.f32 %v6047_v51, %v1532_v62  ;;  %v6548_v32 = vmul.f32 0.25, %v4978_v15 }
 0x191   : > { %4257 = vst.msk [vmem:[%s5950_s23 + $0x7c] sm:$0xf] %vm759_vm2, %v1222_v36  ;;  %v1991_v48 = vpop.f32.mrf.mxu2 }
 0x192   : > { %v1574_v51 = vadd.f32 %v6065_v34, %v1554_v9  ;;  %v5094_v12 = vpop.permute.xlu2 %5093  ;;  %v6557_v34 = vld [vmem:[%s7549_s5 + $0x30] sm:$0xff]  ;;  %v2016_v25 = vmul.f32 %v6150_v26, %v1991_v48  ;;  %v3115_v30 = vadd.f32 %v6548_v32, %v6544_v44 }
 0x193   : > { %v5096_v7 = vunpack.i.h.bf16 %v5094_v12  ;;  %v5095_v39 = vunpack.i.l.bf16 %v5094_v12  ;;  %4456 = vmatmul.msk.f32.gmra.mxu1 %vm347_vm1, %v6557_v34  ;;  %4551 = vmatmul.msk.f32.gmra.mxu0 %vm347_vm1, %v6498_v11 }
 0x194   : > { %v1590_v0 = vmax.f32 %v1574_v51, 0.0  ;;  %4714 = vmatmul.msk.bf16.vlgmr.msrb.gmra.mxu3 %vm533_vm0, %v4899_v61  ;;  %v2036_v5 = vadd.f32 %v6163_v46, %v2016_v25  ;;  %3188 = vmatpush.msrb.mxu1 %v3115_v30 }
 0x195   : > { %v1657_v8 = vsel %vm347_vm1, %v6423_v27, %v5095_v39  ;;  %v1658_v54 = vsel %vm347_vm1, %v6446_v6, %v5096_v7  ;;  %v6589_v6 = vpop.f32.mrf.mxu1  ;;  %v4900_v7 = vld [vmem:[%s5419_s13 + $0x188] sm:$0xff]  ;;  %v4977_v39 = vunpack.c.l.bf16 %v6526_v23 }
 0x196   : > { %v5152_v28 = vpack.i.bf16 %v1590_v0, %v1589_v50  ;;  %v1673_v47 = vpack.c.bf16 %v1657_v8, %v1657_v8  ;;  %v1674_v3 = vpack.c.bf16 %v1658_v54, %v1658_v54  ;;  %v2052_v27 = vmax.f32 %v2036_v5, 0.0  ;;  %4625 = vmatmul.msk.bf16.gmra.mxu2 %vm533_vm0, %v4896_v16  ;;  %v6599_v62 = vpop.f32.mrf.mxu0 }
 0x197   : > { %v2423_v52 = vpop.f32.mrf.mxu3  ;;  %v6630_v5 = vmul.f32 0.25, %v4977_v39 }
 0x198   : > { %5153 = vrot.lane.b32.xlu2 %v5152_v28, %s5351_s7  ;;  %4340 = vst.msk [vmem:[%s5950_s23 + $0x88] sm:$0xf] %vm759_vm2, %v1673_v47  ;;  %v2467_v53 = vmul.f32 %v6581_v24, %v2423_v52  ;;  %v5157_v60 = vpack.i.bf16 %v2052_v27, %v2051_v20  ;;  %v4909_v27 = vld [vmem:[%s5419_s13 + $0x1c0] sm:$0xff] }
 0x199   : > { %4341 = vst.msk [vmem:[%s5950_s23 + $0x8c] sm:$0xf] %vm759_vm2, %v1674_v3  ;;  %v1994_v61 = vpop.f32.mrf.mxu2 }
 0x19a   : > { %v5089_v36 = vpop.permute.xlu1 %5088  ;;  %5158 = vrot.lane.b32.xlu0 %v5157_v60, %s5351_s7  ;;  %v2487_v51 = vadd.f32 %v6597_v43, %v2467_v53  ;;  %v2017_v25 = vmul.f32 %v6150_v26, %v1994_v61 }
 0x19b   : > { %v5091_v9 = vunpack.i.h.bf16 %v5089_v36  ;;  %v5090_v37 = vunpack.i.l.bf16 %v5089_v36  ;;  %4457 = vmatmul.msk.f32.gmra.mxu1 %vm347_vm1, %v6074_v35  ;;  %v4981_v35 = vunpack.c.l.bf16 %v6529_v19  ;;  %v6641_v19 = vld [vmem:[%s7549_s5 + $0x40] sm:$0xff]  ;;  %4552 = vmatmul.msk.f32.gmra.mxu0 %vm347_vm1, %v6557_v34 }
 0x19c   : > { %v2503_v11 = vmax.f32 %v2487_v51, 0.0  ;;  %v2037_v3 = vadd.f32 %v6163_v46, %v2017_v25  ;;  %v6676_v25 = vld [vmem:[%s7547_s3] ss:$0 sm:$0xff] }
 0x19d   : > { %v1655_v50 = vsel %vm347_vm1, %v6366_v14, %v5090_v37  ;;  %v1656_v22 = vsel %vm347_vm1, %v6397_v13, %v5091_v9  ;;  %v4973_v13 = vunpack.c.l.bf16 %v6523_v2  ;;  %v6621_v16 = vpop.f32.mrf.mxu1  ;;  %v6634_v28 = vmul.f32 0.25, %v4981_v35 }
 0x19e   : > { %v1671_v48 = vpack.c.bf16 %v1655_v50, %v1655_v50  ;;  %v1672_v12 = vpack.c.bf16 %v1656_v22, %v1656_v22  ;;  %v6632_v8 = vpop.f32.mrf.mxu0  ;;  %v6636_v47 = vmul.f32 0.75, %v4981_v35  ;;  %v2053_v9 = vmax.f32 %v2037_v3, 0.0  ;;  %v6688_v3 = vld [vmem:[%s7548_s4] ss:$0 sm:$0xff] }
 0x19f   : > { %v2425_v0 = vpop.f32.mrf.mxu3  ;;  %v6626_v58 = vmul.f32 0.75, %v4973_v13 }
 0x1a0   : > { %4338 = vst.msk [vmem:[%s5950_s23 + $0x80] sm:$0xf] %vm759_vm2, %v1671_v48  ;;  %v2468_v14 = vmul.f32 %v6581_v24, %v2425_v0  ;;  %v3574_v60 = vadd.f32 %v6636_v47, %v6634_v28  ;;  %v6671_v0 = vld [vmem:[%s7549_s5 + $0x38] sm:$0xff] }
 0x1a1   : > { %4339 = vst.msk [vmem:[%s5950_s23 + $0x84] sm:$0xf] %vm759_vm2, %v1672_v12  ;;  %v1996_v54 = vpop.f32.mrf.mxu2  ;;  %v3114_v53 = vadd.f32 %v6630_v5, %v6626_v58  ;;  %v6666_v12 = vld [vmem:[%s7549_s5 + $0x48] sm:$0xff] }
 0x1a2   : > { %v2488_v30 = vadd.f32 %v6597_v43, %v2468_v14  ;;  %v2018_v20 = vmul.f32 %v6150_v26, %v1996_v54  ;;  %3649 = vmatpush.msrb.mxu0 %v3574_v60 }
 0x1a3   : > { %4458 = vmatmul.msk.f32.gmra.mxu1 %vm347_vm1, %v6641_v19  ;;  %4553 = vmatmul.msk.f32.gmra.mxu0 %vm347_vm1, %v6671_v0 }
 0x1a4   : > { %v2504_v52 = vmax.f32 %v2488_v30, 0.0  ;;  %4715 = vmatmul.msk.bf16.gmra.mxu3 %vm533_vm0, %v4900_v7  ;;  %v2038_v36 = vadd.f32 %v6163_v46, %v2018_v20  ;;  %3189 = vmatpush.msrb.mxu1 %v3114_v53  ;;  %v4901_v20 = vld [vmem:[%s5419_s13 + $0x190] sm:$0xff]  ;;  %v3573_v53 = vadd.f32 %v6552_v10, %v6548_v32 }
 0x1a5   : > { %v6658_v50 = vpop.f32.mrf.mxu1 }
 0x1a6   : > { %v5162_v61 = vpack.i.bf16 %v2504_v52, %v2503_v11  ;;  %v2054_v37 = vmax.f32 %v2038_v36, 0.0  ;;  %4810 = vmatmul.msk.bf16.vlgmr.msrb.gmra.mxu2 %vm533_vm0, %v4909_v27  ;;  %v6661_v48 = vpop.f32.mrf.mxu0  ;;  %v3109_v27 = vadd.f32 %v6544_v44, %v6042_v1  ;;  %3650 = vmatpush.msrb.mxu0 %v3573_v53 }
 0x1a7   : > { %v2428_v26 = vpop.f32.mrf.mxu3 }
 0x1a8   : > { %5163 = vrot.lane.b32.xlu2 %v5162_v61, %s5351_s7  ;;  %v2469_v22 = vmul.f32 %v6581_v24, %v2428_v26  ;;  %v5167_v51 = vpack.i.bf16 %v2054_v37, %v2053_v9  ;;  %3190 = vmatpush.msrb.mxu1 %v3109_v27 }
 0x1a9   : > { %v2887_v46 = vpop.f32.mrf.mxu2 }
 0x1aa   : > { %5168 = vrot.lane.b32.xlu1 %v5167_v51, %s5351_s7  ;;  %v2489_v14 = vadd.f32 %v6597_v43, %v2469_v22  ;;  %v2931_v54 = vmul.f32 %v6676_v25, %v2887_v46  ;;  %v4910_v51 = vld [vmem:[%s5419_s13 + $0x1c8] sm:$0xff] }
 0x1ab   : > { %4459 = vmatmul.msk.f32.gmra.mxu1 %vm347_vm1, %v6666_v12  ;;  %4554 = vmatmul.msk.f32.gmra.mxu0 %vm347_vm1, %v6641_v19 }
 0x1ac   : > { %v2505_v26 = vmax.f32 %v2489_v14, 0.0 }
 0x1ad   : > { %v5099_v7 = vpop.permute.xlu0 %5098 }
 0x1ae   : > { %v5101_v35 = vunpack.i.h.bf16 %v5099_v7  ;;  %v5100_v11 = vunpack.i.l.bf16 %v5099_v7  ;;  %v6700_v61 = vpop.f32.mrf.mxu1  ;;  %v6703_v1 = vpop.f32.mrf.mxu0 }
 0x1af   : > { %v2430_v30 = vpop.f32.mrf.mxu3 }
 0x1b0   : > { %v2470_v52 = vmul.f32 %v6581_v24, %v2430_v30  ;;  %v2119_v60 = vsel %vm347_vm1, %v6429_v56, %v5100_v11  ;;  %v2120_v36 = vsel %vm347_vm1, %v6451_v31, %v5101_v35  ;;  %v6708_v56 = vld [vmem:[%s7549_s5 + $0x50] sm:$0xff]  ;;  %v2951_v31 = vadd.f32 %v6688_v3, %v2931_v54 }
 0x1b1   : > { %v2135_v9 = vpack.c.bf16 %v2119_v60, %v2119_v60  ;;  %v2136_v37 = vpack.c.bf16 %v2120_v36, %v2120_v36  ;;  %v2889_v44 = vpop.f32.mrf.mxu2 }
 0x1b2   : > { %v2490_v22 = vadd.f32 %v6597_v43, %v2470_v52  ;;  %v2932_v10 = vmul.f32 %v6676_v25, %v2889_v44  ;;  %v2967_v54 = vmax.f32 %v2951_v31, 0.0 }
 0x1b3   : > { %4434 = vst.msk [vmem:[%s5950_s23 + $0xc0] sm:$0xf] %vm759_vm2, %v2135_v9  ;;  %4460 = vmatmul.msk.f32.gmra.mxu1 %vm347_vm1, %v6708_v56  ;;  %4555 = vmatmul.msk.f32.gmra.mxu0 %vm347_vm1, %v6666_v12 }
 0x1b4   : > { %v2506_v32 = vmax.f32 %v2490_v22, 0.0  ;;  %4716 = vmatmul.msk.bf16.gmra.mxu3 %vm533_vm0, %v4901_v20  ;;  %4435 = vst.msk [vmem:[%s5950_s23 + $0xc4] sm:$0xf] %vm759_vm2, %v2136_v37  ;;  %v2952_v46 = vadd.f32 %v6688_v3, %v2932_v10  ;;  %v5119_v14 = vpop.permute.xlu2 %5118 }
 0x1b5   : > { %v5121_v35 = vunpack.i.h.bf16 %v5119_v14  ;;  %v5120_v11 = vunpack.i.l.bf16 %v5119_v14 }
 0x1b6   : > { %v5172_v7 = vpack.i.bf16 %v2506_v32, %v2505_v26  ;;  %v2968_v52 = vmax.f32 %v2952_v46, 0.0  ;;  %4811 = vmatmul.msk.bf16.gmra.mxu2 %vm533_vm0, %v4910_v51  ;;  %v6729_v53 = vpop.f32.mrf.mxu1  ;;  %v6732_v22 = vpop.f32.mrf.mxu0 }
 0x1b7   : > { %v2433_v30 = vpop.f32.mrf.mxu3  ;;  %v2123_v20 = vsel %vm347_vm1, %v6540_v45, %v5120_v11  ;;  %v2124_v27 = vsel %vm347_vm1, %v6599_v62, %v5121_v35  ;;  %v6737_v45 = vld [vmem:[%s7549_s5 + $0x58] sm:$0xff] }
 0x1b8   : > { %5173 = vrot.lane.b32.xlu0 %v5172_v7, %s5351_s7  ;;  %v2139_v60 = vpack.c.bf16 %v2123_v20, %v2123_v20  ;;  %v2140_v36 = vpack.c.bf16 %v2124_v27, %v2124_v27  ;;  %v2471_v26 = vmul.f32 %v6581_v24, %v2433_v30  ;;  %v5177_v9 = vpack.i.bf16 %v2968_v52, %v2967_v54  ;;  %v4902_v54 = vld [vmem:[%s5419_s13 + $0x198] sm:$0xff] }
 0x1b9   : > { %v2892_v44 = vpop.f32.mrf.mxu2  ;;  %v3108_v52 = vadd.f32 %v6626_v58, %v6115_v49  ;;  %v3572_v20 = vadd.f32 %v6636_v47, %v6630_v5 }
 0x1ba   : > { %v5104_v37 = vpop.permute.xlu0 %5103  ;;  %4438 = vst.msk [vmem:[%s5950_s23 + $0xd0] sm:$0xf] %vm759_vm2, %v2139_v60  ;;  %5178 = vrot.lane.b32.xlu1 %v5177_v9, %s5351_s7  ;;  %v2491_v51 = vadd.f32 %v6597_v43, %v2471_v26 }
 0x1bb   : > { %v5106_v31 = vunpack.i.h.bf16 %v5104_v37  ;;  %v5105_v32 = vunpack.i.l.bf16 %v5104_v37  ;;  %4439 = vst.msk [vmem:[%s5950_s23 + $0xd4] sm:$0xf] %vm759_vm2, %v2140_v36  ;;  %4461 = vmatmul.msk.f32.gmra.mxu1 %vm347_vm1, %v6737_v45  ;;  %3651 = vmatpush.msrb.mxu0 %v3572_v20 }
 0x1bc   : > { %v5109_v7 = vpop.permute.xlu1 %5108  ;;  %v2507_v26 = vmax.f32 %v2491_v51, 0.0  ;;  %3191 = vmatpush.msrb.mxu1 %v3108_v52  ;;  %4556 = vmatmul.msk.f32.gmra.mxu0 %vm347_vm1, %v6708_v56 }
 0x1bd   : > { %v1660_v62 = vsel %vm347_vm1, %v6488_v29, %v5106_v31  ;;  %v1659_v10 = vsel %vm347_vm1, %v6463_v57, %v5105_v32  ;;  %v5111_v35 = vunpack.i.h.bf16 %v5109_v7  ;;  %v5110_v11 = vunpack.i.l.bf16 %v5109_v7 }
 0x1be   : > { %v1676_v46 = vpack.c.bf16 %v1660_v62, %v1660_v62  ;;  %v1675_v14 = vpack.c.bf16 %v1659_v10, %v1659_v10  ;;  %v2933_v29 = vmul.f32 %v6676_v25, %v2892_v44  ;;  %v6768_v36 = vpop.f32.mrf.mxu1  ;;  %v6771_v5 = vpop.f32.mrf.mxu0  ;;  %v4911_v10 = vld [vmem:[%s5419_s13 + $0x1d0] sm:$0xff] }
 0x1bf   : > { %v2435_v30 = vpop.f32.mrf.mxu3  ;;  %v2121_v27 = vsel %vm347_vm1, %v6466_v42, %v5110_v11  ;;  %v2122_v60 = vsel %vm347_vm1, %v6493_v33, %v5111_v35  ;;  %v6776_v33 = vld [vmem:[%s7549_s5 + $0x60] sm:$0xff] }
 0x1c0   : > { %4343 = vst.msk [vmem:[%s5950_s23 + $0x94] sm:$0xf] %vm759_vm2, %v1676_v46  ;;  %v2472_v57 = vmul.f32 %v6581_v24, %v2435_v30  ;;  %v2137_v9 = vpack.c.bf16 %v2121_v27, %v2121_v27  ;;  %v2138_v37 = vpack.c.bf16 %v2122_v60, %v2122_v60  ;;  %v2953_v31 = vadd.f32 %v6688_v3, %v2933_v29 }
 0x1c1   : > { %4342 = vst.msk [vmem:[%s5950_s23 + $0x90] sm:$0xf] %vm759_vm2, %v1675_v14  ;;  %v2894_v47 = vpop.f32.mrf.mxu2 }
 0x1c2   : > { %v2492_v49 = vadd.f32 %v6597_v43, %v2472_v57  ;;  %v5124_v58 = vpop.permute.xlu2 %5123  ;;  %4436 = vst.msk [vmem:[%s5950_s23 + $0xc8] sm:$0xf] %vm759_vm2, %v2137_v9  ;;  %v2934_v62 = vmul.f32 %v6676_v25, %v2894_v47  ;;  %v2969_v29 = vmax.f32 %v2953_v31, 0.0  ;;  %v4903_v31 = vld [vmem:[%s5419_s13 + $0x1a0] sm:$0xff] }
 0x1c3   : > { %v5126_v42 = vunpack.i.h.bf16 %v5124_v58  ;;  %v5125_v44 = vunpack.i.l.bf16 %v5124_v58  ;;  %4437 = vst.msk [vmem:[%s5950_s23 + $0xcc] sm:$0xf] %vm759_vm2, %v2138_v37  ;;  %4462 = vmatmul.msk.f32.gmra.mxu1 %vm347_vm1, %v6776_v33 }
 0x1c4   : > { %v2508_v32 = vmax.f32 %v2492_v49, 0.0  ;;  %4717 = vmatmul.msk.bf16.gmra.mxu3 %vm533_vm0, %v4902_v54  ;;  %v2954_v14 = vadd.f32 %v6688_v3, %v2934_v62  ;;  %4557 = vmatmul.msk.f32.gmra.mxu0 %vm347_vm1, %v6737_v45  ;;  %v6831_v62 = vmul.f32 0.75, %v4978_v15 }
 0x1c5   : > { %v1663_v51 = vsel %vm347_vm1, %v6621_v16, %v5125_v44  ;;  %v1664_v46 = vsel %vm347_vm1, %v6658_v50, %v5126_v42 }
 0x1c6   : > { %v1679_v7 = vpack.c.bf16 %v1663_v51, %v1663_v51  ;;  %v1680_v35 = vpack.c.bf16 %v1664_v46, %v1664_v46  ;;  %v5182_v11 = vpack.i.bf16 %v2508_v32, %v2507_v26  ;;  %v2970_v57 = vmax.f32 %v2954_v14, 0.0  ;;  %4812 = vmatmul.msk.bf16.gmra.mxu2 %vm533_vm0, %v4911_v10  ;;  %v6801_v16 = vpop.f32.mrf.mxu1  ;;  %v6804_v20 = vpop.f32.mrf.mxu0 }
 0x1c7   : > { %v2438_v30 = vpop.f32.mrf.mxu3 }
 0x1c8   : > { %4346 = vst.msk [vmem:[%s5950_s23 + $0xa0] sm:$0xf] %vm759_vm2, %v1679_v7  ;;  %5183 = vrot.lane.b32.xlu1 %v5182_v11, %s5351_s7  ;;  %v2473_v50 = vmul.f32 %v6581_v24, %v2438_v30  ;;  %v5187_v54 = vpack.i.bf16 %v2970_v57, %v2969_v29  ;;  %v4912_v57 = vld [vmem:[%s5419_s13 + $0x1d8] sm:$0xff] }
 0x1c9   : > { %4347 = vst.msk [vmem:[%s5950_s23 + $0xa4] sm:$0xf] %vm759_vm2, %v1680_v35  ;;  %v2897_v27 = vpop.f32.mrf.mxu2  ;;  %v3569_v35 = vadd.f32 %v6550_v41, %v6831_v62 }
 0x1ca   : > { %v5114_v52 = vpop.permute.xlu1 %5113  ;;  %5188 = vrot.lane.b32.xlu2 %v5187_v54, %s5351_s7  ;;  %v2493_v49 = vadd.f32 %v6597_v43, %v2473_v50  ;;  %v2935_v44 = vmul.f32 %v6676_v25, %v2897_v27 }
 0x1cb   : > { %v5116_v60 = vunpack.i.h.bf16 %v5114_v52  ;;  %v5115_v26 = vunpack.i.l.bf16 %v5114_v52  ;;  %4463 = vmatmul.msk.f32.gmra.mxu1 %vm347_vm1, %v6274_v63  ;;  %v6825_v63 = vmul.f32 0.25, %v4974_v40  ;;  %v6844_v40 = vld [vmem:[%s7549_s5 + $0x70] sm:$0xff]  ;;  %3652 = vmatpush.msrb.mxu0 %v3569_v35  ;;  %v6891_v35 = vmul.f32 0.75, %v4977_v39 }
 0x1cc   : > { %v2509_v51 = vmax.f32 %v2493_v49, 0.0  ;;  %v2955_v15 = vadd.f32 %v6688_v3, %v2935_v44  ;;  %4558 = vmatmul.msk.f32.gmra.mxu0 %vm347_vm1, %v6776_v33  ;;  %v6870_v33 = vld [vmem:[%s7549_s5 + $0x68] sm:$0xff]  ;;  %v6876_v44 = vmul.f32 0.25, %v4973_v13 }
 0x1cd   : > { %v1662_v9 = vsel %vm347_vm1, %v6589_v6, %v5116_v60  ;;  %v1661_v37 = vsel %vm347_vm1, %v6536_v18, %v5115_v26  ;;  %v7557_v18 = vunpack.c.h.bf16 %v6005_v55  ;;  %v3568_v23 = vadd.f32 %v6634_v28, %v6891_v35  ;;  %v4913_v28 = vld [vmem:[%s5419_s13 + $0x1e0] sm:$0xff] }
 0x1ce   : > { %v1678_v58 = vpack.c.bf16 %v1662_v9, %v1662_v9  ;;  %v1677_v47 = vpack.c.bf16 %v1661_v37, %v1661_v37  ;;  %v6833_v10 = vpop.f32.mrf.mxu1  ;;  %v6839_v11 = vpop.f32.mrf.mxu0  ;;  %v2971_v52 = vmax.f32 %v2955_v15, 0.0 }
 0x1cf   : > { %v2440_v42 = vpop.f32.mrf.mxu3  ;;  %v3097_v32 = vmul.f32 0.75, %v7557_v18  ;;  %3653 = vmatpush.msrb.mxu0 %v3568_v23 }
 0x1d0   : > { %4345 = vst.msk [vmem:[%s5950_s23 + $0x9c] sm:$0xf] %vm759_vm2, %v1678_v58  ;;  %v2474_v6 = vmul.f32 %v6581_v24, %v2440_v42  ;;  %v6865_v58 = vld [vmem:[%s7549_s5 + $0x78] sm:$0xff] }
 0x1d1   : > { %4344 = vst.msk [vmem:[%s5950_s23 + $0x98] sm:$0xf] %vm759_vm2, %v1677_v47  ;;  %v3105_v14 = vadd.f32 %v6825_v63, %v3097_v32  ;;  %v2899_v7 = vpop.f32.mrf.mxu2  ;;  %v7558_v47 = vunpack.c.l.bf16 %v6005_v55  ;;  %v3099_v2 = vadd.f32 %v3097_v32, %v6301_v17 }
 0x1d2   : > { %v2494_v46 = vadd.f32 %v6597_v43, %v2474_v6  ;;  %v2936_v29 = vmul.f32 %v6676_v25, %v2899_v7  ;;  %v4904_v7 = vld [vmem:[%s5419_s13 + $0x1a8] sm:$0xff] }
 0x1d3   : > { %3192 = vmatpush.msrb.mxu1 %v3105_v14  ;;  %v3096_v42 = vmul.f32 0.75, %v7558_v47 }
 0x1d4   : > { %v2510_v30 = vmax.f32 %v2494_v46, 0.0  ;;  %4718 = vmatmul.msk.bf16.gmra.mxu3 %vm533_vm0, %v4903_v31  ;;  %4464 = vmatmul.msk.f32.gmra.mxu1 %vm347_vm1, %v6844_v40  ;;  %v2956_v41 = vadd.f32 %v6688_v3, %v2936_v29 }
 0x1d5   : > { %v3104_v31 = vadd.f32 %v6876_v44, %v3096_v42  ;;  %4559 = vmatmul.msk.f32.gmra.mxu0 %vm347_vm1, %v6870_v33  ;;  %v3098_v17 = vadd.f32 %v3096_v42, %v6364_v59 }
 0x1d6   : > { %v5192_v50 = vpack.i.bf16 %v2510_v30, %v2509_v51  ;;  %v2972_v27 = vmax.f32 %v2956_v41, 0.0  ;;  %4813 = vmatmul.msk.bf16.gmra.mxu2 %vm533_vm0, %v4912_v57  ;;  %v6858_v26 = vpop.f32.mrf.mxu1  ;;  %v6860_v49 = vpop.f32.mrf.mxu0 }
 0x1d7   : > { %v2443_v54 = vpop.f32.mrf.mxu3  ;;  %3193 = vmatpush.msrb.mxu1 %v3104_v31 }
 0x1d8   : > { %5193 = vrot.lane.b32.xlu2 %v5192_v50, %s5351_s7  ;;  %v2475_v60 = vmul.f32 %v6581_v24, %v2443_v54  ;;  %v5197_v9 = vpack.i.bf16 %v2972_v27, %v2971_v52 }
 0x1d9   : > { %v2902_v37 = vpop.f32.mrf.mxu2  ;;  %3194 = vmatpush.msrb.mxu1 %v3099_v2 }
 0x1da   : > { %5198 = vrot.lane.b32.xlu0 %v5197_v9, %s5351_s7  ;;  %v2495_v6 = vadd.f32 %v6597_v43, %v2475_v60  ;;  %v2937_v13 = vmul.f32 %v6676_v25, %v2902_v37 }
 0x1db   : > { %3195 = vmatpush.msrb.mxu1 %v3098_v17 }
 0x1dc   : > { %4465 = vmatmul.msk.f32.gmra.mxu1 %vm347_vm1, %v6865_v58  ;;  %v5129_v18 = vpop.permute.xlu0 %5128  ;;  %v2511_v15 = vmax.f32 %v2495_v6, 0.0  ;;  %v2957_v59 = vadd.f32 %v6688_v3, %v2937_v13 }
 0x1dd   : > { %v5131_v55 = vunpack.i.h.bf16 %v5129_v18  ;;  %v5130_v51 = vunpack.i.l.bf16 %v5129_v18  ;;  %4560 = vmatmul.msk.f32.gmra.mxu0 %vm347_vm1, %v6844_v40 }
 0x1de   : > { %v6901_v39 = vpop.f32.mrf.mxu1  ;;  %v6903_v54 = vpop.f32.mrf.mxu0  ;;  %v2973_v6 = vmax.f32 %v2957_v59, 0.0 }
 0x1df   : > { %v2445_v46 = vpop.f32.mrf.mxu3  ;;  %v2125_v30 = vsel %vm347_vm1, %v6632_v8, %v5130_v51  ;;  %v2126_v29 = vsel %vm347_vm1, %v6661_v48, %v5131_v55  ;;  %v6908_v8 = vld [vmem:[%s7549_s5] sm:$0xff] }
 0x1e0   : > { %v2476_v14 = vmul.f32 %v6581_v24, %v2445_v46  ;;  %v2141_v32 = vpack.c.bf16 %v2125_v30, %v2125_v30  ;;  %v2142_v57 = vpack.c.bf16 %v2126_v29, %v2126_v29 }
 0x1e1   : > { %v2904_v50 = vpop.f32.mrf.mxu2 }
 0x1e2   : > { %v2496_v41 = vadd.f32 %v6597_v43, %v2476_v14  ;;  %4440 = vst.msk [vmem:[%s5950_s23 + $0xd8] sm:$0xf] %vm759_vm2, %v2141_v32  ;;  %v2938_v52 = vmul.f32 %v6676_v25, %v2904_v50 }
 0x1e3   : > { %4441 = vst.msk [vmem:[%s5950_s23 + $0xdc] sm:$0xf] %vm759_vm2, %v2142_v57 }
 0x1e4   : > { %v2512_v48 = vmax.f32 %v2496_v41, 0.0  ;;  %4719 = vmatmul.msk.bf16.gmra.mxu3 %vm533_vm0, %v4904_v7  ;;  %4642 = vmatmul.msk.f32.vlgmr.msrb.gmra.mxu1 %vm347_vm1, %v6908_v8  ;;  %v2958_v27 = vadd.f32 %v6688_v3, %v2938_v52  ;;  %v5149_v60 = vpop.permute.xlu2 %5148 }
 0x1e5   : > { %v5151_v37 = vunpack.i.h.bf16 %v5149_v60  ;;  %v5150_v47 = vunpack.i.l.bf16 %v5149_v60  ;;  %4561 = vmatmul.msk.f32.gmra.mxu0 %vm347_vm1, %v6865_v58 }
 0x1e6   : > { %v5202_v9 = vpack.i.bf16 %v2512_v48, %v2511_v15  ;;  %v2974_v31 = vmax.f32 %v2958_v27, 0.0  ;;  %4814 = vmatmul.msk.bf16.gmra.mxu2 %vm533_vm0, %v4913_v28  ;;  %v6930_v7 = vpop.f32.mrf.mxu1  ;;  %v6932_v17 = vpop.f32.mrf.mxu0  ;;  %v4905_v27 = vld [vmem:[%s5419_s13 + $0x1b0] sm:$0xff] }
 0x1e7   : > { %v2448_v42 = vpop.f32.mrf.mxu3  ;;  %v2129_v18 = vsel %vm347_vm1, %v6771_v5, %v5150_v47  ;;  %v2130_v55 = vsel %vm347_vm1, %v6804_v20, %v5151_v37  ;;  %v6937_v5 = vld [vmem:[%s7549_s5 + $0x8] sm:$0xff] }
 0x1e8   : > { %5203 = vrot.lane.b32.xlu0 %v5202_v9, %s5351_s7  ;;  %v2145_v51 = vpack.c.bf16 %v2129_v18, %v2129_v18  ;;  %v2146_v46 = vpack.c.bf16 %v2130_v55, %v2130_v55  ;;  %v2477_v2 = vmul.f32 %v6581_v24, %v2448_v42  ;;  %v5207_v13 = vpack.i.bf16 %v2974_v31, %v2973_v6 }
 0x1e9   : > { %v2907_v15 = vpop.f32.mrf.mxu2 }
 0x1ea   : > { %v5134_v14 = vpop.permute.xlu0 %5133  ;;  %4444 = vst.msk [vmem:[%s5950_s23 + $0xe8] sm:$0xf] %vm759_vm2, %v2145_v51  ;;  %5208 = vrot.lane.b32.xlu1 %v5207_v13, %s5351_s7  ;;  %v2497_v57 = vadd.f32 %v6597_v43, %v2477_v2  ;;  %v2939_v28 = vmul.f32 %v6676_v25, %v2907_v15 }
 0x1eb   : > { %v5136_v30 = vunpack.i.h.bf16 %v5134_v14  ;;  %v5135_v29 = vunpack.i.l.bf16 %v5134_v14  ;;  %4445 = vst.msk [vmem:[%s5950_s23 + $0xec] sm:$0xf] %vm759_vm2, %v2146_v46  ;;  %v4914_v46 = vld [vmem:[%s5419_s13 + $0x1e8] sm:$0xff] }
 0x1ec   : > { %4643 = vmatmul.msk.f32.gmra.mxu1 %vm347_vm1, %v6937_v5  ;;  %v5139_v50 = vpop.permute.xlu1 %5138 }
 0x1ed   : > { %v1666_v20 = vsel %vm347_vm1, %v6729_v53, %v5136_v30  ;;  %v1665_v32 = vsel %vm347_vm1, %v6700_v61, %v5135_v29  ;;  %v5141_v59 = vunpack.i.h.bf16 %v5139_v50  ;;  %v5140_v48 = vunpack.i.l.bf16 %v5139_v50 }
 0x1ee   : > { %v1682_v41 = vpack.c.bf16 %v1666_v20, %v1666_v20  ;;  %v1681_v23 = vpack.c.bf16 %v1665_v32, %v1665_v32  ;;  %v3563_v53 = vadd.f32 %v6831_v62, %v6825_v63  ;;  %v3562_v63 = vadd.f32 %v6891_v35, %v6876_v44  ;;  %v6969_v31 = vpop.f32.mrf.mxu1  ;;  %v6971_v51 = vpop.f32.mrf.mxu0 }
 0x1ef   : > { %v2450_v52 = vpop.f32.mrf.mxu3  ;;  %v2127_v60 = vsel %vm347_vm1, %v6703_v1, %v5140_v48  ;;  %v2128_v9 = vsel %vm347_vm1, %v6732_v22, %v5141_v59  ;;  %v2513_v62 = vmax.f32 %v2497_v57, 0.0  ;;  %v2959_v22 = vadd.f32 %v6688_v3, %v2939_v28 }
 0x1f0   : > { %4349 = vst.msk [vmem:[%s5950_s23 + $0xac] sm:$0xf] %vm759_vm2, %v1682_v41  ;;  %v2478_v61 = vmul.f32 %v6581_v24, %v2450_v52  ;;  %3654 = vmatpush.msrb.mxu0 %v3563_v53  ;;  %v2143_v37 = vpack.c.bf16 %v2127_v60, %v2127_v60  ;;  %v2144_v47 = vpack.c.bf16 %v2128_v9, %v2128_v9  ;;  %v4906_v9 = vld [vmem:[%s5419_s13 + $0x1b8] sm:$0xff] }
 0x1f1   : > { %4348 = vst.msk [vmem:[%s5950_s23 + $0xa8] sm:$0xf] %vm759_vm2, %v1681_v23  ;;  %v2909_v18 = vpop.f32.mrf.mxu2  ;;  %v2975_v32 = vmax.f32 %v2959_v22, 0.0  ;;  %v4915_v22 = vld [vmem:[%s5419_s13 + $0x1f0] sm:$0xff] }
 0x1f2   : > { %v2498_v42 = vadd.f32 %v6597_v43, %v2478_v61  ;;  %v5154_v6 = vpop.permute.xlu2 %5153  ;;  %3655 = vmatpush.msrb.mxu0 %v3562_v63  ;;  %4442 = vst.msk [vmem:[%s5950_s23 + $0xe0] sm:$0xf] %vm759_vm2, %v2143_v37  ;;  %v2940_v35 = vmul.f32 %v6676_v25, %v2909_v18 }
 0x1f3   : > { %v5156_v1 = vunpack.i.h.bf16 %v5154_v6  ;;  %v5155_v55 = vunpack.i.l.bf16 %v5154_v6  ;;  %4443 = vst.msk [vmem:[%s5950_s23 + $0xe4] sm:$0xf] %vm759_vm2, %v2144_v47  ;;  %4738 = vmatmul.msk.f32.vlgmr.msrb.gmra.mxu0 %vm347_vm1, %v6908_v8  ;;  %v3578_v6 = vld [vmem:[%s7549_s5 + $0x10] sm:$0xff] }
 0x1f4   : > { %v2514_v44 = vmax.f32 %v2498_v42, 0.0  ;;  %4720 = vmatmul.msk.bf16.gmra.mxu3 %vm533_vm0, %v4905_v27  ;;  %4644 = vmatmul.msk.f32.gmra.mxu1 %vm347_vm1, %v6471_v4  ;;  %v2960_v14 = vadd.f32 %v6688_v3, %v2940_v35 }
 0x1f5   : > { %v1669_v2 = vsel %vm347_vm1, %v6833_v10, %v5155_v55  ;;  %v1670_v13 = vsel %vm347_vm1, %v6858_v26, %v5156_v1 }
 0x1f6   : > { %v1685_v15 = vpack.c.bf16 %v1669_v2, %v1669_v2  ;;  %v1686_v30 = vpack.c.bf16 %v1670_v13, %v1670_v13  ;;  %v5212_v29 = vpack.i.bf16 %v2514_v44, %v2513_v62  ;;  %v2976_v57 = vmax.f32 %v2960_v14, 0.0  ;;  %4815 = vmatmul.msk.bf16.gmra.mxu2 %vm533_vm0, %v4914_v46  ;;  %v6997_v41 = vpop.f32.mrf.mxu1  ;;  %v6999_v59 = vpop.f32.mrf.mxu0 }
 0x1f7   : > { %v2453_v20 = vpop.f32.mrf.mxu3 }
 0x1f8   : > { %4352 = vst.msk [vmem:[%s5950_s23 + $0xb8] sm:$0xf] %vm759_vm2, %v1685_v15  ;;  %5213 = vrot.lane.b32.xlu1 %v5212_v29, %s5351_s7  ;;  %v2479_v4 = vmul.f32 %v6581_v24, %v2453_v20  ;;  %v5217_v10 = vpack.i.bf16 %v2976_v57, %v2975_v32 }
 0x1f9   : > { %4353 = vst.msk [vmem:[%s5950_s23 + $0xbc] sm:$0xf] %vm759_vm2, %v1686_v30  ;;  %v2912_v23 = vpop.f32.mrf.mxu2 }
 0x1fa   : > { %v5144_v26 = vpop.permute.xlu1 %5143  ;;  %5218 = vrot.lane.b32.xlu2 %v5217_v10, %s5351_s7  ;;  %v2499_v53 = vadd.f32 %v6597_v43, %v2479_v4  ;;  %v2941_v60 = vmul.f32 %v6676_v25, %v2912_v23  ;;  %v3121_v4 = vld [vmem:[%s7549_s5 + $0x28] sm:$0xff]  ;;  %v3579_v10 = vld [vmem:[%s7549_s5 + $0x18] sm:$0xff] }
 0x1fb   : > { %v5146_v8 = vunpack.i.h.bf16 %v5144_v26  ;;  %v5145_v50 = vunpack.i.l.bf16 %v5144_v26  ;;  %4739 = vmatmul.msk.f32.gmra.mxu0 %vm347_vm1, %v6937_v5 }
 0x1fc   : > { %4645 = vmatmul.msk.f32.gmra.mxu1 %vm347_vm1, %v6505_v38  ;;  %v2961_v18 = vadd.f32 %v6688_v3, %v2941_v60 }
 0x1fd   : > { %v1668_v48 = vsel %vm347_vm1, %v6801_v16, %v5146_v8  ;;  %v1667_v52 = vsel %vm347_vm1, %v6768_v36, %v5145_v50  ;;  %v2515_v36 = vmax.f32 %v2499_v53, 0.0 }
 0x1fe   : > { %v1684_v28 = vpack.c.bf16 %v1668_v48, %v1668_v48  ;;  %v1683_v61 = vpack.c.bf16 %v1667_v52, %v1667_v52  ;;  %v7019_v62 = vpop.f32.mrf.mxu1  ;;  %v7021_v42 = vpop.f32.mrf.mxu0  ;;  %v2977_v30 = vmax.f32 %v2961_v18, 0.0 }
 0x1ff   : > { %v2455_v27 = vpop.f32.mrf.mxu3 }
 0x200   : > { %4351 = vst.msk [vmem:[%s5950_s23 + $0xb4] sm:$0xf] %vm759_vm2, %v1684_v28  ;;  %v2480_v16 = vmul.f32 %v6581_v24, %v2455_v27 }
 0x201   : > { %4350 = vst.msk [vmem:[%s5950_s23 + $0xb0] sm:$0xf] %vm759_vm2, %v1683_v61  ;;  %v2914_v37 = vpop.f32.mrf.mxu2 }
 0x202   : > { %v2500_v38 = vadd.f32 %v6597_v43, %v2480_v16  ;;  %v5164_v63 = vpop.permute.xlu2 %5163  ;;  %v2942_v55 = vmul.f32 %v6676_v25, %v2914_v37 }
 0x203   : > { %v5166_v47 = vunpack.i.h.bf16 %v5164_v63  ;;  %v5165_v5 = vunpack.i.l.bf16 %v5164_v63  ;;  %4740 = vmatmul.msk.f32.gmra.mxu0 %vm347_vm1, %v3578_v6 }
 0x204   : > { %v2516_v1 = vmax.f32 %v2500_v38, 0.0  ;;  %4721 = vmatmul.msk.bf16.gmra.mxu3 %vm533_vm0, %v4906_v9  ;;  %4646 = vmatmul.msk.f32.gmra.mxu1 %vm347_vm1, %v6562_v21  ;;  %v2962_v46 = vadd.f32 %v6688_v3, %v2942_v55  ;;  %v7093_v55 = vld [vmem:[%s7548_s4] ss:$0 sm:$0xff] }
 0x205   : > { %v2583_v44 = vsel %vm347_vm1, %v6901_v39, %v5165_v5  ;;  %v2584_v35 = vsel %vm347_vm1, %v6930_v7, %v5166_v47  ;;  %v4916_v47 = vld [vmem:[%s5419_s13 + $0x1f8] sm:$0xff] }
 0x206   : > { %v2599_v2 = vpack.c.bf16 %v2583_v44, %v2583_v44  ;;  %v2600_v13 = vpack.c.bf16 %v2584_v35, %v2584_v35  ;;  %v5222_v14 = vpack.i.bf16 %v2516_v1, %v2515_v36  ;;  %v2978_v29 = vmax.f32 %v2962_v46, 0.0  ;;  %4816 = vmatmul.msk.bf16.gmra.mxu2 %vm533_vm0, %v4915_v22  ;;  %v7045_v20 = vpop.f32.mrf.mxu1  ;;  %v7047_v57 = vpop.f32.mrf.mxu0 }
 0x207   : > { %v2458_v15 = vpop.f32.mrf.mxu3 }
 0x208   : > { %4530 = vst.msk [vmem:[%s5950_s23 + $0x100] sm:$0xf] %vm759_vm2, %v2599_v2  ;;  %5223 = vrot.lane.b32.xlu2 %v5222_v14, %s5351_s7  ;;  %v2481_v39 = vmul.f32 %v6581_v24, %v2458_v15  ;;  %v5227_v7 = vpack.i.bf16 %v2978_v29, %v2977_v30 }
 0x209   : > { %4531 = vst.msk [vmem:[%s5950_s23 + $0x104] sm:$0xf] %vm759_vm2, %v2600_v13  ;;  %v2917_v32 = vpop.f32.mrf.mxu2 }
 0x20a   : > { %5228 = vrot.lane.b32.xlu0 %v5227_v7, %s5351_s7  ;;  %v2501_v26 = vadd.f32 %v6597_v43, %v2481_v39  ;;  %v2943_v52 = vmul.f32 %v6676_v25, %v2917_v32 }
 0x20b   : > { %4741 = vmatmul.msk.f32.gmra.mxu0 %vm347_vm1, %v3579_v10 }
 0x20c   : > { %4647 = vmatmul.msk.f32.gmra.mxu1 %vm347_vm1, %v3121_v4  ;;  %v5159_v23 = vpop.permute.xlu0 %5158  ;;  %v2517_v27 = vmax.f32 %v2501_v26, 0.0  ;;  %v2963_v37 = vadd.f32 %v6688_v3, %v2943_v52 }
 0x20d   : > { %v5161_v8 = vunpack.i.h.bf16 %v5159_v23  ;;  %v5160_v50 = vunpack.i.l.bf16 %v5159_v23 }
 0x20e   : > { %v7068_v63 = vpop.f32.mrf.mxu0  ;;  %v2979_v18 = vmax.f32 %v2963_v37, 0.0 }
 0x20f   : > { %v2460_v48 = vpop.f32.mrf.mxu3  ;;  %v2131_v28 = vsel %vm347_vm1, %v6839_v11, %v5160_v50  ;;  %v2132_v61 = vsel %vm347_vm1, %v6860_v49, %v5161_v8  ;;  %v7083_v49 = vld [vmem:[%s7547_s3] ss:$0 sm:$0xff] }
 0x210   : > { %v2482_v53 = vmul.f32 %v6581_v24, %v2460_v48  ;;  %v2147_v60 = vpack.c.bf16 %v2131_v28, %v2131_v28  ;;  %v2148_v16 = vpack.c.bf16 %v2132_v61, %v2132_v61  ;;  %v7066_v36 = vpop.f32.mrf.mxu1  ;;  %v3582_v48 = vld [vmem:[%s7549_s5 + $0x30] sm:$0xff] }
 0x211   : > { %v2919_v38 = vpop.f32.mrf.mxu2 }
 0x212   : > { %v2502_v9 = vadd.f32 %v6597_v43, %v2482_v53  ;;  %4446 = vst.msk [vmem:[%s5950_s23 + $0xf0] sm:$0xf] %vm759_vm2, %v2147_v60  ;;  %v2944_v11 = vmul.f32 %v6676_v25, %v2919_v38 }
 0x213   : > { %4447 = vst.msk [vmem:[%s5950_s23 + $0xf4] sm:$0xf] %vm759_vm2, %v2148_v16  ;;  %4742 = vmatmul.msk.f32.gmra.mxu0 %vm347_vm1, %v6562_v21 }
 0x214   : > { %v2518_v24 = vmax.f32 %v2502_v9, 0.0  ;;  %4648 = vmatmul.msk.f32.gmra.mxu1 %vm347_vm1, %v6557_v34  ;;  %v2964_v43 = vadd.f32 %v6688_v3, %v2944_v11 }
 0x216   : > { %v5232_v5 = vpack.i.bf16 %v2518_v24, %v2517_v27  ;;  %v2980_v1 = vmax.f32 %v2964_v43, 0.0  ;;  %4817 = vmatmul.msk.bf16.gmra.mxu2 %vm533_vm0, %v4916_v47  ;;  %v7097_v46 = vpop.f32.mrf.mxu0 }
 0x217   : > { %v3351_v6 = vpop.f32.mrf.mxu3 }
 0x218   : > { %5233 = vrot.lane.b32.xlu0 %v5232_v5, %s5351_s7  ;;  %v3395_v34 = vmul.f32 %v7083_v49, %v3351_v6  ;;  %v5237_v22 = vpack.i.bf16 %v2980_v1, %v2979_v18  ;;  %v7095_v44 = vpop.f32.mrf.mxu1 }
 0x219   : > { %v2922_v35 = vpop.f32.mrf.mxu2 }
 0x21a   : > { %5238 = vrot.lane.b32.xlu1 %v5237_v22, %s5351_s7  ;;  %v3415_v21 = vadd.f32 %v7093_v55, %v3395_v34  ;;  %v2945_v30 = vmul.f32 %v6676_v25, %v2922_v35 }
 0x21b   : > { %4743 = vmatmul.msk.f32.gmra.mxu0 %vm347_vm1, %v3121_v4 }
 0x21c   : > { %4649 = vmatmul.msk.f32.gmra.mxu1 %vm347_vm1, %v6671_v0  ;;  %v5169_v2 = vpop.permute.xlu1 %5168  ;;  %v3431_v32 = vmax.f32 %v3415_v21, 0.0  ;;  %v2965_v52 = vadd.f32 %v6688_v3, %v2945_v30 }
 0x21d   : > { %v5171_v13 = vunpack.i.h.bf16 %v5169_v2  ;;  %v5170_v14 = vunpack.i.l.bf16 %v5169_v2 }
 0x21e   : > { %v7113_v50 = vpop.f32.mrf.mxu0  ;;  %v2981_v9 = vmax.f32 %v2965_v52, 0.0 }
 0x21f   : > { %v3353_v15 = vpop.f32.mrf.mxu3  ;;  %v2133_v39 = vsel %vm347_vm1, %v6903_v54, %v5170_v14  ;;  %v2134_v7 = vsel %vm347_vm1, %v6932_v17, %v5171_v13 }
 0x220   : > { %v3396_v29 = vmul.f32 %v7083_v49, %v3353_v15  ;;  %v2149_v10 = vpack.c.bf16 %v2133_v39, %v2133_v39  ;;  %v2150_v26 = vpack.c.bf16 %v2134_v7, %v2134_v7  ;;  %v7111_v23 = vpop.f32.mrf.mxu1 }
 0x221   : > { %v2924_v8 = vpop.f32.mrf.mxu2 }
 0x222   : > { %v3416_v4 = vadd.f32 %v7093_v55, %v3396_v29  ;;  %4448 = vst.msk [vmem:[%s5950_s23 + $0xf8] sm:$0xf] %vm759_vm2, %v2149_v10  ;;  %v2946_v17 = vmul.f32 %v6676_v25, %v2924_v8 }
 0x223   : > { %4449 = vst.msk [vmem:[%s5950_s23 + $0xfc] sm:$0xf] %vm759_vm2, %v2150_v26  ;;  %4744 = vmatmul.msk.f32.gmra.mxu0 %vm347_vm1, %v3582_v48 }
 0x224   : > { %v3432_v54 = vmax.f32 %v3416_v4, 0.0  ;;  %4650 = vmatmul.msk.f32.gmra.mxu1 %vm347_vm1, %v6641_v19  ;;  %v2966_v53 = vadd.f32 %v6688_v3, %v2946_v17  ;;  %v5189_v28 = vpop.permute.xlu2 %5188 }
 0x225   : > { %v5191_v27 = vunpack.i.h.bf16 %v5189_v28  ;;  %v5190_v60 = vunpack.i.l.bf16 %v5189_v28 }
 0x226   : > { %v5242_v61 = vpack.i.bf16 %v3432_v54, %v3431_v32  ;;  %v2982_v38 = vmax.f32 %v2966_v53, 0.0  ;;  %v7136_v1 = vpop.f32.mrf.mxu0 }
 0x227   : > { %v3356_v16 = vpop.f32.mrf.mxu3  ;;  %v3049_v25 = vsel %vm347_vm1, %v7021_v42, %v5190_v60  ;;  %v3050_v19 = vsel %vm347_vm1, %v7047_v57, %v5191_v27  ;;  %v7143_v42 = vld [vmem:[%s7547_s3] ss:$0 sm:$0xff] }
 0x228   : > { %5243 = vrot.lane.b32.xlu0 %v5242_v61, %s5351_s7  ;;  %v3065_v3 = vpack.c.bf16 %v3049_v25, %v3049_v25  ;;  %v3066_v37 = vpack.c.bf16 %v3050_v19, %v3050_v19  ;;  %v3397_v24 = vmul.f32 %v7083_v49, %v3356_v16  ;;  %v5247_v11 = vpack.i.bf16 %v2982_v38, %v2981_v9  ;;  %v7134_v43 = vpop.f32.mrf.mxu1 }
 0x229   : > { %v3811_v5 = vpop.f32.mrf.mxu2 }
 0x22a   : > { %v5174_v47 = vpop.permute.xlu0 %5173  ;;  %4628 = vst.msk [vmem:[%s5950_s23 + $0x148] sm:$0xf] %vm759_vm2, %v3065_v3  ;;  %5248 = vrot.lane.b32.xlu2 %v5247_v11, %s5351_s7  ;;  %v3417_v22 = vadd.f32 %v7093_v55, %v3397_v24  ;;  %v3855_v30 = vmul.f32 %v7143_v42, %v3811_v5 }
 0x22b   : > { %v5176_v6 = vunpack.i.h.bf16 %v5174_v47  ;;  %v5175_v18 = vunpack.i.l.bf16 %v5174_v47  ;;  %4629 = vst.msk [vmem:[%s5950_s23 + $0x14c] sm:$0xf] %vm759_vm2, %v3066_v37  ;;  %4745 = vmatmul.msk.f32.gmra.mxu0 %vm347_vm1, %v6671_v0  ;;  %v3585_v47 = vld [vmem:[%s7549_s5 + $0x48] sm:$0xff] }
 0x22c   : > { %4651 = vmatmul.msk.f32.gmra.mxu1 %vm347_vm1, %v6666_v12  ;;  %v5179_v2 = vpop.permute.xlu1 %5178  ;;  %v3433_v29 = vmax.f32 %v3417_v22, 0.0 }
 0x22d   : > { %v2586_v57 = vsel %vm347_vm1, %v6997_v41, %v5176_v6  ;;  %v2585_v34 = vsel %vm347_vm1, %v6969_v31, %v5175_v18  ;;  %v5181_v13 = vunpack.i.h.bf16 %v5179_v2  ;;  %v5180_v14 = vunpack.i.l.bf16 %v5179_v2  ;;  %v7161_v31 = vld [vmem:[%s7548_s4] ss:$0 sm:$0xff] }
 0x22e   : > { %v2602_v35 = vpack.c.bf16 %v2586_v57, %v2586_v57  ;;  %v2601_v21 = vpack.c.bf16 %v2585_v34, %v2585_v34  ;;  %v7175_v52 = vpop.f32.mrf.mxu0 }
 0x22f   : > { %v3358_v15 = vpop.f32.mrf.mxu3  ;;  %v3047_v0 = vsel %vm347_vm1, %v6971_v51, %v5180_v14  ;;  %v3048_v41 = vsel %vm347_vm1, %v6999_v59, %v5181_v13  ;;  %v3584_v51 = vld [vmem:[%s7549_s5 + $0x40] sm:$0xff]  ;;  %v3875_v59 = vadd.f32 %v7161_v31, %v3855_v30  ;;  %v3586_v14 = vld [vmem:[%s7549_s5 + $0x50] sm:$0xff] }
 0x230   : > { %4533 = vst.msk [vmem:[%s5950_s23 + $0x10c] sm:$0xf] %vm759_vm2, %v2602_v35  ;;  %v3398_v12 = vmul.f32 %v7083_v49, %v3358_v15  ;;  %v3063_v39 = vpack.c.bf16 %v3047_v0, %v3047_v0  ;;  %v3064_v7 = vpack.c.bf16 %v3048_v41, %v3048_v41  ;;  %v7173_v26 = vpop.f32.mrf.mxu1 }
 0x231   : > { %4532 = vst.msk [vmem:[%s5950_s23 + $0x108] sm:$0xf] %vm759_vm2, %v2601_v21  ;;  %v3813_v4 = vpop.f32.mrf.mxu2  ;;  %v3891_v38 = vmax.f32 %v3875_v59, 0.0 }
 0x232   : > { %v3418_v32 = vadd.f32 %v7093_v55, %v3398_v12  ;;  %v5194_v10 = vpop.permute.xlu2 %5193  ;;  %4626 = vst.msk [vmem:[%s5950_s23 + $0x140] sm:$0xf] %vm759_vm2, %v3063_v39  ;;  %v3856_v17 = vmul.f32 %v7143_v42, %v3813_v4 }
 0x233   : > { %v5196_v8 = vunpack.i.h.bf16 %v5194_v10  ;;  %v5195_v48 = vunpack.i.l.bf16 %v5194_v10  ;;  %4627 = vst.msk [vmem:[%s5950_s23 + $0x144] sm:$0xf] %vm759_vm2, %v3064_v7  ;;  %4746 = vmatmul.msk.f32.gmra.mxu0 %vm347_vm1, %v3584_v51  ;;  %v3587_v51 = vld [vmem:[%s7549_s5 + $0x58] sm:$0xff] }
 0x234   : > { %v3434_v54 = vmax.f32 %v3418_v32, 0.0  ;;  %4652 = vmatmul.msk.f32.gmra.mxu1 %vm347_vm1, %v6708_v56  ;;  %v3876_v61 = vadd.f32 %v7161_v31, %v3856_v17 }
 0x235   : > { %v2589_v53 = vsel %vm347_vm1, %v7066_v36, %v5195_v48  ;;  %v2590_v28 = vsel %vm347_vm1, %v7095_v44, %v5196_v8 }
 0x236   : > { %v2605_v27 = vpack.c.bf16 %v2589_v53, %v2589_v53  ;;  %v2606_v60 = vpack.c.bf16 %v2590_v28, %v2590_v28  ;;  %v5252_v16 = vpack.i.bf16 %v3434_v54, %v3433_v29  ;;  %v3892_v25 = vmax.f32 %v3876_v61, 0.0  ;;  %v7202_v11 = vpop.f32.mrf.mxu0 }
 0x237   : > { %v3361_v9 = vpop.f32.mrf.mxu3 }
 0x238   : > { %4536 = vst.msk [vmem:[%s5950_s23 + $0x118] sm:$0xf] %vm759_vm2, %v2605_v27  ;;  %5253 = vrot.lane.b32.xlu1 %v5252_v16, %s5351_s7  ;;  %v3399_v36 = vmul.f32 %v7083_v49, %v3361_v9  ;;  %v5257_v44 = vpack.i.bf16 %v3892_v25, %v3891_v38  ;;  %v7200_v19 = vpop.f32.mrf.mxu1 }
 0x239   : > { %4537 = vst.msk [vmem:[%s5950_s23 + $0x11c] sm:$0xf] %vm759_vm2, %v2606_v60  ;;  %v3816_v3 = vpop.f32.mrf.mxu2 }
 0x23a   : > { %v5184_v56 = vpop.permute.xlu1 %5183  ;;  %5258 = vrot.lane.b32.xlu2 %v5257_v44, %s5351_s7  ;;  %v3419_v18 = vadd.f32 %v7093_v55, %v3399_v36  ;;  %v3857_v35 = vmul.f32 %v7143_v42, %v3816_v3 }
 0x23b   : > { %v5186_v37 = vunpack.i.h.bf16 %v5184_v56  ;;  %v5185_v24 = vunpack.i.l.bf16 %v5184_v56  ;;  %4747 = vmatmul.msk.f32.gmra.mxu0 %vm347_vm1, %v3585_v47 }
 0x23c   : > { %4653 = vmatmul.msk.f32.gmra.mxu1 %vm347_vm1, %v6737_v45  ;;  %v3877_v15 = vadd.f32 %v7161_v31, %v3857_v35 }
 0x23d   : > { %v2588_v5 = vsel %vm347_vm1, %v7045_v20, %v5186_v37  ;;  %v2587_v6 = vsel %vm347_vm1, %v7019_v62, %v5185_v24  ;;  %v3435_v20 = vmax.f32 %v3419_v18, 0.0  ;;  %v3588_v37 = vld [vmem:[%s7549_s5 + $0x60] sm:$0xff] }
 0x23e   : > { %v2604_v57 = vpack.c.bf16 %v2588_v5, %v2588_v5  ;;  %v2603_v34 = vpack.c.bf16 %v2587_v6, %v2587_v6  ;;  %v7225_v13 = vpop.f32.mrf.mxu0  ;;  %v3893_v39 = vmax.f32 %v3877_v15, 0.0 }
 0x23f   : > { %v3363_v22 = vpop.f32.mrf.mxu3 }
 0x240   : > { %4535 = vst.msk [vmem:[%s5950_s23 + $0x114] sm:$0xf] %vm759_vm2, %v2604_v57  ;;  %v3400_v21 = vmul.f32 %v7083_v49, %v3363_v22  ;;  %v7223_v2 = vpop.f32.mrf.mxu1 }
 0x241   : > { %4534 = vst.msk [vmem:[%s5950_s23 + $0x110] sm:$0xf] %vm759_vm2, %v2603_v34  ;;  %v3818_v45 = vpop.f32.mrf.mxu2 }
 0x242   : > { %v3420_v62 = vadd.f32 %v7093_v55, %v3400_v21  ;;  %v3858_v12 = vmul.f32 %v7143_v42, %v3818_v45 }
 0x243   : > { %4748 = vmatmul.msk.f32.gmra.mxu0 %vm347_vm1, %v3586_v14 }
 0x244   : > { %v3436_v30 = vmax.f32 %v3420_v62, 0.0  ;;  %v3878_v0 = vadd.f32 %v7161_v31, %v3858_v12  ;;  %4654 = vmatmul.msk.f32.gmra.mxu1 %vm347_vm1, %v3588_v37 }
 0x246   : > { %v5262_v41 = vpack.i.bf16 %v3436_v30, %v3435_v20  ;;  %v3894_v7 = vmax.f32 %v3878_v0, 0.0  ;;  %v7238_v48 = vpop.f32.mrf.mxu0 }
 0x247   : > { %v3366_v29 = vpop.f32.mrf.mxu3 }
 0x248   : > { %5263 = vrot.lane.b32.xlu2 %v5262_v41, %s5351_s7  ;;  %v3401_v32 = vmul.f32 %v7083_v49, %v3366_v29  ;;  %v5267_v10 = vpack.i.bf16 %v3894_v7, %v3893_v39  ;;  %v7236_v4 = vpop.f32.mrf.mxu1 }
 0x249   : > { %v3821_v8 = vpop.f32.mrf.mxu2 }
 0x24a   : > { %5268 = vrot.lane.b32.xlu0 %v5267_v10, %s5351_s7  ;;  %v3421_v59 = vadd.f32 %v7093_v55, %v3401_v32  ;;  %v3859_v61 = vmul.f32 %v7143_v42, %v3821_v8 }
 0x24b   : > { %4749 = vmatmul.msk.f32.gmra.mxu0 %vm347_vm1, %v3587_v51 }
 0x24c   : > { %v5199_v54 = vpop.permute.xlu0 %5198  ;;  %v3437_v9 = vmax.f32 %v3421_v59, 0.0  ;;  %v3879_v24 = vadd.f32 %v7161_v31, %v3859_v61  ;;  %4655 = vmatmul.msk.f32.gmra.mxu1 %vm347_vm1, %v6870_v33 }
 0x24d   : > { %v5201_v17 = vunpack.i.h.bf16 %v5199_v54  ;;  %v5200_v53 = vunpack.i.l.bf16 %v5199_v54 }
 0x24e   : > { %v7255_v3 = vpop.f32.mrf.mxu0  ;;  %v3895_v22 = vmax.f32 %v3879_v24, 0.0 }
 0x24f   : > { %v3368_v28 = vpop.f32.mrf.mxu3  ;;  %v3051_v60 = vsel %vm347_vm1, %v7068_v63, %v5200_v53  ;;  %v3052_v16 = vsel %vm347_vm1, %v7097_v46, %v5201_v17 }
 0x250   : > { %v3402_v27 = vmul.f32 %v7083_v49, %v3368_v28  ;;  %v3067_v38 = vpack.c.bf16 %v3051_v60, %v3051_v60  ;;  %v3068_v25 = vpack.c.bf16 %v3052_v16, %v3052_v16 }
 0x251   : > { %v7253_v44 = vpop.f32.mrf.mxu1  ;;  %v3823_v56 = vpop.f32.mrf.mxu2 }
 0x252   : > { %v3422_v36 = vadd.f32 %v7093_v55, %v3402_v27  ;;  %4630 = vst.msk [vmem:[%s5950_s23 + $0x150] sm:$0xf] %vm759_vm2, %v3067_v38  ;;  %v3860_v46 = vmul.f32 %v7143_v42, %v3823_v56 }
 0x253   : > { %4631 = vst.msk [vmem:[%s5950_s23 + $0x154] sm:$0xf] %vm759_vm2, %v3068_v25  ;;  %4750 = vmatmul.msk.f32.gmra.mxu0 %vm347_vm1, %v3588_v37 }
 0x254   : > { %v3438_v63 = vmax.f32 %v3422_v36, 0.0  ;;  %v3880_v47 = vadd.f32 %v7161_v31, %v3860_v46  ;;  %v5219_v5 = vpop.permute.xlu2 %5218  ;;  %4656 = vmatmul.msk.f32.gmra.mxu1 %vm347_vm1, %v6844_v40 }
 0x255   : > { %v5221_v18 = vunpack.i.h.bf16 %v5219_v5  ;;  %v5220_v57 = vunpack.i.l.bf16 %v5219_v5 }
 0x256   : > { %v5272_v6 = vpack.i.bf16 %v3438_v63, %v3437_v9  ;;  %v3896_v35 = vmax.f32 %v3880_v47, 0.0  ;;  %v7277_v39 = vpop.f32.mrf.mxu0 }
 0x257   : > { %v3371_v34 = vpop.f32.mrf.mxu3  ;;  %v3055_v21 = vsel %vm347_vm1, %v7175_v52, %v5220_v57  ;;  %v3056_v20 = vsel %vm347_vm1, %v7202_v11, %v5221_v18 }
 0x258   : > { %5273 = vrot.lane.b32.xlu0 %v5272_v6, %s5351_s7  ;;  %v3071_v62 = vpack.c.bf16 %v3055_v21, %v3055_v21  ;;  %v3072_v45 = vpack.c.bf16 %v3056_v20, %v3056_v20  ;;  %v3403_v14 = vmul.f32 %v7083_v49, %v3371_v34  ;;  %v5277_v15 = vpack.i.bf16 %v3896_v35, %v3895_v22 }
 0x259   : > { %v7275_v12 = vpop.f32.mrf.mxu1  ;;  %v3826_v0 = vpop.f32.mrf.mxu2 }
 0x25a   : > { %v5204_v30 = vpop.permute.xlu0 %5203  ;;  %4634 = vst.msk [vmem:[%s5950_s23 + $0x160] sm:$0xf] %vm759_vm2, %v3071_v62  ;;  %5278 = vrot.lane.b32.xlu1 %v5277_v15, %s5351_s7  ;;  %v3423_v7 = vadd.f32 %v7093_v55, %v3403_v14  ;;  %v3861_v17 = vmul.f32 %v7143_v42, %v3826_v0 }
 0x25b   : > { %v5206_v41 = vunpack.i.h.bf16 %v5204_v30  ;;  %v5205_v29 = vunpack.i.l.bf16 %v5204_v30  ;;  %4635 = vst.msk [vmem:[%s5950_s23 + $0x164] sm:$0xf] %vm759_vm2, %v3072_v45  ;;  %4751 = vmatmul.msk.f32.gmra.mxu0 %vm347_vm1, %v6870_v33 }
 0x25c   : > { %v5209_v8 = vpop.permute.xlu1 %5208  ;;  %v3439_v33 = vmax.f32 %v3423_v7, 0.0  ;;  %v3881_v36 = vadd.f32 %v7161_v31, %v3861_v17  ;;  %4657 = vmatmul.msk.f32.gmra.mxu1 %vm347_vm1, %v6865_v58 }
 0x25d   : > { %v2592_v52 = vsel %vm347_vm1, %v7134_v43, %v5206_v41  ;;  %v2591_v11 = vsel %vm347_vm1, %v7111_v23, %v5205_v29  ;;  %v5211_v51 = vunpack.i.h.bf16 %v5209_v8  ;;  %v5210_v59 = vunpack.i.l.bf16 %v5209_v8 }
 0x25e   : > { %v2608_v32 = vpack.c.bf16 %v2592_v52, %v2592_v52  ;;  %v2607_v10 = vpack.c.bf16 %v2591_v11, %v2591_v11  ;;  %v7304_v25 = vpop.f32.mrf.mxu0  ;;  %v3897_v18 = vmax.f32 %v3881_v36, 0.0 }
 0x25f   : > { %v3373_v54 = vpop.f32.mrf.mxu3  ;;  %v3053_v23 = vsel %vm347_vm1, %v7113_v50, %v5210_v59  ;;  %v3054_v53 = vsel %vm347_vm1, %v7136_v1, %v5211_v51 }
 0x260   : > { %4539 = vst.msk [vmem:[%s5950_s23 + $0x124] sm:$0xf] %vm759_vm2, %v2608_v32  ;;  %v3404_v43 = vmul.f32 %v7083_v49, %v3373_v54  ;;  %v3069_v28 = vpack.c.bf16 %v3053_v23, %v3053_v23  ;;  %v3070_v61 = vpack.c.bf16 %v3054_v53, %v3054_v53 }
 0x261   : > { %4538 = vst.msk [vmem:[%s5950_s23 + $0x120] sm:$0xf] %vm759_vm2, %v2607_v10  ;;  %v3828_v16 = vpop.f32.mrf.mxu2  ;;  %v7310_v56 = vpop.f32.mrf.mxu1 }
 0x262   : > { %v3424_v27 = vadd.f32 %v7093_v55, %v3404_v43  ;;  %v5224_v60 = vpop.permute.xlu2 %5223  ;;  %4632 = vst.msk [vmem:[%s5950_s23 + $0x158] sm:$0xf] %vm759_vm2, %v3069_v28  ;;  %v3862_v1 = vmul.f32 %v7143_v42, %v3828_v16 }
 0x263   : > { %v5226_v9 = vunpack.i.h.bf16 %v5224_v60  ;;  %v5225_v38 = vunpack.i.l.bf16 %v5224_v60  ;;  %4633 = vst.msk [vmem:[%s5950_s23 + $0x15c] sm:$0xf] %vm759_vm2, %v3070_v61 }
 0x264   : > { %v3440_v50 = vmax.f32 %v3424_v27, 0.0  ;;  %v3882_v63 = vadd.f32 %v7161_v31, %v3862_v1  ;;  %v3591_v1 = vld [vmem:[%s7549_s5 + $0x78] sm:$0xff] }
 0x265   : > { %v2595_v37 = vsel %vm347_vm1, %v7223_v2, %v5225_v38  ;;  %v2596_v24 = vsel %vm347_vm1, %v7236_v4, %v5226_v9 }
 0x266   : > { %v2611_v46 = vpack.c.bf16 %v2595_v37, %v2595_v37  ;;  %v2612_v47 = vpack.c.bf16 %v2596_v24, %v2596_v24  ;;  %v5282_v5 = vpack.i.bf16 %v3440_v50, %v3439_v33  ;;  %v3898_v57 = vmax.f32 %v3882_v63, 0.0  ;;  %v7327_v21 = vpop.f32.mrf.mxu0  ;;  %v3590_v33 = vld [vmem:[%s7549_s5 + $0x70] sm:$0xff] }
 0x267   : > { %v3376_v6 = vpop.f32.mrf.mxu3  ;;  %4752 = vmatmul.msk.f32.gmra.mxu0 %vm347_vm1, %v3590_v33 }
 0x268   : > { %4542 = vst.msk [vmem:[%s5950_s23 + $0x130] sm:$0xf] %vm759_vm2, %v2611_v46  ;;  %5283 = vrot.lane.b32.xlu1 %v5282_v5, %s5351_s7  ;;  %v3405_v40 = vmul.f32 %v7083_v49, %v3376_v6  ;;  %v5287_v2 = vpack.i.bf16 %v3898_v57, %v3897_v18 }
 0x269   : > { %4543 = vst.msk [vmem:[%s5950_s23 + $0x134] sm:$0xf] %vm759_vm2, %v2612_v47  ;;  %v3831_v4 = vpop.f32.mrf.mxu2  ;;  %v7337_v30 = vpop.f32.mrf.mxu1 }
 0x26a   : > { %v5214_v34 = vpop.permute.xlu1 %5213  ;;  %5288 = vrot.lane.b32.xlu2 %v5287_v2, %s5351_s7  ;;  %v3425_v45 = vadd.f32 %v7093_v55, %v3405_v40  ;;  %v3863_v41 = vmul.f32 %v7143_v42, %v3831_v4 }
 0x26b   : > { %v5216_v22 = vunpack.i.h.bf16 %v5214_v34  ;;  %v5215_v35 = vunpack.i.l.bf16 %v5214_v34 }
 0x26c   : > { %v3441_v58 = vmax.f32 %v3425_v45, 0.0  ;;  %v3883_v11 = vadd.f32 %v7161_v31, %v3863_v41 }
 0x26d   : > { %v2594_v20 = vsel %vm347_vm1, %v7200_v19, %v5216_v22  ;;  %v2593_v62 = vsel %vm347_vm1, %v7173_v26, %v5215_v35 }
 0x26e   : > { %v2610_v14 = vpack.c.bf16 %v2594_v20, %v2594_v20  ;;  %v2609_v15 = vpack.c.bf16 %v2593_v62, %v2593_v62  ;;  %v3899_v59 = vmax.f32 %v3883_v11, 0.0 }
 0x26f   : > { %v3378_v0 = vpop.f32.mrf.mxu3  ;;  %4753 = vmatmul.msk.f32.gmra.mxu0 %vm347_vm1, %v3591_v1 }
 0x270   : > { %4541 = vst.msk [vmem:[%s5950_s23 + $0x12c] sm:$0xf] %vm759_vm2, %v2610_v14  ;;  %v3406_v29 = vmul.f32 %v7083_v49, %v3378_v0  ;;  %v7346_v26 = vpop.f32.mrf.mxu0 }
 0x271   : > { %4540 = vst.msk [vmem:[%s5950_s23 + $0x128] sm:$0xf] %vm759_vm2, %v2609_v15  ;;  %v3833_v52 = vpop.f32.mrf.mxu2  ;;  %v7352_v17 = vpop.f32.mrf.mxu1 }
 0x272   : > { %v3426_v19 = vadd.f32 %v7093_v55, %v3406_v29  ;;  %v3864_v32 = vmul.f32 %v7143_v42, %v3833_v52 }
 0x274   : > { %v3442_v7 = vmax.f32 %v3426_v19, 0.0  ;;  %v3884_v10 = vadd.f32 %v7161_v31, %v3864_v32 }
 0x276   : > { %v5292_v8 = vpack.i.bf16 %v3442_v7, %v3441_v58  ;;  %v3900_v54 = vmax.f32 %v3884_v10, 0.0 }
 0x277   : > { %v3381_v51 = vpop.f32.mrf.mxu3 }
 0x278   : > { %5293 = vrot.lane.b32.xlu2 %v5292_v8, %s5351_s7  ;;  %v3407_v43 = vmul.f32 %v7083_v49, %v3381_v51  ;;  %v5297_v23 = vpack.i.bf16 %v3900_v54, %v3899_v59  ;;  %v7362_v28 = vpop.f32.mrf.mxu0 }
 0x279   : > { %v7355_v53 = vpop.f32.mrf.mxu2  ;;  %v7374_v47 = vpop.f32.mrf.mxu1 }
 0x27a   : > { %5298 = vrot.lane.b32.xlu0 %v5297_v23, %s5351_s7  ;;  %v3427_v61 = vadd.f32 %v7093_v55, %v3407_v43 }
 0x27c   : > { %v5229_v27 = vpop.permute.xlu0 %5228  ;;  %v3443_v37 = vmax.f32 %v3427_v61, 0.0 }
 0x27d   : > { %v5231_v60 = vunpack.i.h.bf16 %v5229_v27  ;;  %v5230_v16 = vunpack.i.l.bf16 %v5229_v27 }
 0x27f   : > { %v3383_v9 = vpop.f32.mrf.mxu3  ;;  %v3057_v36 = vsel %vm347_vm1, %v7225_v13, %v5230_v16  ;;  %v3058_v50 = vsel %vm347_vm1, %v7238_v48, %v5231_v60 }
 0x280   : > { %v3408_v38 = vmul.f32 %v7083_v49, %v3383_v9  ;;  %v3073_v24 = vpack.c.bf16 %v3057_v36, %v3057_v36  ;;  %v3074_v63 = vpack.c.bf16 %v3058_v50, %v3058_v50  ;;  %v7381_v2 = vpop.f32.mrf.mxu0 }
 0x281   : > { %v3838_v5 = vpop.f32.mrf.mxu2  ;;  %v7391_v0 = vpop.f32.mrf.mxu1 }
 0x282   : > { %v3428_v46 = vadd.f32 %v7093_v55, %v3408_v38  ;;  %4636 = vst.msk [vmem:[%s5950_s23 + $0x168] sm:$0xf] %vm759_vm2, %v3073_v24 }
 0x283   : > { %4637 = vst.msk [vmem:[%s5950_s23 + $0x16c] sm:$0xf] %vm759_vm2, %v3074_v63 }
 0x284   : > { %v3444_v6 = vmax.f32 %v3428_v46, 0.0  ;;  %v5249_v13 = vpop.permute.xlu2 %5248 }
 0x285   : > { %v5251_v18 = vunpack.i.h.bf16 %v5249_v13  ;;  %v5250_v57 = vunpack.i.l.bf16 %v5249_v13 }
 0x286   : > { %v5302_v48 = vpack.i.bf16 %v3444_v6, %v3443_v37 }
 0x287   : > { %v3386_v40 = vpop.f32.mrf.mxu3  ;;  %v3061_v34 = vsel %vm347_vm1, %v7304_v25, %v5250_v57  ;;  %v3062_v4 = vsel %vm347_vm1, %v7327_v21, %v5251_v18 }
 0x288   : > { %5303 = vrot.lane.b32.xlu0 %v5302_v48, %s5351_s7  ;;  %v3077_v22 = vpack.c.bf16 %v3061_v34, %v3061_v34  ;;  %v3078_v35 = vpack.c.bf16 %v3062_v4, %v3062_v4  ;;  %v3409_v20 = vmul.f32 %v7083_v49, %v3386_v40  ;;  %v7411_v51 = vpop.f32.mrf.mxu0 }
 0x289   : > { %v3841_v45 = vpop.f32.mrf.mxu2 }
 0x28a   : > { %v5234_v62 = vpop.permute.xlu0 %5233  ;;  %4640 = vst.msk [vmem:[%s5950_s23 + $0x178] sm:$0xf] %vm759_vm2, %v3077_v22  ;;  %v3429_v41 = vadd.f32 %v7093_v55, %v3409_v20  ;;  %v3867_v32 = vmul.f32 %v7143_v42, %v3841_v45 }
 0x28b   : > { %v5236_v14 = vunpack.i.h.bf16 %v5234_v62  ;;  %v5235_v15 = vunpack.i.l.bf16 %v5234_v62  ;;  %4641 = vst.msk [vmem:[%s5950_s23 + $0x17c] sm:$0xf] %vm759_vm2, %v3078_v35 }
 0x28c   : > { %v5239_v19 = vpop.permute.xlu1 %5238  ;;  %v3445_v59 = vmax.f32 %v3429_v41, 0.0  ;;  %v3887_v61 = vadd.f32 %v7161_v31, %v3867_v32 }
 0x28d   : > { %v2598_v25 = vsel %vm347_vm1, %v7275_v12, %v5236_v14  ;;  %v2597_v21 = vsel %vm347_vm1, %v7253_v44, %v5235_v15  ;;  %v5241_v52 = vunpack.i.h.bf16 %v5239_v19  ;;  %v5240_v11 = vunpack.i.l.bf16 %v5239_v19 }
 0x28e   : > { %v2614_v29 = vpack.c.bf16 %v2598_v25, %v2598_v25  ;;  %v2613_v58 = vpack.c.bf16 %v2597_v21, %v2597_v21  ;;  %v3866_v12 = vmul.f32 %v7143_v42, %v3838_v5  ;;  %v3903_v50 = vmax.f32 %v3887_v61, 0.0 }
 0x28f   : > { %v3388_v7 = vpop.f32.mrf.mxu3  ;;  %v3059_v44 = vsel %vm347_vm1, %v7255_v3, %v5240_v11  ;;  %v3060_v8 = vsel %vm347_vm1, %v7277_v39, %v5241_v52 }
 0x290   : > { %4545 = vst.msk [vmem:[%s5950_s23 + $0x13c] sm:$0xf] %vm759_vm2, %v2614_v29  ;;  %v3410_v10 = vmul.f32 %v7083_v49, %v3388_v7  ;;  %v3075_v54 = vpack.c.bf16 %v3059_v44, %v3059_v44  ;;  %v3076_v43 = vpack.c.bf16 %v3060_v8, %v3060_v8  ;;  %v3865_v49 = vmul.f32 %v7143_v42, %v7355_v53  ;;  %v7430_v40 = vpop.f32.mrf.mxu0 }
 0x291   : > { %4544 = vst.msk [vmem:[%s5950_s23 + $0x138] sm:$0xf] %vm759_vm2, %v2613_v58  ;;  %v3843_v33 = vpop.f32.mrf.mxu2  ;;  %v3886_v39 = vadd.f32 %v7161_v31, %v3866_v12 }
 0x292   : > { %v3430_v23 = vadd.f32 %v7093_v55, %v3410_v10  ;;  %4638 = vst.msk [vmem:[%s5950_s23 + $0x170] sm:$0xf] %vm759_vm2, %v3075_v54  ;;  %v3868_v3 = vmul.f32 %v7143_v42, %v3843_v33  ;;  %v3212_v55 = vpop.f32.mrf.mxu1  ;;  %v3885_v53 = vadd.f32 %v7161_v31, %v3865_v49 }
 0x293   : > { %4639 = vst.msk [vmem:[%s5950_s23 + $0x174] sm:$0xf] %vm759_vm2, %v3076_v43  ;;  %v3902_v63 = vmax.f32 %v3886_v39, 0.0 }
 0x294   : > { %v3446_v27 = vmax.f32 %v3430_v23, 0.0  ;;  %v3888_v60 = vadd.f32 %v7161_v31, %v3868_v3  ;;  %v5259_v16 = vpop.permute.xlu2 %5258  ;;  %v3901_v34 = vmax.f32 %v3885_v53, 0.0 }
 0x295   : > { %v5261_v38 = vunpack.i.h.bf16 %v5259_v16  ;;  %v5260_v36 = vunpack.i.l.bf16 %v5259_v16 }
 0x296   : > { %v5307_v9 = vpack.i.bf16 %v3446_v27, %v3445_v59  ;;  %v3904_v1 = vmax.f32 %v3888_v60, 0.0  ;;  %v5312_v35 = vpack.i.bf16 %v3902_v63, %v3901_v34 }
 0x297   : > { %v3971_v37 = vsel %vm347_vm1, %v7346_v26, %v5260_v36  ;;  %v3972_v24 = vsel %vm347_vm1, %v7362_v28, %v5261_v38 }
 0x298   : > { %5308 = vrot.lane.b32.xlu1 %v5307_v9, %s5351_s7  ;;  %v3987_v46 = vpack.c.bf16 %v3971_v37, %v3971_v37  ;;  %v3988_v5 = vpack.c.bf16 %v3972_v24, %v3972_v24  ;;  %v5317_v6 = vpack.i.bf16 %v3904_v1, %v3903_v50  ;;  %v3672_v29 = vpop.f32.mrf.mxu0 }
 0x299   : > { %v3846_v48 = vpop.f32.mrf.mxu2 }
 0x29a   : > { %v5244_v13 = vpop.permute.xlu0 %5243  ;;  %4818 = vst.msk [vmem:[%s5950_s23 + $0x1c0] sm:$0xf] %vm759_vm2, %v3987_v46  ;;  %5318 = vrot.lane.b32.xlu2 %v5317_v6, %s5351_s7  ;;  %v3869_v20 = vmul.f32 %v7143_v42, %v3846_v48  ;;  %v3215_v62 = vpop.f32.mrf.mxu1 }
 0x29b   : > { %v5246_v18 = vunpack.i.h.bf16 %v5244_v13  ;;  %v5245_v57 = vunpack.i.l.bf16 %v5244_v13  ;;  %4819 = vst.msk [vmem:[%s5950_s23 + $0x1c4] sm:$0xf] %vm759_vm2, %v3988_v5 }
 0x29d   : > { %v3512_v26 = vsel %vm347_vm1, %v7337_v30, %v5246_v18  ;;  %v3511_v28 = vsel %vm347_vm1, %v7310_v56, %v5245_v57  ;;  %v3889_v56 = vadd.f32 %v7161_v31, %v3869_v20 }
 0x29e   : > { %v3528_v4 = vpack.c.bf16 %v3512_v26, %v3512_v26  ;;  %v3527_v22 = vpack.c.bf16 %v3511_v28, %v3511_v28 }
 0x29f   : > { %v3905_v11 = vmax.f32 %v3889_v56, 0.0 }
 0x2a0   : > { %4723 = vst.msk [vmem:[%s5950_s23 + $0x184] sm:$0xf] %vm759_vm2, %v3528_v4  ;;  %5313 = vrot.lane.b32.xlu1 %v5312_v35, %s5351_s7  ;;  %v3675_v54 = vpop.f32.mrf.mxu0 }
 0x2a1   : > { %4722 = vst.msk [vmem:[%s5950_s23 + $0x180] sm:$0xf] %vm759_vm2, %v3527_v22  ;;  %v3848_v14 = vpop.f32.mrf.mxu2 }
 0x2a2   : > { %v5264_v45 = vpop.permute.xlu2 %5263  ;;  %v3870_v25 = vmul.f32 %v7143_v42, %v3848_v14  ;;  %v3218_v10 = vpop.f32.mrf.mxu1 }
 0x2a3   : > { %v5266_v30 = vunpack.i.h.bf16 %v5264_v45  ;;  %v5265_v15 = vunpack.i.l.bf16 %v5264_v45 }
 0x2a4   : > { %v3890_v58 = vadd.f32 %v7161_v31, %v3870_v25 }
 0x2a5   : > { %v3515_v21 = vsel %vm347_vm1, %v7391_v0, %v5265_v15  ;;  %v3516_v41 = vsel %vm347_vm1, %v3212_v55, %v5266_v30 }
 0x2a6   : > { %v3531_v19 = vpack.c.bf16 %v3515_v21, %v3515_v21  ;;  %v3532_v52 = vpack.c.bf16 %v3516_v41, %v3516_v41  ;;  %v3906_v7 = vmax.f32 %v3890_v58, 0.0 }
 0x2a8   : > { %4726 = vst.msk [vmem:[%s5950_s23 + $0x190] sm:$0xf] %vm759_vm2, %v3531_v19  ;;  %v5322_v32 = vpack.i.bf16 %v3906_v7, %v3905_v11  ;;  %v3678_v23 = vpop.f32.mrf.mxu0 }
 0x2a9   : > { %4727 = vst.msk [vmem:[%s5950_s23 + $0x194] sm:$0xf] %vm759_vm2, %v3532_v52 }
 0x2aa   : > { %v5254_v42 = vpop.permute.xlu1 %5253  ;;  %5323 = vrot.lane.b32.xlu0 %v5322_v32, %s5351_s7  ;;  %v3221_v43 = vpop.f32.mrf.mxu1 }
 0x2ab   : > { %v5256_v12 = vunpack.i.h.bf16 %v5254_v42  ;;  %v5255_v0 = vunpack.i.l.bf16 %v5254_v42 }
 0x2ad   : > { %v3514_v31 = vsel %vm347_vm1, %v7374_v47, %v5256_v12  ;;  %v3513_v44 = vsel %vm347_vm1, %v7352_v17, %v5255_v0 }
 0x2ae   : > { %v3530_v8 = vpack.c.bf16 %v3514_v31, %v3514_v31  ;;  %v3529_v59 = vpack.c.bf16 %v3513_v44, %v3513_v44 }
 0x2b0   : > { %4725 = vst.msk [vmem:[%s5950_s23 + $0x18c] sm:$0xf] %vm759_vm2, %v3530_v8  ;;  %v3681_v60 = vpop.f32.mrf.mxu0 }
 0x2b1   : > { %4724 = vst.msk [vmem:[%s5950_s23 + $0x188] sm:$0xf] %vm759_vm2, %v3529_v59 }
 0x2b2   : > { %v3224_v49 = vpop.f32.mrf.mxu1 }
 0x2b8   : > { %v3684_v46 = vpop.f32.mrf.mxu0 }
 0x2ba   : > { %v3227_v38 = vpop.f32.mrf.mxu1 }
 0x2bc   : > { %v5269_v33 = vpop.permute.xlu0 %5268 }
 0x2bd   : > { %v5271_v61 = vunpack.i.h.bf16 %v5269_v33  ;;  %v5270_v27 = vunpack.i.l.bf16 %v5269_v33 }
 0x2bf   : > { %v3973_v47 = vsel %vm347_vm1, %v7381_v2, %v5270_v27  ;;  %v3974_v17 = vsel %vm347_vm1, %v7411_v51, %v5271_v61 }
 0x2c0   : > { %v3989_v3 = vpack.c.bf16 %v3973_v47, %v3973_v47  ;;  %v3990_v39 = vpack.c.bf16 %v3974_v17, %v3974_v17  ;;  %v3687_v30 = vpop.f32.mrf.mxu0 }
 0x2c2   : > { %4820 = vst.msk [vmem:[%s5950_s23 + $0x1c8] sm:$0xf] %vm759_vm2, %v3989_v3  ;;  %v3230_v22 = vpop.f32.mrf.mxu1 }
 0x2c3   : > { %4821 = vst.msk [vmem:[%s5950_s23 + $0x1cc] sm:$0xf] %vm759_vm2, %v3990_v39 }
 0x2c4   : > { %v5289_v16 = vpop.permute.xlu2 %5288 }
 0x2c5   : > { %v5291_v9 = vunpack.i.h.bf16 %v5289_v16  ;;  %v5290_v55 = vunpack.i.l.bf16 %v5289_v16 }
 0x2c7   : > { %v3977_v36 = vsel %vm347_vm1, %v3675_v54, %v5290_v55  ;;  %v3978_v2 = vsel %vm347_vm1, %v3678_v23, %v5291_v9 }
 0x2c8   : > { %v3993_v53 = vpack.c.bf16 %v3977_v36, %v3977_v36  ;;  %v3994_v51 = vpack.c.bf16 %v3978_v2, %v3978_v2  ;;  %v3690_v19 = vpop.f32.mrf.mxu0 }
 0x2ca   : > { %v5274_v50 = vpop.permute.xlu0 %5273  ;;  %4824 = vst.msk [vmem:[%s5950_s23 + $0x1d8] sm:$0xf] %vm759_vm2, %v3993_v53  ;;  %v3233_v11 = vpop.f32.mrf.mxu1 }
 0x2cb   : > { %v5276_v1 = vunpack.i.h.bf16 %v5274_v50  ;;  %v5275_v37 = vunpack.i.l.bf16 %v5274_v50  ;;  %4825 = vst.msk [vmem:[%s5950_s23 + $0x1dc] sm:$0xf] %vm759_vm2, %v3994_v51 }
 0x2cc   : > { %v5279_v13 = vpop.permute.xlu1 %5278 }
 0x2cd   : > { %v3518_v24 = vsel %vm347_vm1, %v3218_v10, %v5276_v1  ;;  %v3517_v63 = vsel %vm347_vm1, %v3215_v62, %v5275_v37  ;;  %v5281_v48 = vunpack.i.h.bf16 %v5279_v13  ;;  %v5280_v18 = vunpack.i.l.bf16 %v5279_v13 }
 0x2ce   : > { %v3534_v5 = vpack.c.bf16 %v3518_v24, %v3518_v24  ;;  %v3533_v6 = vpack.c.bf16 %v3517_v63, %v3517_v63 }
 0x2cf   : > { %v3975_v57 = vsel %vm347_vm1, %v7430_v40, %v5280_v18  ;;  %v3976_v34 = vsel %vm347_vm1, %v3672_v29, %v5281_v48 }
 0x2d0   : > { %4729 = vst.msk [vmem:[%s5950_s23 + $0x19c] sm:$0xf] %vm759_vm2, %v3534_v5  ;;  %v3991_v26 = vpack.c.bf16 %v3975_v57, %v3975_v57  ;;  %v3992_v28 = vpack.c.bf16 %v3976_v34, %v3976_v34  ;;  %v3693_v52 = vpop.f32.mrf.mxu0 }
 0x2d1   : > { %4728 = vst.msk [vmem:[%s5950_s23 + $0x198] sm:$0xf] %vm759_vm2, %v3533_v6 }
 0x2d2   : > { %v5294_v4 = vpop.permute.xlu2 %5293  ;;  %4822 = vst.msk [vmem:[%s5950_s23 + $0x1d0] sm:$0xf] %vm759_vm2, %v3991_v26  ;;  %v3236_v59 = vpop.f32.mrf.mxu1 }
 0x2d3   : > { %v5296_v35 = vunpack.i.h.bf16 %v5294_v4  ;;  %v5295_v20 = vunpack.i.l.bf16 %v5294_v4  ;;  %4823 = vst.msk [vmem:[%s5950_s23 + $0x1d4] sm:$0xf] %vm759_vm2, %v3992_v28 }
 0x2d5   : > { %v3521_v62 = vsel %vm347_vm1, %v3227_v38, %v5295_v20  ;;  %v3522_v45 = vsel %vm347_vm1, %v3230_v22, %v5296_v35 }
 0x2d6   : > { %v3537_v40 = vpack.c.bf16 %v3521_v62, %v3521_v62  ;;  %v3538_v14 = vpack.c.bf16 %v3522_v45, %v3522_v45 }
 0x2d8   : > { %4732 = vst.msk [vmem:[%s5950_s23 + $0x1a8] sm:$0xf] %vm759_vm2, %v3537_v40  ;;  %v3696_v44 = vpop.f32.mrf.mxu0 }
 0x2d9   : > { %4733 = vst.msk [vmem:[%s5950_s23 + $0x1ac] sm:$0xf] %vm759_vm2, %v3538_v14 }
 0x2da   : > { %v5284_v15 = vpop.permute.xlu1 %5283  ;;  %v3239_v9 = vpop.f32.mrf.mxu1 }
 0x2db   : > { %v5286_v56 = vunpack.i.h.bf16 %v5284_v15  ;;  %v5285_v25 = vunpack.i.l.bf16 %v5284_v15 }
 0x2dd   : > { %v3520_v21 = vsel %vm347_vm1, %v3224_v49, %v5286_v56  ;;  %v3519_v41 = vsel %vm347_vm1, %v3221_v43, %v5285_v25 }
 0x2de   : > { %v3536_v29 = vpack.c.bf16 %v3520_v21, %v3520_v21  ;;  %v3535_v58 = vpack.c.bf16 %v3519_v41, %v3519_v41 }
 0x2e0   : > { %4731 = vst.msk [vmem:[%s5950_s23 + $0x1a4] sm:$0xf] %vm759_vm2, %v3536_v29 }
 0x2e1   : > { %4730 = vst.msk [vmem:[%s5950_s23 + $0x1a0] sm:$0xf] %vm759_vm2, %v3535_v58 }
 0x2e2   : > { %v3242_v38 = vpop.f32.mrf.mxu1 }
 0x2ec   : > { %v5299_v7 = vpop.permute.xlu0 %5298 }
 0x2ed   : > { %v5301_v32 = vunpack.i.h.bf16 %v5299_v7  ;;  %v5300_v42 = vunpack.i.l.bf16 %v5299_v7 }
 0x2ef   : > { %v3979_v10 = vsel %vm347_vm1, %v3681_v60, %v5300_v42  ;;  %v3980_v12 = vsel %vm347_vm1, %v3684_v46, %v5301_v32  ;;  %v3699_v46 = vpop.f32.mrf.mxu0 }
 0x2f0   : > { %v3995_v0 = vpack.c.bf16 %v3979_v10, %v3979_v10  ;;  %v3996_v31 = vpack.c.bf16 %v3980_v12, %v3980_v12 }
 0x2f2   : > { %4826 = vst.msk [vmem:[%s5950_s23 + $0x1e0] sm:$0xf] %vm759_vm2, %v3995_v0 }
 0x2f3   : > { %4827 = vst.msk [vmem:[%s5950_s23 + $0x1e4] sm:$0xf] %vm759_vm2, %v3996_v31 }
 0x2f4   : > { %v5319_v8 = vpop.permute.xlu2 %5318 }
 0x2f5   : > { %v5321_v54 = vunpack.i.h.bf16 %v5319_v8  ;;  %v5320_v43 = vunpack.i.l.bf16 %v5319_v8 }
 0x2f7   : > { %v3983_v23 = vsel %vm347_vm1, %v3693_v52, %v5320_v43  ;;  %v3984_v33 = vsel %vm347_vm1, %v3696_v44, %v5321_v54  ;;  %v3702_v57 = vpop.f32.mrf.mxu0 }
 0x2f8   : > { %v3999_v49 = vpack.c.bf16 %v3983_v23, %v3983_v23  ;;  %v4000_v61 = vpack.c.bf16 %v3984_v33, %v3984_v33 }
 0x2fa   : > { %v5304_v27 = vpop.permute.xlu0 %5303  ;;  %4830 = vst.msk [vmem:[%s5950_s23 + $0x1f0] sm:$0xf] %vm759_vm2, %v3999_v49 }
 0x2fb   : > { %v5306_v47 = vunpack.i.h.bf16 %v5304_v27  ;;  %v5305_v17 = vunpack.i.l.bf16 %v5304_v27  ;;  %4831 = vst.msk [vmem:[%s5950_s23 + $0x1f4] sm:$0xf] %vm759_vm2, %v4000_v61 }
 0x2fd   : > { %v3523_v3 = vsel %vm347_vm1, %v3233_v11, %v5305_v17  ;;  %v3524_v39 = vsel %vm347_vm1, %v3236_v59, %v5306_v47 }
 0x2fe   : > { %v3539_v60 = vpack.c.bf16 %v3523_v3, %v3523_v3  ;;  %v3540_v16 = vpack.c.bf16 %v3524_v39, %v3524_v39 }
 0x300   : > { %4734 = vst.msk [vmem:[%s5950_s23 + $0x1b0] sm:$0xf] %vm759_vm2, %v3539_v60 }
 0x301   : > { %4735 = vst.msk [vmem:[%s5950_s23 + $0x1b4] sm:$0xf] %vm759_vm2, %v3540_v16 }
 0x30a   : > { %v5309_v55 = vpop.permute.xlu1 %5308 }
 0x30b   : > { %v5311_v36 = vunpack.i.h.bf16 %v5309_v55  ;;  %v5310_v2 = vunpack.i.l.bf16 %v5309_v55 }
 0x30d   : > { %v3525_v53 = vsel %vm347_vm1, %v3239_v9, %v5310_v2  ;;  %v3526_v51 = vsel %vm347_vm1, %v3242_v38, %v5311_v36 }
 0x30e   : > { %v3541_v50 = vpack.c.bf16 %v3525_v53, %v3525_v53  ;;  %v3542_v1 = vpack.c.bf16 %v3526_v51, %v3526_v51 }
 0x310   : > { %4736 = vst.msk [vmem:[%s5950_s23 + $0x1b8] sm:$0xf] %vm759_vm2, %v3541_v50 }
 0x311   : > { %4737 = vst.msk [vmem:[%s5950_s23 + $0x1bc] sm:$0xf] %vm759_vm2, %v3542_v1 }
 0x312   : > { %v5314_v37 = vpop.permute.xlu1 %5313 }
 0x313   : > { %v5316_v24 = vunpack.i.h.bf16 %v5314_v37  ;;  %v5315_v63 = vunpack.i.l.bf16 %v5314_v37 }
 0x315   : > { %v3981_v5 = vsel %vm347_vm1, %v3687_v30, %v5315_v63  ;;  %v3982_v6 = vsel %vm347_vm1, %v3690_v19, %v5316_v24 }
 0x316   : > { %v3997_v13 = vpack.c.bf16 %v3981_v5, %v3981_v5  ;;  %v3998_v48 = vpack.c.bf16 %v3982_v6, %v3982_v6 }
 0x318   : > { %4828 = vst.msk [vmem:[%s5950_s23 + $0x1e8] sm:$0xf] %vm759_vm2, %v3997_v13 }
 0x319   : > { %4829 = vst.msk [vmem:[%s5950_s23 + $0x1ec] sm:$0xf] %vm759_vm2, %v3998_v48 }
 0x31c   : > { %v5324_v18 = vpop.permute.xlu0 %5323 }
 0x31d   : > { %v5326_v34 = vunpack.i.h.bf16 %v5324_v18  ;;  %v5325_v26 = vunpack.i.l.bf16 %v5324_v18 }
 0x31f   : > { %v3985_v28 = vsel %vm347_vm1, %v3699_v46, %v5325_v26  ;;  %v3986_v4 = vsel %vm347_vm1, %v3702_v57, %v5326_v34 }
 0x320   : > { %v4001_v22 = vpack.c.bf16 %v3985_v28, %v3985_v28  ;;  %v4002_v35 = vpack.c.bf16 %v3986_v4, %v3986_v4 }
 0x322   : > { %4832 = vst.msk [vmem:[%s5950_s23 + $0x1f8] sm:$0xf] %vm759_vm2, %v4001_v22 }
 0x323   : > { %4833 = vst.msk [vmem:[%s5950_s23 + $0x1fc] sm:$0xf] %vm759_vm2, %v4002_v35 }
 0x324 PF: > { %s16_s21 = sadd.s32 1, %s5349_s21  }
 0x325   : > { %p13_p4 = scmp.ge.s32.totalorder %s16_s21, 4  }
 0x327   :  { %15 = sbr.rel (!%p13_p4) target bundleno = 1 (0x1), region = 91 }

// kernel: exp2_decoder26_forward.7
= control target key start
LH: loop header
LB: loop body
LE: loop exit
PB: predicated region body
PF: predicated region fallthrough
CT: control target
= control target key end

     0   :  { %s4067_s27 = smov 0   ;;  %s4069_s28 = smov 0   ;;  %s5503_s0 = inlined_call_operand.vmem [shape: bf16[2,40,34,72], index: 0, kind: input, shape index: {}, may-alias: {0,1,2}]   ;;  %s5504_s1 = inlined_call_operand.vmem [shape: bf16[2,40,34,72], index: 1, kind: input, shape index: {}, may-alias: {0,1,2}]   ;;  %s5505_s2 = inlined_call_operand.vmem [shape: bf16[2,40,34,72], index: 2, kind: input, shape index: {}, may-alias: {0,1,2}]   ;;  %s5506_s3 = inlined_call_operand.vmem [shape: bf16[9,72,64], index: 3, kind: input, shape index: {}]   ;;  %s5507_s4 = inlined_call_operand.vmem [shape: f32[1,64], index: 4, kind: input, shape index: {}]   ;;  %s5508_s5 = inlined_call_operand.vmem [shape: f32[1,64], index: 5, kind: input, shape index: {}]   ;;  %s5509_s6 = inlined_call_operand.vmem [shape: bf16[64,19], index: 6, kind: input, shape index: {}]   ;;  %s5510_s7 = inlined_call_operand.vmem [shape: f32[1,19], index: 7, kind: input, shape index: {}]   ;;  %s5511_s8 = inlined_call_operand.vmem [shape: f32[2,32,32,19], index: 8, kind: output, shape index: {}]  }
   0x1   :  { %s4071_s29 = smov 0   ;;  %s4073_s30 = smov 0  }
   0x2   :  { %s4075_s9 = smov 0  }
   0x3 LB: > { %s27_s10 = sadd.s32 1, %s4012_s29  ;;  %s30_s11 = sadd.s32 1, %s4016_s30  ;;  %s4020_s9 = sphi %s4075_s9, %s18_s9   ;;  %s4016_s30 = sphi %s4073_s30, %s5607_s30   ;;  %s4012_s29 = sphi %s4071_s29, %s5606_s29   ;;  %s4008_s28 = sphi %s4069_s28, %s5605_s28   ;;  %s4004_s27 = sphi %s4067_s27, %s5604_s27  }
   0x4   : > { %p28_p0 = scmp.ge.s32.totalorder %s27_s10, 4  ;;  %p3345_p1 = scmp.ge.s32.totalorder %s4020_s9, 1 }
   0x5   : > { %p332_p2 = scmp.lt.s32.totalorder %s4020_s9, 9 }
   0x6   : > { %s5609_s10 = smov (%p28_p0, %s27_s10), 0  ;;  %s5611_s11 = smov (!%p28_p0, %s30_s11), %s4016_s30 }
   0x7   : > { %p333_p3 = pnand %p3345_p1, %p332_p2  ;;  %p32_p4 = scmp.ge.s32.totalorder %s5611_s11, 2 }
   0x9   : > { %s5613_s11 = smov (%p32_p4, %s5611_s11), 0  ;;  %336 = sbr.rel (%p333_p3) target bundleno = 954 (0x3ba), region = 52 }
   0xe   : > { %v3364_v0 = vld [vmem:[%s5506_s3 + $0x44] sm:$0xf]  ;;  %v505_v1 = vld [vmem:[%s5506_s3 + $0x20] sm:$0xf]  ;;  %s4103_s16 = sshll.u32 %s4004_s27, 3  ;;  %p399_p5 = scmp.lt.s32.totalorder %s4008_s28, 1 }
   0xf   : > { %v936_v2 = vunpack.c.l.b16 %v3364_v0  ;;  %v1185_v3 = vunpack.c.l.b16 %v505_v1  ;;  %vm995_vm0 = vcmask 1043456   ;;  %p401_p6 = scmp.lt.s32.totalorder %s4103_s16, 39  ;;  %v3509_v6 = vld [vmem:[%s5506_s3 + $0x68] sm:$0xf]  ;;  %v3550_v8 = vld [vmem:[%s5506_s3 + $0x8c] sm:$0xf] }
  0x10   : > { %s5615_s28 = smov (!%p399_p5, %s4008_s28), 1  ;;  %v1525_v7 = vunpack.c.l.b16 %v3509_v6  ;;  %v3599_v9 = vld [vmem:[%s5506_s3 + $0xb0] sm:$0xf]  ;;  %v3867_v12 = vld [vmem:[%s5506_s3 + $0x3c] sm:$0xff]  ;;  %v3866_v15 = vld [vmem:[%s5506_s3 + $0x34] sm:$0xff]  ;;  %v1744_v16 = vunpack.c.l.b16 %v3550_v8  ;;  %vm946_vm3 = vcmask 588800  }
  0x11   : > { %v941_v4 = vpack.c.b16 %v936_v2, %v936_v2  ;;  %v1190_v5 = vpack.c.b16 %v1185_v3, %v1185_v3  ;;  %s402_s19 = scalar_select %p401_p6, %s4103_s16, 39  ;;  %v3863_v13 = vld [vmem:[%s5506_s3 + $0x18] sm:$0xff]  ;;  %v1961_v17 = vunpack.c.l.b16 %v3599_v9  ;;  %v3862_v18 = vld [vmem:[%s5506_s3 + $0x10] sm:$0xff]  ;;  %vm506_vm1 = vsmask.f32 3328  ;;  %v3861_v24 = vld [vmem:[%s5506_s3 + $0x8] sm:$0xff] }
  0x12   : > { %s4124_s26 = smul.u32 200, %s5615_s28  ;;  %v1530_v14 = vpack.c.b16 %v1525_v7, %v1525_v7  ;;  %vm507_vm2 = vsmask.f32 7440  ;;  %v3865_v23 = vld [vmem:[%s5506_s3 + $0x2c] sm:$0xff]  ;;  %v1749_v32 = vpack.c.b16 %v1744_v16, %v1744_v16  ;;  %v3864_v49 = vld [vmem:[%s5506_s3 + $0x24] sm:$0xff]  ;;  %vm1343_vm5 = vcmask 1042432  }
  0x13   : > { %v997_v10 = vsel %vm995_vm0, %v941_v4, 0  ;;  %v1244_v11 = vsel %vm995_vm0, %v1190_v5, 0  ;;  %s3910_s13 = smul.u32 5, %s402_s19  ;;  %v1966_v33 = vpack.c.b16 %v1961_v17, %v1961_v17  ;;  %v3860_v50 = vld [vmem:[%s5506_s3] sm:$0xff]  ;;  %vm4176_vm4 = vmor %vm506_vm1, %vm507_vm2  ;;  %vm1344_vm6 = vcmask 1046532   ;;  %s410_s12 = sadd.s32 8, %s4103_s16 }
  0x14   : > { %3900 = vmatpush.bf16.msra.mxu2 %v997_v10  ;;  %3905 = vmatpush.bf16.msra.mxu3 %v1244_v11  ;;  %v4142_v19 = vsel %vm995_vm0, %v1530_v14, 0  ;;  %v1761_v59 = vsel %vm995_vm0, %v1749_v32, 0  ;;  %vm4560_vm7 = vmor %vm1343_vm5, %vm1344_vm6  ;;  %p4883_p7 = scmp.lt.s32.totalorder %s410_s12, 39  ;;  %vm3025_vm8 = vcmask 523264   ;;  %p438_p9 = scmp.lt.s32.totalorder %s4103_s16, 31  ;;  %vm3163_vm9 = vcmask 154624  }
  0x15   : > { %1002 = vmatpush.bf16.msra.mxu0 %v997_v10  ;;  %1249 = vmatpush.bf16.msra.mxu1 %v1244_v11  ;;  %s405_s14 = sadd.s32 %s4124_s26, %s3910_s13  ;;  %v1978_v17 = vsel %vm995_vm0, %v1966_v33, 0  ;;  %s3354_s17 = sshll.u32 %s5615_s28, 7 }
  0x16   : > { %s3347_s18 = sshll.u32 %s405_s14, 2  ;;  %s5617_s12 = smov (!%p4883_p7, %s410_s12), 39 }
  0x17   : > { %s4139_s19 = scalar_lea.vmem %s5503_s0, %s3347_s18  ;;  %s3912_s20 = smul.u32 5, %s5617_s12 }
  0x18   : > { %3901 = vmatpush.bf16.msra.mxu2 %v3867_v12  ;;  %3906 = vmatpush.bf16.msra.mxu3 %v3863_v13  ;;  %v467_v20 = vld [vmem:[%s4139_s19 + $0x50] sm:$0xf]  ;;  %v468_v21 = vld [vmem:[%s4139_s19 + $0x54] sm:$0xf]  ;;  %v469_v22 = vld [vmem:[%s4139_s19 + $0x58] sm:$0xf] }
  0x19   : > { %1003 = vmatpush.bf16.msra.mxu0 %v3867_v12  ;;  %1250 = vmatpush.bf16.msra.mxu1 %v3863_v13  ;;  %v686_v25 = vshrl.u32 %v467_v20, 16  ;;  %v689_v26 = vshll.u32 %v467_v20, 16  ;;  %v695_v27 = vshll.u32 %v468_v21, 16  ;;  %v699_v28 = vshrl.u32 %v468_v21, 16  ;;  %v4154_v30 = vld [vmem:[%s4139_s19] sm:$0xf]  ;;  %s417_s25 = sadd.s32 %s3912_s20, %s4124_s26 }
  0x1a   : > { %v705_v29 = vshll.u32 %v469_v22, 16  ;;  %v4157_v31 = vld [vmem:[%s4139_s19 + $0x4] sm:$0xf]  ;;  %v709_v34 = vshrl.u32 %v469_v22, 16  ;;  %v4160_v39 = vld [vmem:[%s4139_s19 + $0x8] sm:$0xf] }
  0x1b   : > { %v688_v35 = vrot.slane %v686_v25, 4  ;;  %v691_v36 = vrot.slane %v689_v26, 5  ;;  %v697_v37 = vrot.slane %v695_v27, 5  ;;  %v701_v38 = vrot.slane %v699_v28, 4  ;;  %v470_v48 = vld [vmem:[%s4139_s19 + $0x5c] sm:$0xf] }
  0x1c   : > { %3902 = vmatpush.bf16.msra.mxu2 %v3866_v15  ;;  %3907 = vmatpush.bf16.msra.mxu3 %v3862_v18  ;;  %v707_v40 = vrot.slane %v705_v29, 5  ;;  %v510_v41 = vshrl.u32 %v4154_v30, 16  ;;  %v513_v42 = vshll.u32 %v4154_v30, 16  ;;  %v519_v43 = vshll.u32 %v4157_v31, 16  ;;  %v471_v60 = vld [vmem:[%s4139_s19 + $0x60] sm:$0x1] }
  0x1d   : > { %1004 = vmatpush.bf16.msra.mxu0 %v3866_v15  ;;  %1251 = vmatpush.bf16.msra.mxu1 %v3862_v18  ;;  %v692_v44 = vor.u32 %v691_v36, %v688_v35  ;;  %v702_v45 = vor.u32 %v701_v38, %v697_v37  ;;  %v523_v46 = vshrl.u32 %v4157_v31, 16  ;;  %v529_v47 = vshll.u32 %v4160_v39, 16  ;;  %v3848_v7 = vld [vmem:[%s4139_s19 + $0x50] sm:$0xff]  ;;  %v3840_v11 = vld [vmem:[%s4139_s19] sm:$0xff]  ;;  %v4189_v14 = vld [vmem:[%s4139_s19 + $0xc] sm:$0xf] }
  0x1e   : > { %v512_v52 = vrot.slane %v510_v41, 4  ;;  %v515_v53 = vrot.slane %v513_v42, 5  ;;  %v521_v54 = vrot.slane %v519_v43, 5  ;;  %v711_v55 = vrot.slane %v709_v34, 4  ;;  %v4197_v18 = vld [vmem:[%s4139_s19 + $0x10] sm:$0x1] }
  0x1f   : > { %v693_v56 = vrot.slane %v692_v44, 4  ;;  %v703_v57 = vrot.slane %v702_v45, 4  ;;  %v525_v58 = vrot.slane %v523_v46, 4  ;;  %v531_v62 = vrot.slane %v529_v47, 5  ;;  %v3871_v25 = vld [vmem:[%s5506_s3 + $0x60] sm:$0xff]  ;;  %s3349_s27 = sshll.u32 %s417_s25, 2 }
  0x20   : > { %3903 = vmatpush.bf16.msra.mxu2 %v3865_v23  ;;  %3908 = vmatpush.bf16.msra.mxu3 %v3861_v24  ;;  %v516_v61 = vor.u32 %v515_v53, %v512_v52  ;;  %v715_v63 = vshll.u32 %v470_v48, 16  ;;  %v719_v0 = vshrl.u32 %v470_v48, 16  ;;  %v712_v4 = vor.u32 %v711_v55, %v707_v40  ;;  %v3875_v26 = vld [vmem:[%s5506_s3 + $0x84] sm:$0xff]  ;;  %v4227_v53 = vld [vmem:[%s4139_s19 + $0x14] sm:$0xf]  ;;  %s4931_s14 = scalar_lea.vmem %s5504_s1, %s3349_s27  ;;  %s423_s25 = sadd.s32 9, %s4103_s16 }
  0x21   : > { %1005 = vmatpush.bf16.msra.mxu0 %v3865_v23  ;;  %1252 = vmatpush.bf16.msra.mxu1 %v3861_v24  ;;  %v698_v1 = vsel %vm4176_vm4, %v693_v56, %v697_v37  ;;  %v708_v2 = vsel %vm4176_vm4, %v703_v57, %v707_v40  ;;  %v526_v3 = vor.u32 %v525_v58, %v521_v54  ;;  %v725_v9 = vshll.u32 %v471_v60, 16  ;;  %v472_v32 = vld [vmem:[%s4139_s19 + $0x64] sm:$0xf]  ;;  %v473_v36 = vld [vmem:[%s4139_s19 + $0x68] sm:$0xf]  ;;  %p426_p8 = scmp.lt.s32.totalorder %s423_s25, 39 }
  0x22   : > { %v887_v5 = vunpack.c.l.b16 %v698_v1  ;;  %v888_v6 = vunpack.c.l.b16 %v708_v2  ;;  %v517_v8 = vrot.slane %v516_v61, 4  ;;  %v717_v12 = vrot.slane %v715_v63, 5  ;;  %v3879_v48 = vld [vmem:[%s5506_s3 + $0xa8] sm:$0xff]  ;;  %v4230_v55 = vld [vmem:[%s4139_s19 + $0x18] sm:$0xf]  ;;  %s5621_s16 = smov (!%p438_p9, %s4103_s16), 31 }
  0x23   : > { %v527_v10 = vrot.slane %v526_v3, 4  ;;  %v721_v13 = vrot.slane %v719_v0, 4  ;;  %v533_v20 = vshrl.u32 %v4160_v39, 16  ;;  %v713_v23 = vrot.slane %v712_v4, 4  ;;  %v474_v61 = vld [vmem:[%s4139_s19 + $0x6c] sm:$0xf] }
  0x24   : > { %3904 = vmatpush.bf16.msra.mxu2 %v3864_v49  ;;  %3909 = vmatpush.bf16.msra.mxu3 %v3860_v50  ;;  %v4191_v15 = vpack.c.b16 %v888_v6, %v887_v5  ;;  %v522_v16 = vsel %vm4176_vm4, %v517_v8, %v521_v54  ;;  %v727_v27 = vrot.slane %v725_v9, 5  ;;  %v539_v29 = vshll.u32 %v4189_v14, 16  ;;  %v3849_v8 = vld [vmem:[%s4139_s19 + $0x58] sm:$0xff]  ;;  %s5619_s25 = smov (!%p426_p8, %s423_s25), 39 }
  0x25   : > { %1006 = vmatpush.bf16.msra.mxu0 %v3864_v49  ;;  %1253 = vmatpush.bf16.msra.mxu1 %v3860_v50  ;;  %v532_v21 = vsel %vm4176_vm4, %v527_v10, %v531_v62  ;;  %v871_v22 = vunpack.c.l.b16 %v522_v16  ;;  %v722_v24 = vor.u32 %v721_v13, %v717_v12  ;;  %v535_v28 = vrot.slane %v533_v20, 4  ;;  %s3913_s27 = smul.u32 5, %s5619_s25 }
  0x26   : > { %5529 = vst [vmem:[#allocation2_spill] sm:$0xff] %v4191_v15  ;;  %v543_v34 = vshrl.u32 %v4189_v14, 16  ;;  %v549_v35 = vshll.u32 %v4197_v18, 16  ;;  %v541_v40 = vrot.slane %v539_v29, 5  ;;  %v718_v41 = vsel %vm4176_vm4, %v713_v23, %v717_v12  ;;  %v3841_v12 = vld [vmem:[%s4139_s19 + $0x8] sm:$0xff] }
  0x27   : > { %3389 = vmatmul.msk.bf16.vlgmr.msra.gmra.mxu2 %vm946_vm3, %v4191_v15  ;;  %3485 = vmatmul.msk.bf16.vlgmr.msra.gmra.mxu3 %vm946_vm3, %v3848_v7  ;;  %v723_v33 = vrot.slane %v722_v24, 4  ;;  %v536_v38 = vor.u32 %v535_v28, %v531_v62  ;;  %v730_v43 = vshrl.u32 %v472_v32, 16  ;;  %v733_v44 = vshll.u32 %v472_v32, 16  ;;  %v475_v28 = vld [vmem:[%s4139_s19 + $0x70] sm:$0xf] }
  0x28   : > { %1589 = vmatpush.bf16.msrb.mxu2 %v4142_v19  ;;  %1766 = vmatpush.bf16.msrb.mxu3 %v1761_v59  ;;  %v872_v19 = vunpack.c.l.b16 %v532_v21  ;;  %v545_v42 = vrot.slane %v543_v34, 4  ;;  %v739_v47 = vshll.u32 %v473_v36, 16  ;;  %v551_v50 = vrot.slane %v549_v35, 5  ;;  %v4246_v21 = vld [vmem:[%s4139_s19 + $0x1c] sm:$0xf] }
  0x29   : > { %3477 = vmatmul.msk.bf16.vlgmr.msra.gmra.mxu1 %vm946_vm3, %v3840_v11  ;;  %1983 = vmatpush.bf16.msrb.mxu0 %v1978_v17  ;;  %v728_v45 = vsel %vm4176_vm4, %v723_v33, %v727_v27  ;;  %v537_v46 = vrot.slane %v536_v38, 4  ;;  %v743_v52 = vshrl.u32 %v473_v36, 16  ;;  %v889_v54 = vunpack.c.l.b16 %v718_v41  ;;  %v3870_v36 = vld [vmem:[%s5506_s3 + $0x58] sm:$0xff]  ;;  %v3878_v38 = vld [vmem:[%s5506_s3 + $0xa0] sm:$0xff] }
  0x2a   : > { %v903_v37 = vpack.c.b16 %v872_v19, %v871_v22  ;;  %v546_v49 = vor.u32 %v545_v42, %v541_v40  ;;  %v890_v56 = vunpack.c.l.b16 %v728_v45  ;;  %v732_v58 = vrot.slane %v730_v43, 4  ;;  %v4269_v43 = vld [vmem:[%s4139_s19 + $0x20] sm:$0xf] }
  0x2b   : > { %v735_v59 = vrot.slane %v733_v44, 5  ;;  %v542_v60 = vsel %vm4176_vm4, %v537_v46, %v541_v40  ;;  %v741_v62 = vrot.slane %v739_v47, 5  ;;  %v745_v63 = vrot.slane %v743_v52, 4  ;;  %v476_v47 = vld [vmem:[%s4139_s19 + $0x74] sm:$0x1] }
  0x2c   : > { %1590 = vmatpush.bf16.msrb.mxu2 %v3871_v25  ;;  %1767 = vmatpush.bf16.msrb.mxu3 %v3875_v26  ;;  %v547_v57 = vrot.slane %v546_v49, 4  ;;  %v554_v0 = vshrl.u32 %v4227_v53, 16  ;;  %v557_v2 = vshll.u32 %v4227_v53, 16  ;;  %v563_v3 = vshll.u32 %v4230_v55, 16 }
  0x2d   : > { %3381 = vmatmul.msk.bf16.vlgmr.msra.gmra.mxu0 %vm946_vm3, %v903_v37  ;;  %v567_v4 = vshrl.u32 %v4230_v55, 16  ;;  %v736_v5 = vor.u32 %v735_v59, %v732_v58  ;;  %v749_v6 = vshll.u32 %v474_v61, 16  ;;  %v4241_v7 = vpack.c.b16 %v890_v56, %v889_v54  ;;  %v3874_v37 = vld [vmem:[%s5506_s3 + $0x7c] sm:$0xff] }
  0x2e   : > { %1984 = vmatpush.bf16.msrb.mxu0 %v3879_v48  ;;  %v552_v1 = vsel %vm4176_vm4, %v547_v57, %v551_v50  ;;  %v873_v9 = vunpack.c.l.b16 %v542_v60  ;;  %v746_v11 = vor.u32 %v745_v63, %v741_v62  ;;  %v556_v13 = vrot.slane %v554_v0, 4 }
  0x2f   : > { %5530 = vst [vmem:[#allocation3_spill] sm:$0xff] %v4241_v7  ;;  %v874_v10 = vunpack.c.l.b16 %v552_v1  ;;  %v559_v16 = vrot.slane %v557_v2, 5  ;;  %v565_v17 = vrot.slane %v563_v3, 5  ;;  %v569_v20 = vrot.slane %v567_v4, 4  ;;  %v4283_v2 = vld [vmem:[%s4139_s19 + $0x14] sm:$0xff] }
  0x30   : > { %v737_v22 = vrot.slane %v736_v5, 4  ;;  %v747_v24 = vrot.slane %v746_v11, 4  ;;  %v751_v25 = vrot.slane %v749_v6, 5  ;;  %v573_v27 = vshll.u32 %v4246_v21, 16  ;;  %1591 = vmatpush.bf16.msrb.mxu2 %v3870_v36  ;;  %1768 = vmatpush.bf16.msrb.mxu3 %v3874_v37  ;;  %v4286_v5 = vld [vmem:[%s4139_s19 + $0x24] sm:$0x1] }
  0x31   : > { %v904_v23 = vpack.c.b16 %v874_v10, %v873_v9  ;;  %v560_v26 = vor.u32 %v559_v16, %v556_v13  ;;  %v570_v19 = vor.u32 %v569_v20, %v565_v17  ;;  %v753_v33 = vshrl.u32 %v474_v61, 16  ;;  %v3850_v61 = vld [vmem:[%s4139_s19 + $0x64] sm:$0xff] }
  0x32   : > { %v742_v29 = vsel %vm4176_vm4, %v737_v22, %v741_v62  ;;  %v752_v32 = vsel %vm4176_vm4, %v747_v24, %v751_v25  ;;  %v759_v34 = vshll.u32 %v475_v28, 16  ;;  %v763_v35 = vshrl.u32 %v475_v28, 16  ;;  %1985 = vmatpush.bf16.msrb.mxu0 %v3878_v38 }
  0x33   : > { %v561_v40 = vrot.slane %v560_v26, 4  ;;  %v571_v41 = vrot.slane %v570_v19, 4  ;;  %v575_v42 = vrot.slane %v573_v27, 5  ;;  %v891_v44 = vunpack.c.l.b16 %v742_v29  ;;  %v3869_v19 = vld [vmem:[%s5506_s3 + $0x50] sm:$0xff] }
  0x34   : > { %v892_v45 = vunpack.c.l.b16 %v752_v32  ;;  %v577_v46 = vshrl.u32 %v4246_v21, 16  ;;  %v755_v48 = vrot.slane %v753_v33, 4  ;;  %v761_v49 = vrot.slane %v759_v34, 5  ;;  %v3873_v27 = vld [vmem:[%s5506_s3 + $0x74] sm:$0xff]  ;;  %v4311_v33 = vld [vmem:[%s4139_s19 + $0x28] sm:$0xf]  ;;  %1592 = vmatpush.bf16.msrb.mxu2 %v3869_v19 }
  0x35   : > { %v765_v50 = vrot.slane %v763_v35, 4  ;;  %v566_v52 = vsel %vm4176_vm4, %v561_v40, %v565_v17  ;;  %v576_v54 = vsel %vm4176_vm4, %v571_v41, %v575_v42  ;;  %v583_v56 = vshll.u32 %v4269_v43, 16  ;;  %v478_v17 = vld [vmem:[%s4139_s19 + $0x7c] sm:$0xf]  ;;  %v4314_v34 = vld [vmem:[%s4139_s19 + $0x2c] sm:$0xf]  ;;  %1769 = vmatpush.bf16.msrb.mxu3 %v3873_v27 }
  0x36   : > { %v587_v57 = vshrl.u32 %v4269_v43, 16  ;;  %v4279_v58 = vpack.c.b16 %v892_v45, %v891_v44  ;;  %v769_v59 = vshll.u32 %v476_v47, 16  ;;  %v579_v60 = vrot.slane %v577_v46, 4  ;;  %v479_v40 = vld [vmem:[%s4139_s19 + $0x80] sm:$0xf] }
  0x37   : > { %3390 = vmatmul.msk.bf16.gmra.mxu2 %vm946_vm3, %v4241_v7  ;;  %3486 = vmatmul.msk.bf16.gmra.mxu3 %vm946_vm3, %v3849_v8  ;;  %v875_v62 = vunpack.c.l.b16 %v566_v52  ;;  %v876_v63 = vunpack.c.l.b16 %v576_v54  ;;  %v756_v0 = vor.u32 %v755_v48, %v751_v25  ;;  %v766_v1 = vor.u32 %v765_v50, %v761_v49  ;;  %v4328_v54 = vld [vmem:[%s4139_s19 + $0x6c] sm:$0xff] }
  0x38   : > { %5531 = vst [vmem:[#allocation4_spill] sm:$0xff] %v4279_v58  ;;  %v585_v3 = vrot.slane %v583_v56, 5  ;;  %v589_v4 = vrot.slane %v587_v57, 4  ;;  %v580_v6 = vor.u32 %v579_v60, %v575_v42  ;;  %v771_v11 = vrot.slane %v769_v59, 5 }
  0x39   : > { %3478 = vmatmul.msk.bf16.gmra.mxu1 %vm946_vm3, %v3841_v12  ;;  %v4291_v8 = vpack.c.b16 %v876_v63, %v875_v62  ;;  %v757_v9 = vrot.slane %v756_v0, 4  ;;  %v767_v10 = vrot.slane %v766_v1, 4  ;;  %v477_v12 = vld [vmem:[%s4139_s19 + $0x78] sm:$0xf]  ;;  %v593_v16 = vshll.u32 %v4286_v5, 16 }
  0x3a   : > { %v590_v13 = vor.u32 %v589_v4, %v585_v3  ;;  %v581_v20 = vrot.slane %v580_v6, 4  ;;  %v774_v22 = vshrl.u32 %v477_v12, 16  ;;  %v777_v25 = vshll.u32 %v477_v12, 16 }
  0x3b   : > { %v772_v24 = vsel %vm4176_vm4, %v767_v10, %v771_v11  ;;  %v783_v26 = vshll.u32 %v478_v17, 16  ;;  %v595_v29 = vrot.slane %v593_v16, 5  ;;  %v787_v32 = vshrl.u32 %v478_v17, 16  ;;  %v4343_v10 = vld [vmem:[%s4139_s19 + $0x84] sm:$0xf] }
  0x3c   : > { %v591_v28 = vrot.slane %v590_v13, 4  ;;  %v894_v36 = vunpack.c.l.b16 %v772_v24  ;;  %v586_v37 = vsel %vm4176_vm4, %v581_v20, %v585_v3  ;;  %v776_v38 = vrot.slane %v774_v22, 4  ;;  %v4334_v3 = vld [vmem:[%s4139_s19 + $0x30] sm:$0xf]  ;;  %v3877_v24 = vld [vmem:[%s5506_s3 + $0x98] sm:$0xff] }
  0x3d   : > { %3382 = vmatmul.msk.bf16.gmra.mxu0 %vm946_vm3, %v904_v23  ;;  %v762_v23 = vsel %vm4176_vm4, %v757_v9, %v761_v49  ;;  %v779_v41 = vrot.slane %v777_v25, 5  ;;  %v785_v42 = vrot.slane %v783_v26, 5  ;;  %v598_v44 = vshrl.u32 %v4311_v33, 16 }
  0x3e   : > { %v893_v35 = vunpack.c.l.b16 %v762_v23  ;;  %v601_v45 = vshll.u32 %v4311_v33, 16  ;;  %v596_v46 = vsel %vm4176_vm4, %v591_v28, %v595_v29  ;;  %v789_v47 = vrot.slane %v787_v32, 4  ;;  %v4360_v28 = vld [vmem:[%s4139_s19 + $0x34] sm:$0xf]  ;;  %1986 = vmatpush.bf16.msrb.mxu0 %v3877_v24 }
  0x3f   : > { %v607_v48 = vshll.u32 %v4314_v34, 16  ;;  %v611_v49 = vshrl.u32 %v4314_v34, 16  ;;  %v793_v52 = vshll.u32 %v479_v40, 16  ;;  %v877_v56 = vunpack.c.l.b16 %v586_v37 }
  0x40   : > { %v4325_v50 = vpack.c.b16 %v894_v36, %v893_v35  ;;  %v878_v57 = vunpack.c.l.b16 %v596_v46  ;;  %v600_v59 = vrot.slane %v598_v44, 4  ;;  %v603_v60 = vrot.slane %v601_v45, 5 }
  0x41   : > { %v780_v62 = vor.u32 %v779_v41, %v776_v38  ;;  %v790_v63 = vor.u32 %v789_v47, %v785_v42  ;;  %v609_v0 = vrot.slane %v607_v48, 5  ;;  %v613_v1 = vrot.slane %v611_v49, 4 }
  0x42   : > { %5532 = vst [vmem:[#allocation5_spill] sm:$0xff] %v4325_v50  ;;  %v4340_v4 = vpack.c.b16 %v878_v57, %v877_v56  ;;  %v795_v6 = vrot.slane %v793_v52, 5  ;;  %v604_v9 = vor.u32 %v603_v60, %v600_v59  ;;  %v617_v16 = vshll.u32 %v4334_v3, 16  ;;  %v4376_v52 = vld [vmem:[%s4139_s19 + $0x78] sm:$0xff]  ;;  %v4379_v59 = vld [vmem:[%s4139_s19 + $0x28] sm:$0xff] }
  0x43   : > { %v781_v11 = vrot.slane %v780_v62, 4  ;;  %v791_v12 = vrot.slane %v790_v63, 4  ;;  %v614_v13 = vor.u32 %v613_v1, %v609_v0  ;;  %v797_v17 = vshrl.u32 %v479_v40, 16  ;;  %v4365_v40 = vld [vmem:[%s4139_s19 + $0x88] sm:$0x1] }
  0x44   : > { %v803_v20 = vshll.u32 %v4343_v10, 16  ;;  %v807_v22 = vshrl.u32 %v4343_v10, 16  ;;  %v605_v23 = vrot.slane %v604_v9, 4  ;;  %v619_v27 = vrot.slane %v617_v16, 5 }
  0x45   : > { %v786_v25 = vsel %vm4176_vm4, %v781_v11, %v785_v42  ;;  %v796_v26 = vsel %vm4176_vm4, %v791_v12, %v795_v6  ;;  %v615_v19 = vrot.slane %v614_v13, 4  ;;  %v799_v29 = vrot.slane %v797_v17, 4  ;;  %v4385_v11 = vld [vmem:[%s4139_s19 + $0x8c] sm:$0xf] }
  0x46   : > { %v805_v32 = vrot.slane %v803_v20, 5  ;;  %v809_v35 = vrot.slane %v807_v22, 4  ;;  %v895_v36 = vunpack.c.l.b16 %v786_v25  ;;  %v896_v37 = vunpack.c.l.b16 %v796_v26  ;;  %5533 = vst [vmem:[#allocation6_spill] sm:$0xff] %v4385_v11  ;;  %v4397_v20 = vld [vmem:[%s4139_s19 + $0x90] sm:$0xf] }
  0x47   : > { %3391 = vmatmul.msk.bf16.gmra.mxu2 %vm946_vm3, %v4279_v58  ;;  %3487 = vmatmul.msk.bf16.gmra.mxu3 %vm946_vm3, %v3850_v61  ;;  %v4331_v61 = vld [vmem:[%s4139_s19 + $0x1c] sm:$0xff]  ;;  %v610_v38 = vsel %vm4176_vm4, %v605_v23, %v609_v0  ;;  %v620_v41 = vsel %vm4176_vm4, %v615_v19, %v619_v27  ;;  %v621_v42 = vshrl.u32 %v4334_v3, 16  ;;  %v627_v44 = vshll.u32 %v4360_v28, 16  ;;  %v4382_v0 = vld [vmem:[%s4139_s19 + $0x38] sm:$0x1]  ;;  %5534 = vst [vmem:[#allocation7_spill] sm:$0xff] %v4397_v20 }
  0x48   : > { %v631_v45 = vshrl.u32 %v4360_v28, 16  ;;  %v800_v46 = vor.u32 %v799_v29, %v795_v6  ;;  %v810_v47 = vor.u32 %v809_v35, %v805_v32  ;;  %v813_v48 = vshll.u32 %v4365_v40, 16  ;;  %v4406_v26 = vld [vmem:[%s4139_s19 + $0x3c] sm:$0xf]  ;;  %v4413_v29 = vld [vmem:[%s4139_s19 + $0x40] sm:$0xf] }
  0x49   : > { %3479 = vmatmul.msk.bf16.gmra.mxu1 %vm946_vm3, %v4283_v2  ;;  %v4373_v49 = vpack.c.b16 %v896_v37, %v895_v36  ;;  %v879_v56 = vunpack.c.l.b16 %v610_v38  ;;  %v880_v57 = vunpack.c.l.b16 %v620_v41  ;;  %v623_v60 = vrot.slane %v621_v42, 4  ;;  %v3868_v35 = vld [vmem:[%s5506_s3 + $0x48] sm:$0xff] }
  0x4a   : > { %v629_v62 = vrot.slane %v627_v44, 5  ;;  %v633_v63 = vrot.slane %v631_v45, 4  ;;  %v801_v1 = vrot.slane %v800_v46, 4  ;;  %v811_v6 = vrot.slane %v810_v47, 4  ;;  %1593 = vmatpush.bf16.msrb.mxu2 %v3868_v35  ;;  %v4439_v35 = vld [vmem:[%s4139_s19 + $0x44] sm:$0xf] }
  0x4b   : > { %v815_v9 = vrot.slane %v813_v48, 5  ;;  %v4391_v12 = vpack.c.b16 %v880_v57, %v879_v56  ;;  %v624_v13 = vor.u32 %v623_v60, %v619_v27  ;;  %v637_v17 = vshll.u32 %v4382_v0, 16 }
  0x4c   : > { %v634_v16 = vor.u32 %v633_v63, %v629_v62  ;;  %v818_v22 = vshrl.u32 %v4385_v11, 16  ;;  %v821_v23 = vshll.u32 %v4385_v11, 16  ;;  %v806_v24 = vsel %vm4176_vm4, %v801_v1, %v805_v32  ;;  %v3872_v32 = vld [vmem:[%s5506_s3 + $0x6c] sm:$0xff]  ;;  %v4495_v11 = vld [vmem:[%s4139_s19 + $0x3c] sm:$0xff] }
  0x4d   : > { %3383 = vmatmul.msk.bf16.gmra.mxu0 %vm946_vm3, %v4291_v8  ;;  %v816_v25 = vsel %vm4176_vm4, %v811_v6, %v815_v9  ;;  %v827_v19 = vshll.u32 %v4397_v20, 16  ;;  %v831_v27 = vshrl.u32 %v4397_v20, 16  ;;  %v625_v36 = vrot.slane %v624_v13, 4  ;;  %1770 = vmatpush.bf16.msrb.mxu3 %v3872_v32  ;;  %v4430_v6 = vld [vmem:[%s4139_s19 + $0x94] sm:$0xf] }
  0x4e   : > { %v635_v37 = vrot.slane %v634_v16, 4  ;;  %v639_v38 = vrot.slane %v637_v17, 5  ;;  %v897_v41 = vunpack.c.l.b16 %v806_v24  ;;  %v898_v42 = vunpack.c.l.b16 %v816_v25  ;;  %5535 = vst [vmem:[#allocation8_spill] sm:$0xff] %v4430_v6  ;;  %v4435_v24 = vld [vmem:[%s4139_s19 + $0x80] sm:$0xff]  ;;  %v4442_v32 = vld [vmem:[%s4139_s19 + $0x30] sm:$0xff] }
  0x4f   : > { %v820_v44 = vrot.slane %v818_v22, 4  ;;  %v823_v45 = vrot.slane %v821_v23, 5  ;;  %v642_v46 = vshrl.u32 %v4406_v26, 16  ;;  %v645_v47 = vshll.u32 %v4406_v26, 16  ;;  %5537 = vst [vmem:[#allocation10_spill] sm:$0xff] %v4435_v24 }
  0x50   : > { %v651_v48 = vshll.u32 %v4413_v29, 16  ;;  %v655_v56 = vshrl.u32 %v4413_v29, 16  ;;  %v829_v57 = vrot.slane %v827_v19, 5  ;;  %v833_v60 = vrot.slane %v831_v27, 4 }
  0x51   : > { %v630_v63 = vsel %vm4176_vm4, %v625_v36, %v629_v62  ;;  %v640_v1 = vsel %vm4176_vm4, %v635_v37, %v639_v38  ;;  %v4432_v9 = vpack.c.b16 %v898_v42, %v897_v41  ;;  %v824_v13 = vor.u32 %v823_v45, %v820_v44 }
  0x52   : > { %v644_v16 = vrot.slane %v642_v46, 4  ;;  %v647_v17 = vrot.slane %v645_v47, 5  ;;  %v653_v22 = vrot.slane %v651_v48, 5  ;;  %v657_v23 = vrot.slane %v655_v56, 4  ;;  %v3876_v46 = vld [vmem:[%s5506_s3 + $0x90] sm:$0xff] }
  0x53   : > { %5536 = vst [vmem:[#allocation9_spill] sm:$0xff] %v4432_v9  ;;  %v881_v25 = vunpack.c.l.b16 %v630_v63  ;;  %v882_v19 = vunpack.c.l.b16 %v640_v1  ;;  %v834_v27 = vor.u32 %v833_v60, %v829_v57  ;;  %v837_v62 = vshll.u32 %v4430_v6, 16  ;;  %v4457_v47 = vld [vmem:[%s4139_s19 + $0x98] sm:$0xf]  ;;  %1987 = vmatpush.bf16.msrb.mxu0 %v3876_v46 }
  0x54   : > { %v825_v36 = vrot.slane %v824_v13, 4  ;;  %v648_v37 = vor.u32 %v647_v17, %v644_v16  ;;  %v658_v38 = vor.u32 %v657_v23, %v653_v22  ;;  %v661_v41 = vshll.u32 %v4439_v35, 16  ;;  %5538 = vst [vmem:[#allocation11_spill] sm:$0xff] %v4457_v47 }
  0x55   : > { %v4449_v42 = vpack.c.b16 %v882_v19, %v881_v25  ;;  %v835_v44 = vrot.slane %v834_v27, 4  ;;  %v839_v45 = vrot.slane %v837_v62, 5  ;;  %v841_v13 = vshrl.u32 %v4430_v6, 16  ;;  %v4472_v19 = vld [vmem:[%s4139_s19 + $0x48] sm:$0xf] }
  0x56   : > { %v830_v48 = vsel %vm4176_vm4, %v825_v36, %v829_v57  ;;  %v649_v56 = vrot.slane %v648_v37, 4  ;;  %v659_v60 = vrot.slane %v658_v38, 4  ;;  %v663_v63 = vrot.slane %v661_v41, 5  ;;  %v3641_v57 = vld [vmem:[%s5506_s3 + $0xd4] sm:$0xf] }
  0x57   : > { %3392 = vmatmul.msk.bf16.gmra.mxu2 %vm946_vm3, %v4325_v50  ;;  %3488 = vmatmul.msk.bf16.gmra.mxu3 %vm946_vm3, %v4328_v54  ;;  %v840_v1 = vsel %vm4176_vm4, %v835_v44, %v839_v45  ;;  %v847_v16 = vshll.u32 %v4457_v47, 16  ;;  %v851_v17 = vshrl.u32 %v4457_v47, 16  ;;  %v2148_v23 = vunpack.c.l.b16 %v3641_v57  ;;  %v4480_v47 = vld [vmem:[%s4139_s19 + $0x9c] sm:$0x1] }
  0x58   : > { %v899_v25 = vunpack.c.l.b16 %v830_v48  ;;  %v900_v27 = vunpack.c.l.b16 %v840_v1  ;;  %v654_v62 = vsel %vm4176_vm4, %v649_v56, %v653_v22  ;;  %v664_v36 = vsel %vm4176_vm4, %v659_v60, %v663_v63  ;;  %v3883_v56 = vld [vmem:[%s5506_s3 + $0xcc] sm:$0xff] }
  0x59   : > { %3480 = vmatmul.msk.bf16.gmra.mxu1 %vm946_vm3, %v4331_v61  ;;  %v2153_v37 = vpack.c.b16 %v2148_v23, %v2148_v23  ;;  %v843_v38 = vrot.slane %v841_v13, 4  ;;  %v849_v41 = vrot.slane %v847_v16, 5  ;;  %v853_v44 = vrot.slane %v851_v17, 4  ;;  %v4491_v17 = vld [vmem:[%s4139_s19 + $0x8c] sm:$0xff] }
  0x5a   : > { %v665_v46 = vshrl.u32 %v4439_v35, 16  ;;  %v671_v48 = vshll.u32 %v4472_v19, 16  ;;  %v675_v1 = vshrl.u32 %v4472_v19, 16  ;;  %v4488_v60 = vpack.c.b16 %v900_v27, %v899_v25 }
  0x5b   : > { %v2165_v22 = vsel %vm995_vm0, %v2153_v37, 0  ;;  %v883_v13 = vunpack.c.l.b16 %v654_v62  ;;  %v884_v16 = vunpack.c.l.b16 %v664_v36  ;;  %v844_v57 = vor.u32 %v843_v38, %v839_v45 }
  0x5c   : > { %2170 = vmatpush.bf16.msrb.mxu1 %v2165_v22  ;;  %v854_v23 = vor.u32 %v853_v44, %v849_v41  ;;  %v667_v6 = vrot.slane %v665_v46, 4  ;;  %v677_v37 = vrot.slane %v675_v1, 4  ;;  %v4498_v22 = vld [vmem:[%s4139_s19 + $0x4c] sm:$0x1]  ;;  %v3882_v44 = vld [vmem:[%s5506_s3 + $0xc4] sm:$0xff] }
  0x5d   : > { %3384 = vmatmul.msk.bf16.gmra.mxu0 %vm946_vm3, %v4340_v4  ;;  %v4500_v20 = vpack.c.b16 %v884_v16, %v883_v13  ;;  %v845_v45 = vrot.slane %v844_v57, 4  ;;  %v681_v38 = vshll.u32 %v4498_v22, 16  ;;  %v3682_v46 = vld [vmem:[%s5506_s3 + $0xf8] sm:$0xf]  ;;  %v3731_v1 = vld [vmem:[%s5506_s3 + $0x11c] sm:$0xf] }
  0x5e   : > { %v855_v25 = vrot.slane %v854_v23, 4  ;;  %v668_v62 = vor.u32 %v667_v6, %v663_v63  ;;  %v2542_v23 = vunpack.c.l.b16 %v3731_v1  ;;  %v1348_v1 = vrot.slane %v4157_v31, 5 }
  0x5f   : > { %v850_v6 = vsel %vm4176_vm4, %v845_v45, %v849_v41  ;;  %v683_v16 = vrot.slane %v681_v38, 5  ;;  %v3880_v38 = vld [vmem:[%s5506_s3 + $0xb4] sm:$0xff]  ;;  %v3493_v31 = vrot.slane %v4154_v30, 9 }
  0x60   : > { %2171 = vmatpush.bf16.msrb.mxu1 %v3883_v56  ;;  %v669_v63 = vrot.slane %v668_v62, 4  ;;  %v3881_v56 = vld [vmem:[%s5506_s3 + $0xbc] sm:$0xff]  ;;  %v2547_v41 = vpack.c.b16 %v2542_v23, %v2542_v23  ;;  %v901_v45 = vunpack.c.l.b16 %v850_v6  ;;  %v4542_v6 = vld [vmem:[%s4139_s19 + $0x94] sm:$0xff]  ;;  %v1350_v23 = vrot.slane %v1348_v1, 4 }
  0x64   : > { %2172 = vmatpush.bf16.msrb.mxu1 %v3882_v44  ;;  %v3773_v44 = vld [vmem:[%s5506_s3 + $0x140] sm:$0xf] }
  0x67   : > { %3393 = vmatmul.msk.bf16.gmra.mxu2 %vm946_vm3, %v4373_v49  ;;  %3489 = vmatmul.msk.bf16.gmra.mxu3 %vm946_vm3, %v4376_v52 }
  0x68   : > { %2173 = vmatpush.bf16.msrb.mxu1 %v3881_v56 }
  0x69   : > { %3481 = vmatmul.msk.bf16.gmra.mxu1 %vm946_vm3, %v4379_v59 }
  0x6c   : > { %2174 = vmatpush.bf16.msrb.mxu1 %v3880_v38 }
  0x6d   : > { %3385 = vmatmul.msk.bf16.gmra.mxu0 %vm946_vm3, %v4391_v12 }
  0x77   : > { %3394 = vmatmul.msk.bf16.gmra.mxu2 %vm946_vm3, %v4432_v9  ;;  %3490 = vmatmul.msk.bf16.gmra.mxu3 %vm946_vm3, %v4435_v24  ;;  %v857_v9 = vshll.u32 %v4480_v47, 16  ;;  %v673_v24 = vrot.slane %v671_v48, 5  ;;  %v2325_v48 = vunpack.c.l.b16 %v3682_v46  ;;  %v2729_v46 = vunpack.c.l.b16 %v3773_v44 }
  0x79   : > { %3482 = vmatmul.msk.bf16.gmra.mxu1 %vm946_vm3, %v4442_v32  ;;  %v859_v27 = vrot.slane %v857_v9, 5  ;;  %v678_v36 = vor.u32 %v677_v37, %v673_v24  ;;  %v2330_v57 = vpack.c.b16 %v2325_v48, %v2325_v48  ;;  %v2734_v56 = vpack.c.b16 %v2729_v46, %v2729_v46 }
  0x7b   : > { %v860_v9 = vsel %vm4176_vm4, %v855_v25, %v859_v27  ;;  %v679_v13 = vrot.slane %v678_v36, 4  ;;  %v2342_v37 = vsel %vm995_vm0, %v2330_v57, 0  ;;  %v674_v27 = vsel %vm4176_vm4, %v669_v63, %v673_v24  ;;  %v4545_v63 = vld [vmem:[%s4139_s19 + $0x44] sm:$0xff] }
  0x7c   : > { %v902_v25 = vunpack.c.l.b16 %v860_v9  ;;  %2347 = vmatpush.bf16.msra.mxu2 %v2342_v37  ;;  %v2559_v36 = vsel %vm995_vm0, %v2547_v41, 0  ;;  %v885_v24 = vunpack.c.l.b16 %v674_v27  ;;  %v3494_v41 = vrot.slane %v4227_v53, 9 }
  0x7d   : > { %3386 = vmatmul.msk.bf16.gmra.mxu0 %vm946_vm3, %v4449_v42  ;;  %v684_v62 = vsel %vm4176_vm4, %v679_v13, %v683_v16  ;;  %2564 = vmatpush.bf16.msra.mxu3 %v2559_v36  ;;  %v1361_v13 = vrot.slane %v4230_v55, 5  ;;  %v2746_v16 = vsel %vm995_vm0, %v2734_v56, 0  ;;  %v1351_v55 = vrot.slane %v4160_v39, 5 }
  0x7e   : > { %v4539_v48 = vpack.c.b16 %v902_v25, %v901_v45  ;;  %v886_v9 = vunpack.c.l.b16 %v684_v62  ;;  %2751 = vmatpush.bf16.msra.mxu0 %v2746_v16  ;;  %v1364_v25 = vrot.slane %v4246_v21, 5  ;;  %v1349_v27 = vsel %vm4560_vm7, %v3493_v31, %v1348_v1 }
  0x7f   : > { %v1363_v45 = vrot.slane %v1361_v13, 4  ;;  %v1352_v30 = vsel %vm4560_vm7, %v1350_v23, %v1351_v55  ;;  %v1362_v39 = vsel %vm4560_vm7, %v3494_v41, %v1361_v13  ;;  %v1460_v36 = vunpack.c.l.b16 %v1349_v27 }
  0x80   : > { %v4554_v57 = vpack.c.b16 %v886_v9, %v885_v24  ;;  %v1461_v53 = vunpack.c.l.b16 %v1352_v30  ;;  %v1464_v38 = vunpack.c.l.b16 %v1362_v39  ;;  %v1354_v24 = vrot.slane %v4189_v14, 5 }
  0x81   : > { %v1365_v62 = vsel %vm4560_vm7, %v1363_v45, %v1364_v25  ;;  %v1367_v1 = vrot.slane %v4269_v43, 5  ;;  %v1353_v13 = vrot.slane %v1351_v55, 4  ;;  %v1357_v31 = vrot.slane %v4197_v18, 5 }
  0x82   : > { %v1465_v44 = vunpack.c.l.b16 %v1365_v62  ;;  %v1492_v21 = vpack.c.b16 %v1461_v53, %v1460_v36  ;;  %v1356_v16 = vrot.slane %v1354_v24, 4  ;;  %v1366_v41 = vrot.slane %v1364_v25, 4 }
  0x83   : > { %v1369_v14 = vrot.slane %v1367_v1, 4  ;;  %v1370_v45 = vrot.slane %v4286_v5, 5  ;;  %v1355_v30 = vsel %vm4560_vm7, %v1353_v13, %v1354_v24 }
  0x84   : > { %v4576_v46 = vpack.c.b16 %v1465_v44, %v1464_v38  ;;  %v1358_v55 = vsel %vm4560_vm7, %v1356_v16, %v1357_v31  ;;  %v1368_v25 = vsel %vm4560_vm7, %v1366_v41, %v1367_v1  ;;  %v1462_v39 = vunpack.c.l.b16 %v1355_v30  ;;  %v3891_v30 = vld [vmem:[%s5506_s3 + $0x114] sm:$0xff] }
  0x85   : > { %v1371_v5 = vsel %vm4560_vm7, %v1369_v14, %v1370_v45  ;;  %v1463_v62 = vunpack.c.l.b16 %v1358_v55  ;;  %v1466_v53 = vunpack.c.l.b16 %v1368_v25  ;;  %v1374_v16 = vrot.slane %v4314_v34, 5  ;;  %2565 = vmatpush.bf16.msra.mxu3 %v3891_v30 }
  0x86   : > { %v3495_v41 = vrot.slane %v4311_v33, 9  ;;  %v1377_v45 = vrot.slane %v4334_v3, 5 }
  0x87   : > { %3395 = vmatmul.msk.bf16.gmra.mxu2 %vm946_vm3, %v4488_v60  ;;  %3491 = vmatmul.msk.bf16.gmra.mxu3 %vm946_vm3, %v4491_v17  ;;  %v1376_v14 = vrot.slane %v1374_v16, 4 }
  0x88   : > { %v1375_v33 = vsel %vm4560_vm7, %v3495_v41, %v1374_v16  ;;  %v1379_v16 = vrot.slane %v1377_v45, 4  ;;  %v1383_v41 = vrot.slane %v4382_v0, 5 }
  0x89   : > { %3483 = vmatmul.msk.bf16.gmra.mxu1 %vm946_vm3, %v4495_v11  ;;  %v1378_v3 = vsel %vm4560_vm7, %v1376_v14, %v1377_v45 }
  0x8a   : > { %v1469_v25 = vunpack.c.l.b16 %v1378_v3 }
  0x8d   : > { %3387 = vmatmul.msk.bf16.gmra.mxu0 %vm946_vm3, %v4500_v20 }
  0x97   : > { %3396 = vmatmul.msk.bf16.gmra.mxu2 %vm946_vm3, %v4539_v48  ;;  %3492 = vmatmul.msk.bf16.gmra.mxu3 %vm946_vm3, %v4542_v6 }
  0x99   : > { %3484 = vmatmul.msk.bf16.gmra.mxu1 %vm946_vm3, %v4545_v63 }
  0x9d   : > { %3388 = vmatmul.msk.bf16.gmra.mxu0 %vm946_vm3, %v4554_v57 }
  0xa6   : > { %v1255_v9 = vpop.f32.mrf.mxu1 }
  0xa7   : > { %3526 = vmatmul.msk.bf16.vlgmr.msrb.gmra.mxu2 %vm946_vm3, %v1492_v21  ;;  %3575 = vmatmul.msk.bf16.vlgmr.msrb.gmra.mxu3 %vm946_vm3, %v4283_v2 }
  0xa9   : > { %3658 = vmatmul.msk.bf16.vlgmr.msrb.gmra.mxu1 %vm946_vm3, %v4576_v46 }
  0xaa   : > { %v1008_v56 = vpop.f32.mrf.mxu0  ;;  %v1048_v43 = vpop.f32.mrf.mxu2 }
  0xab   : > { %v4586_v23 = vadd.f32 %v1255_v9, %v1008_v56  ;;  %v1295_v27 = vpop.f32.mrf.mxu3  ;;  %v1493_v9 = vpack.c.b16 %v1463_v62, %v1462_v39 }
  0xac   : > { %v4591_v2 = vadd.f32 %v1295_v27, %v1048_v43 }
  0xad   : > { %3616 = vmatmul.msk.bf16.vlgmr.msrb.gmra.mxu0 %vm946_vm3, %v4291_v8  ;;  %v1467_v8 = vunpack.c.l.b16 %v1371_v5 }
  0xae   : > { %v1257_v18 = vpop.f32.mrf.mxu1 }
  0xaf   : > { %v1495_v56 = vpack.c.b16 %v1467_v8, %v1466_v53  ;;  %v3895_v53 = vld [vmem:[%s5506_s3 + $0x138] sm:$0xff] }
  0xb0   : > { %2752 = vmatpush.bf16.msra.mxu0 %v3895_v53  ;;  %v3496_v53 = vrot.slane %v4406_v26, 9 }
  0xb2   : > { %v1010_v36 = vpop.f32.mrf.mxu0  ;;  %v1050_v44 = vpop.f32.mrf.mxu2 }
  0xb3   : > { %v4601_v38 = vadd.f32 %v1257_v18, %v1010_v36  ;;  %v1297_v21 = vpop.f32.mrf.mxu3  ;;  %v1468_v18 = vunpack.c.l.b16 %v1375_v33 }
  0xb4   : > { %v4603_v24 = vadd.f32 %v1297_v21, %v1050_v44  ;;  %v1380_v21 = vrot.slane %v4360_v28, 5 }
  0xb5   : > { %v4635_v8 = vpack.c.b16 %v1469_v25, %v1468_v18  ;;  %v1387_v25 = vrot.slane %v4413_v29, 5 }
  0xb6   : > { %v1260_v13 = vpop.f32.mrf.mxu1 }
  0xb7   : > { %3527 = vmatmul.msk.bf16.gmra.mxu2 %vm946_vm3, %v1493_v9  ;;  %3576 = vmatmul.msk.bf16.gmra.mxu3 %vm946_vm3, %v4331_v61  ;;  %v3887_v61 = vld [vmem:[%s5506_s3 + $0xf0] sm:$0xff] }
  0xb8   : > { %2348 = vmatpush.bf16.msra.mxu2 %v3887_v61 }
  0xb9   : > { %3659 = vmatmul.msk.bf16.gmra.mxu1 %vm946_vm3, %v1495_v56 }
  0xba   : > { %v1013_v1 = vpop.f32.mrf.mxu0  ;;  %v1053_v43 = vpop.f32.mrf.mxu2 }
  0xbb   : > { %v4610_v31 = vadd.f32 %v1260_v13, %v1013_v1  ;;  %v1300_v27 = vpop.f32.mrf.mxu3  ;;  %v1382_v1 = vrot.slane %v1380_v21, 4 }
  0xbc   : > { %v4616_v34 = vadd.f32 %v1300_v27, %v1053_v43 }
  0xbd   : > { %3617 = vmatmul.msk.bf16.gmra.mxu0 %vm946_vm3, %v4340_v4  ;;  %v1384_v27 = vsel %vm4560_vm7, %v1382_v1, %v1383_v41 }
  0xbe   : > { %v1262_v55 = vpop.f32.mrf.mxu1  ;;  %v1471_v45 = vunpack.c.l.b16 %v1384_v27 }
  0xc2   : > { %v1015_v4 = vpop.f32.mrf.mxu0  ;;  %v1055_v39 = vpop.f32.mrf.mxu2 }
  0xc3   : > { %v4628_v5 = vadd.f32 %v1262_v55, %v1015_v4  ;;  %v1302_v62 = vpop.f32.mrf.mxu3 }
  0xc4   : > { %v4630_v36 = vadd.f32 %v1302_v62, %v1055_v39 }
  0xc6   : > { %v1265_v44 = vpop.f32.mrf.mxu1 }
  0xc7   : > { %3528 = vmatmul.msk.bf16.gmra.mxu2 %vm946_vm3, %v4576_v46  ;;  %3577 = vmatmul.msk.bf16.gmra.mxu3 %vm946_vm3, %v4379_v59  ;;  %v1381_v59 = vsel %vm4560_vm7, %v1379_v16, %v1380_v21  ;;  %v1390_v21 = vrot.slane %v4439_v35, 5 }
  0xc8   : > { %v1470_v30 = vunpack.c.l.b16 %v1381_v59 }
  0xc9   : > { %3660 = vmatmul.msk.bf16.gmra.mxu1 %vm946_vm3, %v4635_v8 }
  0xca   : > { %v1018_v9 = vpop.f32.mrf.mxu0  ;;  %v1058_v14 = vpop.f32.mrf.mxu2  ;;  %v4659_v4 = vpack.c.b16 %v1471_v45, %v1470_v30  ;;  %v1393_v30 = vrot.slane %v4472_v19, 5 }
  0xcb   : > { %v4644_v13 = vadd.f32 %v1265_v44, %v1018_v9  ;;  %v1305_v43 = vpop.f32.mrf.mxu3  ;;  %v1389_v44 = vrot.slane %v1387_v25, 4 }
  0xcc   : > { %v4649_v28 = vadd.f32 %v1305_v43, %v1058_v14 }
  0xcd   : > { %3618 = vmatmul.msk.bf16.gmra.mxu0 %vm946_vm3, %v4391_v12  ;;  %v1391_v1 = vsel %vm4560_vm7, %v1389_v44, %v1390_v21 }
  0xce   : > { %v1267_v46 = vpop.f32.mrf.mxu1  ;;  %v1473_v26 = vunpack.c.l.b16 %v1391_v1  ;;  %v3890_v1 = vld [vmem:[%s5506_s3 + $0x10c] sm:$0xff] }
  0xcf   : > { %2566 = vmatpush.bf16.msra.mxu3 %v3890_v1 }
  0xd2   : > { %v1020_v61 = vpop.f32.mrf.mxu0  ;;  %v1060_v0 = vpop.f32.mrf.mxu2 }
  0xd3   : > { %v4655_v55 = vadd.f32 %v1267_v46, %v1020_v61  ;;  %v1307_v33 = vpop.f32.mrf.mxu3 }
  0xd4   : > { %v4657_v3 = vadd.f32 %v1307_v33, %v1060_v0  ;;  %v1396_v0 = vrot.slane %v4498_v22, 5 }
  0xd6   : > { %v1270_v18 = vpop.f32.mrf.mxu1 }
  0xd7   : > { %3529 = vmatmul.msk.bf16.gmra.mxu2 %vm946_vm3, %v1495_v56  ;;  %3578 = vmatmul.msk.bf16.gmra.mxu3 %vm946_vm3, %v4442_v32  ;;  %v1388_v32 = vsel %vm4560_vm7, %v3496_v53, %v1387_v25  ;;  %v1395_v25 = vrot.slane %v1393_v30, 4 }
  0xd8   : > { %v1472_v14 = vunpack.c.l.b16 %v1388_v32  ;;  %v3886_v32 = vld [vmem:[%s5506_s3 + $0xe8] sm:$0xff] }
  0xd9   : > { %3661 = vmatmul.msk.bf16.gmra.mxu1 %vm946_vm3, %v4659_v4  ;;  %2349 = vmatpush.bf16.msra.mxu2 %v3886_v32 }
  0xda   : > { %v1023_v39 = vpop.f32.mrf.mxu0  ;;  %v1063_v9 = vpop.f32.mrf.mxu2  ;;  %v4683_v27 = vpack.c.b16 %v1473_v26, %v1472_v14 }
  0xdb   : > { %v4667_v62 = vadd.f32 %v1270_v18, %v1023_v39  ;;  %v1310_v16 = vpop.f32.mrf.mxu3  ;;  %v1392_v18 = vrot.slane %v1390_v21, 4 }
  0xdc   : > { %v4673_v29 = vadd.f32 %v1310_v16, %v1063_v9  ;;  %v1397_v9 = vsel %vm4560_vm7, %v1395_v25, %v1396_v0 }
  0xdd   : > { %3619 = vmatmul.msk.bf16.gmra.mxu0 %vm946_vm3, %v4449_v42 }
  0xde   : > { %5541 = vst [vmem:[#allocation12_spill] sm:$0xff] %v4673_v29  ;;  %v1272_v56 = vpop.f32.mrf.mxu1 }
  0xe2   : > { %v1025_v41 = vpop.f32.mrf.mxu0  ;;  %v1065_v35 = vpop.f32.mrf.mxu2 }
  0xe3   : > { %v4679_v43 = vadd.f32 %v1272_v56, %v1025_v41  ;;  %v1312_v46 = vpop.f32.mrf.mxu3  ;;  %v1475_v56 = vunpack.c.l.b16 %v1397_v9 }
  0xe4   : > { %v4681_v59 = vadd.f32 %v1312_v46, %v1065_v35 }
  0xe6   : > { %5542 = vst [vmem:[#allocation13_spill] sm:$0xff] %v4681_v59  ;;  %v1275_v61 = vpop.f32.mrf.mxu1 }
  0xe7   : > { %3530 = vmatmul.msk.bf16.gmra.mxu2 %vm946_vm3, %v4635_v8  ;;  %3579 = vmatmul.msk.bf16.gmra.mxu3 %vm946_vm3, %v4495_v11  ;;  %v1394_v11 = vsel %vm4560_vm7, %v1392_v18, %v1393_v30  ;;  %v3958_v18 = vld [vmem:[%s4139_s19 + $0x50] sm:$0xf] }
  0xe8   : > { %v1474_v16 = vunpack.c.l.b16 %v1394_v11  ;;  %v3497_v25 = vrot.slane %v3958_v18, 9  ;;  %v3894_v11 = vld [vmem:[%s5506_s3 + $0x130] sm:$0xff] }
  0xe9   : > { %3662 = vmatmul.msk.bf16.gmra.mxu1 %vm946_vm3, %v4683_v27  ;;  %2753 = vmatpush.bf16.msra.mxu0 %v3894_v11 }
  0xea   : > { %v1028_v45 = vpop.f32.mrf.mxu0  ;;  %v1068_v39 = vpop.f32.mrf.mxu2  ;;  %v4713_v35 = vpack.c.b16 %v1475_v56, %v1474_v16 }
  0xeb   : > { %v4693_v33 = vadd.f32 %v1275_v61, %v1028_v45  ;;  %v1315_v53 = vpop.f32.mrf.mxu3  ;;  %v3957_v61 = vld [vmem:[%s4139_s19 + $0x54] sm:$0xf] }
  0xec   : > { %v4697_v19 = vadd.f32 %v1315_v53, %v1068_v39  ;;  %v1400_v30 = vrot.slane %v3957_v61, 5  ;;  %v3959_v53 = vld [vmem:[%s4139_s19 + $0x58] sm:$0xf] }
  0xed   : > { %3620 = vmatmul.msk.bf16.gmra.mxu0 %vm946_vm3, %v4500_v20 }
  0xee   : > { %5543 = vst [vmem:[#allocation14_spill] sm:$0xff] %v4697_v19  ;;  %v1277_v44 = vpop.f32.mrf.mxu1  ;;  %v1402_v39 = vrot.slane %v1400_v30, 4  ;;  %v1401_v56 = vsel %vm4560_vm7, %v3497_v25, %v1400_v30  ;;  %v4747_v30 = vld [vmem:[%s4139_s19 + $0x50] sm:$0xff] }
  0xef   : > { %5548 = vst [vmem:[#allocation19_spill] sm:$0xff] %v4747_v30 }
  0xf2   : > { %v1030_v22 = vpop.f32.mrf.mxu0  ;;  %v1070_v41 = vpop.f32.mrf.mxu2 }
  0xf3   : > { %v4703_v21 = vadd.f32 %v1277_v44, %v1030_v22  ;;  %v1317_v14 = vpop.f32.mrf.mxu3  ;;  %v1403_v44 = vrot.slane %v3959_v53, 5 }
  0xf4   : > { %v4711_v26 = vadd.f32 %v1317_v14, %v1070_v41  ;;  %v1476_v41 = vunpack.c.l.b16 %v1401_v56 }
  0xf5   : > { %v1404_v32 = vsel %vm4560_vm7, %v1402_v39, %v1403_v44  ;;  %v3962_v39 = vld [vmem:[%s4139_s19 + $0x60] sm:$0x1] }
  0xf6   : > { %5544 = vst [vmem:[#allocation15_spill] sm:$0xff] %v4711_v26  ;;  %v1280_v46 = vpop.f32.mrf.mxu1  ;;  %v1477_v14 = vunpack.c.l.b16 %v1404_v32  ;;  %v1405_v32 = vrot.slane %v1403_v44, 4 }
  0xf7   : > { %3531 = vmatmul.msk.bf16.gmra.mxu2 %vm946_vm3, %v4659_v4  ;;  %3580 = vmatmul.msk.bf16.gmra.mxu3 %vm946_vm3, %v4545_v63 }
  0xf8   : > { %v4741_v53 = vpack.c.b16 %v1477_v14, %v1476_v41 }
  0xf9   : > { %3663 = vmatmul.msk.bf16.gmra.mxu1 %vm946_vm3, %v4713_v35 }
  0xfa   : > { %v1033_v45 = vpop.f32.mrf.mxu0  ;;  %v1073_v9 = vpop.f32.mrf.mxu2  ;;  %5547 = vst [vmem:[#allocation18_spill] sm:$0xff] %v4741_v53 }
  0xfb   : > { %v4722_v0 = vadd.f32 %v1280_v46, %v1033_v45  ;;  %v1320_v22 = vpop.f32.mrf.mxu3 }
  0xfc   : > { %v4731_v63 = vadd.f32 %v1320_v22, %v1073_v9  ;;  %v3960_v9 = vld [vmem:[%s4139_s19 + $0x5c] sm:$0xf] }
  0xfd   : > { %3621 = vmatmul.msk.bf16.gmra.mxu0 %vm946_vm3, %v4554_v57  ;;  %v1406_v22 = vrot.slane %v3960_v9, 5 }
  0xfe   : > { %5545 = vst [vmem:[#allocation16_spill] sm:$0xff] %v4731_v63  ;;  %v1282_v16 = vpop.f32.mrf.mxu1 }
  0xff   : > { %v1407_v9 = vsel %vm4560_vm7, %v1405_v32, %v1406_v22 }
 0x102   : > { %v1035_v1 = vpop.f32.mrf.mxu0  ;;  %v1075_v61 = vpop.f32.mrf.mxu2 }
 0x103   : > { %v4737_v46 = vadd.f32 %v1282_v16, %v1035_v1  ;;  %v1322_v45 = vpop.f32.mrf.mxu3  ;;  %v1409_v16 = vrot.slane %v3962_v39, 5  ;;  %v1408_v1 = vrot.slane %v1406_v22, 4  ;;  %v4774_v22 = vld [vmem:[%s4139_s19 + $0x58] sm:$0xff] }
 0x104   : > { %v4739_v18 = vadd.f32 %v1322_v45, %v1075_v61  ;;  %5551 = vst [vmem:[#allocation22_spill] sm:$0xff] %v4774_v22 }
 0x105   : > { %v1410_v39 = vsel %vm4560_vm7, %v1408_v1, %v1409_v16 }
 0x106   : > { %5546 = vst [vmem:[#allocation17_spill] sm:$0xff] %v4739_v18  ;;  %v1285_v11 = vpop.f32.mrf.mxu1  ;;  %v1479_v44 = vunpack.c.l.b16 %v1410_v39 }
 0x107   : > { %3532 = vmatmul.msk.bf16.gmra.mxu2 %vm946_vm3, %v4683_v27  ;;  %3581 = vmatmul.msk.bf16.gmra.mxu3 %vm946_vm3, %v4747_v30 }
 0x109   : > { %3664 = vmatmul.msk.bf16.gmra.mxu1 %vm946_vm3, %v4741_v53 }
 0x10a   : > { %v1038_v25 = vpop.f32.mrf.mxu0  ;;  %v1078_v41 = vpop.f32.mrf.mxu2 }
 0x10b   : > { %v4754_v56 = vadd.f32 %v1285_v11, %v1038_v25  ;;  %v1325_v14 = vpop.f32.mrf.mxu3  ;;  %v1478_v25 = vunpack.c.l.b16 %v1407_v9 }
 0x10c   : > { %v4758_v61 = vadd.f32 %v1325_v14, %v1078_v41 }
 0x10d   : > { %3622 = vmatmul.msk.bf16.gmra.mxu0 %vm946_vm3, %v4191_v15  ;;  %v4768_v41 = vpack.c.b16 %v1479_v44, %v1478_v25 }
 0x10e   : > { %5549 = vst [vmem:[#allocation20_spill] sm:$0xff] %v4758_v61  ;;  %v1287_v45 = vpop.f32.mrf.mxu1  ;;  %v3963_v61 = vld [vmem:[%s4139_s19 + $0x68] sm:$0xf] }
 0x10f   : > { %v1413_v15 = vrot.slane %v3963_v61, 5 }
 0x111   : > { %v1415_v1 = vrot.slane %v1413_v15, 4 }
 0x112   : > { %v1040_v11 = vpop.f32.mrf.mxu0  ;;  %v1080_v63 = vpop.f32.mrf.mxu2 }
 0x113   : > { %v4764_v18 = vadd.f32 %v1287_v45, %v1040_v11  ;;  %v1327_v26 = vpop.f32.mrf.mxu3  ;;  %v3966_v45 = vld [vmem:[%s4139_s19 + $0x6c] sm:$0xf] }
 0x114   : > { %v4766_v19 = vadd.f32 %v1327_v26, %v1080_v63  ;;  %v3965_v26 = vld [vmem:[%s4139_s19 + $0x64] sm:$0xf]  ;;  %v1416_v9 = vrot.slane %v3966_v45, 5 }
 0x115   : > { %v3498_v63 = vrot.slane %v3965_v26, 9 }
 0x116   : > { %5550 = vst [vmem:[#allocation21_spill] sm:$0xff] %v4766_v19  ;;  %v1290_v14 = vpop.f32.mrf.mxu1 }
 0x117   : > { %3533 = vmatmul.msk.bf16.gmra.mxu2 %vm946_vm3, %v4713_v35  ;;  %3582 = vmatmul.msk.bf16.gmra.mxu3 %vm946_vm3, %v4774_v22  ;;  %v1414_v44 = vsel %vm4560_vm7, %v3498_v63, %v1413_v15 }
 0x118   : > { %v1480_v26 = vunpack.c.l.b16 %v1414_v44 }
 0x119   : > { %3665 = vmatmul.msk.bf16.gmra.mxu1 %vm946_vm3, %v4768_v41 }
 0x11a   : > { %v1043_v16 = vpop.f32.mrf.mxu0  ;;  %v1083_v61 = vpop.f32.mrf.mxu2 }
 0x11b   : > { %v4780_v32 = vadd.f32 %v1290_v14, %v1043_v16  ;;  %v1330_v39 = vpop.f32.mrf.mxu3  ;;  %v1417_v14 = vsel %vm4560_vm7, %v1415_v1, %v1416_v9 }
 0x11c   : > { %v4786_v11 = vadd.f32 %v1330_v39, %v1083_v61  ;;  %v1481_v19 = vunpack.c.l.b16 %v1417_v14  ;;  %v3899_v61 = vld [vmem:[%s5509_s6 + $0x18] sm:$0xff] }
 0x11d   : > { %3623 = vmatmul.msk.bf16.gmra.mxu0 %vm946_vm3, %v4241_v7  ;;  %v3885_v7 = vld [vmem:[%s5506_s3 + $0xe0] sm:$0xff]  ;;  %3078 = vmatpush.bf16.msra.mxu1 %v3899_v61 }
 0x11e   : > { %5552 = vst [vmem:[#allocation23_spill] sm:$0xff] %v4786_v11  ;;  %v1292_v25 = vpop.f32.mrf.mxu1  ;;  %2350 = vmatpush.bf16.msra.mxu2 %v3885_v7  ;;  %v4802_v1 = vpack.c.b16 %v1481_v19, %v1480_v26  ;;  %v4811_v11 = vld [vmem:[%s4139_s19 + $0x64] sm:$0xff]  ;;  %v3969_v7 = vld [vmem:[%s4139_s19 + $0x74] sm:$0x1]  ;;  %v1418_v26 = vrot.slane %v1416_v9, 4 }
 0x11f   : > { %5554 = vst [vmem:[#allocation25_spill] sm:$0xff] %v4811_v11  ;;  %v1422_v19 = vrot.slane %v3969_v7, 5  ;;  %v3893_v9 = vld [vmem:[%s5506_s3 + $0x128] sm:$0xff] }
 0x120   : > { %2754 = vmatpush.bf16.msra.mxu0 %v3893_v9 }
 0x122   : > { %v1045_v16 = vpop.f32.mrf.mxu0  ;;  %v1085_v39 = vpop.f32.mrf.mxu2 }
 0x123   : > { %v4792_v45 = vadd.f32 %v1292_v25, %v1045_v16  ;;  %v1332_v15 = vpop.f32.mrf.mxu3  ;;  %v3967_v25 = vld [vmem:[%s4139_s19 + $0x70] sm:$0xf]  ;;  %v3889_v16 = vld [vmem:[%s5506_s3 + $0x104] sm:$0xff] }
 0x124   : > { %v4800_v63 = vadd.f32 %v1332_v15, %v1085_v39  ;;  %v1419_v14 = vrot.slane %v3967_v25, 5  ;;  %2567 = vmatpush.bf16.msra.mxu3 %v3889_v16 }
 0x126   : > { %5553 = vst [vmem:[#allocation24_spill] sm:$0xff] %v4800_v63  ;;  %v2176_v44 = vpop.f32.mrf.mxu1  ;;  %v1421_v61 = vrot.slane %v1419_v14, 4 }
 0x127   : > { %3534 = vmatmul.msk.bf16.gmra.mxu2 %vm946_vm3, %v4741_v53  ;;  %3583 = vmatmul.msk.bf16.gmra.mxu3 %vm946_vm3, %v4811_v11  ;;  %v1420_v11 = vsel %vm4560_vm7, %v1418_v26, %v1419_v14 }
 0x128   : > { %v1423_v16 = vsel %vm4560_vm7, %v1421_v61, %v1422_v19  ;;  %v1482_v59 = vunpack.c.l.b16 %v1420_v11 }
 0x129   : > { %3666 = vmatmul.msk.bf16.gmra.mxu1 %vm946_vm3, %v4802_v1 }
 0x12a   : > { %v1989_v39 = vpop.f32.mrf.mxu0  ;;  %v1595_v15 = vpop.f32.mrf.mxu2 }
 0x12b   : > { %v1772_v25 = vpop.f32.mrf.mxu3  ;;  %v1675_v63 = vadd.f32 %v1595_v15, %v4586_v23 }
 0x12d   : > { %3624 = vmatmul.msk.bf16.gmra.mxu0 %vm946_vm3, %v4279_v58  ;;  %v1852_v22 = vadd.f32 %v1772_v25, %v1675_v63  ;;  %v1483_v58 = vunpack.c.l.b16 %v1423_v16  ;;  %v3970_v25 = vld [vmem:[%s4139_s19 + $0x7c] sm:$0xf] }
 0x12e   : > { %v2178_v53 = vpop.f32.mrf.mxu1  ;;  %v1426_v29 = vrot.slane %v3970_v25, 5 }
 0x12f   : > { %v2069_v7 = vadd.f32 %v1989_v39, %v1852_v22  ;;  %v4831_v26 = vpack.c.b16 %v1483_v58, %v1482_v59  ;;  %v3972_v39 = vld [vmem:[%s4139_s19 + $0x80] sm:$0xf] }
 0x130   : > { %v1428_v59 = vrot.slane %v1426_v29, 4  ;;  %v1429_v16 = vrot.slane %v3972_v39, 5 }
 0x131   : > { %v4828_v23 = vadd.f32 %v2176_v44, %v2069_v7 }
 0x132   : > { %v1991_v30 = vpop.f32.mrf.mxu0  ;;  %v1597_v63 = vpop.f32.mrf.mxu2 }
 0x133   : > { %5555 = vst [vmem:[#allocation26_spill] sm:$0xff] %v4828_v23  ;;  %v1774_v15 = vpop.f32.mrf.mxu3  ;;  %v1676_v14 = vadd.f32 %v1597_v63, %v4601_v38  ;;  %v3971_v38 = vld [vmem:[%s4139_s19 + $0x78] sm:$0xf] }
 0x134   : > { %v3499_v58 = vrot.slane %v3971_v38, 9 }
 0x135   : > { %v1853_v19 = vadd.f32 %v1774_v15, %v1676_v14 }
 0x136   : > { %v2181_v61 = vpop.f32.mrf.mxu1  ;;  %v1427_v15 = vsel %vm4560_vm7, %v3499_v58, %v1426_v29  ;;  %v1431_v58 = vrot.slane %v1429_v16, 4 }
 0x137   : > { %3535 = vmatmul.msk.bf16.gmra.mxu2 %vm946_vm3, %v4768_v41  ;;  %3584 = vmatmul.msk.bf16.gmra.mxu3 %vm946_vm3, %v4328_v54  ;;  %v2070_v22 = vadd.f32 %v1991_v30, %v1853_v19  ;;  %v1484_v25 = vunpack.c.l.b16 %v1427_v15 }
 0x139   : > { %3667 = vmatmul.msk.bf16.gmra.mxu1 %vm946_vm3, %v4831_v26  ;;  %v4840_v44 = vadd.f32 %v2178_v53, %v2070_v22  ;;  %v1430_v53 = vsel %vm4560_vm7, %v1428_v59, %v1429_v16 }
 0x13a   : > { %v1994_v11 = vpop.f32.mrf.mxu0  ;;  %v1600_v9 = vpop.f32.mrf.mxu2  ;;  %v1485_v22 = vunpack.c.l.b16 %v1430_v53 }
 0x13b   : > { %5556 = vst [vmem:[#allocation27_spill] sm:$0xff] %v4840_v44  ;;  %v1777_v7 = vpop.f32.mrf.mxu3  ;;  %v1677_v63 = vadd.f32 %v1600_v9, %v4610_v31 }
 0x13d   : > { %3625 = vmatmul.msk.bf16.gmra.mxu0 %vm946_vm3, %v4325_v50  ;;  %v1854_v54 = vadd.f32 %v1777_v7, %v1677_v63  ;;  %v4854_v50 = vpack.c.b16 %v1485_v22, %v1484_v25  ;;  %v1432_v7 = vrot.slane %v4343_v10, 5 }
 0x13e   : > { %v2183_v30 = vpop.f32.mrf.mxu1 }
 0x13f   : > { %v2071_v14 = vadd.f32 %v1994_v11, %v1854_v54  ;;  %v1433_v54 = vsel %vm4560_vm7, %v1431_v58, %v1432_v7  ;;  %v3888_v58 = vld [vmem:[%s5506_s3 + $0xfc] sm:$0xff] }
 0x140   : > { %v1486_v16 = vunpack.c.l.b16 %v1433_v54  ;;  %2568 = vmatpush.bf16.msra.mxu3 %v3888_v58 }
 0x141   : > { %v4851_v38 = vadd.f32 %v2181_v61, %v2071_v14  ;;  %v1435_v61 = vrot.slane %v4365_v40, 5 }
 0x142   : > { %v1996_v19 = vpop.f32.mrf.mxu0  ;;  %v1602_v39 = vpop.f32.mrf.mxu2 }
 0x143   : > { %v1779_v44 = vpop.f32.mrf.mxu3  ;;  %v1678_v23 = vadd.f32 %v1602_v39, %v4628_v5 }
 0x145   : > { %v1855_v31 = vadd.f32 %v1779_v44, %v1678_v23  ;;  %v1434_v23 = vrot.slane %v1432_v7, 4 }
 0x146   : > { %v2186_v9 = vpop.f32.mrf.mxu1 }
 0x147   : > { %3536 = vmatmul.msk.bf16.gmra.mxu2 %vm946_vm3, %v4802_v1  ;;  %3585 = vmatmul.msk.bf16.gmra.mxu3 %vm946_vm3, %v4376_v52  ;;  %v2072_v29 = vadd.f32 %v1996_v19, %v1855_v31  ;;  %v1436_v40 = vsel %vm4560_vm7, %v1434_v23, %v1435_v61 }
 0x148   : > { %v1487_v53 = vunpack.c.l.b16 %v1436_v40 }
 0x149   : > { %3668 = vmatmul.msk.bf16.gmra.mxu1 %vm946_vm3, %v4854_v50  ;;  %v4864_v5 = vadd.f32 %v2183_v30, %v2072_v29  ;;  %v5557_v29 = vld [vmem:[#allocation7_spill] sm:$0xff] }
 0x14a   : > { %v1999_v11 = vpop.f32.mrf.mxu0  ;;  %v1605_v44 = vpop.f32.mrf.mxu2  ;;  %v1439_v7 = vrot.slane %v5557_v29, 5 }
 0x14b   : > { %v1782_v10 = vpop.f32.mrf.mxu3  ;;  %v1679_v59 = vadd.f32 %v1605_v44, %v4644_v13  ;;  %v4877_v13 = vpack.c.b16 %v1487_v53, %v1486_v16  ;;  %v5560_v44 = vld [vmem:[#allocation6_spill] sm:$0xff] }
 0x14d   : > { %3626 = vmatmul.msk.bf16.gmra.mxu0 %vm946_vm3, %v4373_v49  ;;  %v1856_v52 = vadd.f32 %v1782_v10, %v1679_v59  ;;  %v3500_v10 = vrot.slane %v5560_v44, 9  ;;  %v1441_v59 = vrot.slane %v1439_v7, 4 }
 0x14e   : > { %v2188_v63 = vpop.f32.mrf.mxu1 }
 0x14f   : > { %v2073_v30 = vadd.f32 %v1999_v11, %v1856_v52  ;;  %v3884_v11 = vld [vmem:[%s5506_s3 + $0xd8] sm:$0xff]  ;;  %v5561_v52 = vld [vmem:[#allocation8_spill] sm:$0xff] }
 0x150   : > { %2351 = vmatpush.bf16.msra.mxu2 %v3884_v11  ;;  %v1442_v54 = vrot.slane %v5561_v52, 5  ;;  %v5564_v52 = vld [vmem:[#allocation11_spill] sm:$0xff] }
 0x151   : > { %v4873_v14 = vadd.f32 %v2186_v9, %v2073_v30 }
 0x152   : > { %v2001_v15 = vpop.f32.mrf.mxu0  ;;  %v1607_v19 = vpop.f32.mrf.mxu2 }
 0x153   : > { %v1784_v25 = vpop.f32.mrf.mxu3  ;;  %v1680_v22 = vadd.f32 %v1607_v19, %v4655_v55  ;;  %v5559_v55 = vld [vmem:[#allocation10_spill] sm:$0xff] }
 0x155   : > { %v1857_v39 = vadd.f32 %v1784_v25, %v1680_v22  ;;  %v1443_v25 = vsel %vm4560_vm7, %v1441_v59, %v1442_v54 }
 0x156   : > { %v2191_v31 = vpop.f32.mrf.mxu1  ;;  %v1489_v11 = vunpack.c.l.b16 %v1443_v25 }
 0x157   : > { %3537 = vmatmul.msk.bf16.gmra.mxu2 %vm946_vm3, %v4831_v26  ;;  %3586 = vmatmul.msk.bf16.gmra.mxu3 %vm946_vm3, %v5559_v55  ;;  %v2074_v9 = vadd.f32 %v2001_v15, %v1857_v39  ;;  %v5562_v15 = vld [vmem:[#allocation9_spill] sm:$0xff]  ;;  %v3892_v55 = vld [vmem:[%s5506_s3 + $0x120] sm:$0xff] }
 0x158   : > { %2755 = vmatpush.bf16.msra.mxu0 %v3892_v55 }
 0x159   : > { %3669 = vmatmul.msk.bf16.gmra.mxu1 %vm946_vm3, %v4877_v13  ;;  %v4896_v23 = vadd.f32 %v2188_v63, %v2074_v9  ;;  %v1440_v63 = vsel %vm4560_vm7, %v3500_v10, %v1439_v7 }
 0x15a   : > { %v2004_v61 = vpop.f32.mrf.mxu0  ;;  %v1610_v40 = vpop.f32.mrf.mxu2  ;;  %v1488_v29 = vunpack.c.l.b16 %v1440_v63 }
 0x15b   : > { %v1787_v30 = vpop.f32.mrf.mxu3  ;;  %v1681_v16 = vadd.f32 %v1610_v40, %v4667_v62  ;;  %v3898_v62 = vld [vmem:[%s5509_s6 + $0x10] sm:$0xff]  ;;  %v1445_v40 = vrot.slane %v5564_v52, 5 }
 0x15c   : > { %3079 = vmatpush.bf16.msra.mxu1 %v3898_v62 }
 0x15d   : > { %3627 = vmatmul.msk.bf16.gmra.mxu0 %vm946_vm3, %v5562_v15  ;;  %v1858_v53 = vadd.f32 %v1787_v30, %v1681_v16  ;;  %v1447_v63 = vrot.slane %v1445_v40, 4 }
 0x15e   : > { %v2193_v19 = vpop.f32.mrf.mxu1 }
 0x15f   : > { %v2075_v22 = vadd.f32 %v2004_v61, %v1858_v53  ;;  %v4919_v61 = vpack.c.b16 %v1489_v11, %v1488_v29  ;;  %v1444_v53 = vrot.slane %v1442_v54, 4  ;;  %v488_v29 = vld [vmem:[%s4931_s14 + $0x4] sm:$0xf] }
 0x161   : > { %v4912_v9 = vadd.f32 %v2191_v31, %v2075_v22  ;;  %v1446_v62 = vsel %vm4560_vm7, %v1444_v53, %v1445_v40 }
 0x162   : > { %v2006_v39 = vpop.f32.mrf.mxu0  ;;  %v1612_v58 = vpop.f32.mrf.mxu2  ;;  %v1490_v52 = vunpack.c.l.b16 %v1446_v62 }
 0x163   : > { %5563 = vst [vmem:[#allocation7_spill] sm:$0xff] %v4912_v9  ;;  %v1789_v7 = vpop.f32.mrf.mxu3  ;;  %v1682_v44 = vadd.f32 %v1612_v58, %v4679_v43  ;;  %v1448_v43 = vrot.slane %v4480_v47, 5  ;;  %v2104_v9 = vrot.slane %v488_v29, 5 }
 0x165   : > { %v1859_v10 = vadd.f32 %v1789_v7, %v1682_v44  ;;  %v1449_v47 = vsel %vm4560_vm7, %v1447_v63, %v1448_v43  ;;  %v1894_v7 = vshll.u32 %v488_v29, 16  ;;  %v1898_v44 = vshrl.u32 %v488_v29, 16 }
 0x166   : > { %v2196_v59 = vpop.f32.mrf.mxu1 }
 0x167   : > { %3538 = vmatmul.msk.bf16.gmra.mxu2 %vm946_vm3, %v4854_v50  ;;  %3587 = vmatmul.msk.bf16.gmra.mxu3 %vm946_vm3, %v4491_v17  ;;  %v2076_v31 = vadd.f32 %v2006_v39, %v1859_v10  ;;  %v487_v39 = vld [vmem:[%s4931_s14] sm:$0xf]  ;;  %v1896_v53 = vrot.slane %v1894_v7, 5 }
 0x168   : > { %v1885_v54 = vshrl.u32 %v487_v39, 16  ;;  %v1888_v58 = vshll.u32 %v487_v39, 16 }
 0x169   : > { %3670 = vmatmul.msk.bf16.gmra.mxu1 %vm946_vm3, %v4919_v61  ;;  %v4934_v16 = vadd.f32 %v2193_v19, %v2076_v31 }
 0x16a   : > { %v2009_v30 = vpop.f32.mrf.mxu0  ;;  %v1615_v25 = vpop.f32.mrf.mxu2  ;;  %v1890_v40 = vrot.slane %v1888_v58, 5 }
 0x16b   : > { %5565 = vst [vmem:[#allocation10_spill] sm:$0xff] %v4934_v16  ;;  %v1792_v17 = vpop.f32.mrf.mxu3  ;;  %v1683_v22 = vadd.f32 %v1615_v25, %v4693_v33  ;;  %v1491_v33 = vunpack.c.l.b16 %v1449_v47  ;;  %v1900_v16 = vrot.slane %v1898_v44, 4 }
 0x16d   : > { %3628 = vmatmul.msk.bf16.gmra.mxu0 %vm946_vm3, %v4488_v60  ;;  %v1860_v11 = vadd.f32 %v1792_v17, %v1683_v22  ;;  %v1887_v22 = vrot.slane %v1885_v54, 4  ;;  %v4950_v43 = vpack.c.b16 %v1491_v33, %v1490_v52  ;;  %v1901_v47 = vor.u32 %v1900_v16, %v1896_v53 }
 0x16e   : > { %v4941_v55 = vpop.f32.mrf.mxu1 }
 0x16f   : > { %5566 = vst [vmem:[#allocation6_spill] sm:$0xff] %v4941_v55  ;;  %v2077_v19 = vadd.f32 %v2009_v30, %v1860_v11  ;;  %v489_v30 = vld [vmem:[%s4931_s14 + $0x8] sm:$0xf]  ;;  %v1891_v62 = vor.u32 %v1890_v40, %v1887_v22 }
 0x170   : > { %v2107_v58 = vrot.slane %v489_v30, 5 }
 0x171   : > { %v4947_v31 = vadd.f32 %v2196_v59, %v2077_v19  ;;  %v3632_v19 = vrot.slane %v487_v39, 9  ;;  %v1892_v44 = vrot.slane %v1891_v62, 4 }
 0x172   : > { %v2011_v10 = vpop.f32.mrf.mxu0  ;;  %v1617_v25 = vpop.f32.mrf.mxu2 }
 0x173   : > { %5567 = vst [vmem:[#allocation8_spill] sm:$0xff] %v4947_v31  ;;  %v1794_v17 = vpop.f32.mrf.mxu3  ;;  %v1684_v55 = vadd.f32 %v1617_v25, %v4703_v21  ;;  %v1904_v21 = vshll.u32 %v489_v30, 16  ;;  %v2105_v25 = vsel %vm4560_vm7, %v3632_v19, %v2104_v9  ;;  %v1897_v40 = vsel %vm4176_vm4, %v1892_v44, %v1896_v53 }
 0x175   : > { %v1861_v63 = vadd.f32 %v1794_v17, %v1684_v55  ;;  %v2106_v55 = vrot.slane %v2104_v9, 4  ;;  %v1906_v52 = vrot.slane %v1904_v21, 5  ;;  %v490_v17 = vld [vmem:[%s4931_s14 + $0xc] sm:$0xf] }
 0x176   : > { %v2201_v11 = vpop.f32.mrf.mxu1  ;;  %v2110_v31 = vrot.slane %v490_v17, 5 }
 0x177   : > { %3539 = vmatmul.msk.bf16.gmra.mxu2 %vm946_vm3, %v4877_v13  ;;  %3588 = vmatmul.msk.bf16.gmra.mxu3 %vm946_vm3, %v4542_v6  ;;  %v4957_v59 = vadd.f32 %v2011_v10, %v1861_v63  ;;  %v1902_v10 = vrot.slane %v1901_v47, 4  ;;  %v2108_v39 = vsel %vm4560_vm7, %v2106_v55, %v2107_v58  ;;  %v1908_v63 = vshrl.u32 %v489_v30, 16 }
 0x178   : > { %v2125_v47 = vunpack.c.l.b16 %v2105_v25  ;;  %v2126_v21 = vunpack.c.l.b16 %v2108_v39 }
 0x179   : > { %5568 = vst [vmem:[#allocation9_spill] sm:$0xff] %v4957_v59  ;;  %3671 = vmatmul.msk.bf16.gmra.mxu1 %vm946_vm3, %v4950_v43  ;;  %v491_v59 = vld [vmem:[%s4931_s14 + $0x10] sm:$0x1] }
 0x17a   : > { %v2014_v54 = vpop.f32.mrf.mxu0  ;;  %v1620_v29 = vpop.f32.mrf.mxu2  ;;  %v4981_v44 = vpack.c.b16 %v2126_v21, %v2125_v47  ;;  %v2109_v47 = vrot.slane %v2107_v58, 4  ;;  %v2112_v21 = vrot.slane %v2110_v31, 4 }
 0x17b   : > { %v1797_v7 = vpop.f32.mrf.mxu3  ;;  %v1685_v6 = vadd.f32 %v1620_v29, %v4722_v0  ;;  %v1907_v0 = vsel %vm4176_vm4, %v1902_v10, %v1906_v52  ;;  %v1914_v29 = vshll.u32 %v490_v17, 16  ;;  %v1910_v10 = vrot.slane %v1908_v63, 4 }
 0x17c   : > { %v1939_v53 = vunpack.c.l.b16 %v1907_v0  ;;  %v1924_v63 = vshll.u32 %v491_v59, 16 }
 0x17d   : > { %3629 = vmatmul.msk.bf16.gmra.mxu0 %vm946_vm3, %v4539_v48  ;;  %v1862_v16 = vadd.f32 %v1797_v7, %v1685_v6  ;;  %v1918_v7 = vshrl.u32 %v490_v17, 16  ;;  %v1916_v30 = vrot.slane %v1914_v29, 5  ;;  %v2113_v17 = vrot.slane %v491_v59, 5 }
 0x17e   : > { %v4964_v33 = vpop.f32.mrf.mxu1 }
 0x17f   : > { %5569 = vst [vmem:[#allocation11_spill] sm:$0xff] %v4964_v33  ;;  %v2079_v22 = vadd.f32 %v2014_v54, %v1862_v16  ;;  %v4979_v54 = vld [vmem:[%s4931_s14] sm:$0xff]  ;;  %v1938_v16 = vunpack.c.l.b16 %v1897_v40  ;;  %v1920_v33 = vrot.slane %v1918_v7, 4  ;;  %v1911_v40 = vor.u32 %v1910_v10, %v1906_v52 }
 0x180   : > { %v2111_v52 = vsel %vm4560_vm7, %v2109_v47, %v2110_v31  ;;  %v2114_v59 = vsel %vm4560_vm7, %v2112_v21, %v2113_v17  ;;  %v5011_v31 = vld [vmem:[%s4931_s14 + $0x8] sm:$0xff] }
 0x181   : > { %v4975_v9 = vadd.f32 %v2201_v11, %v2079_v22  ;;  %v4990_v11 = vpack.c.b16 %v1939_v53, %v1938_v16  ;;  %v1921_v0 = vor.u32 %v1920_v33, %v1916_v30 }
 0x182   : > { %v2016_v62 = vpop.f32.mrf.mxu0  ;;  %v1622_v19 = vpop.f32.mrf.mxu2 }
 0x183   : > { %v1799_v6 = vpop.f32.mrf.mxu3  ;;  %v1686_v55 = vadd.f32 %v1622_v19, %v4737_v46  ;;  %v1912_v19 = vrot.slane %v1911_v40, 4  ;;  %v2128_v40 = vunpack.c.l.b16 %v2114_v59 }
 0x185   : > { %v1863_v25 = vadd.f32 %v1799_v6, %v1686_v55  ;;  %v1922_v6 = vrot.slane %v1921_v0, 4  ;;  %v1926_v55 = vrot.slane %v1924_v63, 5  ;;  %v1917_v10 = vsel %vm4176_vm4, %v1912_v19, %v1916_v30 }
 0x186   : > { %v2206_v39 = vpop.f32.mrf.mxu1  ;;  %v1940_v47 = vunpack.c.l.b16 %v1917_v10  ;;  %v3897_v10 = vld [vmem:[%s5509_s6 + $0x8] sm:$0xff] }
 0x187   : > { %3540 = vmatmul.msk.bf16.gmra.mxu2 %vm946_vm3, %v4919_v61  ;;  %3589 = vmatmul.msk.bf16.gmra.mxu3 %vm946_vm3, %v4979_v54  ;;  %v4988_v46 = vadd.f32 %v2016_v62, %v1863_v25  ;;  %v2127_v25 = vunpack.c.l.b16 %v2111_v52 }
 0x188   : > { %3080 = vmatpush.bf16.msra.mxu1 %v3897_v10 }
 0x189   : > { %3672 = vmatmul.msk.bf16.gmra.mxu1 %vm946_vm3, %v4981_v44 }
 0x18a   : > { %v2019_v22 = vpop.f32.mrf.mxu0  ;;  %v1625_v29 = vpop.f32.mrf.mxu2 }
 0x18b   : > { %v1802_v7 = vpop.f32.mrf.mxu3  ;;  %v1687_v62 = vadd.f32 %v1625_v29, %v4754_v56  ;;  %v1927_v56 = vsel %vm4176_vm4, %v1922_v6, %v1926_v55 }
 0x18c   : > { %v1941_v21 = vunpack.c.l.b16 %v1927_v56 }
 0x18d   : > { %3630 = vmatmul.msk.bf16.gmra.mxu0 %vm946_vm3, %v4990_v11  ;;  %v1864_v16 = vadd.f32 %v1802_v7, %v1687_v62 }
 0x18e   : > { %v4997_v53 = vpop.f32.mrf.mxu1 }
 0x18f   : > { %v2081_v58 = vadd.f32 %v2019_v22, %v1864_v16  ;;  %v5013_v22 = vpack.c.b16 %v2128_v40, %v2127_v25 }
 0x191   : > { %v5007_v0 = vadd.f32 %v2206_v39, %v2081_v58  ;;  %v5021_v39 = vpack.c.b16 %v1941_v21, %v1940_v47 }
 0x192   : > { %v2021_v33 = vpop.f32.mrf.mxu0  ;;  %v1627_v63 = vpop.f32.mrf.mxu2 }
 0x193   : > { %v1804_v29 = vpop.f32.mrf.mxu3  ;;  %v1688_v7 = vadd.f32 %v1627_v63, %v4764_v18 }
 0x195   : > { %v1865_v17 = vadd.f32 %v1804_v29, %v1688_v7  ;;  %v3973_v7 = vld [vmem:[%s4139_s19 + $0x28] sm:$0xff] }
 0x196   : > { %v2211_v62 = vpop.f32.mrf.mxu1 }
 0x197   : > { %3541 = vmatmul.msk.bf16.gmra.mxu2 %vm946_vm3, %v4950_v43  ;;  %3590 = vmatmul.msk.bf16.gmra.mxu3 %vm946_vm3, %v5011_v31  ;;  %v5019_v30 = vadd.f32 %v2021_v33, %v1865_v17 }
 0x199   : > { %3673 = vmatmul.msk.bf16.gmra.mxu1 %vm946_vm3, %v5013_v22  ;;  %v2269_v51 = vadd.f32 %v4997_v53, %v5019_v30 }
 0x19a   : > { %v2024_v19 = vpop.f32.mrf.mxu0  ;;  %v1630_v18 = vpop.f32.mrf.mxu2 }
 0x19b   : > { %v1807_v6 = vpop.f32.mrf.mxu3  ;;  %v1689_v55 = vadd.f32 %v1630_v18, %v4780_v32 }
 0x19d   : > { %3631 = vmatmul.msk.bf16.gmra.mxu0 %vm946_vm3, %v5021_v39  ;;  %v1866_v16 = vadd.f32 %v1807_v6, %v1689_v55 }
 0x19e   : > { %v5028_v52 = vpop.f32.mrf.mxu1 }
 0x19f   : > { %v2083_v59 = vadd.f32 %v2024_v19, %v1866_v16 }
 0x1a1   : > { %v5030_v33 = vadd.f32 %v2211_v62, %v2083_v59 }
 0x1a2   : > { %v2026_v58 = vpop.f32.mrf.mxu0  ;;  %v1632_v56 = vpop.f32.mrf.mxu2 }
 0x1a3   : > { %v1809_v25 = vpop.f32.mrf.mxu3  ;;  %v1690_v40 = vadd.f32 %v1632_v56, %v4792_v45  ;;  %v3974_v56 = vld [vmem:[%s4139_s19 + $0x30] sm:$0xff] }
 0x1a5   : > { %v1867_v63 = vadd.f32 %v1809_v25, %v1690_v40 }
 0x1a6   : > { %v2216_v29 = vpop.f32.mrf.mxu1 }
 0x1a7   : > { %3707 = vmatmul.msk.bf16.vlgmr.msra.gmra.mxu2 %vm946_vm3, %v3973_v7  ;;  %3748 = vmatmul.msk.bf16.vlgmr.msra.gmra.mxu3 %vm946_vm3, %v4391_v12  ;;  %v5040_v32 = vadd.f32 %v2026_v58, %v1867_v63 }
 0x1aa   : > { %v2029_v47 = vpop.f32.mrf.mxu0  ;;  %v1635_v21 = vpop.f32.mrf.mxu2 }
 0x1ab   : > { %v1812_v17 = vpop.f32.mrf.mxu3  ;;  %v1691_v45 = vadd.f32 %v1635_v21, %v4591_v2 }
 0x1ad   : > { %3790 = vmatmul.msk.bf16.vlgmr.msra.gmra.mxu0 %vm946_vm3, %v4635_v8  ;;  %v1868_v62 = vadd.f32 %v1812_v17, %v1691_v45 }
 0x1ae   : > { %v5045_v19 = vpop.f32.mrf.mxu1 }
 0x1af   : > { %v2085_v18 = vadd.f32 %v2029_v47, %v1868_v62 }
 0x1b1   : > { %v5047_v55 = vadd.f32 %v2216_v29, %v2085_v18 }
 0x1b2   : > { %v2031_v6 = vpop.f32.mrf.mxu0  ;;  %v1637_v16 = vpop.f32.mrf.mxu2 }
 0x1b3   : > { %v1814_v12 = vpop.f32.mrf.mxu3  ;;  %v1692_v59 = vadd.f32 %v1637_v16, %v4603_v24 }
 0x1b5   : > { %v1869_v58 = vadd.f32 %v1814_v12, %v1692_v59 }
 0x1b6   : > { %v2221_v10 = vpop.f32.mrf.mxu1 }
 0x1b7   : > { %3708 = vmatmul.msk.bf16.gmra.mxu2 %vm946_vm3, %v3974_v56  ;;  %3749 = vmatmul.msk.bf16.gmra.mxu3 %vm946_vm3, %v4449_v42  ;;  %v5054_v2 = vadd.f32 %v2031_v6, %v1869_v58  ;;  %v3975_v6 = vld [vmem:[%s4139_s19 + $0x3c] sm:$0xff] }
 0x1ba   : > { %v2034_v8 = vpop.f32.mrf.mxu0  ;;  %v1640_v25 = vpop.f32.mrf.mxu2 }
 0x1bb   : > { %v1817_v40 = vpop.f32.mrf.mxu3  ;;  %v1693_v63 = vadd.f32 %v1640_v25, %v4616_v34 }
 0x1bd   : > { %3791 = vmatmul.msk.bf16.gmra.mxu0 %vm946_vm3, %v4659_v4  ;;  %v1870_v24 = vadd.f32 %v1817_v40, %v1693_v63 }
 0x1be   : > { %v5059_v29 = vpop.f32.mrf.mxu1 }
 0x1bf   : > { %v2087_v7 = vadd.f32 %v2034_v8, %v1870_v24 }
 0x1c1   : > { %v5061_v21 = vadd.f32 %v2221_v10, %v2087_v7  ;;  %v3976_v7 = vld [vmem:[%s4139_s19 + $0x44] sm:$0xff] }
 0x1c2   : > { %v2036_v47 = vpop.f32.mrf.mxu0  ;;  %v1642_v17 = vpop.f32.mrf.mxu2 }
 0x1c3   : > { %v1819_v42 = vpop.f32.mrf.mxu3  ;;  %v1694_v45 = vadd.f32 %v1642_v17, %v4630_v36 }
 0x1c5   : > { %v1871_v62 = vadd.f32 %v1819_v42, %v1694_v45  ;;  %v5570_v42 = vld [vmem:[#allocation12_spill] sm:$0xff] }
 0x1c6   : > { %v2226_v18 = vpop.f32.mrf.mxu1 }
 0x1c7   : > { %3709 = vmatmul.msk.bf16.gmra.mxu2 %vm946_vm3, %v3975_v6  ;;  %3750 = vmatmul.msk.bf16.gmra.mxu3 %vm946_vm3, %v4500_v20  ;;  %v5068_v34 = vadd.f32 %v2036_v47, %v1871_v62 }
 0x1ca   : > { %v2039_v4 = vpop.f32.mrf.mxu0  ;;  %v1645_v16 = vpop.f32.mrf.mxu2 }
 0x1cb   : > { %v1822_v12 = vpop.f32.mrf.mxu3  ;;  %v1695_v59 = vadd.f32 %v1645_v16, %v4649_v28 }
 0x1cd   : > { %3792 = vmatmul.msk.bf16.gmra.mxu0 %vm946_vm3, %v4683_v27  ;;  %v1872_v36 = vadd.f32 %v1822_v12, %v1695_v59  ;;  %v5571_v59 = vld [vmem:[#allocation13_spill] sm:$0xff] }
 0x1ce   : > { %v5073_v58 = vpop.f32.mrf.mxu1 }
 0x1cf   : > { %v2089_v10 = vadd.f32 %v2039_v4, %v1872_v36 }
 0x1d1   : > { %v5075_v8 = vadd.f32 %v2226_v18, %v2089_v10 }
 0x1d2   : > { %v2041_v56 = vpop.f32.mrf.mxu0  ;;  %v1647_v25 = vpop.f32.mrf.mxu2 }
 0x1d3   : > { %v1824_v20 = vpop.f32.mrf.mxu3  ;;  %v1696_v40 = vadd.f32 %v1647_v25, %v4657_v3  ;;  %v5573_v25 = vld [vmem:[#allocation2_spill] sm:$0xff] }
 0x1d5   : > { %v1873_v63 = vadd.f32 %v1824_v20, %v1696_v40 }
 0x1d6   : > { %v2231_v24 = vpop.f32.mrf.mxu1 }
 0x1d7   : > { %3710 = vmatmul.msk.bf16.gmra.mxu2 %vm946_vm3, %v3976_v7  ;;  %3751 = vmatmul.msk.bf16.gmra.mxu3 %vm946_vm3, %v4554_v57  ;;  %v5082_v28 = vadd.f32 %v2041_v56, %v1873_v63  ;;  %v3896_v57 = vld [vmem:[%s5509_s6] sm:$0xff]  ;;  %v5572_v56 = vld [vmem:[#allocation19_spill] sm:$0xff] }
 0x1d8   : > { %3081 = vmatpush.bf16.msra.mxu1 %v3896_v57  ;;  %v5574_v7 = vld [vmem:[#allocation18_spill] sm:$0xff] }
 0x1da   : > { %v2044_v27 = vpop.f32.mrf.mxu0  ;;  %v1650_v47 = vpop.f32.mrf.mxu2 }
 0x1db   : > { %v1827_v17 = vpop.f32.mrf.mxu3  ;;  %v1697_v45 = vadd.f32 %v1650_v47, %v5570_v42 }
 0x1dd   : > { %3793 = vmatmul.msk.bf16.gmra.mxu0 %vm946_vm3, %v4713_v35  ;;  %v1874_v62 = vadd.f32 %v1827_v17, %v1697_v45 }
 0x1de   : > { %v5087_v3 = vpop.f32.mrf.mxu1 }
 0x1df   : > { %v2091_v18 = vadd.f32 %v2044_v27, %v1874_v62  ;;  %v5575_v27 = vld [vmem:[#allocation14_spill] sm:$0xff] }
 0x1e1   : > { %v5089_v4 = vadd.f32 %v2231_v24, %v2091_v18 }
 0x1e2   : > { %v2046_v6 = vpop.f32.mrf.mxu0  ;;  %v1652_v16 = vpop.f32.mrf.mxu2 }
 0x1e3   : > { %v1829_v12 = vpop.f32.mrf.mxu3  ;;  %v1698_v36 = vadd.f32 %v1652_v16, %v5571_v59 }
 0x1e5   : > { %v1875_v10 = vadd.f32 %v1829_v12, %v1698_v36  ;;  %v5576_v12 = vld [vmem:[#allocation15_spill] sm:$0xff] }
 0x1e6   : > { %v2236_v35 = vpop.f32.mrf.mxu1 }
 0x1e7   : > { %3711 = vmatmul.msk.bf16.gmra.mxu2 %vm946_vm3, %v5572_v56  ;;  %3752 = vmatmul.msk.bf16.gmra.mxu3 %vm946_vm3, %v5573_v25  ;;  %v5099_v20 = vadd.f32 %v2046_v6, %v1875_v10  ;;  %v5577_v10 = vld [vmem:[#allocation22_spill] sm:$0xff]  ;;  %v5578_v56 = vld [vmem:[#allocation3_spill] sm:$0xff] }
 0x1ea   : > { %v2049_v40 = vpop.f32.mrf.mxu0  ;;  %v1655_v63 = vpop.f32.mrf.mxu2 }
 0x1eb   : > { %v1832_v24 = vpop.f32.mrf.mxu3  ;;  %v1699_v47 = vadd.f32 %v1655_v63, %v5575_v27 }
 0x1ed   : > { %3794 = vmatmul.msk.bf16.gmra.mxu0 %vm946_vm3, %v5574_v7  ;;  %v1876_v17 = vadd.f32 %v1832_v24, %v1699_v47 }
 0x1ee   : > { %v5104_v42 = vpop.f32.mrf.mxu1 }
 0x1ef   : > { %v2093_v45 = vadd.f32 %v2049_v40, %v1876_v17 }
 0x1f1   : > { %v5106_v18 = vadd.f32 %v2236_v35, %v2093_v45  ;;  %v5579_v35 = vld [vmem:[#allocation16_spill] sm:$0xff] }
 0x1f2   : > { %v2051_v62 = vpop.f32.mrf.mxu0  ;;  %v1657_v57 = vpop.f32.mrf.mxu2 }
 0x1f3   : > { %v1834_v16 = vpop.f32.mrf.mxu3  ;;  %v1700_v6 = vadd.f32 %v1657_v57, %v5576_v12 }
 0x1f5   : > { %v1877_v59 = vadd.f32 %v1834_v16, %v1700_v6  ;;  %v5581_v6 = vld [vmem:[#allocation17_spill] sm:$0xff] }
 0x1f6   : > { %v2241_v36 = vpop.f32.mrf.mxu1 }
 0x1f7   : > { %3712 = vmatmul.msk.bf16.gmra.mxu2 %vm946_vm3, %v5577_v10  ;;  %3753 = vmatmul.msk.bf16.gmra.mxu3 %vm946_vm3, %v5578_v56  ;;  %v5113_v25 = vadd.f32 %v2051_v62, %v1877_v59  ;;  %v5582_v10 = vld [vmem:[#allocation25_spill] sm:$0xff]  ;;  %v5583_v56 = vld [vmem:[#allocation4_spill] sm:$0xff] }
 0x1fa   : > { %v2054_v63 = vpop.f32.mrf.mxu0  ;;  %v1660_v24 = vpop.f32.mrf.mxu2 }
 0x1fb   : > { %v1837_v40 = vpop.f32.mrf.mxu3  ;;  %v1701_v7 = vadd.f32 %v1660_v24, %v5579_v35 }
 0x1fd   : > { %3795 = vmatmul.msk.bf16.gmra.mxu0 %vm946_vm3, %v4768_v41  ;;  %v1878_v27 = vadd.f32 %v1837_v40, %v1701_v7 }
 0x1fe   : > { %v5118_v17 = vpop.f32.mrf.mxu1 }
 0x1ff   : > { %v2095_v47 = vadd.f32 %v2054_v63, %v1878_v27  ;;  %5580 = vst [vmem:[#allocation12_spill] sm:$0xff] %v5118_v17  ;;  %v3977_v17 = vld [vmem:[%s4139_s19 + $0x6c] sm:$0xff] }
 0x201   : > { %v5120_v57 = vadd.f32 %v2241_v36, %v2095_v47  ;;  %v5585_v36 = vld [vmem:[#allocation20_spill] sm:$0xff] }
 0x202   : > { %v2056_v45 = vpop.f32.mrf.mxu0  ;;  %v1662_v16 = vpop.f32.mrf.mxu2 }
 0x203   : > { %v1839_v12 = vpop.f32.mrf.mxu3  ;;  %v1702_v62 = vadd.f32 %v1662_v16, %v5581_v6 }
 0x205   : > { %v1879_v59 = vadd.f32 %v1839_v12, %v1702_v62 }
 0x206   : > { %v2246_v24 = vpop.f32.mrf.mxu1 }
 0x207   : > { %3713 = vmatmul.msk.bf16.gmra.mxu2 %vm946_vm3, %v5582_v10  ;;  %3754 = vmatmul.msk.bf16.gmra.mxu3 %vm946_vm3, %v5583_v56  ;;  %v5127_v41 = vadd.f32 %v2056_v45, %v1879_v59  ;;  %v5586_v10 = vld [vmem:[#allocation21_spill] sm:$0xff] }
 0x209   : > { %5584 = vst [vmem:[#allocation13_spill] sm:$0xff] %v5127_v41  ;;  %v5587_v41 = vld [vmem:[#allocation5_spill] sm:$0xff] }
 0x20a   : > { %v2059_v63 = vpop.f32.mrf.mxu0  ;;  %v1665_v40 = vpop.f32.mrf.mxu2 }
 0x20b   : > { %v1842_v35 = vpop.f32.mrf.mxu3  ;;  %v1703_v7 = vadd.f32 %v1665_v40, %v5585_v36 }
 0x20d   : > { %3796 = vmatmul.msk.bf16.gmra.mxu0 %vm946_vm3, %v4802_v1  ;;  %v1880_v27 = vadd.f32 %v1842_v35, %v1703_v7  ;;  %v5588_v35 = vld [vmem:[#allocation23_spill] sm:$0xff] }
 0x20e   : > { %v5135_v59 = vpop.f32.mrf.mxu1 }
 0x20f   : > { %v2097_v47 = vadd.f32 %v2059_v63, %v1880_v27 }
 0x211   : > { %v5132_v12 = vadd.f32 %v2246_v24, %v2097_v47 }
 0x212   : > { %v2061_v16 = vpop.f32.mrf.mxu0  ;;  %v1667_v6 = vpop.f32.mrf.mxu2 }
 0x213   : > { %v1844_v62 = vpop.f32.mrf.mxu3  ;;  %v1704_v45 = vadd.f32 %v1667_v6, %v5586_v10 }
 0x215   : > { %v1881_v56 = vadd.f32 %v1844_v62, %v1704_v45 }
 0x216   : > { %v2251_v27 = vpop.f32.mrf.mxu1 }
 0x217   : > { %3714 = vmatmul.msk.bf16.gmra.mxu2 %vm946_vm3, %v3977_v17  ;;  %3755 = vmatmul.msk.bf16.gmra.mxu3 %vm946_vm3, %v5587_v41  ;;  %v5141_v1 = vadd.f32 %v2061_v16, %v1881_v56  ;;  %v5590_v41 = vld [vmem:[#allocation24_spill] sm:$0xff]  ;;  %v3978_v56 = vld [vmem:[%s4139_s19 + $0x78] sm:$0xff] }
 0x21a   : > { %v2064_v63 = vpop.f32.mrf.mxu0  ;;  %v1670_v40 = vpop.f32.mrf.mxu2 }
 0x21b   : > { %v1847_v24 = vpop.f32.mrf.mxu3  ;;  %v1705_v36 = vadd.f32 %v1670_v40, %v5588_v35  ;;  %v5592_v35 = vld [vmem:[#allocation26_spill] sm:$0xff] }
 0x21d   : > { %3797 = vmatmul.msk.bf16.gmra.mxu0 %vm946_vm3, %v4831_v26  ;;  %v1882_v7 = vadd.f32 %v1847_v24, %v1705_v36 }
 0x21f   : > { %v2099_v47 = vadd.f32 %v2064_v63, %v1882_v7 }
 0x221   : > { %v5146_v62 = vadd.f32 %v2251_v27, %v2099_v47 }
 0x222   : > { %v2066_v6 = vpop.f32.mrf.mxu0  ;;  %v1672_v17 = vpop.f32.mrf.mxu2 }
 0x223   : > { %5589 = vst [vmem:[#allocation19_spill] sm:$0xff] %v5146_v62  ;;  %v1849_v10 = vpop.f32.mrf.mxu3  ;;  %v1706_v45 = vadd.f32 %v1672_v17, %v5590_v41  ;;  %v5161_v17 = vld [vmem:[%s5507_s4] ss:$0 sm:$0xff]  ;;  %v3980_v62 = vld [vmem:[%s4139_s19 + $0x8c] sm:$0xff] }
 0x225   : > { %v1883_v16 = vadd.f32 %v1849_v10, %v1706_v45  ;;  %v5593_v10 = vld [vmem:[#allocation27_spill] sm:$0xff] }
 0x227   : > { %3715 = vmatmul.msk.bf16.gmra.mxu2 %vm946_vm3, %v3978_v56  ;;  %3756 = vmatmul.msk.bf16.gmra.mxu3 %vm946_vm3, %v4373_v49  ;;  %v5153_v26 = vadd.f32 %v2066_v6, %v1883_v16 }
 0x229   : > { %5591 = vst [vmem:[#allocation2_spill] sm:$0xff] %v5153_v26 }
 0x22a   : > { %v2757_v40 = vpop.f32.mrf.mxu0  ;;  %v2353_v24 = vpop.f32.mrf.mxu2 }
 0x22b   : > { %v2570_v63 = vpop.f32.mrf.mxu3  ;;  %v2433_v36 = vadd.f32 %v2353_v24, %v5592_v35  ;;  %v3979_v24 = vld [vmem:[%s4139_s19 + $0x80] sm:$0xff] }
 0x22d   : > { %3798 = vmatmul.msk.bf16.gmra.mxu0 %vm946_vm3, %v4854_v50  ;;  %v2650_v7 = vadd.f32 %v2570_v63, %v2433_v36  ;;  %v5168_v50 = vld [vmem:[%s5508_s5] ss:$0 sm:$0xff] }
 0x22f   : > { %v2837_v47 = vadd.f32 %v2757_v40, %v2650_v7 }
 0x231   : > { %v2873_v45 = vmul.f32 %v5161_v17, %v2837_v47 }
 0x232   : > { %v2759_v27 = vpop.f32.mrf.mxu0  ;;  %v2355_v49 = vpop.f32.mrf.mxu2 }
 0x233   : > { %v2572_v6 = vpop.f32.mrf.mxu3  ;;  %v2434_v41 = vadd.f32 %v2355_v49, %v5593_v10  ;;  %v2909_v63 = vadd.f32 %v5168_v50, %v2873_v45 }
 0x235   : > { %v2651_v16 = vadd.f32 %v2572_v6, %v2434_v41  ;;  %v2941_v49 = vmax.f32 %v2909_v63, 0.0 }
 0x237   : > { %v2838_v56 = vadd.f32 %v2759_v27, %v2651_v16  ;;  %3716 = vmatmul.msk.bf16.gmra.mxu2 %vm946_vm3, %v3979_v24  ;;  %3757 = vmatmul.msk.bf16.gmra.mxu3 %vm946_vm3, %v5562_v15 }
 0x239   : > { %v2874_v35 = vmul.f32 %v5161_v17, %v2838_v56 }
 0x23a   : > { %v2762_v40 = vpop.f32.mrf.mxu0  ;;  %v2358_v36 = vpop.f32.mrf.mxu2 }
 0x23b   : > { %v2575_v7 = vpop.f32.mrf.mxu3  ;;  %v2910_v47 = vadd.f32 %v5168_v50, %v2874_v35  ;;  %v2435_v27 = vadd.f32 %v2358_v36, %v4851_v38 }
 0x23d   : > { %3799 = vmatmul.msk.bf16.gmra.mxu0 %vm946_vm3, %v4877_v13  ;;  %v2942_v6 = vmax.f32 %v2910_v47, 0.0  ;;  %v2652_v10 = vadd.f32 %v2575_v7, %v2435_v27 }
 0x23f   : > { %v2973_v15 = vpack.c.bf16 %v2942_v6, %v2941_v49  ;;  %v2839_v16 = vadd.f32 %v2762_v40, %v2652_v10 }
 0x241   : > { %3822 = vmatmul.msk.bf16.vlgmr.msra.gmra.mxu1 %vm3025_vm8, %v2973_v15  ;;  %v2875_v35 = vmul.f32 %v5161_v17, %v2839_v16 }
 0x242   : > { %v2764_v41 = vpop.f32.mrf.mxu0  ;;  %v2360_v45 = vpop.f32.mrf.mxu2 }
 0x243   : > { %v2577_v56 = vpop.f32.mrf.mxu3  ;;  %v2436_v24 = vadd.f32 %v2360_v45, %v4864_v5  ;;  %v2911_v40 = vadd.f32 %v5168_v50, %v2875_v35  ;;  %v3981_v45 = vld [vmem:[%s4139_s19 + $0x94] sm:$0xff]  ;;  %s430_s19 = sadd.s32 %s3913_s27, %s4124_s26  ;;  %s3353_s26 = sshll.u32 %s5621_s16, 2 }
 0x244   : > { %s3351_s12 = sshll.u32 %s430_s19, 2  ;;  %s442_s18 = sadd.s32 %s3354_s17, %s3353_s26 }
 0x245   : > { %v2653_v26 = vadd.f32 %v2577_v56, %v2436_v24  ;;  %v2943_v47 = vmax.f32 %v2911_v40, 0.0  ;;  %v5594_v40 = vld [vmem:[#allocation7_spill] sm:$0xff]  ;;  %s5213_s15 = scalar_lea.vmem %s5505_s2, %s3351_s12  ;;  %s3355_s20 = sshll.u32 %s442_s18, 3 }
 0x246   : > { %s5334_s23 = scalar_lea.vmem %s5511_s8, %s3355_s20 }
 0x247   : > { %v2840_v13 = vadd.f32 %v2764_v41, %v2653_v26  ;;  %3717 = vmatmul.msk.bf16.gmra.mxu2 %vm946_vm3, %v3980_v62  ;;  %3758 = vmatmul.msk.bf16.gmra.mxu3 %vm946_vm3, %v4488_v60 }
 0x249   : > { %v2876_v63 = vmul.f32 %v5161_v17, %v2840_v13 }
 0x24a   : > { %v2767_v38 = vpop.f32.mrf.mxu0  ;;  %v2363_v36 = vpop.f32.mrf.mxu2 }
 0x24b   : > { %v2580_v7 = vpop.f32.mrf.mxu3  ;;  %v2912_v5 = vadd.f32 %v5168_v50, %v2876_v63  ;;  %v2437_v26 = vadd.f32 %v2363_v36, %v4873_v14 }
 0x24d   : > { %3800 = vmatmul.msk.bf16.gmra.mxu0 %vm946_vm3, %v4919_v61  ;;  %v2944_v62 = vmax.f32 %v2912_v5, 0.0  ;;  %v2654_v27 = vadd.f32 %v2580_v7, %v2437_v26 }
 0x24f   : > { %v2974_v49 = vpack.c.bf16 %v2944_v62, %v2943_v47  ;;  %v2841_v6 = vadd.f32 %v2767_v38, %v2654_v27 }
 0x251   : > { %3823 = vmatmul.msk.bf16.gmra.mxu1 %vm3025_vm8, %v2974_v49  ;;  %v2877_v16 = vmul.f32 %v5161_v17, %v2841_v6  ;;  %v5595_v49 = vld [vmem:[#allocation10_spill] sm:$0xff] }
 0x252   : > { %v2769_v60 = vpop.f32.mrf.mxu0  ;;  %v2365_v10 = vpop.f32.mrf.mxu2 }
 0x253   : > { %v2582_v15 = vpop.f32.mrf.mxu3  ;;  %v2438_v41 = vadd.f32 %v2365_v10, %v4896_v23  ;;  %v2913_v24 = vadd.f32 %v5168_v50, %v2877_v16 }
 0x255   : > { %v2655_v61 = vadd.f32 %v2582_v15, %v2438_v41  ;;  %v2945_v36 = vmax.f32 %v2913_v24, 0.0  ;;  %v5221_v15 = vld [vmem:[%s5213_s15] sm:$0xf]  ;;  %v5224_v41 = vld [vmem:[%s5213_s15 + $0x4] sm:$0xf] }
 0x256   : > { %v2466_v24 = vshrl.u32 %v5221_v15, 16 }
 0x257   : > { %v2842_v14 = vadd.f32 %v2769_v60, %v2655_v61  ;;  %3718 = vmatmul.msk.bf16.gmra.mxu2 %vm946_vm3, %v3981_v45  ;;  %3759 = vmatmul.msk.bf16.gmra.mxu3 %vm946_vm3, %v4539_v48 }
 0x259   : > { %v2878_v35 = vmul.f32 %v5161_v17, %v2842_v14 }
 0x25a   : > { %v2772_v56 = vpop.f32.mrf.mxu0  ;;  %v2368_v13 = vpop.f32.mrf.mxu2 }
 0x25b   : > { %v2585_v38 = vpop.f32.mrf.mxu3  ;;  %v2914_v23 = vadd.f32 %v5168_v50, %v2878_v35  ;;  %v2439_v63 = vadd.f32 %v2368_v13, %v5594_v40  ;;  %v2469_v35 = vshll.u32 %v5221_v15, 16 }
 0x25d   : > { %3801 = vmatmul.msk.bf16.gmra.mxu0 %vm946_vm3, %v4950_v43  ;;  %v2946_v7 = vmax.f32 %v2914_v23, 0.0  ;;  %v2656_v5 = vadd.f32 %v2585_v38, %v2439_v63  ;;  %v5596_v38 = vld [vmem:[#allocation8_spill] sm:$0xff] }
 0x25f   : > { %v2975_v48 = vpack.c.bf16 %v2946_v7, %v2945_v36  ;;  %v2843_v47 = vadd.f32 %v2772_v56, %v2656_v5  ;;  %v2468_v7 = vrot.slane %v2466_v24, 4  ;;  %v2471_v5 = vrot.slane %v2469_v35, 5 }
 0x261   : > { %3824 = vmatmul.msk.bf16.gmra.mxu1 %vm3025_vm8, %v2975_v48  ;;  %v2879_v43 = vmul.f32 %v5161_v17, %v2843_v47 }
 0x262   : > { %v2774_v26 = vpop.f32.mrf.mxu0  ;;  %v2370_v62 = vpop.f32.mrf.mxu2 }
 0x263   : > { %v2587_v27 = vpop.f32.mrf.mxu3  ;;  %v2440_v60 = vadd.f32 %v2370_v62, %v5595_v49  ;;  %v2915_v61 = vadd.f32 %v5168_v50, %v2879_v43  ;;  %v5237_v62 = vld [vmem:[%s5213_s15 + $0x8] sm:$0xf]  ;;  %v5597_v49 = vld [vmem:[#allocation9_spill] sm:$0xff] }
 0x265   : > { %v2657_v6 = vadd.f32 %v2587_v27, %v2440_v60  ;;  %v2947_v40 = vmax.f32 %v2915_v61, 0.0  ;;  %v5598_v60 = vld [vmem:[#allocation6_spill] sm:$0xff] }
 0x266   : > { %v2265_v43 = vadd.f32 %v5598_v60, %v5597_v49  ;;  %v2688_v60 = vrot.slane %v5237_v62, 5 }
 0x267   : > { %v2844_v10 = vadd.f32 %v2774_v26, %v2657_v6  ;;  %3719 = vmatmul.msk.bf16.gmra.mxu2 %vm946_vm3, %v4979_v54  ;;  %3760 = vmatmul.msk.bf16.gmra.mxu3 %vm946_vm3, %v4990_v11  ;;  %v2475_v54 = vshll.u32 %v5224_v41, 16  ;;  %v2479_v11 = vshrl.u32 %v5224_v41, 16 }
 0x269   : > { %v2880_v14 = vmul.f32 %v5161_v17, %v2844_v10  ;;  %v2477_v48 = vrot.slane %v2475_v54, 5  ;;  %v2481_v26 = vrot.slane %v2479_v11, 4 }
 0x26a   : > { %v2777_v16 = vpop.f32.mrf.mxu0  ;;  %v2373_v45 = vpop.f32.mrf.mxu2 }
 0x26b   : > { %v2590_v56 = vpop.f32.mrf.mxu3  ;;  %v2916_v13 = vadd.f32 %v5168_v50, %v2880_v14  ;;  %v2441_v23 = vadd.f32 %v2373_v45, %v5596_v38  ;;  %v2472_v14 = vor.u32 %v2471_v5, %v2468_v7  ;;  %v2482_v61 = vor.u32 %v2481_v26, %v2477_v48 }
 0x26c   : > { %v2485_v45 = vshll.u32 %v5237_v62, 16 }
 0x26d   : > { %3802 = vmatmul.msk.bf16.gmra.mxu0 %vm946_vm3, %v4981_v44  ;;  %v2948_v63 = vmax.f32 %v2916_v13, 0.0  ;;  %v2658_v36 = vadd.f32 %v2590_v56, %v2441_v23  ;;  %v2473_v54 = vrot.slane %v2472_v14, 4  ;;  %v2483_v11 = vrot.slane %v2482_v61, 4 }
 0x26e   : > { %v2487_v13 = vrot.slane %v2485_v45, 5  ;;  %v2685_v23 = vrot.slane %v5224_v41, 5  ;;  %v3764_v41 = vrot.slane %v5221_v15, 9 }
 0x26f   : > { %v2976_v47 = vpack.c.bf16 %v2948_v63, %v2947_v40  ;;  %v2845_v6 = vadd.f32 %v2777_v16, %v2658_v36  ;;  %v5252_v36 = vld [vmem:[%s5213_s15 + $0xc] sm:$0xf]  ;;  %v2478_v26 = vsel %vm4176_vm4, %v2473_v54, %v2477_v48 }
 0x270   : > { %v2687_v49 = vrot.slane %v2685_v23, 4  ;;  %v2499_v48 = vshrl.u32 %v5252_v36, 16  ;;  %v2519_v14 = vunpack.c.l.b16 %v2478_v26  ;;  %v2686_v15 = vsel %vm4560_vm7, %v3764_v41, %v2685_v23  ;;  %v3858_v26 = vld [vmem:[%s5213_s15] sm:$0xff] }
 0x271   : > { %3825 = vmatmul.msk.bf16.gmra.mxu1 %vm3025_vm8, %v2976_v47  ;;  %v2881_v24 = vmul.f32 %v5161_v17, %v2845_v6 }
 0x272   : > { %v2779_v27 = vpop.f32.mrf.mxu0  ;;  %v2375_v44 = vpop.f32.mrf.mxu2 }
 0x273   : > { %v2592_v10 = vpop.f32.mrf.mxu3  ;;  %v2442_v56 = vadd.f32 %v2375_v44, %v2265_v43  ;;  %v2917_v40 = vadd.f32 %v5168_v50, %v2881_v24  ;;  %v2495_v43 = vshll.u32 %v5252_v36, 16  ;;  %v2501_v24 = vrot.slane %v2499_v48, 4 }
 0x275   : > { %v2659_v35 = vadd.f32 %v2592_v10, %v2442_v56  ;;  %v2949_v6 = vmax.f32 %v2917_v40, 0.0  ;;  %v2497_v56 = vrot.slane %v2495_v43, 5 }
 0x277   : > { %v2846_v38 = vadd.f32 %v2779_v27, %v2659_v35  ;;  %3720 = vmatmul.msk.bf16.gmra.mxu2 %vm946_vm3, %v5011_v31  ;;  %3761 = vmatmul.msk.bf16.gmra.mxu3 %vm946_vm3, %v5021_v39  ;;  %v2488_v31 = vsel %vm4176_vm4, %v2483_v11, %v2487_v13  ;;  %v2489_v27 = vshrl.u32 %v5237_v62, 16  ;;  %v2689_v62 = vsel %vm4560_vm7, %v2687_v49, %v2688_v60  ;;  %v5599_v35 = vld [vmem:[#allocation11_spill] sm:$0xff] }
 0x278   : > { %v2520_v61 = vunpack.c.l.b16 %v2488_v31  ;;  %v2267_v54 = vadd.f32 %v5599_v35, %v4988_v46  ;;  %v2706_v31 = vunpack.c.l.b16 %v2686_v15 }
 0x279   : > { %v2882_v63 = vmul.f32 %v5161_v17, %v2846_v38  ;;  %v496_v38 = vld [vmem:[%s5213_s15 + $0x10] sm:$0x1] }
 0x27a   : > { %v2782_v16 = vpop.f32.mrf.mxu0  ;;  %v2378_v7 = vpop.f32.mrf.mxu2  ;;  %v2505_v41 = vshll.u32 %v496_v38, 16  ;;  %v2694_v35 = vrot.slane %v496_v38, 5 }
 0x27b   : > { %v2595_v5 = vpop.f32.mrf.mxu3  ;;  %v2918_v47 = vadd.f32 %v5168_v50, %v2882_v63  ;;  %v2443_v39 = vadd.f32 %v2378_v7, %v4975_v9  ;;  %v2491_v9 = vrot.slane %v2489_v27, 4  ;;  %v2523_v7 = vpack.c.b16 %v2520_v61, %v2519_v14 }
 0x27d   : > { %3803 = vmatmul.msk.bf16.gmra.mxu0 %vm946_vm3, %v5013_v22  ;;  %v2950_v44 = vmax.f32 %v2918_v47, 0.0  ;;  %v2660_v10 = vadd.f32 %v2595_v5, %v2443_v39  ;;  %v2707_v47 = vunpack.c.l.b16 %v2689_v62  ;;  %v2492_v23 = vor.u32 %v2491_v9, %v2487_v13 }
 0x27e   : > { %v2502_v39 = vor.u32 %v2501_v24, %v2497_v56  ;;  %v2690_v24 = vrot.slane %v2688_v60, 4 }
 0x27f   : > { %v2977_v22 = vpack.c.bf16 %v2950_v44, %v2949_v6  ;;  %v2847_v11 = vadd.f32 %v2782_v16, %v2660_v10  ;;  %v2710_v46 = vpack.c.b16 %v2707_v47, %v2706_v31  ;;  %v2493_v16 = vrot.slane %v2492_v23, 4  ;;  %v3859_v23 = vld [vmem:[%s5213_s15 + $0x8] sm:$0xff] }
 0x280   : > { %v2503_v6 = vrot.slane %v2502_v39, 4  ;;  %v2507_v44 = vrot.slane %v2505_v41, 5  ;;  %v2691_v10 = vrot.slane %v5252_v36, 5 }
 0x281   : > { %3826 = vmatmul.msk.bf16.gmra.mxu1 %vm3025_vm8, %v2977_v22  ;;  %v2883_v27 = vmul.f32 %v5161_v17, %v2847_v11  ;;  %v2498_v15 = vsel %vm4176_vm4, %v2493_v16, %v2497_v56 }
 0x282   : > { %v2784_v45 = vpop.f32.mrf.mxu0  ;;  %v2380_v40 = vpop.f32.mrf.mxu2  ;;  %v2508_v62 = vsel %vm4176_vm4, %v2503_v6, %v2507_v44  ;;  %v2693_v36 = vrot.slane %v2691_v10, 4 }
 0x283   : > { %v2597_v63 = vpop.f32.mrf.mxu3  ;;  %v2444_v5 = vadd.f32 %v2380_v40, %v2267_v54  ;;  %v2919_v14 = vadd.f32 %v5168_v50, %v2883_v27 }
 0x284   : > { %v2695_v56 = vsel %vm4560_vm7, %v2693_v36, %v2694_v35 }
 0x285   : > { %v2661_v49 = vadd.f32 %v2597_v63, %v2444_v5  ;;  %v2951_v54 = vmax.f32 %v2919_v14, 0.0  ;;  %v2522_v5 = vunpack.c.l.b16 %v2508_v62  ;;  %v2709_v27 = vunpack.c.l.b16 %v2695_v56 }
 0x287   : > { %v2848_v43 = vadd.f32 %v2784_v45, %v2661_v49  ;;  %3721 = vmatmul.msk.bf16.gmra.mxu2 %vm946_vm3, %v3858_v26  ;;  %3762 = vmatmul.msk.bf16.gmra.mxu3 %vm946_vm3, %v2523_v7  ;;  %v2521_v7 = vunpack.c.l.b16 %v2498_v15 }
 0x289   : > { %v2884_v13 = vmul.f32 %v5161_v17, %v2848_v43  ;;  %v2524_v39 = vpack.c.b16 %v2522_v5, %v2521_v7 }
 0x28a   : > { %v2787_v48 = vpop.f32.mrf.mxu0  ;;  %v2383_v61 = vpop.f32.mrf.mxu2 }
 0x28b   : > { %v2600_v22 = vpop.f32.mrf.mxu3  ;;  %v2920_v9 = vadd.f32 %v5168_v50, %v2884_v13  ;;  %v2445_v45 = vadd.f32 %v2383_v61, %v5007_v0  ;;  %v2692_v0 = vsel %vm4560_vm7, %v2690_v24, %v2691_v10 }
 0x28c   : > { %v2708_v41 = vunpack.c.l.b16 %v2692_v0 }
 0x28d   : > { %3804 = vmatmul.msk.bf16.gmra.mxu0 %vm946_vm3, %v2710_v46  ;;  %v2952_v11 = vmax.f32 %v2920_v9, 0.0  ;;  %v2662_v40 = vadd.f32 %v2600_v22, %v2445_v45  ;;  %v2271_v45 = vadd.f32 %v5028_v52, %v5040_v32 }
 0x28e   : > { %v2711_v37 = vpack.c.b16 %v2709_v27, %v2708_v41  ;;  %v5320_v27 = vpop.f32.mrf.mxu1 }
 0x28f   : > { %v2978_v63 = vpack.c.bf16 %v2952_v11, %v2951_v54  ;;  %v2849_v60 = vadd.f32 %v2787_v48, %v2662_v40 }
 0x291   : > { %3827 = vmatmul.msk.bf16.gmra.mxu1 %vm3025_vm8, %v2978_v63  ;;  %v2885_v49 = vmul.f32 %v5161_v17, %v2849_v60 }
 0x292   : > { %v2789_v26 = vpop.f32.mrf.mxu0  ;;  %v2385_v38 = vpop.f32.mrf.mxu2 }
 0x293   : > { %v2602_v31 = vpop.f32.mrf.mxu3  ;;  %v2446_v47 = vadd.f32 %v2385_v38, %v2269_v51  ;;  %v2921_v30 = vadd.f32 %v5168_v50, %v2885_v49  ;;  %v2273_v38 = vadd.f32 %v5045_v19, %v5054_v2 }
 0x295   : > { %v2663_v43 = vadd.f32 %v2602_v31, %v2446_v47  ;;  %v2953_v14 = vmax.f32 %v2921_v30, 0.0 }
 0x297   : > { %v2850_v46 = vadd.f32 %v2789_v26, %v2663_v43  ;;  %3722 = vmatmul.msk.bf16.gmra.mxu2 %vm946_vm3, %v3859_v23  ;;  %3763 = vmatmul.msk.bf16.gmra.mxu3 %vm946_vm3, %v2524_v39 }
 0x299   : > { %v2886_v16 = vmul.f32 %v5161_v17, %v2850_v46 }
 0x29a   : > { %v2792_v53 = vpop.f32.mrf.mxu0  ;;  %v2388_v48 = vpop.f32.mrf.mxu2 }
 0x29b   : > { %v2605_v6 = vpop.f32.mrf.mxu3  ;;  %v2922_v44 = vadd.f32 %v5168_v50, %v2886_v16  ;;  %v2447_v10 = vadd.f32 %v2388_v48, %v5030_v33  ;;  %v5329_v16 = vld [vmem:[%s5510_s7] ss:$0 sm:$0xff] }
 0x29d   : > { %3805 = vmatmul.msk.bf16.gmra.mxu0 %vm946_vm3, %v2711_v37  ;;  %v2954_v13 = vmax.f32 %v2922_v44, 0.0  ;;  %v2664_v61 = vadd.f32 %v2605_v6, %v2447_v10 }
 0x29f   : > { %v2979_v22 = vpack.c.bf16 %v2954_v13, %v2953_v14  ;;  %v2851_v15 = vadd.f32 %v2792_v53, %v2664_v61  ;;  %v2275_v61 = vadd.f32 %v5059_v29, %v5068_v34 }
 0x2a1   : > { %3828 = vmatmul.msk.bf16.gmra.mxu1 %vm3025_vm8, %v2979_v22  ;;  %v2887_v35 = vmul.f32 %v5161_v17, %v2851_v15 }
 0x2a2   : > { %v2794_v9 = vpop.f32.mrf.mxu0  ;;  %v2390_v62 = vpop.f32.mrf.mxu2 }
 0x2a3   : > { %v2607_v24 = vpop.f32.mrf.mxu3  ;;  %v2448_v36 = vadd.f32 %v2390_v62, %v2271_v45  ;;  %v2923_v40 = vadd.f32 %v5168_v50, %v2887_v35 }
 0x2a5   : > { %v2665_v54 = vadd.f32 %v2607_v24, %v2448_v36  ;;  %v2955_v26 = vmax.f32 %v2923_v40, 0.0 }
 0x2a7   : > { %v2852_v11 = vadd.f32 %v2794_v9, %v2665_v54 }
 0x2a9   : > { %v2888_v63 = vmul.f32 %v5161_v17, %v2852_v11 }
 0x2aa   : > { %v2797_v33 = vpop.f32.mrf.mxu0  ;;  %v2393_v7 = vpop.f32.mrf.mxu2 }
 0x2ab   : > { %v2610_v5 = vpop.f32.mrf.mxu3  ;;  %v2924_v52 = vadd.f32 %v5168_v50, %v2888_v63  ;;  %v2449_v32 = vadd.f32 %v2393_v7, %v5047_v55 }
 0x2ad   : > { %v2956_v0 = vmax.f32 %v2924_v52, 0.0  ;;  %v2666_v56 = vadd.f32 %v2610_v5, %v2449_v32 }
 0x2af   : > { %v2980_v51 = vpack.c.bf16 %v2956_v0, %v2955_v26  ;;  %v2853_v31 = vadd.f32 %v2797_v33, %v2666_v56 }
 0x2b1   : > { %3829 = vmatmul.msk.bf16.gmra.mxu1 %vm3025_vm8, %v2980_v51  ;;  %v2889_v41 = vmul.f32 %v5161_v17, %v2853_v31 }
 0x2b2   : > { %v2799_v60 = vpop.f32.mrf.mxu0  ;;  %v2395_v47 = vpop.f32.mrf.mxu2 }
 0x2b3   : > { %v2612_v23 = vpop.f32.mrf.mxu3  ;;  %v2450_v39 = vadd.f32 %v2395_v47, %v2273_v38  ;;  %v2925_v46 = vadd.f32 %v5168_v50, %v2889_v41 }
 0x2b5   : > { %v2667_v55 = vadd.f32 %v2612_v23, %v2450_v39  ;;  %v2957_v48 = vmax.f32 %v2925_v46, 0.0 }
 0x2b7   : > { %v2854_v49 = vadd.f32 %v2799_v60, %v2667_v55  ;;  %v2277_v60 = vadd.f32 %v5073_v58, %v5082_v28 }
 0x2b9   : > { %v2890_v19 = vmul.f32 %v5161_v17, %v2854_v49 }
 0x2ba   : > { %v2802_v43 = vpop.f32.mrf.mxu0  ;;  %v2398_v2 = vpop.f32.mrf.mxu2 }
 0x2bb   : > { %v2615_v37 = vpop.f32.mrf.mxu3  ;;  %v2926_v53 = vadd.f32 %v5168_v50, %v2890_v19  ;;  %v2451_v30 = vadd.f32 %v2398_v2, %v5061_v21 }
 0x2bd   : > { %v2958_v6 = vmax.f32 %v2926_v53, 0.0  ;;  %v2668_v44 = vadd.f32 %v2615_v37, %v2451_v30 }
 0x2be   : > { %v3083_v10 = vpop.f32.mrf.mxu1 }
 0x2bf   : > { %v3084_v14 = vadd.f32 %v5329_v16, %v3083_v10  ;;  %v2981_v21 = vpack.c.bf16 %v2958_v6, %v2957_v48  ;;  %v2855_v22 = vadd.f32 %v2802_v43, %v2668_v44 }
 0x2c1   : > { %3164 = vst.msk [vmem:[%s5334_s23] sm:$0xff] %vm3163_vm9, %v3084_v14  ;;  %3830 = vmatmul.msk.bf16.gmra.mxu1 %vm3025_vm8, %v2981_v21  ;;  %v2891_v62 = vmul.f32 %v5161_v17, %v2855_v22  ;;  %v2279_v21 = vadd.f32 %v5087_v3, %v5099_v20 }
 0x2c2   : > { %v2804_v13 = vpop.f32.mrf.mxu0  ;;  %v2400_v9 = vpop.f32.mrf.mxu2 }
 0x2c3   : > { %v2617_v45 = vpop.f32.mrf.mxu3  ;;  %v2452_v15 = vadd.f32 %v2400_v9, %v2275_v61  ;;  %v2927_v33 = vadd.f32 %v5168_v50, %v2891_v62 }
 0x2c5   : > { %v2669_v24 = vadd.f32 %v2617_v45, %v2452_v15  ;;  %v2959_v5 = vmax.f32 %v2927_v33, 0.0 }
 0x2c6   : > { %v3085_v36 = vpop.f32.mrf.mxu1 }
 0x2c7   : > { %v2856_v35 = vadd.f32 %v2804_v13, %v2669_v24  ;;  %v3086_v54 = vadd.f32 %v5329_v16, %v3085_v36 }
 0x2c9   : > { %v2892_v29 = vmul.f32 %v5161_v17, %v2856_v35  ;;  %3165 = vst.msk [vmem:[%s5334_s23 + $0x8] sm:$0xff] %vm3163_vm9, %v3086_v54 }
 0x2ca   : > { %v2807_v11 = vpop.f32.mrf.mxu0  ;;  %v2403_v34 = vpop.f32.mrf.mxu2 }
 0x2cb   : > { %v2620_v40 = vpop.f32.mrf.mxu3  ;;  %v2928_v63 = vadd.f32 %v5168_v50, %v2892_v29  ;;  %v2453_v7 = vadd.f32 %v2403_v34, %v5075_v8 }
 0x2cd   : > { %v2960_v52 = vmax.f32 %v2928_v63, 0.0  ;;  %v2670_v32 = vadd.f32 %v2620_v40, %v2453_v7 }
 0x2ce   : > { %v3088_v26 = vpop.f32.mrf.mxu1 }
 0x2cf   : > { %v3089_v0 = vadd.f32 %v5329_v16, %v3088_v26  ;;  %v2982_v56 = vpack.c.bf16 %v2960_v52, %v2959_v5  ;;  %v2857_v38 = vadd.f32 %v2807_v11, %v2670_v32  ;;  %v2281_v32 = vadd.f32 %v5104_v42, %v5113_v25 }
 0x2d1   : > { %3166 = vst.msk [vmem:[%s5334_s23 + $0x10] sm:$0xff] %vm3163_vm9, %v3089_v0  ;;  %3831 = vmatmul.msk.bf16.gmra.mxu1 %vm3025_vm8, %v2982_v56  ;;  %v2893_v23 = vmul.f32 %v5161_v17, %v2857_v38 }
 0x2d2   : > { %v2809_v51 = vpop.f32.mrf.mxu0  ;;  %v2405_v31 = vpop.f32.mrf.mxu2 }
 0x2d3   : > { %v2622_v47 = vpop.f32.mrf.mxu3  ;;  %v2454_v8 = vadd.f32 %v2405_v31, %v2277_v60  ;;  %v2929_v46 = vadd.f32 %v5168_v50, %v2893_v23 }
 0x2d5   : > { %v2671_v39 = vadd.f32 %v2622_v47, %v2454_v8  ;;  %v2961_v53 = vmax.f32 %v2929_v46, 0.0 }
 0x2d6   : > { %v3090_v41 = vpop.f32.mrf.mxu1 }
 0x2d7   : > { %v2858_v55 = vadd.f32 %v2809_v51, %v2671_v39  ;;  %v3091_v49 = vadd.f32 %v5329_v16, %v3090_v41 }
 0x2d9   : > { %v2894_v58 = vmul.f32 %v5161_v17, %v2858_v55  ;;  %3167 = vst.msk [vmem:[%s5334_s23 + $0x18] sm:$0xff] %vm3163_vm9, %v3091_v49 }
 0x2da   : > { %v2812_v43 = vpop.f32.mrf.mxu0  ;;  %v2408_v28 = vpop.f32.mrf.mxu2 }
 0x2db   : > { %v2625_v19 = vpop.f32.mrf.mxu3  ;;  %v2930_v2 = vadd.f32 %v5168_v50, %v2894_v58  ;;  %v2455_v37 = vadd.f32 %v2408_v28, %v5089_v4 }
 0x2dd   : > { %v2962_v30 = vmax.f32 %v2930_v2, 0.0  ;;  %v2672_v48 = vadd.f32 %v2625_v19, %v2455_v37  ;;  %v5600_v37 = vld [vmem:[#allocation13_spill] sm:$0xff] }
 0x2de   : > { %v3093_v6 = vpop.f32.mrf.mxu1 }
 0x2df   : > { %v3094_v44 = vadd.f32 %v5329_v16, %v3093_v6  ;;  %v2983_v10 = vpack.c.bf16 %v2962_v30, %v2961_v53  ;;  %v2859_v13 = vadd.f32 %v2812_v43, %v2672_v48  ;;  %v5601_v53 = vld [vmem:[#allocation12_spill] sm:$0xff] }
 0x2e0   : > { %v2283_v30 = vadd.f32 %v5601_v53, %v5600_v37 }
 0x2e1   : > { %3168 = vst.msk [vmem:[%s5334_s23 + $0x20] sm:$0xff] %vm3163_vm9, %v3094_v44  ;;  %3832 = vmatmul.msk.bf16.gmra.mxu1 %vm3025_vm8, %v2983_v10  ;;  %v2895_v9 = vmul.f32 %v5161_v17, %v2859_v13 }
 0x2e2   : > { %v2814_v14 = vpop.f32.mrf.mxu0  ;;  %v2410_v61 = vpop.f32.mrf.mxu2 }
 0x2e3   : > { %v2627_v22 = vpop.f32.mrf.mxu3  ;;  %v2456_v4 = vadd.f32 %v2410_v61, %v2279_v21  ;;  %v2931_v35 = vadd.f32 %v5168_v50, %v2895_v9 }
 0x2e5   : > { %v2673_v45 = vadd.f32 %v2627_v22, %v2456_v4  ;;  %v2963_v29 = vmax.f32 %v2931_v35, 0.0 }
 0x2e6   : > { %v3095_v15 = vpop.f32.mrf.mxu1 }
 0x2e7   : > { %v2860_v62 = vadd.f32 %v2814_v14, %v2673_v45  ;;  %v3096_v24 = vadd.f32 %v5329_v16, %v3095_v15 }
 0x2e9   : > { %v2896_v3 = vmul.f32 %v5161_v17, %v2860_v62  ;;  %3169 = vst.msk [vmem:[%s5334_s23 + $0x28] sm:$0xff] %vm3163_vm9, %v3096_v24 }
 0x2ea   : > { %v2817_v36 = vpop.f32.mrf.mxu0  ;;  %v2413_v20 = vpop.f32.mrf.mxu2 }
 0x2eb   : > { %v2630_v54 = vpop.f32.mrf.mxu3  ;;  %v2932_v11 = vadd.f32 %v5168_v50, %v2896_v3  ;;  %v2457_v33 = vadd.f32 %v2413_v20, %v5106_v18 }
 0x2ed   : > { %v2964_v34 = vmax.f32 %v2932_v11, 0.0  ;;  %v2674_v40 = vadd.f32 %v2630_v54, %v2457_v33  ;;  %v2285_v33 = vadd.f32 %v5135_v59, %v5141_v1 }
 0x2ee   : > { %v3098_v63 = vpop.f32.mrf.mxu1 }
 0x2ef   : > { %v3099_v7 = vadd.f32 %v5329_v16, %v3098_v63  ;;  %v2984_v5 = vpack.c.bf16 %v2964_v34, %v2963_v29  ;;  %v2861_v26 = vadd.f32 %v2817_v36, %v2674_v40 }
 0x2f1   : > { %3170 = vst.msk [vmem:[%s5334_s23 + $0x30] sm:$0xff] %vm3163_vm9, %v3099_v7  ;;  %3833 = vmatmul.msk.bf16.gmra.mxu1 %vm3025_vm8, %v2984_v5  ;;  %v2897_v51 = vmul.f32 %v5161_v17, %v2861_v26 }
 0x2f2   : > { %v2819_v52 = vpop.f32.mrf.mxu0  ;;  %v2415_v0 = vpop.f32.mrf.mxu2 }
 0x2f3   : > { %v2632_v56 = vpop.f32.mrf.mxu3  ;;  %v2458_v18 = vadd.f32 %v2415_v0, %v2281_v32  ;;  %v2933_v23 = vadd.f32 %v5168_v50, %v2897_v51  ;;  %v5602_v51 = vld [vmem:[#allocation19_spill] sm:$0xff] }
 0x2f5   : > { %v2675_v60 = vadd.f32 %v2632_v56, %v2458_v18  ;;  %v2965_v49 = vmax.f32 %v2933_v23, 0.0 }
 0x2f6   : > { %v3100_v38 = vpop.f32.mrf.mxu1 }
 0x2f7   : > { %v2862_v31 = vadd.f32 %v2819_v52, %v2675_v60  ;;  %v3101_v47 = vadd.f32 %v5329_v16, %v3100_v38 }
 0x2f9   : > { %v2898_v42 = vmul.f32 %v5161_v17, %v2862_v31  ;;  %3171 = vst.msk [vmem:[%s5334_s23 + $0x38] sm:$0xff] %vm3163_vm9, %v3101_v47 }
 0x2fa   : > { %v2822_v8 = vpop.f32.mrf.mxu0  ;;  %v2418_v25 = vpop.f32.mrf.mxu2 }
 0x2fb   : > { %v2635_v39 = vpop.f32.mrf.mxu3  ;;  %v2934_v41 = vadd.f32 %v5168_v50, %v2898_v42  ;;  %v2459_v55 = vadd.f32 %v2418_v25, %v5120_v57 }
 0x2fd   : > { %v2966_v43 = vmax.f32 %v2934_v41, 0.0  ;;  %v2676_v46 = vadd.f32 %v2635_v39, %v2459_v55  ;;  %v5603_v39 = vld [vmem:[#allocation2_spill] sm:$0xff] }
 0x2fe   : > { %v3103_v58 = vpop.f32.mrf.mxu1  ;;  %v2287_v41 = vadd.f32 %v5320_v27, %v5603_v39 }
 0x2ff   : > { %v3104_v28 = vadd.f32 %v5329_v16, %v3103_v58  ;;  %v2985_v19 = vpack.c.bf16 %v2966_v43, %v2965_v49  ;;  %v2863_v48 = vadd.f32 %v2822_v8, %v2676_v46 }
 0x301   : > { %3172 = vst.msk [vmem:[%s5334_s23 + $0x40] sm:$0xff] %vm3163_vm9, %v3104_v28  ;;  %3834 = vmatmul.msk.bf16.gmra.mxu1 %vm3025_vm8, %v2985_v19  ;;  %v2899_v10 = vmul.f32 %v5161_v17, %v2863_v48 }
 0x302   : > { %v2824_v2 = vpop.f32.mrf.mxu0  ;;  %v2420_v6 = vpop.f32.mrf.mxu2 }
 0x303   : > { %v2637_v44 = vpop.f32.mrf.mxu3  ;;  %v2460_v57 = vadd.f32 %v2420_v6, %v2283_v30  ;;  %v2935_v4 = vadd.f32 %v5168_v50, %v2899_v10 }
 0x305   : > { %v2677_v14 = vadd.f32 %v2637_v44, %v2460_v57  ;;  %v2967_v36 = vmax.f32 %v2935_v4, 0.0 }
 0x306   : > { %v3105_v21 = vpop.f32.mrf.mxu1 }
 0x307   : > { %v2864_v13 = vadd.f32 %v2824_v2, %v2677_v14  ;;  %v3106_v61 = vadd.f32 %v5329_v16, %v3105_v21 }
 0x309   : > { %v2900_v9 = vmul.f32 %v5161_v17, %v2864_v13  ;;  %3173 = vst.msk [vmem:[%s5334_s23 + $0x48] sm:$0xff] %vm3163_vm9, %v3106_v61 }
 0x30a   : > { %v2827_v22 = vpop.f32.mrf.mxu0  ;;  %v2423_v45 = vpop.f32.mrf.mxu2 }
 0x30b   : > { %v2640_v15 = vpop.f32.mrf.mxu3  ;;  %v2936_v62 = vadd.f32 %v5168_v50, %v2900_v9  ;;  %v2461_v24 = vadd.f32 %v2423_v45, %v5132_v12 }
 0x30d   : > { %v2968_v35 = vmax.f32 %v2936_v62, 0.0  ;;  %v2678_v3 = vadd.f32 %v2640_v15, %v2461_v24 }
 0x30e   : > { %v3108_v20 = vpop.f32.mrf.mxu1 }
 0x30f   : > { %v3109_v54 = vadd.f32 %v5329_v16, %v3108_v20  ;;  %v2986_v11 = vpack.c.bf16 %v2968_v35, %v2967_v36  ;;  %v2865_v29 = vadd.f32 %v2827_v22, %v2678_v3 }
 0x311   : > { %3174 = vst.msk [vmem:[%s5334_s23 + $0x50] sm:$0xff] %vm3163_vm9, %v3109_v54  ;;  %3835 = vmatmul.msk.bf16.gmra.mxu1 %vm3025_vm8, %v2986_v11  ;;  %v2901_v7 = vmul.f32 %v5161_v17, %v2865_v29 }
 0x312   : > { %v2829_v34 = vpop.f32.mrf.mxu0  ;;  %v2425_v40 = vpop.f32.mrf.mxu2 }
 0x313   : > { %v2642_v63 = vpop.f32.mrf.mxu3  ;;  %v2462_v12 = vadd.f32 %v2425_v40, %v2285_v33  ;;  %v2937_v0 = vadd.f32 %v5168_v50, %v2901_v7 }
 0x315   : > { %v2679_v5 = vadd.f32 %v2642_v63, %v2462_v12  ;;  %v2969_v31 = vmax.f32 %v2937_v0, 0.0 }
 0x316   : > { %v3110_v52 = vpop.f32.mrf.mxu1 }
 0x317   : > { %v2866_v32 = vadd.f32 %v2829_v34, %v2679_v5  ;;  %v3111_v26 = vadd.f32 %v5329_v16, %v3110_v52 }
 0x319   : > { %v2902_v59 = vmul.f32 %v5161_v17, %v2866_v32  ;;  %3175 = vst.msk [vmem:[%s5334_s23 + $0x58] sm:$0xff] %vm3163_vm9, %v3111_v26 }
 0x31a   : > { %v2428_v1 = vpop.f32.mrf.mxu2  ;;  %v2832_v38 = vpop.f32.mrf.mxu0 }
 0x31b   : > { %v2645_v56 = vpop.f32.mrf.mxu3  ;;  %v2938_v18 = vadd.f32 %v5168_v50, %v2902_v59  ;;  %v2463_v60 = vadd.f32 %v2428_v1, %v5602_v51 }
 0x31d   : > { %v2970_v47 = vmax.f32 %v2938_v18, 0.0  ;;  %v2680_v8 = vadd.f32 %v2645_v56, %v2463_v60 }
 0x31e   : > { %v3113_v23 = vpop.f32.mrf.mxu1 }
 0x31f   : > { %v3114_v42 = vadd.f32 %v5329_v16, %v3113_v23  ;;  %v2987_v25 = vpack.c.bf16 %v2970_v47, %v2969_v31  ;;  %v2867_v55 = vadd.f32 %v2832_v38, %v2680_v8 }
 0x321   : > { %3176 = vst.msk [vmem:[%s5334_s23 + $0x60] sm:$0xff] %vm3163_vm9, %v3114_v42  ;;  %3836 = vmatmul.msk.bf16.gmra.mxu1 %vm3025_vm8, %v2987_v25  ;;  %v2903_v58 = vmul.f32 %v5161_v17, %v2867_v55 }
 0x322   : > { %v2430_v49 = vpop.f32.mrf.mxu2  ;;  %v2834_v19 = vpop.f32.mrf.mxu0 }
 0x323   : > { %v2464_v43 = vadd.f32 %v2430_v49, %v2287_v41  ;;  %v2647_v46 = vpop.f32.mrf.mxu3  ;;  %v2939_v27 = vadd.f32 %v5168_v50, %v2903_v58 }
 0x325   : > { %v2681_v28 = vadd.f32 %v2647_v46, %v2464_v43  ;;  %v2971_v6 = vmax.f32 %v2939_v27, 0.0 }
 0x326   : > { %v3115_v2 = vpop.f32.mrf.mxu1 }
 0x327   : > { %v2868_v37 = vadd.f32 %v2834_v19, %v2681_v28  ;;  %v3116_v53 = vadd.f32 %v5329_v16, %v3115_v2 }
 0x329   : > { %v2904_v30 = vmul.f32 %v5161_v17, %v2868_v37  ;;  %3177 = vst.msk [vmem:[%s5334_s23 + $0x68] sm:$0xff] %vm3163_vm9, %v3116_v53 }
 0x32b   : > { %v2940_v48 = vadd.f32 %v5168_v50, %v2904_v30 }
 0x32d   : > { %v2972_v44 = vmax.f32 %v2940_v48, 0.0 }
 0x32e   : > { %v3118_v57 = vpop.f32.mrf.mxu1 }
 0x32f   : > { %v3119_v10 = vadd.f32 %v5329_v16, %v3118_v57  ;;  %v2988_v14 = vpack.c.bf16 %v2972_v44, %v2971_v6 }
 0x331   : > { %3178 = vst.msk [vmem:[%s5334_s23 + $0x70] sm:$0xff] %vm3163_vm9, %v3119_v10  ;;  %3837 = vmatmul.msk.bf16.gmra.mxu1 %vm3025_vm8, %v2988_v14 }
 0x336   : > { %v3120_v21 = vpop.f32.mrf.mxu1 }
 0x337   : > { %v3121_v17 = vadd.f32 %v5329_v16, %v3120_v21 }
 0x339   : > { %3179 = vst.msk [vmem:[%s5334_s23 + $0x78] sm:$0xff] %vm3163_vm9, %v3121_v17 }
 0x33e   : > { %v3123_v50 = vpop.f32.mrf.mxu1 }
 0x33f   : > { %v3124_v13 = vadd.f32 %v5329_v16, %v3123_v50 }
 0x341   : > { %3180 = vst.msk [vmem:[%s5334_s23 + $0x80] sm:$0xff] %vm3163_vm9, %v3124_v13 }
 0x346   : > { %v3125_v61 = vpop.f32.mrf.mxu1 }
 0x347   : > { %v3126_v22 = vadd.f32 %v5329_v16, %v3125_v61 }
 0x349   : > { %3181 = vst.msk [vmem:[%s5334_s23 + $0x88] sm:$0xff] %vm3163_vm9, %v3126_v22 }
 0x34e   : > { %v3128_v4 = vpop.f32.mrf.mxu1 }
 0x34f   : > { %v3129_v9 = vadd.f32 %v5329_v16, %v3128_v4 }
 0x351   : > { %3182 = vst.msk [vmem:[%s5334_s23 + $0x90] sm:$0xff] %vm3163_vm9, %v3129_v9 }
 0x356   : > { %v3130_v45 = vpop.f32.mrf.mxu1 }
 0x357   : > { %v3131_v15 = vadd.f32 %v5329_v16, %v3130_v45 }
 0x359   : > { %3183 = vst.msk [vmem:[%s5334_s23 + $0x98] sm:$0xff] %vm3163_vm9, %v3131_v15 }
 0x35e   : > { %v3133_v62 = vpop.f32.mrf.mxu1 }
 0x35f   : > { %v3134_v24 = vadd.f32 %v5329_v16, %v3133_v62 }
 0x361   : > { %3184 = vst.msk [vmem:[%s5334_s23 + $0xa0] sm:$0xff] %vm3163_vm9, %v3134_v24 }
 0x366   : > { %v3135_v36 = vpop.f32.mrf.mxu1 }
 0x367   : > { %v3136_v35 = vadd.f32 %v5329_v16, %v3135_v36 }
 0x369   : > { %3185 = vst.msk [vmem:[%s5334_s23 + $0xa8] sm:$0xff] %vm3163_vm9, %v3136_v35 }
 0x36e   : > { %v3138_v3 = vpop.f32.mrf.mxu1 }
 0x36f   : > { %v3139_v20 = vadd.f32 %v5329_v16, %v3138_v3 }
 0x371   : > { %3186 = vst.msk [vmem:[%s5334_s23 + $0xb0] sm:$0xff] %vm3163_vm9, %v3139_v20 }
 0x376   : > { %v3140_v54 = vpop.f32.mrf.mxu1 }
 0x377   : > { %v3141_v11 = vadd.f32 %v5329_v16, %v3140_v54 }
 0x379   : > { %3187 = vst.msk [vmem:[%s5334_s23 + $0xb8] sm:$0xff] %vm3163_vm9, %v3141_v11 }
 0x37e   : > { %v3143_v33 = vpop.f32.mrf.mxu1 }
 0x37f   : > { %v3144_v29 = vadd.f32 %v5329_v16, %v3143_v33 }
 0x381   : > { %3188 = vst.msk [vmem:[%s5334_s23 + $0xc0] sm:$0xff] %vm3163_vm9, %v3144_v29 }
 0x386   : > { %v3145_v34 = vpop.f32.mrf.mxu1 }
 0x387   : > { %v3146_v40 = vadd.f32 %v5329_v16, %v3145_v34 }
 0x389   : > { %3189 = vst.msk [vmem:[%s5334_s23 + $0xc8] sm:$0xff] %vm3163_vm9, %v3146_v40 }
 0x38e   : > { %v3148_v63 = vpop.f32.mrf.mxu1 }
 0x38f   : > { %v3149_v12 = vadd.f32 %v5329_v16, %v3148_v63 }
 0x391   : > { %3190 = vst.msk [vmem:[%s5334_s23 + $0xd0] sm:$0xff] %vm3163_vm9, %v3149_v12 }
 0x396   : > { %v3150_v7 = vpop.f32.mrf.mxu1 }
 0x397   : > { %v3151_v5 = vadd.f32 %v5329_v16, %v3150_v7 }
 0x399   : > { %3191 = vst.msk [vmem:[%s5334_s23 + $0xd8] sm:$0xff] %vm3163_vm9, %v3151_v5 }
 0x39e   : > { %v3153_v52 = vpop.f32.mrf.mxu1 }
 0x39f   : > { %v3154_v32 = vadd.f32 %v5329_v16, %v3153_v52 }
 0x3a1   : > { %3192 = vst.msk [vmem:[%s5334_s23 + $0xe0] sm:$0xff] %vm3163_vm9, %v3154_v32 }
 0x3a6   : > { %v3155_v26 = vpop.f32.mrf.mxu1 }
 0x3a7   : > { %v3156_v0 = vadd.f32 %v5329_v16, %v3155_v26 }
 0x3a9   : > { %3193 = vst.msk [vmem:[%s5334_s23 + $0xe8] sm:$0xff] %vm3163_vm9, %v3156_v0 }
 0x3ae   : > { %v3158_v59 = vpop.f32.mrf.mxu1 }
 0x3af   : > { %v3159_v1 = vadd.f32 %v5329_v16, %v3158_v59 }
 0x3b1   : > { %3194 = vst.msk [vmem:[%s5334_s23 + $0xf0] sm:$0xff] %vm3163_vm9, %v3159_v1 }
 0x3b6   : > { %v3160_v56 = vpop.f32.mrf.mxu1 }
 0x3b7   : > { %v3161_v18 = vadd.f32 %v5329_v16, %v3160_v56 }
 0x3b9   : > { %3195 = vst.msk [vmem:[%s5334_s23 + $0xf8] sm:$0xff] %vm3163_vm9, %v3161_v18 }
 0x3ba PF: > { %s18_s9 = sadd.s32 1, %s4020_s9   ;;  %s5604_s27 = smov %s4012_s29 }
 0x3bb   : > { %p15_p10 = scmp.ge.s32.totalorder %s18_s9, 10   ;;  %s5605_s28 = smov %s4016_s30 }
 0x3bc   : > { %s5606_s29 = smov %s5609_s10  ;;  %s5607_s30 = smov %s5613_s11 }
 0x3bd   :  { %17 = sbr.rel (!%p15_p10) target bundleno = 3 (0x3), region = 96 }

</bundles_post_ra>
